<compile_context>
chip_gen: v5e
topology: v5e:2x2
jax: 0.10.0
libtpu: 0.0.40
codegen_flags: <defaults>
</compile_context>

<pallas_src>
import functools

import jax
import jax.numpy as jnp
import numpy as np
from jax.experimental import pallas as pl
from jax.experimental.pallas import tpu as pltpu

LANE = 128


# ----------------------------- in-kernel helpers -----------------------------

def _erf(x):
    # Abramowitz & Stegun 7.1.26 polynomial erf (max abs err ~1.5e-7).
    p = 0.3275911
    a1, a2, a3, a4, a5 = 0.254829592, -0.284496736, 1.421413741, -1.453152027, 1.061405429
    ax = jnp.abs(x)
    t = 1.0 / (1.0 + p * ax)
    poly = t * (a1 + t * (a2 + t * (a3 + t * (a4 + t * a5))))
    y = 1.0 - poly * jnp.exp(-ax * ax)
    return jnp.where(x >= 0.0, y, -y)


def _gelu_exact(x):
    # matches nn.GELU() (erf-based) up to the erf polynomial error
    return 0.5 * x * (1.0 + _erf(x * (1.0 / np.sqrt(2.0))))


def _sigmoid(x):
    return 1.0 / (1.0 + jnp.exp(-x))


# --------------------------------- the kernel --------------------------------

def fused_cab_kernel(s_ref, x_ref,
                     w3a_ref, b3a_ref, w3b_ref, b3b_ref,
                     wca1_ref, bca1_ref, wca2_ref, bca2_ref,
                     wcat_ref, bc12_ref,
                     out_ref, *, slot, taps_per_blk, nblk):
    B, HP, WP, C = s_ref.shape            # s is spatially pre-padded: HP=H+2, WP=W+2
    H, W = HP - 2, WP - 2
    M = B * H * W

    s = s_ref[...]                        # bf16, halo already zero-padded in HBM
    x = x_ref[...]                        # bf16

    # ---- CAB conv1 (3x3): single long-K bf16 matmul, f32 accumulation --------
    cols = [s[:, dy:dy + H, dx:dx + W, :].reshape(M, C)
            for dy in range(3) for dx in range(3)]
    p1 = jnp.concatenate(cols, axis=-1)                        # (M, 9*C) bf16, lane-aligned
    t = jnp.dot(p1, w3a_ref[...], preferred_element_type=jnp.float32) + b3a_ref[...]
    t = _gelu_exact(t)                                         # (M, TW) f32
    TW = t.shape[-1]                                           # = taps_per_blk * slot
    t = t.astype(jnp.bfloat16).reshape(B, H, W, TW)            # channels replicated x R by W layout

    # zero halo for conv2 (intermediate only exists in VMEM, so pad in-kernel)
    zrow = jnp.zeros((B, 1, W, TW), t.dtype)
    tp = jnp.concatenate([zrow, t, zrow], axis=1)
    zcol = jnp.zeros((B, H + 2, 1, TW), t.dtype)
    tp = jnp.concatenate([zcol, tp, zcol], axis=2)             # (B, H+2, W+2, TW)

    # ---- CAB conv2 (3x3): tap-packed K — several taps per 128-lane block -----
    lane = jax.lax.broadcasted_iota(jnp.int32, (1, TW), 1)
    blocks = []
    for kb in range(nblk):
        acc = None
        for rs in range(taps_per_blk):
            k = kb * taps_per_blk + rs
            if k >= 9:
                break
            dy, dx = k // 3, k % 3
            tap = tp[:, dy:dy + H, dx:dx + W, :].reshape(M, TW)
            if taps_per_blk > 1:
                msk = (lane >= rs * slot) & (lane < (rs + 1) * slot)
                tap = jnp.where(msk, tap, jnp.zeros_like(tap))  # disjoint slots -> exact
            acc = tap if acc is None else acc + tap
        blocks.append(acc)
    p2 = blocks[0] if nblk == 1 else jnp.concatenate(blocks, axis=-1)   # (M, K2) bf16
    v = jnp.dot(p2, w3b_ref[...], preferred_element_type=jnp.float32) + b3b_ref[...]  # (M, C)

    # ---- Channel attention: avg pool -> 1x1 -> ReLU -> 1x1 -> sigmoid (f32) --
    v3 = v.reshape(B, H * W, C)
    pooled = jnp.mean(v3, axis=1)                               # (B, C) per-image pool
    h = jnp.dot(pooled, wca1_ref[...], preferred_element_type=jnp.float32) + bca1_ref[...]
    h = jnp.maximum(h, 0.0)
    y = jnp.dot(h, wca2_ref[...], preferred_element_type=jnp.float32) + bca2_ref[...]
    y = _sigmoid(y)                                             # (B, C)
    cab = v3 * y[:, None, :]                                    # (B, H*W, C)

    # ---- fused trailing 1x1 convs: out = [cab | x] @ [[W1];[W2-W1]] + (b1+b2) -
    lhs = jnp.concatenate([cab.reshape(M, C).astype(jnp.bfloat16),
                           x.reshape(M, C)], axis=-1)           # (M, 2C) bf16
    o = jnp.dot(lhs, wcat_ref[...], preferred_element_type=jnp.float32) + bc12_ref[...]
    out_ref[...] = o.reshape(B, H, W, C).astype(out_ref.dtype)  # bf16 store, lane-dense


# --------------------------------- wrapper ------------------------------------

def fused_cab_pallas(shortcut_nchw, x_nchw, p, *, block_b=None):
    N, C, H, W = shortcut_nchw.shape
    CP = -(-C // LANE) * LANE                  # lane-pad channels (96 -> 128)
    CMID = p['w_cab1'].shape[0]                # dim // compress_ratio (16)
    C16 = p['w_ca1'].shape[0]                  # dim // squeeze_factor (6)
    C16P = -(-C16 // LANE) * LANE

    # conv2 tap-packing geometry: if the intermediate width divides 128, pack
    # R = 128 // CMID taps per 128-lane block (conv1 output replicated R times).
    if CMID <= LANE and LANE % CMID == 0:
        SLOT = CMID
    else:
        SLOT = -(-CMID // LANE) * LANE         # fallback: old 128-per-tap padding
    R = max(1, LANE // SLOT)                   # taps per 128-lane block
    NBLK = -(-9 // R)                          # number of K blocks for conv2
    TW = R * SLOT                              # conv1 output width (128 in packed case)
    K2 = NBLK * TW                             # conv2 K (256 vs the old 1152)

    def to_nhwc_bf16(a, halo):
        a = jnp.transpose(a, (0, 2, 3, 1))
        a = jnp.pad(a, ((0, 0), (halo, halo), (halo, halo), (0, CP - C)))
        return a.astype(jnp.bfloat16)

    # TODO(synk): drop the NCHW<->NHWC transposes if the surrounding model already
    # keeps activations in NHWC.
    s = to_nhwc_bf16(shortcut_nchw, 1)         # (N, H+2, W+2, CP): 3x3 halo pre-padded once
    x = to_nhwc_bf16(x_nchw, 0)                # (N, H, W, CP)

    def conv3_w_rep(w):
        # (CMID, C, 3, 3) -> (9*CP, TW): real output channels replicated R times.
        cout, cin = w.shape[0], w.shape[1]
        wt = jnp.transpose(w, (2, 3, 1, 0))                     # (3,3,Cin,Cout)
        wt = jnp.pad(wt, ((0, 0), (0, 0), (0, CP - cin), (0, SLOT - cout)))
        wt = jnp.tile(wt, (1, 1, 1, R))                         # (3,3,CP,TW)
        return wt.reshape(9 * CP, TW).astype(jnp.bfloat16)

    def conv3_w_packed(w):
        # (C, CMID, 3, 3) -> (K2, CP): tap k occupies rows [k*SLOT, k*SLOT+CMID).
        cout, cin = w.shape[0], w.shape[1]
        wt = jnp.transpose(w, (2, 3, 1, 0))                     # (3,3,CMID,C)
        wt = jnp.pad(wt, ((0, 0), (0, 0), (0, SLOT - cin), (0, CP - cout)))
        wt = wt.reshape(9, SLOT, CP)
        rows = jnp.zeros((NBLK * R, SLOT, CP), wt.dtype).at[:9].set(wt)
        return rows.reshape(K2, CP).astype(jnp.bfloat16)

    def conv1_w(w, cin_p, cout_p):             # (Cout,Cin,1,1) -> (cin_p, cout_p) f32
        cout, cin = w.shape[0], w.shape[1]
        wt = jnp.transpose(w[:, :, 0, 0], (1, 0))
        return jnp.pad(wt, ((0, cin_p - cin), (0, cout_p - cout)))

    def pad_bias(b, to):
        return jnp.pad(b, (0, to - b.shape[0])).reshape(1, to).astype(jnp.float32)

    def rep_bias(b):
        bp = jnp.pad(b, (0, SLOT - b.shape[0]))
        return jnp.tile(bp, (R,)).reshape(1, TW).astype(jnp.float32)

    wc1 = conv1_w(p['w_c1'], CP, CP)
    wc2 = conv1_w(p['w_c2'], CP, CP)
    wcat = jnp.concatenate([wc1, wc2 - wc1], axis=0).astype(jnp.bfloat16)   # (2*CP, CP)

    weights = [
        conv3_w_rep(p['w_cab1']),               rep_bias(p['b_cab1']),
        conv3_w_packed(p['w_cab2']),            pad_bias(p['b_cab2'], CP),
        conv1_w(p['w_ca1'], CP, C16P),          pad_bias(p['b_ca1'], C16P),   # f32 CA matmuls
        conv1_w(p['w_ca2'], C16P, CP),          pad_bias(p['b_ca2'], CP),
        wcat,                                   pad_bias(p['b_c1'] + p['b_c2'], CP),
    ]

    # ---- VMEM-budgeted batch blocking: target M up to ~2048 rows, per-step bytes
    # bounded so the same tile is safe on v7x (64 MiB) as well as v5e/v6e.
    bytes_per_row = 2 * 9 * CP + 2 * K2 + 2 * 3 * 2 * CP + 4 * 4 * CP   # im2col + intermediates
    vmem_budget = 40 * 1024 * 1024
    rows_budget = max(H * W, vmem_budget // max(1, bytes_per_row))
    rows_target = min(2048, rows_budget)
    if block_b is None:
        block_b = max(1, min(N, rows_target // (H * W)))
    while N % block_b != 0:
        block_b -= 1
    # TODO(synk): add H-row spatial tiling (1-row halo) to bound VMEM for very large
    # images and to keep >=2 parallel grid steps for v7x's two TensorCores when N is small.

    kern = functools.partial(fused_cab_kernel, slot=SLOT, taps_per_blk=R, nblk=NBLK)

    s_spec = pl.BlockSpec((block_b, H + 2, W + 2, CP), lambda b: (b, 0, 0, 0))
    img_spec = pl.BlockSpec((block_b, H, W, CP), lambda b: (b, 0, 0, 0))
    w_specs = [pl.BlockSpec(tuple(w.shape), lambda b: (0, 0)) for w in weights]

    out = pl.pallas_call(
        kern,
        out_shape=jax.ShapeDtypeStruct((N, H, W, CP), jnp.bfloat16),
        grid_spec=pltpu.PrefetchScalarGridSpec(
            num_scalar_prefetch=0,
            grid=(N // block_b,),
            in_specs=[s_spec, img_spec] + w_specs,
            out_specs=img_spec,
        ),
        compiler_params=pltpu.CompilerParams(
            dimension_semantics=("parallel",),
            vmem_limit_bytes=48 * 1024 * 1024,
        ),
    )(s, x, *weights)

    out = out[..., :C]                                   # strip channel padding (bf16)
    return jnp.transpose(out, (0, 3, 1, 2))              # back to NCHW


# --------------------------- params & pure-JAX reference ----------------------

def _conv_init(key, cout, cin, k):
    kw, kb = jax.random.split(key)
    fan_in = cin * k * k
    bound = 1.0 / np.sqrt(fan_in)
    w = jax.random.uniform(kw, (cout, cin, k, k), jnp.float32, -bound, bound)
    b = jax.random.uniform(kb, (cout,), jnp.float32, -bound, bound)
    return w, b


def make_params(key, dim=96, compress_ratio=6, squeeze_factor=16):
    c6 = dim // compress_ratio
    c16 = dim // squeeze_factor
    ks = jax.random.split(key, 6)
    p = {}
    p['w_cab1'], p['b_cab1'] = _conv_init(ks[0], c6, dim, 3)
    p['w_cab2'], p['b_cab2'] = _conv_init(ks[1], dim, c6, 3)
    p['w_ca1'],  p['b_ca1']  = _conv_init(ks[2], c16, dim, 1)
    p['w_ca2'],  p['b_ca2']  = _conv_init(ks[3], dim, c16, 1)
    p['w_c1'],   p['b_c1']   = _conv_init(ks[4], dim, dim, 1)
    p['w_c2'],   p['b_c2']   = _conv_init(ks[5], dim, dim, 1)
    return p


def reference_forward(shortcut, x, p):
    """Plain-JAX NCHW reference mirroring the PyTorch fused_cab module."""
    def conv(inp, w, b, pad):
        out = jax.lax.conv_general_dilated(
            inp, w, (1, 1), ((pad, pad), (pad, pad)),
            dimension_numbers=('NCHW', 'OIHW', 'NCHW'),
            precision=jax.lax.Precision.HIGHEST)
        return out + b.reshape(1, -1, 1, 1)

    t = jax.nn.gelu(conv(shortcut, p['w_cab1'], p['b_cab1'], 1), approximate=False)
    v = conv(t, p['w_cab2'], p['b_cab2'], 1)
    pooled = jnp.mean(v, axis=(2, 3), keepdims=True)
    h = jax.nn.relu(conv(pooled, p['w_ca1'], p['b_ca1'], 0))
    y = jax.nn.sigmoid(conv(h, p['w_ca2'], p['b_ca2'], 0))
    cab_out = v * y
    return conv(cab_out - x, p['w_c1'], p['b_c1'], 0) + conv(x, p['w_c2'], p['b_c2'], 0)


# ------------------------------------ main -------------------------------------

if __name__ == "__main__":
    key = jax.random.PRNGKey(0)
    kp, ks, kx = jax.random.split(key, 3)

    dim, N, H, W = 96, 4, 8, 8
    params = make_params(kp, dim)
    shortcut = jax.random.normal(ks, (N, dim, H, W), jnp.float32)
    x = jax.random.normal(kx, (N, dim, H, W), jnp.float32)

    out = jax.block_until_ready(fused_cab_pallas(shortcut, x, params))
    ref = jax.block_until_ready(reference_forward(shortcut, x, params))

    max_err = float(jnp.max(jnp.abs(out.astype(jnp.float32) - ref)))
    scale = max(1.0, float(jnp.max(jnp.abs(ref))))
    # Tolerance accounts for fully-bf16 activation I/O + bf16 MXU operands vs the
    # Precision.HIGHEST f32 reference (errors are O(2^-8) relative; bugs are O(1)).
    if not (max_err <= 2e-2 * scale):
        raise AssertionError(f"Pallas kernel mismatch vs reference: max abs err = {max_err}")

    print("KERNEL_OK")
</pallas_src>

<mosaic_0001>
module attributes {stable_mosaic.version = 11 : i64} {
  func.func @fused_cab_kernel(%arg0: i32, %arg1: memref<4x10x10x128xbf16, #tpu.memory_space<vmem>>, %arg2: memref<4x8x8x128xbf16, #tpu.memory_space<vmem>>, %arg3: memref<1152x128xbf16, #tpu.memory_space<vmem>>, %arg4: memref<1x128xf32, #tpu.memory_space<vmem>>, %arg5: memref<256x128xbf16, #tpu.memory_space<vmem>>, %arg6: memref<1x128xf32, #tpu.memory_space<vmem>>, %arg7: memref<128x128xf32, #tpu.memory_space<vmem>>, %arg8: memref<1x128xf32, #tpu.memory_space<vmem>>, %arg9: memref<128x128xf32, #tpu.memory_space<vmem>>, %arg10: memref<1x128xf32, #tpu.memory_space<vmem>>, %arg11: memref<256x128xbf16, #tpu.memory_space<vmem>>, %arg12: memref<1x128xf32, #tpu.memory_space<vmem>>, %arg13: memref<4x8x8x128xbf16, #tpu.memory_space<vmem>>) attributes {dimension_semantics = [#tpu.dimension_semantics<parallel>], iteration_bounds = array<i64: 1>, scalar_prefetch = 0 : i64, scratch_operands = 0 : i64, tpu.core_type = #tpu.core_type<tc>, window_params = [{transform_indices = @transform_0, window_bounds = array<i64: 4, 10, 10, 128>}, {transform_indices = @transform_1, window_bounds = array<i64: 4, 8, 8, 128>}, {pipeline_mode = #tpu.pipeline_mode<synchronous>, transform_indices = @transform_2, window_bounds = array<i64: 1152, 128>}, {pipeline_mode = #tpu.pipeline_mode<synchronous>, transform_indices = @transform_3, window_bounds = array<i64: 1, 128>}, {pipeline_mode = #tpu.pipeline_mode<synchronous>, transform_indices = @transform_4, window_bounds = array<i64: 256, 128>}, {pipeline_mode = #tpu.pipeline_mode<synchronous>, transform_indices = @transform_5, window_bounds = array<i64: 1, 128>}, {pipeline_mode = #tpu.pipeline_mode<synchronous>, transform_indices = @transform_6, window_bounds = array<i64: 128, 128>}, {pipeline_mode = #tpu.pipeline_mode<synchronous>, transform_indices = @transform_7, window_bounds = array<i64: 1, 128>}, {pipeline_mode = #tpu.pipeline_mode<synchronous>, transform_indices = @transform_8, window_bounds = array<i64: 128, 128>}, {pipeline_mode = #tpu.pipeline_mode<synchronous>, transform_indices = @transform_9, window_bounds = array<i64: 1, 128>}, {pipeline_mode = #tpu.pipeline_mode<synchronous>, transform_indices = @transform_10, window_bounds = array<i64: 256, 128>}, {pipeline_mode = #tpu.pipeline_mode<synchronous>, transform_indices = @transform_11, window_bounds = array<i64: 1, 128>}, {transform_indices = @transform_12, window_bounds = array<i64: 4, 8, 8, 128>}]} {
    %c0 = arith.constant 0 : index
    %c0_0 = arith.constant 0 : index
    %c0_1 = arith.constant 0 : index
    %c0_2 = arith.constant 0 : index
    %0 = vector.load %arg1[%c0, %c0_0, %c0_1, %c0_2] : memref<4x10x10x128xbf16, #tpu.memory_space<vmem>>, vector<4x10x10x128xbf16>
    %c0_3 = arith.constant 0 : index
    %c0_4 = arith.constant 0 : index
    %c0_5 = arith.constant 0 : index
    %c0_6 = arith.constant 0 : index
    %1 = vector.load %arg2[%c0_3, %c0_4, %c0_5, %c0_6] : memref<4x8x8x128xbf16, #tpu.memory_space<vmem>>, vector<4x8x8x128xbf16>
    %2 = vector.extract_strided_slice %0 {offsets = [0, 0, 0, 0], sizes = [4, 8, 8, 128], strides = [1, 1, 1, 1]} : vector<4x10x10x128xbf16> to vector<4x8x8x128xbf16>
    %3 = vector.shape_cast %2 : vector<4x8x8x128xbf16> to vector<256x128xbf16>
    %4 = vector.extract_strided_slice %0 {offsets = [0, 0, 1, 0], sizes = [4, 8, 8, 128], strides = [1, 1, 1, 1]} : vector<4x10x10x128xbf16> to vector<4x8x8x128xbf16>
    %5 = vector.shape_cast %4 : vector<4x8x8x128xbf16> to vector<256x128xbf16>
    %6 = vector.extract_strided_slice %0 {offsets = [0, 0, 2, 0], sizes = [4, 8, 8, 128], strides = [1, 1, 1, 1]} : vector<4x10x10x128xbf16> to vector<4x8x8x128xbf16>
    %7 = vector.shape_cast %6 : vector<4x8x8x128xbf16> to vector<256x128xbf16>
    %8 = vector.extract_strided_slice %0 {offsets = [0, 1, 0, 0], sizes = [4, 8, 8, 128], strides = [1, 1, 1, 1]} : vector<4x10x10x128xbf16> to vector<4x8x8x128xbf16>
    %9 = vector.shape_cast %8 : vector<4x8x8x128xbf16> to vector<256x128xbf16>
    %10 = vector.extract_strided_slice %0 {offsets = [0, 1, 1, 0], sizes = [4, 8, 8, 128], strides = [1, 1, 1, 1]} : vector<4x10x10x128xbf16> to vector<4x8x8x128xbf16>
    %11 = vector.shape_cast %10 : vector<4x8x8x128xbf16> to vector<256x128xbf16>
    %12 = vector.extract_strided_slice %0 {offsets = [0, 1, 2, 0], sizes = [4, 8, 8, 128], strides = [1, 1, 1, 1]} : vector<4x10x10x128xbf16> to vector<4x8x8x128xbf16>
    %13 = vector.shape_cast %12 : vector<4x8x8x128xbf16> to vector<256x128xbf16>
    %14 = vector.extract_strided_slice %0 {offsets = [0, 2, 0, 0], sizes = [4, 8, 8, 128], strides = [1, 1, 1, 1]} : vector<4x10x10x128xbf16> to vector<4x8x8x128xbf16>
    %15 = vector.shape_cast %14 : vector<4x8x8x128xbf16> to vector<256x128xbf16>
    %16 = vector.extract_strided_slice %0 {offsets = [0, 2, 1, 0], sizes = [4, 8, 8, 128], strides = [1, 1, 1, 1]} : vector<4x10x10x128xbf16> to vector<4x8x8x128xbf16>
    %17 = vector.shape_cast %16 : vector<4x8x8x128xbf16> to vector<256x128xbf16>
    %18 = vector.extract_strided_slice %0 {offsets = [0, 2, 2, 0], sizes = [4, 8, 8, 128], strides = [1, 1, 1, 1]} : vector<4x10x10x128xbf16> to vector<4x8x8x128xbf16>
    %19 = vector.shape_cast %18 : vector<4x8x8x128xbf16> to vector<256x128xbf16>
    %20 = tpu.concatenate %3, %5, %7, %9, %11, %13, %15, %17, %19 in 1 : vector<256x128xbf16>, vector<256x128xbf16>, vector<256x128xbf16>, vector<256x128xbf16>, vector<256x128xbf16>, vector<256x128xbf16>, vector<256x128xbf16>, vector<256x128xbf16>, vector<256x128xbf16> -> vector<256x1152xbf16>
    %c0_7 = arith.constant 0 : index
    %c0_8 = arith.constant 0 : index
    %21 = vector.load %arg3[%c0_7, %c0_8] : memref<1152x128xbf16, #tpu.memory_space<vmem>>, vector<1152x128xbf16>
    %cst = arith.constant dense<0.000000e+00> : vector<256x128xf32>
    %22 = tpu.matmul %20, %21, %cst {dimension_numbers = #tpu.dot_dimension_numbers<[1], [0], [0], [1], [0, 0, 1, 1], [], []>} : vector<256x1152xbf16>, vector<1152x128xbf16>, vector<256x128xf32> -> vector<256x128xf32>
    %c0_9 = arith.constant 0 : index
    %c0_10 = arith.constant 0 : index
    %23 = vector.load %arg4[%c0_9, %c0_10] : memref<1x128xf32, #tpu.memory_space<vmem>>, vector<1x128xf32>
    %24 = vector.broadcast %23 : vector<1x128xf32> to vector<256x128xf32>
    %25 = arith.addf %22, %24 : vector<256x128xf32>
    %cst_11 = arith.constant 5.000000e-01 : f32
    %26 = vector.broadcast %cst_11 : f32 to vector<256x128xf32>
    %27 = arith.mulf %26, %25 : vector<256x128xf32>
    %cst_12 = arith.constant 0.707106769 : f32
    %28 = vector.broadcast %cst_12 : f32 to vector<256x128xf32>
    %29 = arith.mulf %25, %28 : vector<256x128xf32>
    %30 = math.absf %29 : vector<256x128xf32>
    %cst_13 = arith.constant 0.327591091 : f32
    %31 = vector.broadcast %cst_13 : f32 to vector<256x128xf32>
    %32 = arith.mulf %31, %30 : vector<256x128xf32>
    %cst_14 = arith.constant 1.000000e+00 : f32
    %33 = vector.broadcast %cst_14 : f32 to vector<256x128xf32>
    %34 = arith.addf %33, %32 : vector<256x128xf32>
    %cst_15 = arith.constant 1.000000e+00 : f32
    %35 = vector.broadcast %cst_15 : f32 to vector<256x128xf32>
    %36 = arith.divf %35, %34 : vector<256x128xf32>
    %cst_16 = arith.constant 1.06140542 : f32
    %37 = vector.broadcast %cst_16 : f32 to vector<256x128xf32>
    %38 = arith.mulf %36, %37 : vector<256x128xf32>
    %cst_17 = arith.constant -1.45315206 : f32
    %39 = vector.broadcast %cst_17 : f32 to vector<256x128xf32>
    %40 = arith.addf %39, %38 : vector<256x128xf32>
    %41 = arith.mulf %36, %40 : vector<256x128xf32>
    %cst_18 = arith.constant 1.42141378 : f32
    %42 = vector.broadcast %cst_18 : f32 to vector<256x128xf32>
    %43 = arith.addf %42, %41 : vector<256x128xf32>
    %44 = arith.mulf %36, %43 : vector<256x128xf32>
    %cst_19 = arith.constant -0.284496725 : f32
    %45 = vector.broadcast %cst_19 : f32 to vector<256x128xf32>
    %46 = arith.addf %45, %44 : vector<256x128xf32>
    %47 = arith.mulf %36, %46 : vector<256x128xf32>
    %cst_20 = arith.constant 0.254829586 : f32
    %48 = vector.broadcast %cst_20 : f32 to vector<256x128xf32>
    %49 = arith.addf %48, %47 : vector<256x128xf32>
    %50 = arith.mulf %36, %49 : vector<256x128xf32>
    %cst_21 = arith.constant 0.000000e+00 : f32
    %51 = vector.broadcast %cst_21 : f32 to vector<256x128xf32>
    %52 = arith.subf %51, %30 : vector<256x128xf32>
    %53 = arith.mulf %52, %30 : vector<256x128xf32>
    %54 = math.exp %53 : vector<256x128xf32>
    %55 = arith.mulf %50, %54 : vector<256x128xf32>
    %cst_22 = arith.constant 1.000000e+00 : f32
    %56 = vector.broadcast %cst_22 : f32 to vector<256x128xf32>
    %57 = arith.subf %56, %55 : vector<256x128xf32>
    %cst_23 = arith.constant 0.000000e+00 : f32
    %58 = vector.broadcast %cst_23 : f32 to vector<256x128xf32>
    %59 = arith.cmpf oge, %29, %58 : vector<256x128xf32>
    %cst_24 = arith.constant 0.000000e+00 : f32
    %60 = vector.broadcast %cst_24 : f32 to vector<256x128xf32>
    %61 = arith.subf %60, %57 : vector<256x128xf32>
    %62 = arith.select %59, %57, %61 : vector<256x128xi1>, vector<256x128xf32>
    %cst_25 = arith.constant 1.000000e+00 : f32
    %63 = vector.broadcast %cst_25 : f32 to vector<256x128xf32>
    %64 = arith.addf %63, %62 : vector<256x128xf32>
    %65 = arith.mulf %27, %64 : vector<256x128xf32>
    %66 = arith.truncf %65 : vector<256x128xf32> to vector<256x128xbf16>
    %67 = vector.shape_cast %66 : vector<256x128xbf16> to vector<4x8x8x128xbf16>
    %cst_26 = arith.constant 0.000000e+00 : bf16
    %68 = vector.broadcast %cst_26 : bf16 to vector<4x1x8x128xbf16>
    %69 = tpu.concatenate %68, %67, %68 in 1 : vector<4x1x8x128xbf16>, vector<4x8x8x128xbf16>, vector<4x1x8x128xbf16> -> vector<4x10x8x128xbf16>
    %cst_27 = arith.constant 0.000000e+00 : bf16
    %70 = vector.broadcast %cst_27 : bf16 to vector<4x10x1x128xbf16>
    %71 = tpu.concatenate %70, %69, %70 in 2 : vector<4x10x1x128xbf16>, vector<4x10x8x128xbf16>, vector<4x10x1x128xbf16> -> vector<4x10x10x128xbf16>
    %72 = tpu.iota {dimensions = array<i32: 1>} : vector<1x128xi32>
    %73 = vector.extract_strided_slice %71 {offsets = [0, 0, 0, 0], sizes = [4, 8, 8, 128], strides = [1, 1, 1, 1]} : vector<4x10x10x128xbf16> to vector<4x8x8x128xbf16>
    %74 = vector.shape_cast %73 : vector<4x8x8x128xbf16> to vector<256x128xbf16>
    %c0_i32 = arith.constant 0 : i32
    %75 = vector.broadcast %c0_i32 : i32 to vector<1x128xi32>
    %76 = arith.cmpi sge, %72, %75 : vector<1x128xi32>
    %c16_i32 = arith.constant 16 : i32
    %77 = vector.broadcast %c16_i32 : i32 to vector<1x128xi32>
    %78 = arith.cmpi slt, %72, %77 : vector<1x128xi32>
    %79 = arith.andi %76, %78 : vector<1x128xi1>
    %cst_28 = arith.constant 0.000000e+00 : bf16
    %80 = vector.broadcast %cst_28 : bf16 to vector<256x128xbf16>
    %81 = vector.shape_cast %79 : vector<1x128xi1> to vector<1x128xi1>
    %82 = vector.broadcast %81 : vector<1x128xi1> to vector<256x128xi1>
    %83 = arith.select %82, %74, %80 : vector<256x128xi1>, vector<256x128xbf16>
    %84 = vector.extract_strided_slice %71 {offsets = [0, 0, 1, 0], sizes = [4, 8, 8, 128], strides = [1, 1, 1, 1]} : vector<4x10x10x128xbf16> to vector<4x8x8x128xbf16>
    %85 = vector.shape_cast %84 : vector<4x8x8x128xbf16> to vector<256x128xbf16>
    %c16_i32_29 = arith.constant 16 : i32
    %86 = vector.broadcast %c16_i32_29 : i32 to vector<1x128xi32>
    %87 = arith.cmpi sge, %72, %86 : vector<1x128xi32>
    %c32_i32 = arith.constant 32 : i32
    %88 = vector.broadcast %c32_i32 : i32 to vector<1x128xi32>
    %89 = arith.cmpi slt, %72, %88 : vector<1x128xi32>
    %90 = arith.andi %87, %89 : vector<1x128xi1>
    %cst_30 = arith.constant 0.000000e+00 : bf16
    %91 = vector.broadcast %cst_30 : bf16 to vector<256x128xbf16>
    %92 = vector.shape_cast %90 : vector<1x128xi1> to vector<1x128xi1>
    %93 = vector.broadcast %92 : vector<1x128xi1> to vector<256x128xi1>
    %94 = arith.select %93, %85, %91 : vector<256x128xi1>, vector<256x128xbf16>
    %95 = arith.addf %83, %94 : vector<256x128xbf16>
    %96 = vector.extract_strided_slice %71 {offsets = [0, 0, 2, 0], sizes = [4, 8, 8, 128], strides = [1, 1, 1, 1]} : vector<4x10x10x128xbf16> to vector<4x8x8x128xbf16>
    %97 = vector.shape_cast %96 : vector<4x8x8x128xbf16> to vector<256x128xbf16>
    %c32_i32_31 = arith.constant 32 : i32
    %98 = vector.broadcast %c32_i32_31 : i32 to vector<1x128xi32>
    %99 = arith.cmpi sge, %72, %98 : vector<1x128xi32>
    %c48_i32 = arith.constant 48 : i32
    %100 = vector.broadcast %c48_i32 : i32 to vector<1x128xi32>
    %101 = arith.cmpi slt, %72, %100 : vector<1x128xi32>
    %102 = arith.andi %99, %101 : vector<1x128xi1>
    %cst_32 = arith.constant 0.000000e+00 : bf16
    %103 = vector.broadcast %cst_32 : bf16 to vector<256x128xbf16>
    %104 = vector.shape_cast %102 : vector<1x128xi1> to vector<1x128xi1>
    %105 = vector.broadcast %104 : vector<1x128xi1> to vector<256x128xi1>
    %106 = arith.select %105, %97, %103 : vector<256x128xi1>, vector<256x128xbf16>
    %107 = arith.addf %95, %106 : vector<256x128xbf16>
    %108 = vector.extract_strided_slice %71 {offsets = [0, 1, 0, 0], sizes = [4, 8, 8, 128], strides = [1, 1, 1, 1]} : vector<4x10x10x128xbf16> to vector<4x8x8x128xbf16>
    %109 = vector.shape_cast %108 : vector<4x8x8x128xbf16> to vector<256x128xbf16>
    %c48_i32_33 = arith.constant 48 : i32
    %110 = vector.broadcast %c48_i32_33 : i32 to vector<1x128xi32>
    %111 = arith.cmpi sge, %72, %110 : vector<1x128xi32>
    %c64_i32 = arith.constant 64 : i32
    %112 = vector.broadcast %c64_i32 : i32 to vector<1x128xi32>
    %113 = arith.cmpi slt, %72, %112 : vector<1x128xi32>
    %114 = arith.andi %111, %113 : vector<1x128xi1>
    %cst_34 = arith.constant 0.000000e+00 : bf16
    %115 = vector.broadcast %cst_34 : bf16 to vector<256x128xbf16>
    %116 = vector.shape_cast %114 : vector<1x128xi1> to vector<1x128xi1>
    %117 = vector.broadcast %116 : vector<1x128xi1> to vector<256x128xi1>
    %118 = arith.select %117, %109, %115 : vector<256x128xi1>, vector<256x128xbf16>
    %119 = arith.addf %107, %118 : vector<256x128xbf16>
    %120 = vector.extract_strided_slice %71 {offsets = [0, 1, 1, 0], sizes = [4, 8, 8, 128], strides = [1, 1, 1, 1]} : vector<4x10x10x128xbf16> to vector<4x8x8x128xbf16>
    %121 = vector.shape_cast %120 : vector<4x8x8x128xbf16> to vector<256x128xbf16>
    %c64_i32_35 = arith.constant 64 : i32
    %122 = vector.broadcast %c64_i32_35 : i32 to vector<1x128xi32>
    %123 = arith.cmpi sge, %72, %122 : vector<1x128xi32>
    %c80_i32 = arith.constant 80 : i32
    %124 = vector.broadcast %c80_i32 : i32 to vector<1x128xi32>
    %125 = arith.cmpi slt, %72, %124 : vector<1x128xi32>
    %126 = arith.andi %123, %125 : vector<1x128xi1>
    %cst_36 = arith.constant 0.000000e+00 : bf16
    %127 = vector.broadcast %cst_36 : bf16 to vector<256x128xbf16>
    %128 = vector.shape_cast %126 : vector<1x128xi1> to vector<1x128xi1>
    %129 = vector.broadcast %128 : vector<1x128xi1> to vector<256x128xi1>
    %130 = arith.select %129, %121, %127 : vector<256x128xi1>, vector<256x128xbf16>
    %131 = arith.addf %119, %130 : vector<256x128xbf16>
    %132 = vector.extract_strided_slice %71 {offsets = [0, 1, 2, 0], sizes = [4, 8, 8, 128], strides = [1, 1, 1, 1]} : vector<4x10x10x128xbf16> to vector<4x8x8x128xbf16>
    %133 = vector.shape_cast %132 : vector<4x8x8x128xbf16> to vector<256x128xbf16>
    %c80_i32_37 = arith.constant 80 : i32
    %134 = vector.broadcast %c80_i32_37 : i32 to vector<1x128xi32>
    %135 = arith.cmpi sge, %72, %134 : vector<1x128xi32>
    %c96_i32 = arith.constant 96 : i32
    %136 = vector.broadcast %c96_i32 : i32 to vector<1x128xi32>
    %137 = arith.cmpi slt, %72, %136 : vector<1x128xi32>
    %138 = arith.andi %135, %137 : vector<1x128xi1>
    %cst_38 = arith.constant 0.000000e+00 : bf16
    %139 = vector.broadcast %cst_38 : bf16 to vector<256x128xbf16>
    %140 = vector.shape_cast %138 : vector<1x128xi1> to vector<1x128xi1>
    %141 = vector.broadcast %140 : vector<1x128xi1> to vector<256x128xi1>
    %142 = arith.select %141, %133, %139 : vector<256x128xi1>, vector<256x128xbf16>
    %143 = arith.addf %131, %142 : vector<256x128xbf16>
    %144 = vector.extract_strided_slice %71 {offsets = [0, 2, 0, 0], sizes = [4, 8, 8, 128], strides = [1, 1, 1, 1]} : vector<4x10x10x128xbf16> to vector<4x8x8x128xbf16>
    %145 = vector.shape_cast %144 : vector<4x8x8x128xbf16> to vector<256x128xbf16>
    %c96_i32_39 = arith.constant 96 : i32
    %146 = vector.broadcast %c96_i32_39 : i32 to vector<1x128xi32>
    %147 = arith.cmpi sge, %72, %146 : vector<1x128xi32>
    %c112_i32 = arith.constant 112 : i32
    %148 = vector.broadcast %c112_i32 : i32 to vector<1x128xi32>
    %149 = arith.cmpi slt, %72, %148 : vector<1x128xi32>
    %150 = arith.andi %147, %149 : vector<1x128xi1>
    %cst_40 = arith.constant 0.000000e+00 : bf16
    %151 = vector.broadcast %cst_40 : bf16 to vector<256x128xbf16>
    %152 = vector.shape_cast %150 : vector<1x128xi1> to vector<1x128xi1>
    %153 = vector.broadcast %152 : vector<1x128xi1> to vector<256x128xi1>
    %154 = arith.select %153, %145, %151 : vector<256x128xi1>, vector<256x128xbf16>
    %155 = arith.addf %143, %154 : vector<256x128xbf16>
    %156 = vector.extract_strided_slice %71 {offsets = [0, 2, 1, 0], sizes = [4, 8, 8, 128], strides = [1, 1, 1, 1]} : vector<4x10x10x128xbf16> to vector<4x8x8x128xbf16>
    %157 = vector.shape_cast %156 : vector<4x8x8x128xbf16> to vector<256x128xbf16>
    %c112_i32_41 = arith.constant 112 : i32
    %158 = vector.broadcast %c112_i32_41 : i32 to vector<1x128xi32>
    %159 = arith.cmpi sge, %72, %158 : vector<1x128xi32>
    %c128_i32 = arith.constant 128 : i32
    %160 = vector.broadcast %c128_i32 : i32 to vector<1x128xi32>
    %161 = arith.cmpi slt, %72, %160 : vector<1x128xi32>
    %162 = arith.andi %159, %161 : vector<1x128xi1>
    %cst_42 = arith.constant 0.000000e+00 : bf16
    %163 = vector.broadcast %cst_42 : bf16 to vector<256x128xbf16>
    %164 = vector.shape_cast %162 : vector<1x128xi1> to vector<1x128xi1>
    %165 = vector.broadcast %164 : vector<1x128xi1> to vector<256x128xi1>
    %166 = arith.select %165, %157, %163 : vector<256x128xi1>, vector<256x128xbf16>
    %167 = arith.addf %155, %166 : vector<256x128xbf16>
    %168 = vector.extract_strided_slice %71 {offsets = [0, 2, 2, 0], sizes = [4, 8, 8, 128], strides = [1, 1, 1, 1]} : vector<4x10x10x128xbf16> to vector<4x8x8x128xbf16>
    %169 = vector.shape_cast %168 : vector<4x8x8x128xbf16> to vector<256x128xbf16>
    %c0_i32_43 = arith.constant 0 : i32
    %170 = vector.broadcast %c0_i32_43 : i32 to vector<1x128xi32>
    %171 = arith.cmpi sge, %72, %170 : vector<1x128xi32>
    %c16_i32_44 = arith.constant 16 : i32
    %172 = vector.broadcast %c16_i32_44 : i32 to vector<1x128xi32>
    %173 = arith.cmpi slt, %72, %172 : vector<1x128xi32>
    %174 = arith.andi %171, %173 : vector<1x128xi1>
    %cst_45 = arith.constant 0.000000e+00 : bf16
    %175 = vector.broadcast %cst_45 : bf16 to vector<256x128xbf16>
    %176 = vector.shape_cast %174 : vector<1x128xi1> to vector<1x128xi1>
    %177 = vector.broadcast %176 : vector<1x128xi1> to vector<256x128xi1>
    %178 = arith.select %177, %169, %175 : vector<256x128xi1>, vector<256x128xbf16>
    %179 = tpu.concatenate %167, %178 in 1 : vector<256x128xbf16>, vector<256x128xbf16> -> vector<256x256xbf16>
    %c0_46 = arith.constant 0 : index
    %c0_47 = arith.constant 0 : index
    %180 = vector.load %arg5[%c0_46, %c0_47] : memref<256x128xbf16, #tpu.memory_space<vmem>>, vector<256x128xbf16>
    %cst_48 = arith.constant dense<0.000000e+00> : vector<256x128xf32>
    %181 = tpu.matmul %179, %180, %cst_48 {dimension_numbers = #tpu.dot_dimension_numbers<[1], [0], [0], [1], [0, 0, 1, 1], [], []>} : vector<256x256xbf16>, vector<256x128xbf16>, vector<256x128xf32> -> vector<256x128xf32>
    %c0_49 = arith.constant 0 : index
    %c0_50 = arith.constant 0 : index
    %182 = vector.load %arg6[%c0_49, %c0_50] : memref<1x128xf32, #tpu.memory_space<vmem>>, vector<1x128xf32>
    %183 = vector.broadcast %182 : vector<1x128xf32> to vector<256x128xf32>
    %184 = arith.addf %181, %183 : vector<256x128xf32>
    %185 = vector.shape_cast %184 : vector<256x128xf32> to vector<4x64x128xf32>
    %cst_51 = arith.constant dense<0.000000e+00> : vector<4x128xf32>
    %186 = vector.multi_reduction <add>, %185, %cst_51 [1] : vector<4x64x128xf32> to vector<4x128xf32>
    %cst_52 = arith.constant 6.400000e+01 : f32
    %187 = vector.broadcast %cst_52 : f32 to vector<4x128xf32>
    %188 = arith.divf %186, %187 : vector<4x128xf32>
    %c0_53 = arith.constant 0 : index
    %c0_54 = arith.constant 0 : index
    %189 = vector.load %arg7[%c0_53, %c0_54] : memref<128x128xf32, #tpu.memory_space<vmem>>, vector<128x128xf32>
    %cst_55 = arith.constant dense<0.000000e+00> : vector<4x128xf32>
    %190 = tpu.matmul %188, %189, %cst_55 {dimension_numbers = #tpu.dot_dimension_numbers<[1], [0], [0], [1], [0, 0, 1, 1], [], []>} : vector<4x128xf32>, vector<128x128xf32>, vector<4x128xf32> -> vector<4x128xf32>
    %c0_56 = arith.constant 0 : index
    %c0_57 = arith.constant 0 : index
    %191 = vector.load %arg8[%c0_56, %c0_57] : memref<1x128xf32, #tpu.memory_space<vmem>>, vector<1x128xf32>
    %192 = vector.broadcast %191 : vector<1x128xf32> to vector<4x128xf32>
    %193 = arith.addf %190, %192 : vector<4x128xf32>
    %cst_58 = arith.constant 0.000000e+00 : f32
    %194 = vector.broadcast %cst_58 : f32 to vector<4x128xf32>
    %195 = arith.maximumf %193, %194 : vector<4x128xf32>
    %c0_59 = arith.constant 0 : index
    %c0_60 = arith.constant 0 : index
    %196 = vector.load %arg9[%c0_59, %c0_60] : memref<128x128xf32, #tpu.memory_space<vmem>>, vector<128x128xf32>
    %cst_61 = arith.constant dense<0.000000e+00> : vector<4x128xf32>
    %197 = tpu.matmul %195, %196, %cst_61 {dimension_numbers = #tpu.dot_dimension_numbers<[1], [0], [0], [1], [0, 0, 1, 1], [], []>} : vector<4x128xf32>, vector<128x128xf32>, vector<4x128xf32> -> vector<4x128xf32>
    %c0_62 = arith.constant 0 : index
    %c0_63 = arith.constant 0 : index
    %198 = vector.load %arg10[%c0_62, %c0_63] : memref<1x128xf32, #tpu.memory_space<vmem>>, vector<1x128xf32>
    %199 = vector.broadcast %198 : vector<1x128xf32> to vector<4x128xf32>
    %200 = arith.addf %197, %199 : vector<4x128xf32>
    %cst_64 = arith.constant 0.000000e+00 : f32
    %201 = vector.broadcast %cst_64 : f32 to vector<4x128xf32>
    %202 = arith.subf %201, %200 : vector<4x128xf32>
    %203 = math.exp %202 : vector<4x128xf32>
    %cst_65 = arith.constant 1.000000e+00 : f32
    %204 = vector.broadcast %cst_65 : f32 to vector<4x128xf32>
    %205 = arith.addf %204, %203 : vector<4x128xf32>
    %cst_66 = arith.constant 1.000000e+00 : f32
    %206 = vector.broadcast %cst_66 : f32 to vector<4x128xf32>
    %207 = arith.divf %206, %205 : vector<4x128xf32>
    %208 = vector.shape_cast %207 : vector<4x128xf32> to vector<4x1x128xf32>
    %209 = vector.broadcast %208 : vector<4x1x128xf32> to vector<4x64x128xf32>
    %210 = arith.mulf %185, %209 : vector<4x64x128xf32>
    %211 = vector.shape_cast %210 : vector<4x64x128xf32> to vector<256x128xf32>
    %212 = arith.truncf %211 : vector<256x128xf32> to vector<256x128xbf16>
    %213 = vector.shape_cast %1 : vector<4x8x8x128xbf16> to vector<256x128xbf16>
    %214 = tpu.concatenate %212, %213 in 1 : vector<256x128xbf16>, vector<256x128xbf16> -> vector<256x256xbf16>
    %c0_67 = arith.constant 0 : index
    %c0_68 = arith.constant 0 : index
    %215 = vector.load %arg11[%c0_67, %c0_68] : memref<256x128xbf16, #tpu.memory_space<vmem>>, vector<256x128xbf16>
    %cst_69 = arith.constant dense<0.000000e+00> : vector<256x128xf32>
    %216 = tpu.matmul %214, %215, %cst_69 {dimension_numbers = #tpu.dot_dimension_numbers<[1], [0], [0], [1], [0, 0, 1, 1], [], []>} : vector<256x256xbf16>, vector<256x128xbf16>, vector<256x128xf32> -> vector<256x128xf32>
    %c0_70 = arith.constant 0 : index
    %c0_71 = arith.constant 0 : index
    %217 = vector.load %arg12[%c0_70, %c0_71] : memref<1x128xf32, #tpu.memory_space<vmem>>, vector<1x128xf32>
    %218 = vector.broadcast %217 : vector<1x128xf32> to vector<256x128xf32>
    %219 = arith.addf %216, %218 : vector<256x128xf32>
    %220 = vector.shape_cast %219 : vector<256x128xf32> to vector<4x8x8x128xf32>
    %221 = arith.truncf %220 : vector<4x8x8x128xf32> to vector<4x8x8x128xbf16>
    %c0_72 = arith.constant 0 : index
    %c0_73 = arith.constant 0 : index
    %c0_74 = arith.constant 0 : index
    %c0_75 = arith.constant 0 : index
    %222 = vector.load %arg13[%c0_72, %c0_73, %c0_74, %c0_75] : memref<4x8x8x128xbf16, #tpu.memory_space<vmem>>, vector<4x8x8x128xbf16>
    tpu.vector_store %arg13[%c0_72, %c0_73, %c0_74, %c0_75], %221 {strides = array<i32>} : memref<4x8x8x128xbf16, #tpu.memory_space<vmem>>, vector<4x8x8x128xbf16>,
    return
  }
  func.func @transform_0(%arg0: i32) -> (i32, i32, i32, i32) {
    %c0_i32 = arith.constant 0 : i32
    %c0_i32_0 = arith.constant 0 : i32
    %c0_i32_1 = arith.constant 0 : i32
    %c0_i32_2 = arith.constant 0 : i32
    return %arg0, %c0_i32, %c0_i32_0, %c0_i32_1 : i32, i32, i32, i32
  }
  func.func @transform_1(%arg0: i32) -> (i32, i32, i32, i32) {
    %c0_i32 = arith.constant 0 : i32
    %c0_i32_0 = arith.constant 0 : i32
    %c0_i32_1 = arith.constant 0 : i32
    %c0_i32_2 = arith.constant 0 : i32
    return %arg0, %c0_i32, %c0_i32_0, %c0_i32_1 : i32, i32, i32, i32
  }
  func.func @transform_2(%arg0: i32) -> (i32, i32) {
    %c0_i32 = arith.constant 0 : i32
    %c0_i32_0 = arith.constant 0 : i32
    %c0_i32_1 = arith.constant 0 : i32
    return %c0_i32, %c0_i32_0 : i32, i32
  }
  func.func @transform_3(%arg0: i32) -> (i32, i32) {
    %c0_i32 = arith.constant 0 : i32
    %c0_i32_0 = arith.constant 0 : i32
    %c0_i32_1 = arith.constant 0 : i32
    return %c0_i32, %c0_i32_0 : i32, i32
  }
  func.func @transform_4(%arg0: i32) -> (i32, i32) {
    %c0_i32 = arith.constant 0 : i32
    %c0_i32_0 = arith.constant 0 : i32
    %c0_i32_1 = arith.constant 0 : i32
    return %c0_i32, %c0_i32_0 : i32, i32
  }
  func.func @transform_5(%arg0: i32) -> (i32, i32) {
    %c0_i32 = arith.constant 0 : i32
    %c0_i32_0 = arith.constant 0 : i32
    %c0_i32_1 = arith.constant 0 : i32
    return %c0_i32, %c0_i32_0 : i32, i32
  }
  func.func @transform_6(%arg0: i32) -> (i32, i32) {
    %c0_i32 = arith.constant 0 : i32
    %c0_i32_0 = arith.constant 0 : i32
    %c0_i32_1 = arith.constant 0 : i32
    return %c0_i32, %c0_i32_0 : i32, i32
  }
  func.func @transform_7(%arg0: i32) -> (i32, i32) {
    %c0_i32 = arith.constant 0 : i32
    %c0_i32_0 = arith.constant 0 : i32
    %c0_i32_1 = arith.constant 0 : i32
    return %c0_i32, %c0_i32_0 : i32, i32
  }
  func.func @transform_8(%arg0: i32) -> (i32, i32) {
    %c0_i32 = arith.constant 0 : i32
    %c0_i32_0 = arith.constant 0 : i32
    %c0_i32_1 = arith.constant 0 : i32
    return %c0_i32, %c0_i32_0 : i32, i32
  }
  func.func @transform_9(%arg0: i32) -> (i32, i32) {
    %c0_i32 = arith.constant 0 : i32
    %c0_i32_0 = arith.constant 0 : i32
    %c0_i32_1 = arith.constant 0 : i32
    return %c0_i32, %c0_i32_0 : i32, i32
  }
  func.func @transform_10(%arg0: i32) -> (i32, i32) {
    %c0_i32 = arith.constant 0 : i32
    %c0_i32_0 = arith.constant 0 : i32
    %c0_i32_1 = arith.constant 0 : i32
    return %c0_i32, %c0_i32_0 : i32, i32
  }
  func.func @transform_11(%arg0: i32) -> (i32, i32) {
    %c0_i32 = arith.constant 0 : i32
    %c0_i32_0 = arith.constant 0 : i32
    %c0_i32_1 = arith.constant 0 : i32
    return %c0_i32, %c0_i32_0 : i32, i32
  }
  func.func @transform_12(%arg0: i32) -> (i32, i32, i32, i32) {
    %c0_i32 = arith.constant 0 : i32
    %c0_i32_0 = arith.constant 0 : i32
    %c0_i32_1 = arith.constant 0 : i32
    %c0_i32_2 = arith.constant 0 : i32
    return %arg0, %c0_i32, %c0_i32_0, %c0_i32_1 : i32, i32, i32, i32
  }
}

</mosaic_0001>

<bundles_post_ra>
// kernel: tpu_custom_call.1
= control target key start
LH: loop header
LB: loop body
LE: loop exit
PB: predicated region body
PF: predicated region fallthrough
CT: control target
= control target key end

     0   :  { %17 = vsyncpa [#allocation3], 0  ;;  %s14419_s0 = inlined_call_operand.vmem [shape: bf16[4,10,10,128], index: 0, kind: input, shape index: {}]   ;;  %s14420_s1 = inlined_call_operand.vmem [shape: bf16[4,8,8,128], index: 1, kind: input, shape index: {}]   ;;  %s14421_s2 = inlined_call_operand.hbm [shape: bf16[1152,128], index: 2, kind: input, shape index: {}]   ;;  %s14422_s3 = inlined_call_operand.vmem [shape: f32[1,128], index: 3, kind: input, shape index: {}]   ;;  %s14423_s4 = inlined_call_operand.vmem [shape: bf16[256,128], index: 4, kind: input, shape index: {}]   ;;  %s14424_s5 = inlined_call_operand.vmem [shape: f32[1,128], index: 5, kind: input, shape index: {}]   ;;  %s14425_s6 = inlined_call_operand.vmem [shape: f32[128,128], index: 6, kind: input, shape index: {}]   ;;  %s14426_s7 = inlined_call_operand.vmem [shape: f32[1,128], index: 7, kind: input, shape index: {}]   ;;  %s14427_s8 = inlined_call_operand.vmem [shape: f32[128,128], index: 8, kind: input, shape index: {}]   ;;  %s14428_s9 = inlined_call_operand.vmem [shape: f32[1,128], index: 9, kind: input, shape index: {}]   ;;  %s14429_s10 = inlined_call_operand.hbm [shape: bf16[256,128], index: 10, kind: input, shape index: {}]   ;;  %s14430_s11 = inlined_call_operand.vmem [shape: f32[1,128], index: 11, kind: input, shape index: {}]   ;;  %s14431_s12 = inlined_call_operand.hbm [shape: bf16[4,8,8,128], index: 12, kind: output, shape index: {}]  }
   0x1   :  { %18 = vsyncpa [#allocation6], 0 }
   0x2   :  { %19 = vsyncpa [#allocation4], 0  ;;  %s28_s23 = sshll.u32 %s14421_s2, 4  ;;  %s8732_s24 = smov [#allocation2]   ;;  %s29_s23 = int_to_ptr.hbm [resolvable:$true] %s28_s23 }
   0x3   :  { %s30_s25 = sshll.u32 %s8732_s24, 4  ;;  %s55_s28 = sshll.u32 %s14429_s10, 4  ;;  %s31_s25 = int_to_ptr.vmem [resolvable:$true] %s30_s25  ;;  %s56_s28 = int_to_ptr.hbm [resolvable:$true] %s55_s28 }
   0x4   :  { %s8733_s29 = smov 64   ;;  %s8734_s30 = smov 4  }
   0x5   :  { %36 = dma.hbm_to_vmem [thread:$0]  %s29_s23, 9216, %s31_s25, [#allocation3], %s8733_s29, %s8733_s29, %s8734_s30  }
   0x6   :  { %s8735_s13 = smov [#allocation5]  }
   0x7   :  { %s57_s14 = sshll.u32 %s8735_s13, 4  ;;  %s58_s14 = int_to_ptr.vmem [resolvable:$true] %s57_s14 }
   0x8   :  { %63 = dma.hbm_to_vmem [thread:$0]  %s56_s28, 2048, %s58_s14, [#allocation6], %s8733_s29, %s8733_s29, %s8734_s30  }
   0x9   :  { %8726 = dma.done.wait [#allocation3], 9216  }
   0xa   :  { %8727 = vsyncadd [#allocation3], 4294958080 }
   0xb   :  { %8728 = dma.done.wait [#allocation6], 2048  }
   0xc   :  { %8729 = vsyncadd [#allocation6], 4294965248  ;;  %v8274_v0 = vld [vmem:[#allocation2 + $0x38] sm:$0xff]  ;;  %v8273_v1 = vld [vmem:[#allocation2 + $0x30] sm:$0xff]  ;;  %vm187_vm0 = vsmask.f32 3328 }
   0xd   :  { %8466 = vmatpush.bf16.msra.mxu1 %v8274_v0  ;;  %8467 = vmatpush.bf16.msra.mxu2 %v8274_v0  ;;  %v8272_v2 = vld [vmem:[#allocation2 + $0x28] sm:$0xff]  ;;  %v8271_v3 = vld [vmem:[#allocation2 + $0x20] sm:$0xff]  ;;  %v8270_v4 = vld [vmem:[#allocation2 + $0x18] sm:$0xff]  ;;  %vm188_vm1 = vsmask.f32 7440  ;;  %vm702_vm3 = vcmask 1042432  }
   0xe   :  { %1909 = vmatpush.bf16.msra.mxu0 %v8274_v0  ;;  %v8269_v5 = vld [vmem:[#allocation2 + $0x10] sm:$0xff]  ;;  %v8268_v6 = vld [vmem:[#allocation2 + $0x8] sm:$0xff]  ;;  %v8819_v7 = vld [vmem:[%s14419_s0 + $0x60] sm:$0xf]  ;;  %vm703_vm4 = vcmask 1046532   ;;  %s7684_s28 = sshll.u32 %s14431_s12, 4  ;;  %s7685_s28 = int_to_ptr.hbm [resolvable:$true] %s7684_s28 }
   0xf   :  { %v8824_v8 = vld [vmem:[%s14419_s0 + $0x68] sm:$0xf]  ;;  %v8829_v9 = vld [vmem:[%s14419_s0 + $0xc0] sm:$0xf]  ;;  %v14445_v13 = vunpack.c.l.b16 %v8819_v7  ;;  %v8290_v20 = vld [vmem:[#allocation2 + $0xb8] sm:$0xff] }
  0x10   :  { %v8834_v10 = vld [vmem:[%s14419_s0 + $0xc8] sm:$0xf]  ;;  %v8839_v11 = vld [vmem:[%s14419_s0] sm:$0xf]  ;;  %v14444_v14 = vunpack.c.l.b16 %v8824_v8  ;;  %v14438_v15 = vunpack.c.l.b16 %v8829_v9  ;;  %v8282_v21 = vld [vmem:[#allocation2 + $0x78] sm:$0xff] }
  0x11   :  { %8468 = vmatpush.bf16.msra.mxu1 %v8273_v1  ;;  %8469 = vmatpush.bf16.msra.mxu2 %v8273_v1  ;;  %v8844_v12 = vld [vmem:[%s14419_s0 + $0x8] sm:$0xf]  ;;  %v14437_v16 = vunpack.c.l.b16 %v8834_v10  ;;  %v8267_v17 = vld [vmem:[#allocation2] sm:$0xff]  ;;  %v993_v18 = vunpack.c.l.b16 %v8839_v11  ;;  %v8306_v22 = vld [vmem:[#allocation2 + $0x138] sm:$0xff] }
  0x12   :  { %1910 = vmatpush.bf16.msra.mxu0 %v8273_v1  ;;  %v994_v19 = vunpack.c.l.b16 %v8844_v12  ;;  %v8856_v23 = vpack.c.b16 %v14444_v14, %v14445_v13  ;;  %v8289_v26 = vld [vmem:[#allocation2 + $0xb0] sm:$0xff]  ;;  %v8288_v29 = vld [vmem:[#allocation2 + $0xa8] sm:$0xff]  ;;  %v8876_v33 = vld [vmem:[%s14419_s0 + $0x78] sm:$0xf] }
  0x13   :  { %v8862_v24 = vpack.c.b16 %v14437_v16, %v14438_v15  ;;  %v8281_v27 = vld [vmem:[#allocation2 + $0x70] sm:$0xff]  ;;  %v8280_v30 = vld [vmem:[#allocation2 + $0x68] sm:$0xff]  ;;  %v8886_v35 = vld [vmem:[%s14419_s0 + $0xd8] sm:$0xf]  ;;  %v14442_v40 = vunpack.c.l.b16 %v8876_v33 }
  0x14   :  { %14653 = vst [vmem:[#allocation11_spill] sm:$0xff] %v8856_v23  ;;  %v1025_v25 = vpack.c.b16 %v994_v19, %v993_v18  ;;  %v8305_v28 = vld [vmem:[#allocation2 + $0x130] sm:$0xff]  ;;  %v8304_v31 = vld [vmem:[#allocation2 + $0x128] sm:$0xff]  ;;  %v8896_v37 = vld [vmem:[%s14419_s0 + $0x18] sm:$0xf]  ;;  %v14435_v42 = vunpack.c.l.b16 %v8886_v35 }
  0x15   :  { %8470 = vmatpush.bf16.msra.mxu1 %v8272_v2  ;;  %8471 = vmatpush.bf16.msra.mxu2 %v8272_v2  ;;  %14654 = vst [vmem:[#allocation12_spill] sm:$0xff] %v8862_v24  ;;  %v8871_v32 = vld [vmem:[%s14419_s0 + $0x70] sm:$0xf]  ;;  %v8287_v38 = vld [vmem:[#allocation2 + $0xa0] sm:$0xff]  ;;  %v996_v44 = vunpack.c.l.b16 %v8896_v37  ;;  %v8286_v48 = vld [vmem:[#allocation2 + $0x98] sm:$0xff] }
  0x16   :  { %1911 = vmatpush.bf16.msra.mxu0 %v8272_v2  ;;  %v8881_v34 = vld [vmem:[%s14419_s0 + $0xd0] sm:$0xf]  ;;  %v14443_v39 = vunpack.c.l.b16 %v8871_v32  ;;  %v8279_v49 = vld [vmem:[#allocation2 + $0x60] sm:$0xff]  ;;  %v8298_v51 = vld [vmem:[#allocation2 + $0xf8] sm:$0xff] }
  0x17   :  { %v8891_v36 = vld [vmem:[%s14419_s0 + $0x10] sm:$0xf]  ;;  %v14436_v41 = vunpack.c.l.b16 %v8881_v34  ;;  %v8303_v50 = vld [vmem:[#allocation2 + $0x120] sm:$0xff]  ;;  %v8278_v52 = vld [vmem:[#allocation2 + $0x58] sm:$0xff]  ;;  %2176 = vmatpush.bf16.msra.mxu3 %v8298_v51 }
  0x18   :  { %v995_v43 = vunpack.c.l.b16 %v8891_v36  ;;  %v8908_v45 = vpack.c.b16 %v14442_v40, %v14443_v39  ;;  %v8285_v53 = vld [vmem:[#allocation2 + $0x90] sm:$0xff]  ;;  %v8928_v55 = vld [vmem:[%s14419_s0 + $0x80] sm:$0xf]  ;;  %v8933_v56 = vld [vmem:[%s14419_s0 + $0x88] sm:$0xf] }
  0x19   :  { %8472 = vmatpush.bf16.msra.mxu1 %v8271_v3  ;;  %8473 = vmatpush.bf16.msra.mxu2 %v8271_v3  ;;  %v8914_v46 = vpack.c.b16 %v14435_v42, %v14436_v41  ;;  %v8297_v54 = vld [vmem:[#allocation2 + $0xf0] sm:$0xff]  ;;  %v8941_v58 = vld [vmem:[%s14419_s0 + $0xf8] sm:$0xf]  ;;  %v8946_v59 = vld [vmem:[%s14419_s0 + $0x20] sm:$0xf]  ;;  %v14441_v61 = vunpack.c.l.b16 %v8928_v55  ;;  %v14440_v62 = vunpack.c.l.b16 %v8933_v56 }
  0x1a   :  { %1912 = vmatpush.bf16.msra.mxu0 %v8271_v3  ;;  %14655 = vst [vmem:[#allocation13_spill] sm:$0xff] %v8908_v45  ;;  %v8920_v47 = vpack.c.b16 %v996_v44, %v995_v43  ;;  %v135_v57 = vld [vmem:[%s14419_s0 + $0xf0] sm:$0xf]  ;;  %v8951_v60 = vld [vmem:[%s14419_s0 + $0x28] sm:$0xf]  ;;  %v14434_v0 = vunpack.c.l.b16 %v8941_v58  ;;  %v997_v1 = vunpack.c.l.b16 %v8946_v59  ;;  %vm9101_vm2 = vmor %vm187_vm0, %vm188_vm1 }
  0x1b   :  { %14656 = vst [vmem:[#allocation14_spill] sm:$0xff] %v8914_v46  ;;  %2177 = vmatpush.bf16.msra.mxu3 %v8297_v54  ;;  %v1017_v63 = vunpack.c.l.b16 %v135_v57  ;;  %v14453_v2 = vunpack.c.l.b16 %v8951_v60  ;;  %v8962_v3 = vpack.c.b16 %v14440_v62, %v14441_v61  ;;  %v8277_v18 = vld [vmem:[#allocation2 + $0x50] sm:$0xff]  ;;  %v9062_v42 = vld [vmem:[%s14419_s0 + $0x58] sm:$0xf]  ;;  %vm9138_vm5 = vmor %vm702_vm3, %vm703_vm4 }
  0x1c   :  { %14657 = vst [vmem:[#allocation15_spill] sm:$0xff] %v8920_v47  ;;  %v8293_v57 = vld [vmem:[#allocation2 + $0xd0] sm:$0xff]  ;;  %v14451_v61 = vunpack.c.l.b16 %v9062_v42 }
  0x1d   :  { %8474 = vmatpush.bf16.msra.mxu1 %v8270_v4  ;;  %8475 = vmatpush.bf16.msra.mxu2 %v8270_v4  ;;  %14658 = vst [vmem:[#allocation16_spill] sm:$0xff] %v8962_v3 }
  0x1e   :  { %1913 = vmatpush.bf16.msra.mxu0 %v8270_v4  ;;  %v1037_v4 = vpack.c.b16 %v14434_v0, %v1017_v63  ;;  %v9057_v0 = vld [vmem:[%s14419_s0 + $0x50] sm:$0xf] }
  0x1f   :  { %v1001_v62 = vunpack.c.l.b16 %v9057_v0 }
  0x21   :  { %8476 = vmatpush.bf16.msra.mxu1 %v8269_v5  ;;  %8477 = vmatpush.bf16.msra.mxu2 %v8269_v5 }
  0x22   :  { %1914 = vmatpush.bf16.msra.mxu0 %v8269_v5  ;;  %v8970_v5 = vpack.c.b16 %v14453_v2, %v997_v1 }
  0x24   :  { %14659 = vst [vmem:[#allocation17_spill] sm:$0xff] %v8970_v5 }
  0x25   :  { %8478 = vmatpush.bf16.msra.mxu1 %v8268_v6  ;;  %8479 = vmatpush.bf16.msra.mxu2 %v8268_v6 }
  0x26   :  { %1915 = vmatpush.bf16.msra.mxu0 %v8268_v6  ;;  %v8302_v6 = vld [vmem:[#allocation2 + $0x118] sm:$0xff] }
  0x29   :  { %8480 = vmatpush.bf16.msra.mxu1 %v8267_v17  ;;  %8481 = vmatpush.bf16.msra.mxu2 %v8267_v17 }
  0x2a   :  { %1916 = vmatpush.bf16.msra.mxu0 %v8267_v17  ;;  %v8296_v17 = vld [vmem:[#allocation2 + $0xe8] sm:$0xff] }
  0x2b   :  { %2178 = vmatpush.bf16.msra.mxu3 %v8296_v17  ;;  %v8292_v17 = vld [vmem:[#allocation2 + $0xc8] sm:$0xff] }
  0x2c   :  { %1942 = vmatmul.bf16.vlgmr.msra.gmra.mxu1 %v8856_v23  ;;  %1967 = vmatmul.bf16.vlgmr.msra.gmra.mxu2 %v8862_v24 }
  0x2d   :  { %2087 = vmatpush.bf16.msrb.mxu2 %v8290_v20  ;;  %1998 = vmatpush.bf16.msrb.mxu1 %v8282_v21  ;;  %v8284_v20 = vld [vmem:[#allocation2 + $0x88] sm:$0xff]  ;;  %v8295_v21 = vld [vmem:[#allocation2 + $0xe0] sm:$0xff] }
  0x2e   :  { %2265 = vmatpush.bf16.msrb.mxu0 %v8306_v22  ;;  %v8276_v22 = vld [vmem:[#allocation2 + $0x48] sm:$0xff] }
  0x2f   :  { %1917 = vmatmul.bf16.vlgmr.msra.gmra.mxu0 %v1025_v25  ;;  %v8301_v25 = vld [vmem:[#allocation2 + $0x110] sm:$0xff]  ;;  %2179 = vmatpush.bf16.msra.mxu3 %v8295_v21  ;;  %v191_v21 = vshrl.u32 %v8839_v11, 16 }
  0x31   :  { %2088 = vmatpush.bf16.msrb.mxu2 %v8289_v26  ;;  %1999 = vmatpush.bf16.msrb.mxu1 %v8281_v27  ;;  %v8977_v26 = vld [vmem:[%s14419_s0 + $0xa0] sm:$0xf]  ;;  %v8982_v27 = vld [vmem:[%s14419_s0 + $0xa8] sm:$0xf] }
  0x32   :  { %2266 = vmatpush.bf16.msrb.mxu0 %v8305_v28  ;;  %v8987_v28 = vld [vmem:[%s14419_s0 + $0x100] sm:$0xf] }
  0x33   :  { %v14433_v51 = vunpack.c.l.b16 %v8987_v28 }
  0x35   :  { %2089 = vmatpush.bf16.msrb.mxu2 %v8288_v29  ;;  %2000 = vmatpush.bf16.msrb.mxu1 %v8280_v30  ;;  %v8992_v29 = vld [vmem:[%s14419_s0 + $0x108] sm:$0xf]  ;;  %v8997_v30 = vld [vmem:[%s14419_s0 + $0x30] sm:$0xf] }
  0x36   :  { %2267 = vmatpush.bf16.msrb.mxu0 %v8304_v31  ;;  %v9002_v31 = vld [vmem:[%s14419_s0 + $0x38] sm:$0xf] }
  0x37   :  { %v14446_v54 = vunpack.c.l.b16 %v9002_v31 }
  0x39   :  { %2090 = vmatpush.bf16.msrb.mxu2 %v8287_v38  ;;  %2001 = vmatpush.bf16.msrb.mxu1 %v8279_v49  ;;  %v8294_v38 = vld [vmem:[#allocation2 + $0xd8] sm:$0xff]  ;;  %v1009_v49 = vunpack.c.l.b16 %v8977_v26 }
  0x3a   :  { %2268 = vmatpush.bf16.msrb.mxu0 %v8303_v50  ;;  %v14439_v50 = vunpack.c.l.b16 %v8982_v27  ;;  %2180 = vmatpush.bf16.msra.mxu3 %v8294_v38  ;;  %v9031_v38 = vld [vmem:[%s14419_s0 + $0xb0] sm:$0xf] }
  0x3b   :  { %v14448_v41 = vunpack.c.l.b16 %v9031_v38 }
  0x3c   :  { %1947 = vmatmul.bf16.gmra.mxu1 %v8908_v45  ;;  %1972 = vmatmul.bf16.gmra.mxu2 %v8914_v46  ;;  %v1033_v63 = vpack.c.b16 %v14439_v50, %v1009_v49  ;;  %v9036_v49 = vld [vmem:[%s14419_s0 + $0xb8] sm:$0xf] }
  0x3d   :  { %2091 = vmatpush.bf16.msrb.mxu2 %v8286_v48  ;;  %2002 = vmatpush.bf16.msrb.mxu1 %v8278_v52  ;;  %v8275_v48 = vld [vmem:[#allocation2 + $0x40] sm:$0xff]  ;;  %v14432_v52 = vunpack.c.l.b16 %v8992_v29  ;;  %v14447_v16 = vunpack.c.l.b16 %v9036_v49 }
  0x3e   :  { %2269 = vmatpush.bf16.msrb.mxu0 %v8302_v6  ;;  %2181 = vmatpush.bf16.msra.mxu3 %v8293_v57  ;;  %v9041_v57 = vld [vmem:[%s14419_s0 + $0x110] sm:$0xf] }
  0x3f   :  { %1922 = vmatmul.bf16.gmra.mxu0 %v8920_v47  ;;  %v14450_v15 = vunpack.c.l.b16 %v9041_v57  ;;  %v9086_v40 = vpack.c.b16 %v14447_v16, %v14448_v41  ;;  %v1029_v16 = vpack.c.b16 %v14451_v61, %v1001_v62  ;;  %v80_v41 = vld [vmem:[%s14419_s0 + $0x14] sm:$0x1] }
  0x41   :  { %2092 = vmatpush.bf16.msrb.mxu2 %v8285_v53  ;;  %2003 = vmatpush.bf16.msrb.mxu1 %v8277_v18  ;;  %v14452_v53 = vunpack.c.l.b16 %v8997_v30  ;;  %v8283_v18 = vld [vmem:[#allocation2 + $0x80] sm:$0xff]  ;;  %14662 = vst [vmem:[#allocation20_spill] sm:$0xff] %v9086_v40 }
  0x42   :  { %2270 = vmatpush.bf16.msrb.mxu0 %v8301_v25  ;;  %2182 = vmatpush.bf16.msra.mxu3 %v8292_v17  ;;  %v8291_v25 = vld [vmem:[#allocation2 + $0xc0] sm:$0xff]  ;;  %v205_v17 = vshrl.u32 %v8844_v12, 16 }
  0x43   :  { %v9022_v6 = vpack.c.b16 %v14446_v54, %v14452_v53  ;;  %v8338_v53 = vld [vmem:[#allocation2 + $0x238] sm:$0xff] }
  0x44   :  { %v207_v50 = vrot.slane %v205_v17, 4 }
  0x45   :  { %2093 = vmatpush.bf16.msrb.mxu2 %v8284_v20  ;;  %2004 = vmatpush.bf16.msrb.mxu1 %v8276_v22  ;;  %14661 = vst [vmem:[#allocation19_spill] sm:$0xff] %v9022_v6  ;;  %v8300_v20 = vld [vmem:[#allocation2 + $0x108] sm:$0xff]  ;;  %v194_v22 = vshll.u32 %v8839_v11, 16 }
  0x46   :  { %2271 = vmatpush.bf16.msrb.mxu0 %v8300_v20  ;;  %v1189_v20 = vpack.c.b16 %v995_v43, %v994_v19  ;;  %2183 = vmatpush.bf16.msra.mxu3 %v8291_v25  ;;  %v9071_v43 = vld [vmem:[%s14419_s0 + $0x4] sm:$0x1] }
  0x49   :  { %2005 = vmatpush.bf16.msrb.mxu1 %v8275_v48  ;;  %2094 = vmatpush.bf16.msrb.mxu2 %v8283_v18  ;;  %v8299_v48 = vld [vmem:[#allocation2 + $0x100] sm:$0xff]  ;;  %v208_v18 = vshll.u32 %v8844_v12, 16 }
  0x4a   :  { %2272 = vmatpush.bf16.msrb.mxu0 %v8299_v48  ;;  %2184 = vmatmul.bf16.vlgmr.msra.gmra.mxu3 %v1189_v20  ;;  %v9080_v48 = vld [vmem:[%s14419_s0 + $0xc] sm:$0x1]  ;;  %v200_v20 = vshll.u32 %v9071_v43, 16 }
  0x4b   :  { %v210_v25 = vrot.slane %v208_v18, 5  ;;  %v214_v54 = vshll.u32 %v9080_v48, 16 }
  0x4c   :  { %1952 = vmatmul.bf16.gmra.mxu1 %v8962_v3  ;;  %1977 = vmatmul.bf16.gmra.mxu2 %v1037_v4  ;;  %v9016_v4 = vpack.c.b16 %v14432_v52, %v14433_v51  ;;  %v193_v52 = vrot.slane %v191_v21, 4  ;;  %v196_v51 = vrot.slane %v194_v22, 5  ;;  %v219_v21 = vshrl.u32 %v8891_v36, 16 }
  0x4d   :  { %v222_v22 = vshll.u32 %v8891_v36, 16  ;;  %v211_v13 = vor.u32 %v210_v25, %v207_v50  ;;  %v8330_v25 = vld [vmem:[#allocation2 + $0x1f8] sm:$0xff]  ;;  %v216_v61 = vrot.slane %v214_v54, 5 }
  0x4e   :  { %14660 = vst [vmem:[#allocation18_spill] sm:$0xff] %v9016_v4  ;;  %v197_v18 = vor.u32 %v196_v51, %v193_v52  ;;  %v221_v39 = vrot.slane %v219_v21, 4  ;;  %v202_v52 = vrot.slane %v200_v20, 5  ;;  %v228_v21 = vshll.u32 %v80_v41, 16  ;;  %2532 = vmatpush.bf16.msrb.mxu3 %v8330_v25  ;;  %v9115_v20 = vld [vmem:[%s14419_s0 + $0x128] sm:$0xf]  ;;  %2621 = vmatpush.bf16.msra.mxu0 %v8338_v53 }
  0x4f   :  { %1927 = vmatmul.bf16.gmra.mxu0 %v8970_v5  ;;  %v224_v14 = vrot.slane %v222_v22, 5  ;;  %v8322_v22 = vld [vmem:[#allocation2 + $0x1b8] sm:$0xff]  ;;  %v212_v62 = vrot.slane %v211_v13, 4  ;;  %v233_v13 = vshrl.u32 %v8896_v37, 16  ;;  %v1190_v25 = vpack.c.b16 %v997_v1, %v996_v44 }
  0x50   :  { %v198_v51 = vrot.slane %v197_v18, 4  ;;  %2443 = vmatpush.bf16.msra.mxu2 %v8322_v22  ;;  %v9110_v18 = vld [vmem:[%s14419_s0 + $0x120] sm:$0xf]  ;;  %v230_v54 = vrot.slane %v228_v21, 5  ;;  %v711_v21 = vrot.slane %v9080_v48, 5  ;;  %v14667_v1 = vmov 0 }
  0x51   :  { %v225_v50 = vor.u32 %v224_v14, %v221_v39  ;;  %v217_v22 = vsel %vm9101_vm2, %v212_v62, %v216_v61  ;;  %v235_v53 = vrot.slane %v233_v13, 4  ;;  %v7699_v61 = vrot.slane %v8844_v12, 9 }
  0x52   :  { %v203_v14 = vsel %vm9101_vm2, %v198_v51, %v202_v52  ;;  %v1058_v62 = vunpack.c.l.b16 %v217_v22  ;;  %v14668_v1 = vsel %vm9138_vm5, 4294967295, %v14667_v1  ;;  %v250_v52 = vshll.u32 %v8946_v59, 16 }
  0x53   :  { %v226_v39 = vrot.slane %v225_v50, 4  ;;  %v1057_v2 = vunpack.c.l.b16 %v203_v14  ;;  %14669 = vst [vmem:[#allocation23_spill] sm:$0xff] %v14668_v1  ;;  %v247_v14 = vshrl.u32 %v8946_v59, 16  ;;  %v7700_v13 = vrot.slane %v8891_v36, 9 }
  0x54   :  { %v712_v22 = vsel %vm9138_vm5, %v7699_v61, %v711_v21 }
  0x55   :  { %v231_v44 = vsel %vm9101_vm2, %v226_v39, %v230_v54  ;;  %v14670_v54 = vunpack.c.l.b16 %v9110_v18  ;;  %v249_v36 = vrot.slane %v247_v14, 4 }
  0x56   :  { %v1059_v48 = vunpack.c.l.b16 %v231_v44 }
  0x58   :  { %v1225_v46 = vpack.c.b16 %v1059_v48, %v1058_v62 }
  0x5a   :  { %2189 = vmatmul.bf16.gmra.mxu3 %v1190_v25  ;;  %v1089_v25 = vpack.c.b16 %v1058_v62, %v1057_v2  ;;  %v707_v2 = vrot.slane %v9071_v43, 5  ;;  %v264_v43 = vshll.u32 %v8951_v60, 16 }
  0x5c   :  { %1957 = vmatmul.bf16.gmra.mxu1 %v1033_v63  ;;  %1982 = vmatmul.bf16.gmra.mxu2 %v9016_v4  ;;  %v9046_v63 = vld [vmem:[%s14419_s0 + $0x118] sm:$0xf] }
  0x5d   :  { %v14449_v19 = vunpack.c.l.b16 %v9046_v63 }
  0x5f   :  { %1932 = vmatmul.bf16.gmra.mxu0 %v9022_v6  ;;  %v9092_v17 = vpack.c.b16 %v14449_v19, %v14450_v15  ;;  %v14664_v19 = vmov 0  ;;  %v8314_v15 = vld [vmem:[#allocation2 + $0x178] sm:$0xff]  ;;  %v7705_v6 = vrot.slane %v9002_v31, 9 }
  0x60   :  { %v14665_v19 = vsel %vm9101_vm2, 4294967295, %v14664_v19  ;;  %2354 = vmatpush.bf16.msra.mxu1 %v8314_v15  ;;  %v9132_v15 = vld [vmem:[%s14419_s0 + $0x1c] sm:$0x1] }
  0x61   :  { %14663 = vst [vmem:[#allocation21_spill] sm:$0xff] %v9092_v17  ;;  %v242_v12 = vshll.u32 %v9132_v15, 16 }
  0x62   :  { %14666 = vst [vmem:[#allocation22_spill] sm:$0xff] %v14665_v19 }
  0x63   :  { %v244_v44 = vrot.slane %v242_v12, 5 }
  0x6c   :  { %1962 = vmatmul.bf16.gmra.mxu1 %v9086_v40  ;;  %1987 = vmatmul.bf16.gmra.mxu2 %v9092_v17  ;;  %v14671_v17 = vunpack.c.l.b16 %v9115_v20 }
  0x6e   :  { %v9156_v4 = vpack.c.b16 %v14671_v17, %v14670_v54  ;;  %v14675_v54 = vunpack.c.l.b16 %v8997_v30 }
  0x6f   :  { %1937 = vmatmul.bf16.gmra.mxu0 %v1029_v16  ;;  %v236_v16 = vshll.u32 %v8896_v37, 16 }
  0x70   :  { %14672 = vst [vmem:[#allocation24_spill] sm:$0xff] %v9156_v4 }
  0x71   :  { %v238_v50 = vrot.slane %v236_v16, 5  ;;  %v715_v16 = vrot.slane %v80_v41, 5  ;;  %v252_v41 = vrot.slane %v250_v52, 5 }
  0x73   :  { %v239_v51 = vor.u32 %v238_v50, %v235_v53  ;;  %v9150_v39 = vsel %vm9138_vm5, %v7700_v13, %v715_v16  ;;  %v9161_v53 = vld [vmem:[%s14419_s0 + $0x24] sm:$0x1]  ;;  %v1122_v50 = vunpack.c.l.b16 %v712_v22  ;;  %v7698_v13 = vrot.slane %v8839_v11, 9 }
  0x74   :  { %v14457_v61 = vunpack.c.l.b16 %v9150_v39  ;;  %v253_v17 = vor.u32 %v252_v41, %v249_v36  ;;  %v256_v52 = vshll.u32 %v9161_v53, 16  ;;  %v14674_v22 = vunpack.c.l.b16 %v8951_v60 }
  0x75   :  { %v240_v21 = vrot.slane %v239_v51, 4  ;;  %v261_v51 = vshrl.u32 %v8951_v60, 16  ;;  %v708_v11 = vsel %vm9138_vm5, %v7698_v13, %v707_v2  ;;  %v278_v13 = vshll.u32 %v8997_v30, 16  ;;  %v9189_v2 = vld [vmem:[%s14419_s0 + $0x2c] sm:$0x1] }
  0x76   :  { %v9170_v62 = vpack.c.b16 %v14457_v61, %v1122_v50  ;;  %v254_v16 = vrot.slane %v253_v17, 4  ;;  %v258_v12 = vrot.slane %v256_v52, 5  ;;  %v1121_v41 = vunpack.c.l.b16 %v708_v11 }
  0x77   :  { %v245_v14 = vsel %vm9101_vm2, %v240_v21, %v244_v44  ;;  %v266_v44 = vrot.slane %v264_v43, 5  ;;  %v275_v61 = vshrl.u32 %v8997_v30, 16  ;;  %v9197_v43 = vld [vmem:[%s14419_s0 + $0x34] sm:$0x1] }
  0x78   :  { %14673 = vst [vmem:[#allocation25_spill] sm:$0xff] %v9170_v62  ;;  %v1060_v36 = vunpack.c.l.b16 %v245_v14  ;;  %v259_v21 = vsel %vm9101_vm2, %v254_v16, %v258_v12  ;;  %v1153_v52 = vpack.c.b16 %v1122_v50, %v1121_v41  ;;  %v280_v16 = vrot.slane %v278_v13, 5  ;;  %v8321_v41 = vld [vmem:[#allocation2 + $0x1b0] sm:$0xff] }
  0x79   :  { %v1061_v14 = vunpack.c.l.b16 %v259_v21  ;;  %v284_v50 = vshll.u32 %v9197_v43, 16  ;;  %v7701_v21 = vrot.slane %v8896_v37, 9  ;;  %2444 = vmatpush.bf16.msra.mxu2 %v8321_v41  ;;  %v8337_v41 = vld [vmem:[#allocation2 + $0x230] sm:$0xff] }
  0x7a   :  { %v9191_v17 = vpack.c.b16 %v1060_v36, %v1059_v48  ;;  %2622 = vmatpush.bf16.msra.mxu0 %v8337_v41 }
  0x7b   :  { %v1226_v12 = vpack.c.b16 %v1061_v14, %v1060_v36  ;;  %v289_v36 = vshrl.u32 %v9002_v31, 16 }
  0x7c   :  { %1992 = vmatmul.bf16.gmra.mxu2 %v9156_v4  ;;  %2006 = vmatmul.bf16.vlgmr.msrb.gmra.mxu1 %v1089_v25  ;;  %v1191_v25 = vpack.c.b16 %v14675_v54, %v14674_v22  ;;  %14676 = vst [vmem:[#allocation26_spill] sm:$0xff] %v9191_v17  ;;  %v277_v22 = vrot.slane %v275_v61, 4  ;;  %v719_v61 = vrot.slane %v9132_v15, 5 }
  0x7d   :  { %v291_v15 = vrot.slane %v289_v36, 4 }
  0x7e   :  { %2194 = vmatmul.bf16.gmra.mxu3 %v1191_v25  ;;  %v281_v48 = vor.u32 %v280_v16, %v277_v22  ;;  %v9210_v22 = vld [vmem:[%s14419_s0 + $0x40] sm:$0xf]  ;;  %v9214_v37 = vsel %vm9138_vm5, %v7701_v21, %v719_v61  ;;  %v14679_v21 = vunpack.c.l.b16 %v9002_v31 }
  0x7f   :  { %2273 = vmatmul.bf16.vlgmr.msrb.gmra.mxu0 %v1225_v46  ;;  %v263_v46 = vrot.slane %v261_v51, 4  ;;  %v270_v51 = vshll.u32 %v9189_v2, 16  ;;  %14677 = vst [vmem:[#allocation27_spill] sm:$0xff] %v9210_v22  ;;  %v837_v36 = vshll.u32 %v9210_v22, 16 }
  0x80   :  { %14678 = vst [vmem:[#allocation28_spill] sm:$0xff] %v9214_v37 }
  0x81   :  { %v267_v11 = vor.u32 %v266_v44, %v263_v46  ;;  %v272_v25 = vrot.slane %v270_v51, 5  ;;  %v8329_v46 = vld [vmem:[#allocation2 + $0x1f0] sm:$0xff]  ;;  %v292_v44 = vshll.u32 %v9002_v31, 16  ;;  %v839_v24 = vrot.slane %v837_v36, 5 }
  0x82   :  { %2533 = vmatpush.bf16.msrb.mxu3 %v8329_v46  ;;  %v8313_v51 = vld [vmem:[#allocation2 + $0x170] sm:$0xff] }
  0x83   :  { %v268_v54 = vrot.slane %v267_v11, 4  ;;  %v286_v11 = vrot.slane %v284_v50, 5  ;;  %v294_v16 = vrot.slane %v292_v44, 5  ;;  %2355 = vmatpush.bf16.msra.mxu1 %v8313_v51  ;;  %v92_v50 = vld [vmem:[%s14419_s0 + $0x44] sm:$0x1] }
  0x85   :  { %v273_v13 = vsel %vm9101_vm2, %v268_v54, %v272_v25  ;;  %v834_v54 = vshrl.u32 %v9210_v22, 16  ;;  %v295_v44 = vor.u32 %v294_v16, %v291_v15 }
  0x86   :  { %v1062_v25 = vunpack.c.l.b16 %v273_v13 }
  0x87   :  { %v836_v51 = vrot.slane %v834_v54, 4  ;;  %v296_v15 = vrot.slane %v295_v44, 4  ;;  %v7702_v54 = vrot.slane %v8946_v59, 9  ;;  %v320_v59 = vshll.u32 %v9062_v42, 16 }
  0x89   :  { %v840_v40 = vor.u32 %v839_v24, %v836_v51  ;;  %v303_v24 = vshrl.u32 %v9057_v0, 16  ;;  %v14687_v51 = vunpack.c.l.b16 %v8819_v7 }
  0x8b   :  { %v841_v36 = vrot.slane %v840_v40, 4 }
  0x8c   :  { %2011 = vmatmul.bf16.gmra.mxu1 %v9191_v17  ;;  %2095 = vmatmul.bf16.vlgmr.msrb.gmra.mxu2 %v1153_v52  ;;  %v282_v52 = vrot.slane %v281_v48, 4  ;;  %v9221_v48 = vld [vmem:[%s14419_s0 + $0x3c] sm:$0x1] }
  0x8d   :  { %v298_v13 = vshll.u32 %v9221_v48, 16 }
  0x8e   :  { %v287_v46 = vsel %vm9101_vm2, %v282_v52, %v286_v11  ;;  %v9235_v52 = vpack.c.b16 %v1062_v25, %v1061_v14  ;;  %v14681_v11 = vunpack.c.l.b16 %v9150_v39  ;;  %v723_v14 = vrot.slane %v9161_v53, 5 }
  0x8f   :  { %2278 = vmatmul.bf16.gmra.mxu0 %v1226_v12  ;;  %v14460_v12 = vunpack.c.l.b16 %v9210_v22  ;;  %v1063_v4 = vunpack.c.l.b16 %v287_v46  ;;  %v300_v16 = vrot.slane %v298_v13, 5  ;;  %v7703_v46 = vrot.slane %v8951_v60, 9  ;;  %v8328_v22 = vld [vmem:[#allocation2 + $0x1e8] sm:$0xff] }
  0x90   :  { %14680 = vst [vmem:[#allocation29_spill] sm:$0xff] %v9235_v52  ;;  %v727_v39 = vrot.slane %v9189_v2, 5  ;;  %v317_v13 = vshrl.u32 %v9062_v42, 16  ;;  %v9257_v53 = vsel %vm9138_vm5, %v7702_v54, %v723_v14  ;;  %2534 = vmatpush.bf16.msrb.mxu3 %v8328_v22 }
  0x91   :  { %v1192_v61 = vpack.c.b16 %v14460_v12, %v14679_v21  ;;  %v14682_v21 = vunpack.c.l.b16 %v9214_v37  ;;  %v1227_v12 = vpack.c.b16 %v1063_v4, %v1062_v25  ;;  %v301_v25 = vsel %vm9101_vm2, %v296_v15, %v300_v16  ;;  %14684 = vst [vmem:[#allocation31_spill] sm:$0xff] %v9257_v53 }
  0x92   :  { %v9261_v60 = vsel %vm9138_vm5, %v7703_v46, %v727_v39  ;;  %v1064_v2 = vunpack.c.l.b16 %v301_v25  ;;  %v319_v16 = vrot.slane %v317_v13, 4  ;;  %v14466_v54 = vunpack.c.l.b16 %v9257_v53  ;;  %v9274_v46 = vld [vmem:[%s14419_s0 + $0x54] sm:$0x1]  ;;  %v9279_v39 = vld [vmem:[%s14419_s0 + $0x5c] sm:$0x1] }
  0x93   :  { %2199 = vmatmul.bf16.gmra.mxu3 %v1192_v61  ;;  %v9241_v41 = vpack.c.b16 %v14682_v21, %v14681_v11  ;;  %v843_v61 = vshll.u32 %v92_v50, 16  ;;  %v306_v50 = vshll.u32 %v9057_v0, 16  ;;  %14685 = vst [vmem:[#allocation32_spill] sm:$0xff] %v9261_v60  ;;  %v305_v21 = vrot.slane %v303_v24, 4  ;;  %v9460_v53 = vld [vmem:[%s14419_s0 + $0x8c] sm:$0x1] }
  0x94   :  { %v14465_v14 = vunpack.c.l.b16 %v9261_v60  ;;  %v331_v25 = vshrl.u32 %v8819_v7, 16 }
  0x95   :  { %14683 = vst [vmem:[#allocation30_spill] sm:$0xff] %v9241_v41  ;;  %v845_v44 = vrot.slane %v843_v61, 5  ;;  %v308_v15 = vrot.slane %v306_v50, 5  ;;  %v322_v61 = vrot.slane %v320_v59, 5  ;;  %v312_v50 = vshll.u32 %v9274_v46, 16 }
  0x96   :  { %v326_v59 = vshll.u32 %v9279_v39, 16  ;;  %v333_v3 = vrot.slane %v331_v25, 4  ;;  %v7704_v25 = vrot.slane %v8997_v30, 9  ;;  %v345_v30 = vshrl.u32 %v8824_v8, 16 }
  0x97   :  { %v846_v40 = vsel %vm9101_vm2, %v841_v36, %v845_v44  ;;  %v334_v36 = vshll.u32 %v8819_v7, 16  ;;  %v309_v24 = vor.u32 %v308_v15, %v305_v21  ;;  %v323_v13 = vor.u32 %v322_v61, %v319_v16 }
  0x98   :  { %v9283_v44 = vunpack.c.l.b16 %v846_v40  ;;  %v314_v15 = vrot.slane %v312_v50, 5  ;;  %v328_v61 = vrot.slane %v326_v59, 5 }
  0x99   :  { %v336_v45 = vrot.slane %v334_v36, 5  ;;  %v324_v16 = vrot.slane %v323_v13, 4  ;;  %v731_v36 = vrot.slane %v9197_v43, 5 }
  0x9a   :  { %14688 = vst [vmem:[#allocation33_spill] sm:$0xff] %v9283_v44  ;;  %v1228_v40 = vpack.c.b16 %v9283_v44, %v1064_v2 }
  0x9b   :  { %v9322_v31 = vsel %vm9138_vm5, %v7704_v25, %v731_v36  ;;  %v8336_v25 = vld [vmem:[#allocation2 + $0x228] sm:$0xff] }
  0x9c   :  { %2016 = vmatmul.bf16.gmra.mxu1 %v9235_v52  ;;  %2100 = vmatmul.bf16.gmra.mxu2 %v9241_v41  ;;  %14692 = vst [vmem:[#allocation37_spill] sm:$0xff] %v9322_v31 }
  0x9d   :  { %2623 = vmatpush.bf16.msra.mxu0 %v8336_v25 }
  0x9f   :  { %2283 = vmatmul.bf16.gmra.mxu0 %v1227_v12  ;;  %v14686_v12 = vunpack.c.l.b16 %v9062_v42 }
  0xa1   :  { %v1193_v11 = vpack.c.b16 %v14687_v51, %v14686_v12  ;;  %v9287_v12 = vpack.c.b16 %v1064_v2, %v1063_v4  ;;  %v9293_v51 = vpack.c.b16 %v14465_v14, %v14466_v54  ;;  %v310_v4 = vrot.slane %v309_v24, 4  ;;  %v8320_v54 = vld [vmem:[#allocation2 + $0x1a8] sm:$0xff] }
  0xa2   :  { %v337_v2 = vor.u32 %v336_v45, %v333_v3  ;;  %v735_v24 = vrot.slane %v9221_v48, 5  ;;  %2445 = vmatpush.bf16.msra.mxu2 %v8320_v54  ;;  %v348_v45 = vshll.u32 %v8824_v8, 16  ;;  %v329_v3 = vsel %vm9101_vm2, %v324_v16, %v328_v61  ;;  %v8312_v54 = vld [vmem:[#allocation2 + $0x168] sm:$0xff] }
  0xa3   :  { %2204 = vmatmul.bf16.gmra.mxu3 %v1193_v11  ;;  %14689 = vst [vmem:[#allocation34_spill] sm:$0xff] %v9287_v12  ;;  %v9301_v11 = vld [vmem:[%s14419_s0 + $0x64] sm:$0x1]  ;;  %v315_v13 = vsel %vm9101_vm2, %v310_v4, %v314_v15  ;;  %2356 = vmatpush.bf16.msra.mxu1 %v8312_v54  ;;  %v14694_v15 = vunpack.c.l.b16 %v8824_v8  ;;  %v14695_v16 = vunpack.c.l.b16 %v8871_v32  ;;  %v1066_v36 = vunpack.c.l.b16 %v329_v3 }
  0xa4   :  { %14690 = vst [vmem:[#allocation35_spill] sm:$0xff] %v9293_v51  ;;  %v340_v14 = vshll.u32 %v9301_v11, 16  ;;  %v338_v43 = vrot.slane %v337_v2, 4  ;;  %v9328_v59 = vsel %vm9138_vm5, %v7705_v6, %v735_v24  ;;  %v347_v2 = vrot.slane %v345_v30, 4  ;;  %v9341_v6 = vld [vmem:[%s14419_s0 + $0x6c] sm:$0x1] }
  0xa5   :  { %14693 = vst [vmem:[#allocation38_spill] sm:$0xff] %v9328_v59  ;;  %v1194_v61 = vpack.c.b16 %v14695_v16, %v14694_v15  ;;  %v350_v5 = vrot.slane %v348_v45, 5  ;;  %v14473_v60 = vunpack.c.l.b16 %v9328_v59  ;;  %v362_v54 = vshll.u32 %v8871_v32, 16 }
  0xa6   :  { %v342_v48 = vrot.slane %v340_v14, 5  ;;  %v14474_v14 = vunpack.c.l.b16 %v9322_v31  ;;  %v354_v45 = vshll.u32 %v9341_v6, 16  ;;  %v739_v59 = vrot.slane %v9274_v46, 5 }
  0xa7   :  { %v351_v30 = vor.u32 %v350_v5, %v347_v2 }
  0xa8   :  { %v343_v24 = vsel %vm9101_vm2, %v338_v43, %v342_v48  ;;  %v364_v48 = vrot.slane %v362_v54, 5 }
  0xa9   :  { %v9295_v23 = vpop.f32.mrf.mxu1  ;;  %v1067_v15 = vunpack.c.l.b16 %v343_v24  ;;  %v352_v2 = vrot.slane %v351_v30, 4  ;;  %v7706_v24 = vrot.slane %v9057_v0, 9 }
  0xab   :  { %v1229_v44 = vpack.c.b16 %v1067_v15, %v1066_v36  ;;  %v740_v0 = vsel %vm9138_vm5, %v7706_v24, %v739_v59  ;;  %v387_v59 = vshrl.u32 %v8928_v55, 16  ;;  %v390_v24 = vshll.u32 %v8928_v55, 16 }
  0xac   :  { %v9303_v21 = vpop.f32.mrf.mxu0  ;;  %2021 = vmatmul.bf16.gmra.mxu1 %v9287_v12  ;;  %2105 = vmatmul.bf16.gmra.mxu2 %v9293_v51 }
  0xaf   :  { %2288 = vmatmul.bf16.gmra.mxu0 %v1228_v40  ;;  %v9312_v50 = vpop.f32.mrf.mxu2  ;;  %v1065_v40 = vunpack.c.l.b16 %v315_v13  ;;  %v359_v13 = vshrl.u32 %v8871_v32, 16 }
  0xb0   :  { %14691 = vst [vmem:[#allocation36_spill] sm:$0xff] %v9312_v50  ;;  %v9354_v50 = vpack.c.b16 %v14473_v60, %v14474_v14  ;;  %v743_v60 = vrot.slane %v9279_v39, 5 }
  0xb1   :  { %v9324_v22 = vpop.f32.mrf.mxu1  ;;  %v1093_v16 = vpack.c.b16 %v1066_v36, %v1065_v40  ;;  %v361_v43 = vrot.slane %v359_v13, 4  ;;  %v356_v40 = vrot.slane %v354_v45, 5  ;;  %v7707_v36 = vrot.slane %v9062_v42, 9 }
  0xb2   :  { %14697 = vst [vmem:[#allocation40_spill] sm:$0xff] %v9354_v50 }
  0xb3   :  { %2209 = vmatmul.bf16.gmra.mxu3 %v1194_v61  ;;  %v9361_v61 = vld [vmem:[%s14419_s0 + $0x74] sm:$0x1]  ;;  %v365_v13 = vor.u32 %v364_v48, %v361_v43  ;;  %v357_v30 = vsel %vm9101_vm2, %v352_v2, %v356_v40  ;;  %v376_v43 = vshll.u32 %v8876_v33, 16  ;;  %v9383_v42 = vsel %vm9138_vm5, %v7707_v36, %v743_v60 }
  0xb4   :  { %v9330_v4 = vpop.f32.mrf.mxu0  ;;  %v368_v54 = vshll.u32 %v9361_v61, 16  ;;  %14699 = vst [vmem:[#allocation42_spill] sm:$0xff] %v9383_v42  ;;  %v14701_v2 = vunpack.c.l.b16 %v8928_v55 }
  0xb5   :  { %v366_v46 = vrot.slane %v365_v13, 4  ;;  %v1068_v13 = vunpack.c.l.b16 %v357_v30  ;;  %v378_v36 = vrot.slane %v376_v43, 5  ;;  %v9413_v43 = vld [vmem:[%s14419_s0 + $0x84] sm:$0x1] }
  0xb6   :  { %v370_v45 = vrot.slane %v368_v54, 5  ;;  %v1129_v54 = vunpack.c.l.b16 %v740_v0 }
  0xb7   :  { %v9347_v3 = vpop.f32.mrf.mxu2  ;;  %v9403_v30 = vpack.c.b16 %v1068_v13, %v1067_v15 }
  0xb8   :  { %14696 = vst [vmem:[#allocation39_spill] sm:$0xff] %v9347_v3  ;;  %v371_v3 = vsel %vm9101_vm2, %v366_v46, %v370_v45 }
  0xb9   :  { %v9356_v25 = vpop.f32.mrf.mxu1  ;;  %v1069_v51 = vunpack.c.l.b16 %v371_v3  ;;  %14703 = vst [vmem:[#allocation44_spill] sm:$0xff] %v9403_v30 }
  0xbc   :  { %v9363_v5 = vpop.f32.mrf.mxu0  ;;  %2026 = vmatmul.bf16.gmra.mxu1 %v1093_v16  ;;  %2110 = vmatmul.bf16.gmra.mxu2 %v9354_v50  ;;  %v373_v16 = vshrl.u32 %v8876_v33, 16  ;;  %v9399_v50 = vld [vmem:[%s14419_s0 + $0x7c] sm:$0x1] }
  0xbd   :  { %v382_v46 = vshll.u32 %v9399_v50, 16 }
  0xbe   :  { %v375_v60 = vrot.slane %v373_v16, 4  ;;  %v1230_v16 = vpack.c.b16 %v1069_v51, %v1068_v13  ;;  %v747_v13 = vrot.slane %v9301_v11, 5 }
  0xbf   :  { %2293 = vmatmul.bf16.gmra.mxu0 %v1229_v44  ;;  %v9371_v14 = vpop.f32.mrf.mxu2  ;;  %v14700_v44 = vunpack.c.l.b16 %v8876_v33  ;;  %v384_v15 = vrot.slane %v382_v46, 5 }
  0xc0   :  { %14698 = vst [vmem:[#allocation41_spill] sm:$0xff] %v9371_v14  ;;  %v14479_v14 = vunpack.c.l.b16 %v9383_v42  ;;  %v379_v47 = vor.u32 %v378_v36, %v375_v60  ;;  %v8327_v60 = vld [vmem:[#allocation2 + $0x1e0] sm:$0xff]  ;;  %v7708_v36 = vrot.slane %v8819_v7, 9  ;;  %v751_v42 = vrot.slane %v9341_v6, 5 }
  0xc1   :  { %v9379_v48 = vpop.f32.mrf.mxu1  ;;  %v1195_v40 = vpack.c.b16 %v14701_v2, %v14700_v44  ;;  %v389_v44 = vrot.slane %v387_v59, 4  ;;  %v392_v2 = vrot.slane %v390_v24, 5  ;;  %v396_v24 = vshll.u32 %v9413_v43, 16  ;;  %2535 = vmatpush.bf16.msrb.mxu3 %v8327_v60 }
  0xc2   :  { %v1157_v0 = vpack.c.b16 %v14479_v14, %v1129_v54  ;;  %v380_v3 = vrot.slane %v379_v47, 4  ;;  %v8319_v54 = vld [vmem:[#allocation2 + $0x1a0] sm:$0xff]  ;;  %v7709_v14 = vrot.slane %v8824_v8, 9  ;;  %v404_v47 = vshll.u32 %v8933_v56, 16  ;;  %v9432_v8 = vld [vmem:[%s14419_s0 + $0x90] sm:$0xf] }
  0xc3   :  { %2214 = vmatmul.bf16.gmra.mxu3 %v1195_v40  ;;  %v393_v59 = vor.u32 %v392_v2, %v389_v44  ;;  %2446 = vmatpush.bf16.msra.mxu2 %v8319_v54  ;;  %v398_v7 = vrot.slane %v396_v24, 5  ;;  %14706 = vst [vmem:[#allocation47_spill] sm:$0xff] %v9432_v8  ;;  %v9438_v6 = vsel %vm9138_vm5, %v7708_v36, %v747_v13  ;;  %v8335_v24 = vld [vmem:[#allocation2 + $0x220] sm:$0xff] }
  0xc4   :  { %v9385_v39 = vpop.f32.mrf.mxu0  ;;  %v385_v2 = vsel %vm9101_vm2, %v380_v3, %v384_v15  ;;  %14708 = vst [vmem:[#allocation49_spill] sm:$0xff] %v9438_v6  ;;  %v848_v3 = vshrl.u32 %v9432_v8, 16  ;;  %v851_v15 = vshll.u32 %v9432_v8, 16  ;;  %v14487_v36 = vunpack.c.l.b16 %v9438_v6  ;;  %2624 = vmatpush.bf16.msra.mxu0 %v8335_v24 }
  0xc5   :  { %v394_v46 = vrot.slane %v393_v59, 4  ;;  %v14483_v59 = vunpack.c.l.b16 %v9432_v8  ;;  %v7710_v6 = vrot.slane %v8871_v32, 9  ;;  %v432_v32 = vshll.u32 %v8982_v27, 16 }
  0xc7   :  { %v9401_v31 = vpop.f32.mrf.mxu2  ;;  %v434_v37 = vrot.slane %v432_v32, 5 }
  0xc8   :  { %14702 = vst [vmem:[#allocation43_spill] sm:$0xff] %v9401_v31  ;;  %v8311_v31 = vld [vmem:[#allocation2 + $0x160] sm:$0xff] }
  0xc9   :  { %v9408_v45 = vpop.f32.mrf.mxu1  ;;  %2357 = vmatpush.bf16.msra.mxu1 %v8311_v31 }
  0xca   :  { %14704 = vst [vmem:[#allocation45_spill] sm:$0xff] %v9408_v45 }
  0xcc   :  { %v9415_v40 = vpop.f32.mrf.mxu0  ;;  %2031 = vmatmul.bf16.gmra.mxu1 %v9403_v30  ;;  %2115 = vmatmul.bf16.gmra.mxu2 %v1157_v0  ;;  %v401_v0 = vshrl.u32 %v8933_v56, 16  ;;  %v1070_v30 = vunpack.c.l.b16 %v385_v2 }
  0xce   :  { %v403_v60 = vrot.slane %v401_v0, 4  ;;  %v850_v0 = vrot.slane %v848_v3, 4  ;;  %v410_v3 = vshll.u32 %v9460_v53, 16 }
  0xcf   :  { %2298 = vmatmul.bf16.gmra.mxu0 %v1230_v16  ;;  %v9425_v44 = vpop.f32.mrf.mxu2  ;;  %v9442_v16 = vsel %vm9138_vm5, %v7709_v14, %v751_v42  ;;  %v399_v14 = vsel %vm9101_vm2, %v394_v46, %v398_v7  ;;  %v14710_v42 = vunpack.c.l.b16 %v8933_v56  ;;  %v112_v46 = vld [vmem:[%s14419_s0 + $0x94] sm:$0x1]  ;;  %v9467_v7 = vpack.c.b16 %v1070_v30, %v1069_v51 }
  0xd0   :  { %14705 = vst [vmem:[#allocation46_spill] sm:$0xff] %v9425_v44  ;;  %v406_v44 = vrot.slane %v404_v47, 5  ;;  %v853_v47 = vrot.slane %v851_v15, 5  ;;  %v1071_v13 = vunpack.c.l.b16 %v399_v14  ;;  %v14713_v24 = vunpack.c.l.b16 %v9442_v16 }
  0xd1   :  { %v9434_v11 = vpop.f32.mrf.mxu1  ;;  %14709 = vst [vmem:[#allocation50_spill] sm:$0xff] %v9442_v16  ;;  %v1196_v31 = vpack.c.b16 %v14483_v59, %v14710_v42  ;;  %v412_v16 = vrot.slane %v410_v3, 5 }
  0xd2   :  { %14707 = vst [vmem:[#allocation48_spill] sm:$0xff] %v9434_v11  ;;  %v9473_v42 = vpack.c.b16 %v14713_v24, %v14487_v36  ;;  %v407_v59 = vor.u32 %v406_v44, %v403_v60  ;;  %v1231_v15 = vpack.c.b16 %v1071_v13, %v1070_v30  ;;  %v854_v14 = vor.u32 %v853_v47, %v850_v0 }
  0xd3   :  { %2219 = vmatmul.bf16.gmra.mxu3 %v1196_v31  ;;  %14712 = vst [vmem:[#allocation52_spill] sm:$0xff] %v9467_v7  ;;  %v755_v24 = vrot.slane %v9361_v61, 5  ;;  %v7711_v44 = vrot.slane %v8876_v33, 9  ;;  %v759_v60 = vrot.slane %v9399_v50, 5  ;;  %v415_v0 = vshrl.u32 %v8977_v26, 16 }
  0xd4   :  { %v9444_v54 = vpop.f32.mrf.mxu0  ;;  %14714 = vst [vmem:[#allocation53_spill] sm:$0xff] %v9473_v42  ;;  %v408_v51 = vrot.slane %v407_v59, 4  ;;  %v855_v30 = vrot.slane %v854_v14, 4  ;;  %v418_v47 = vshll.u32 %v8977_v26, 16  ;;  %v429_v59 = vshrl.u32 %v8982_v27, 16 }
  0xd5   :  { %v9498_v50 = vsel %vm9138_vm5, %v7710_v6, %v755_v24  ;;  %v9502_v61 = vsel %vm9138_vm5, %v7711_v44, %v759_v60  ;;  %v14721_v14 = vunpack.c.l.b16 %v9031_v38  ;;  %v446_v6 = vshll.u32 %v9031_v38, 16 }
  0xd6   :  { %v413_v33 = vsel %vm9101_vm2, %v408_v51, %v412_v16  ;;  %14718 = vst [vmem:[#allocation57_spill] sm:$0xff] %v9498_v50  ;;  %v420_v16 = vrot.slane %v418_v47, 5  ;;  %v443_v51 = vshrl.u32 %v9031_v38, 16  ;;  %v14492_v44 = vunpack.c.l.b16 %v9498_v50 }
  0xd7   :  { %v9462_v2 = vpop.f32.mrf.mxu2  ;;  %14719 = vst [vmem:[#allocation58_spill] sm:$0xff] %v9502_v61  ;;  %v1072_v24 = vunpack.c.l.b16 %v413_v33  ;;  %v14491_v60 = vunpack.c.l.b16 %v9502_v61  ;;  %v448_v33 = vrot.slane %v446_v6, 5  ;;  %v7712_v6 = vrot.slane %v8928_v55, 9  ;;  %v8326_v61 = vld [vmem:[#allocation2 + $0x1d8] sm:$0xff] }
  0xd8   :  { %14711 = vst [vmem:[#allocation51_spill] sm:$0xff] %v9462_v2  ;;  %v857_v2 = vshll.u32 %v112_v46, 16  ;;  %v445_v38 = vrot.slane %v443_v51, 4  ;;  %2536 = vmatpush.bf16.msrb.mxu3 %v8326_v61  ;;  %v457_v55 = vshrl.u32 %v9036_v49, 16 }
  0xd9   :  { %v9475_v8 = vpop.f32.mrf.mxu1  ;;  %v9536_v32 = vpack.c.b16 %v14491_v60, %v14492_v44  ;;  %v8318_v44 = vld [vmem:[#allocation2 + $0x198] sm:$0xff] }
  0xda   :  { %14715 = vst [vmem:[#allocation54_spill] sm:$0xff] %v9475_v8  ;;  %v859_v36 = vrot.slane %v857_v2, 5  ;;  %2447 = vmatpush.bf16.msra.mxu2 %v8318_v44 }
  0xdb   :  { %14725 = vst [vmem:[#allocation62_spill] sm:$0xff] %v9536_v32 }
  0xdc   :  { %v9478_v31 = vpop.f32.mrf.mxu0  ;;  %2036 = vmatmul.bf16.gmra.mxu1 %v9467_v7  ;;  %2120 = vmatmul.bf16.gmra.mxu2 %v9473_v42  ;;  %v860_v2 = vsel %vm9101_vm2, %v855_v30, %v859_v36  ;;  %v417_v42 = vrot.slane %v415_v0, 4  ;;  %v431_v7 = vrot.slane %v429_v59, 4  ;;  %v9526_v30 = vld [vmem:[%s14419_s0 + $0xac] sm:$0x1]  ;;  %v9530_v59 = vpack.c.b16 %v1072_v24, %v1071_v13  ;;  %v9548_v13 = vld [vmem:[%s14419_s0 + $0xb4] sm:$0x1] }
  0xdd   :  { %v9521_v36 = vunpack.c.l.b16 %v860_v2  ;;  %v452_v60 = vshll.u32 %v9548_v13, 16 }
  0xde   :  { %v421_v47 = vor.u32 %v420_v16, %v417_v42  ;;  %14724 = vst [vmem:[#allocation61_spill] sm:$0xff] %v9530_v59 }
  0xdf   :  { %2303 = vmatmul.bf16.gmra.mxu0 %v1231_v15  ;;  %v9488_v46 = vpop.f32.mrf.mxu2  ;;  %v14720_v15 = vunpack.c.l.b16 %v8982_v27  ;;  %v9519_v27 = vld [vmem:[%s14419_s0 + $0xa4] sm:$0x1]  ;;  %14722 = vst [vmem:[#allocation59_spill] sm:$0xff] %v9521_v36  ;;  %v1232_v51 = vpack.c.b16 %v9521_v36, %v1072_v24  ;;  %v449_v24 = vor.u32 %v448_v33, %v445_v38  ;;  %v454_v33 = vrot.slane %v452_v60, 5 }
  0xe0   :  { %14716 = vst [vmem:[#allocation55_spill] sm:$0xff] %v9488_v46  ;;  %v424_v2 = vshll.u32 %v9519_v27, 16  ;;  %v422_v16 = vrot.slane %v421_v47, 4  ;;  %v767_v47 = vrot.slane %v9460_v53, 5 }
  0xe1   :  { %v9492_v3 = vpop.f32.mrf.mxu1  ;;  %v1197_v46 = vpack.c.b16 %v14721_v14, %v14720_v15  ;;  %v435_v14 = vor.u32 %v434_v37, %v431_v7  ;;  %v763_v7 = vrot.slane %v9413_v43, 5  ;;  %v450_v38 = vrot.slane %v449_v24, 4 }
  0xe2   :  { %14717 = vst [vmem:[#allocation56_spill] sm:$0xff] %v9492_v3  ;;  %v426_v37 = vrot.slane %v424_v2, 5  ;;  %v460_v2 = vshll.u32 %v9036_v49, 16 }
  0xe3   :  { %2224 = vmatmul.bf16.gmra.mxu3 %v1197_v46  ;;  %v438_v46 = vshll.u32 %v9526_v30, 16  ;;  %v436_v36 = vrot.slane %v435_v14, 4  ;;  %v9571_v53 = vsel %vm9138_vm5, %v7712_v6, %v763_v7  ;;  %v459_v7 = vrot.slane %v457_v55, 4 }
  0xe4   :  { %v9504_v26 = vpop.f32.mrf.mxu0  ;;  %v427_v43 = vsel %vm9101_vm2, %v422_v16, %v426_v37  ;;  %14729 = vst [vmem:[#allocation66_spill] sm:$0xff] %v9571_v53  ;;  %v14732_v16 = vunpack.c.l.b16 %v8829_v9  ;;  %v8334_v37 = vld [vmem:[#allocation2 + $0x218] sm:$0xff]  ;;  %v462_v24 = vrot.slane %v460_v2, 5  ;;  %v455_v12 = vsel %vm9101_vm2, %v450_v38, %v454_v33  ;;  %v9599_v9 = vld [vmem:[%s14422_s3] ss:$0 sm:$0xff] }
  0xe5   :  { %v440_v50 = vrot.slane %v438_v46, 5  ;;  %v9582_v46 = vld [vmem:[%s14419_s0 + $0xc0] sm:$0xf]  ;;  %2625 = vmatpush.bf16.msra.mxu0 %v8334_v37  ;;  %v1919_v38 = vadd.f32 %v9599_v9, %v9303_v21 }
  0xe6   :  { %v471_v60 = vshrl.u32 %v9582_v46, 16 }
  0xe7   :  { %v9528_v0 = vpop.f32.mrf.mxu2 }
  0xe8   :  { %14723 = vst [vmem:[#allocation60_spill] sm:$0xff] %v9528_v0  ;;  %v9543_v0 = vpop.f32.mrf.mxu3  ;;  %v473_v55 = vrot.slane %v471_v60, 4 }
  0xe9   :  { %v9539_v15 = vpop.f32.mrf.mxu1 }
  0xea   :  { %14726 = vst [vmem:[#allocation63_spill] sm:$0xff] %v9539_v15  ;;  %v7713_v15 = vrot.slane %v8933_v56, 9  ;;  %v441_v56 = vsel %vm9101_vm2, %v436_v36, %v440_v50  ;;  %v8310_v50 = vld [vmem:[#allocation2 + $0x158] sm:$0xff]  ;;  %v14731_v36 = vunpack.c.l.b16 %v9036_v49 }
  0xeb   :  { %2358 = vmatpush.bf16.msra.mxu1 %v8310_v50  ;;  %v9604_v49 = vld [vmem:[%s14419_s0 + $0xbc] sm:$0x1] }
  0xec   :  { %v9550_v42 = vpop.f32.mrf.mxu0  ;;  %2041 = vmatmul.bf16.gmra.mxu1 %v9530_v59  ;;  %2125 = vmatmul.bf16.gmra.mxu2 %v9536_v32  ;;  %v9575_v61 = vsel %vm9138_vm5, %v7713_v15, %v767_v47  ;;  %v1198_v6 = vpack.c.b16 %v14732_v16, %v14731_v36  ;;  %v474_v15 = vshll.u32 %v9582_v46, 16  ;;  %v1073_v47 = vunpack.c.l.b16 %v427_v43 }
  0xed   :  { %14730 = vst [vmem:[#allocation67_spill] sm:$0xff] %v9575_v61  ;;  %v14500_v59 = vunpack.c.l.b16 %v9571_v53  ;;  %v463_v36 = vor.u32 %v462_v24, %v459_v7  ;;  %v466_v37 = vshll.u32 %v9604_v49, 16  ;;  %v8629_v7 = vld [vmem:[%s14419_s0 + $0xa0] sm:$0xf] }
  0xee   :  { %v476_v2 = vrot.slane %v474_v15, 5 }
  0xef   :  { %2308 = vmatmul.bf16.gmra.mxu0 %v1232_v51  ;;  %v9561_v32 = vpop.f32.mrf.mxu2 }
  0xf0   :  { %14727 = vst [vmem:[#allocation64_spill] sm:$0xff] %v9561_v32  ;;  %v9577_v44 = vpop.f32.mrf.mxu3  ;;  %v1074_v32 = vunpack.c.l.b16 %v441_v56  ;;  %v1075_v56 = vunpack.c.l.b16 %v455_v12  ;;  %v9622_v12 = vld [vmem:[%s14419_s0 + $0xc4] sm:$0x1]  ;;  %v477_v24 = vor.u32 %v476_v2, %v473_v55 }
  0xf1   :  { %v9565_v14 = vpop.f32.mrf.mxu1 }
  0xf2   :  { %14728 = vst [vmem:[#allocation65_spill] sm:$0xff] %v9565_v14  ;;  %v14499_v14 = vunpack.c.l.b16 %v9575_v61  ;;  %v1097_v33 = vpack.c.b16 %v1074_v32, %v1073_v47  ;;  %v464_v47 = vrot.slane %v463_v36, 4  ;;  %v771_v61 = vrot.slane %v9519_v27, 5  ;;  %v9641_v36 = vld [vmem:[%s14419_s0 + $0xc8] sm:$0xf] }
  0xf3   :  { %2229 = vmatmul.bf16.gmra.mxu3 %v1198_v6  ;;  %v1233_v6 = vpack.c.b16 %v1075_v56, %v1074_v32  ;;  %v7714_v32 = vrot.slane %v8629_v7, 9  ;;  %v485_v55 = vshrl.u32 %v9641_v36, 16  ;;  %v488_v2 = vshll.u32 %v9641_v36, 16 }
  0xf4   :  { %v9585_v51 = vpop.f32.mrf.mxu0  ;;  %v9614_v50 = vpack.c.b16 %v14499_v14, %v14500_v59  ;;  %v480_v14 = vshll.u32 %v9622_v12, 16  ;;  %v468_v59 = vrot.slane %v466_v37, 5  ;;  %v1921_v27 = vadd.f32 %v9599_v9, %v9330_v4 }
  0xf5   :  { %v478_v7 = vrot.slane %v477_v24, 4  ;;  %v14737_v4 = vunpack.c.l.b16 %v8834_v10  ;;  %v487_v41 = vrot.slane %v485_v55, 4  ;;  %v9678_v10 = vld [vmem:[%s14419_s0 + $0xcc] sm:$0x1] }
  0xf6   :  { %14734 = vst [vmem:[#allocation69_spill] sm:$0xff] %v9614_v50 }
  0xf7   :  { %v9606_v43 = vpop.f32.mrf.mxu2 }
  0xf8   :  { %14733 = vst [vmem:[#allocation68_spill] sm:$0xff] %v9606_v43  ;;  %v9617_v60 = vpop.f32.mrf.mxu3  ;;  %v482_v43 = vrot.slane %v480_v14, 5  ;;  %v14738_v14 = vunpack.c.l.b16 %v8881_v34 }
  0xf9   :  { %v2007_v16 = vpop.f32.mrf.mxu1 }
  0xfa   :  { %v9624_v21 = vadd.f32 %v2007_v16, %v1919_v38  ;;  %v8630_v38 = vld [vmem:[%s14419_s0 + $0xa8] sm:$0xf]  ;;  %v1199_v24 = vpack.c.b16 %v14738_v14, %v14737_v4  ;;  %v483_v34 = vsel %vm9101_vm2, %v478_v7, %v482_v43  ;;  %v494_v4 = vshll.u32 %v9678_v10, 16 }
  0xfb   :  { %v7715_v16 = vrot.slane %v8630_v38, 9  ;;  %v9685_v14 = vunpack.c.l.b16 %v483_v34  ;;  %v8317_v34 = vld [vmem:[#allocation2 + $0x190] sm:$0xff] }
  0xfc   :  { %v9626_v15 = vpop.f32.mrf.mxu0  ;;  %2046 = vmatmul.bf16.gmra.mxu1 %v1097_v33  ;;  %2130 = vmatmul.bf16.gmra.mxu2 %v9614_v50  ;;  %v775_v33 = vrot.slane %v9526_v30, 5  ;;  %v469_v30 = vsel %vm9101_vm2, %v464_v47, %v468_v59  ;;  %v490_v59 = vrot.slane %v488_v2, 5 }
  0xfd   :  { %2448 = vmatpush.bf16.msra.mxu2 %v8317_v34 }
  0xfe   :  { %v9655_v50 = vsel %vm9138_vm5, %v7715_v16, %v775_v33  ;;  %v1076_v16 = vunpack.c.l.b16 %v469_v30 }
  0xff   :  { %2313 = vmatmul.bf16.gmra.mxu0 %v1233_v6  ;;  %v9645_v37 = vpop.f32.mrf.mxu2  ;;  %v772_v6 = vsel %vm9138_vm5, %v7714_v32, %v771_v61  ;;  %14736 = vst [vmem:[#allocation71_spill] sm:$0xff] %v9655_v50  ;;  %v9670_v61 = vld [vmem:[%s14419_s0 + $0xd0] sm:$0xf]  ;;  %v14741_v62 = vunpack.c.l.b16 %v9655_v50  ;;  %v9734_v50 = vld [vmem:[%s14419_s0 + $0xe0] sm:$0xf] }
 0x100   :  { %14735 = vst [vmem:[#allocation70_spill] sm:$0xff] %v9645_v37  ;;  %v9657_v53 = vpop.f32.mrf.mxu3  ;;  %v499_v47 = vshrl.u32 %v9670_v61, 16  ;;  %v502_v32 = vshll.u32 %v9670_v61, 16  ;;  %v1137_v33 = vunpack.c.l.b16 %v772_v6  ;;  %v1924_v6 = vadd.f32 %v9599_v9, %v9363_v5 }
 0x101   :  { %v2009_v38 = vpop.f32.mrf.mxu1  ;;  %v1234_v43 = vpack.c.b16 %v9685_v14, %v1076_v16  ;;  %14743 = vst [vmem:[#allocation75_spill] sm:$0xff] %v9734_v50 }
 0x102   :  { %v9659_v3 = vadd.f32 %v2009_v38, %v1921_v27  ;;  %v501_v55 = vrot.slane %v499_v47, 4  ;;  %v491_v38 = vor.u32 %v490_v59, %v487_v41  ;;  %v504_v30 = vrot.slane %v502_v32, 5  ;;  %v9699_v41 = vld [vmem:[%s14419_s0 + $0xd4] sm:$0x1] }
 0x103   :  { %2234 = vmatmul.bf16.gmra.mxu3 %v1199_v24  ;;  %v9689_v27 = vpack.c.b16 %v1076_v16, %v1075_v56  ;;  %v1161_v8 = vpack.c.b16 %v14741_v62, %v1137_v33  ;;  %v496_v56 = vrot.slane %v494_v4, 5  ;;  %v8633_v62 = vld [vmem:[%s14419_s0 + $0xb0] sm:$0xf]  ;;  %v779_v32 = vrot.slane %v9548_v13, 5 }
 0x104   :  { %v9661_v37 = vpop.f32.mrf.mxu0  ;;  %v492_v5 = vrot.slane %v491_v38, 4  ;;  %v7716_v47 = vrot.slane %v8633_v62, 9  ;;  %v505_v16 = vor.u32 %v504_v30, %v501_v55  ;;  %v508_v33 = vshll.u32 %v9699_v41, 16  ;;  %v8634_v38 = vld [vmem:[%s14419_s0 + $0xb8] sm:$0xf] }
 0x105   :  { %14740 = vst [vmem:[#allocation73_spill] sm:$0xff] %v9689_v27  ;;  %v7717_v4 = vrot.slane %v8634_v38, 9  ;;  %v1926_v30 = vadd.f32 %v9599_v9, %v9385_v39 }
 0x106   :  { %v497_v38 = vsel %vm9101_vm2, %v492_v5, %v496_v56  ;;  %v506_v34 = vrot.slane %v505_v16, 4  ;;  %v865_v16 = vshll.u32 %v9734_v50, 16 }
 0x107   :  { %v9682_v2 = vpop.f32.mrf.mxu2 }
 0x108   :  { %14739 = vst [vmem:[#allocation72_spill] sm:$0xff] %v9682_v2  ;;  %v9694_v7 = vpop.f32.mrf.mxu3 }
 0x109   :  { %v2012_v52 = vpop.f32.mrf.mxu1 }
 0x10a   :  { %v9701_v24 = vadd.f32 %v2012_v52, %v1924_v6  ;;  %v8325_v52 = vld [vmem:[#allocation2 + $0x1d0] sm:$0xff]  ;;  %v783_v6 = vrot.slane %v9604_v49, 5 }
 0x10b   :  { %2537 = vmatpush.bf16.msrb.mxu3 %v8325_v52  ;;  %v510_v52 = vrot.slane %v508_v33, 5  ;;  %v14509_v33 = vunpack.c.l.b16 %v9734_v50 }
 0x10c   :  { %v9703_v59 = vpop.f32.mrf.mxu0  ;;  %2051 = vmatmul.bf16.gmra.mxu1 %v9689_v27  ;;  %2135 = vmatmul.bf16.gmra.mxu2 %v1161_v8  ;;  %v9718_v8 = vld [vmem:[%s14419_s0 + $0xd8] sm:$0xf]  ;;  %v9738_v39 = vsel %vm9138_vm5, %v7717_v4, %v783_v6  ;;  %v1078_v4 = vunpack.c.l.b16 %v497_v38  ;;  %v867_v38 = vrot.slane %v865_v16, 5 }
 0x10d   :  { %v513_v13 = vshrl.u32 %v9718_v8, 16  ;;  %v516_v55 = vshll.u32 %v9718_v8, 16  ;;  %14744 = vst [vmem:[#allocation76_spill] sm:$0xff] %v9738_v39  ;;  %v14510_v17 = vunpack.c.l.b16 %v9738_v39 }
 0x10f   :  { %2318 = vmatmul.bf16.gmra.mxu0 %v1234_v43  ;;  %v2096_v62 = vpop.f32.mrf.mxu2  ;;  %v9729_v43 = vsel %vm9138_vm5, %v7716_v47, %v779_v32  ;;  %v8309_v32 = vld [vmem:[#allocation2 + $0x150] sm:$0xff]  ;;  %v515_v11 = vrot.slane %v513_v13, 4  ;;  %v518_v45 = vrot.slane %v516_v55, 5  ;;  %v9764_v13 = vld [vmem:[%s14419_s0 + $0xdc] sm:$0x1] }
 0x110   :  { %v2097_v49 = vadd.f32 %v2096_v62, %v9624_v21  ;;  %14742 = vst [vmem:[#allocation74_spill] sm:$0xff] %v9729_v43  ;;  %v9740_v27 = vpop.f32.mrf.mxu3  ;;  %v862_v21 = vshrl.u32 %v9734_v50, 16  ;;  %v8333_v62 = vld [vmem:[#allocation2 + $0x210] sm:$0xff]  ;;  %v14511_v6 = vunpack.c.l.b16 %v9729_v43  ;;  %2359 = vmatpush.bf16.msra.mxu1 %v8309_v32 }
 0x111   :  { %v2014_v2 = vpop.f32.mrf.mxu1  ;;  %2626 = vmatpush.bf16.msra.mxu0 %v8333_v62  ;;  %v519_v16 = vor.u32 %v518_v45, %v515_v11 }
 0x112   :  { %v2186_v5 = vadd.f32 %v9543_v0, %v2097_v49  ;;  %v9744_v56 = vadd.f32 %v2014_v2, %v1926_v30  ;;  %v511_v0 = vsel %vm9101_vm2, %v506_v34, %v510_v52  ;;  %v14745_v2 = vunpack.c.l.b16 %v8886_v35 }
 0x113   :  { %v864_v55 = vrot.slane %v862_v21, 4  ;;  %v1929_v34 = vadd.f32 %v9599_v9, %v9415_v40  ;;  %v9769_v35 = vpack.c.b16 %v1078_v4, %v9685_v14  ;;  %v9771_v32 = vunpack.c.l.b16 %v511_v0 }
 0x114   :  { %v9746_v47 = vpop.f32.mrf.mxu0  ;;  %v1200_v30 = vpack.c.b16 %v14509_v33, %v14745_v2  ;;  %v9759_v49 = vadd.f32 %v9626_v15, %v2186_v5  ;;  %v132_v15 = vld [vmem:[%s14419_s0 + $0xe4] sm:$0x1]  ;;  %v9781_v21 = vpack.c.b16 %v14510_v17, %v14511_v6  ;;  %v522_v40 = vshll.u32 %v9764_v13, 16 }
 0x115   :  { %14747 = vst [vmem:[#allocation78_spill] sm:$0xff] %v9769_v35  ;;  %v1235_v14 = vpack.c.b16 %v9771_v32, %v1078_v4  ;;  %v520_v45 = vrot.slane %v519_v16, 4  ;;  %v7718_v4 = vrot.slane %v9582_v46, 9  ;;  %v787_v6 = vrot.slane %v9622_v12, 5  ;;  %v9811_v46 = vld [vmem:[%s14419_s0 + $0xf8] sm:$0xf] }
 0x116   :  { %14746 = vst [vmem:[#allocation77_spill] sm:$0xff] %v9759_v49  ;;  %2239 = vmatmul.bf16.gmra.mxu3 %v1200_v30  ;;  %v524_v11 = vrot.slane %v522_v40, 5  ;;  %v541_v12 = vshrl.u32 %v9811_v46, 16  ;;  %v9818_v16 = vld [vmem:[%s14419_s0 + $0x100] sm:$0xf] }
 0x117   :  { %v2098_v52 = vpop.f32.mrf.mxu2  ;;  %14748 = vst [vmem:[#allocation79_spill] sm:$0xff] %v9781_v21  ;;  %v555_v40 = vshrl.u32 %v9818_v16, 16 }
 0x118   :  { %v2099_v5 = vadd.f32 %v2098_v52, %v9659_v3  ;;  %v9785_v0 = vpop.f32.mrf.mxu3  ;;  %v868_v3 = vor.u32 %v867_v38, %v864_v55  ;;  %v871_v52 = vshll.u32 %v132_v15, 16  ;;  %v9804_v15 = vld [vmem:[%s14419_s0 + $0xf0] sm:$0xf] }
 0x119   :  { %v2017_v62 = vpop.f32.mrf.mxu1 }
 0x11a   :  { %v2188_v2 = vadd.f32 %v9577_v44, %v2099_v5  ;;  %v9788_v30 = vadd.f32 %v2017_v62, %v1929_v34  ;;  %v7719_v44 = vrot.slane %v9641_v36, 9  ;;  %v791_v34 = vrot.slane %v9678_v10, 5 }
 0x11b   :  { %v869_v55 = vrot.slane %v868_v3, 4  ;;  %v873_v38 = vrot.slane %v871_v52, 5  ;;  %v527_v5 = vshrl.u32 %v9804_v15, 16  ;;  %v544_v36 = vshll.u32 %v9811_v46, 16 }
 0x11c   :  { %v9790_v33 = vpop.f32.mrf.mxu0  ;;  %2056 = vmatmul.bf16.gmra.mxu1 %v9769_v35  ;;  %2140 = vmatmul.bf16.gmra.mxu2 %v9781_v21  ;;  %v9795_v17 = vadd.f32 %v9661_v37, %v2188_v2  ;;  %v530_v37 = vshll.u32 %v9804_v15, 16  ;;  %v1931_v62 = vadd.f32 %v9599_v9, %v9444_v54  ;;  %v558_v2 = vshll.u32 %v9818_v16, 16 }
 0x11d   :  { %v525_v52 = vsel %vm9101_vm2, %v520_v45, %v524_v11  ;;  %v9833_v50 = vsel %vm9138_vm5, %v7719_v44, %v791_v34  ;;  %v14750_v45 = vunpack.c.l.b16 %v8941_v58  ;;  %v543_v44 = vrot.slane %v541_v12, 4  ;;  %v9861_v58 = vld [vmem:[%s14419_s0 + $0xfc] sm:$0x1] }
 0x11e   :  { %14749 = vst [vmem:[#allocation80_spill] sm:$0xff] %v9795_v17  ;;  %v9829_v17 = vsel %vm9138_vm5, %v7718_v4, %v787_v6  ;;  %v14751_v6 = vunpack.c.l.b16 %v8987_v28  ;;  %v529_v4 = vrot.slane %v527_v5, 4  ;;  %v532_v49 = vrot.slane %v530_v37, 5 }
 0x11f   :  { %2323 = vmatmul.bf16.gmra.mxu0 %v1235_v14  ;;  %v2101_v10 = vpop.f32.mrf.mxu2  ;;  %v546_v34 = vrot.slane %v544_v36, 5  ;;  %v1080_v43 = vunpack.c.l.b16 %v525_v52  ;;  %v14518_v35 = vunpack.c.l.b16 %v9829_v17  ;;  %v560_v5 = vrot.slane %v558_v2, 5 }
 0x120   :  { %v2102_v14 = vadd.f32 %v2101_v10, %v9701_v24  ;;  %v9835_v39 = vpop.f32.mrf.mxu3  ;;  %v874_v10 = vsel %vm9101_vm2, %v869_v55, %v873_v38  ;;  %v1201_v11 = vpack.c.b16 %v14751_v6, %v14750_v45  ;;  %v557_v38 = vrot.slane %v555_v40, 4  ;;  %v9895_v6 = vld [vmem:[%s14419_s0 + $0x108] sm:$0xf] }
 0x121   :  { %v2019_v3 = vpop.f32.mrf.mxu1  ;;  %v9863_v28 = vunpack.c.l.b16 %v874_v10  ;;  %v1934_v37 = vadd.f32 %v9599_v9, %v9478_v31  ;;  %v533_v36 = vor.u32 %v532_v49, %v529_v4  ;;  %v9870_v52 = vpack.c.b16 %v1080_v43, %v9771_v32 }
 0x122   :  { %v2191_v54 = vadd.f32 %v9617_v60, %v2102_v14  ;;  %v9838_v21 = vadd.f32 %v2019_v3, %v1931_v62  ;;  %v14517_v60 = vunpack.c.l.b16 %v9833_v50  ;;  %v9853_v62 = vld [vmem:[%s14419_s0 + $0xf4] sm:$0x1]  ;;  %v547_v3 = vor.u32 %v546_v34, %v543_v44 }
 0x123   :  { %v536_v14 = vshll.u32 %v9853_v62, 16  ;;  %v550_v2 = vshll.u32 %v9861_v58, 16  ;;  %v1236_v31 = vpack.c.b16 %v9863_v28, %v1080_v43  ;;  %v569_v43 = vshrl.u32 %v9895_v6, 16 }
 0x124   :  { %v9840_v24 = vpop.f32.mrf.mxu0  ;;  %v9856_v55 = vadd.f32 %v9703_v59, %v2191_v54  ;;  %v9876_v40 = vpack.c.b16 %v14517_v60, %v14518_v35  ;;  %v548_v44 = vrot.slane %v547_v3, 4  ;;  %v7720_v60 = vrot.slane %v9670_v61, 9 }
 0x125   :  { %v538_v4 = vrot.slane %v536_v14, 5  ;;  %v552_v34 = vrot.slane %v550_v2, 5  ;;  %v795_v35 = vrot.slane %v9699_v41, 5  ;;  %v799_v14 = vrot.slane %v9764_v13, 5 }
 0x126   :  { %2244 = vmatmul.bf16.gmra.mxu3 %v1201_v11  ;;  %v534_v11 = vrot.slane %v533_v36, 4  ;;  %v7721_v36 = vrot.slane %v9718_v8, 9  ;;  %v571_v13 = vrot.slane %v569_v43, 4 }
 0x127   :  { %v2103_v12 = vpop.f32.mrf.mxu2  ;;  %v553_v41 = vsel %vm9101_vm2, %v548_v44, %v552_v34  ;;  %v14754_v34 = vunpack.c.l.b16 %v9041_v57  ;;  %v9952_v57 = vld [vmem:[%s14419_s0 + $0x10c] sm:$0x1] }
 0x128   :  { %v2104_v59 = vadd.f32 %v2103_v12, %v9744_v56  ;;  %v9880_v49 = vpop.f32.mrf.mxu3  ;;  %v9885_v56 = vld [vmem:[%s14419_s0 + $0x104] sm:$0x1]  ;;  %v8316_v12 = vld [vmem:[#allocation2 + $0x188] sm:$0xff] }
 0x129   :  { %v2022_v54 = vpop.f32.mrf.mxu1  ;;  %2449 = vmatpush.bf16.msra.mxu2 %v8316_v12 }
 0x12a   :  { %v2193_v32 = vadd.f32 %v9657_v53, %v2104_v59  ;;  %v9888_v10 = vadd.f32 %v2022_v54, %v1934_v37  ;;  %v561_v53 = vor.u32 %v560_v5, %v557_v38  ;;  %v564_v37 = vshll.u32 %v9885_v56, 16  ;;  %v8324_v59 = vld [vmem:[#allocation2 + $0x1c8] sm:$0xff] }
 0x12b   :  { %2538 = vmatpush.bf16.msrb.mxu3 %v8324_v59  ;;  %v572_v38 = vshll.u32 %v9895_v6, 16  ;;  %v1936_v5 = vadd.f32 %v9599_v9, %v9504_v26  ;;  %v9922_v26 = vsel %vm9138_vm5, %v7721_v36, %v799_v14 }
 0x12c   :  { %v9890_v45 = vpop.f32.mrf.mxu0  ;;  %2061 = vmatmul.bf16.gmra.mxu1 %v9870_v52  ;;  %2145 = vmatmul.bf16.gmra.mxu2 %v9876_v40  ;;  %v9902_v54 = vadd.f32 %v9746_v47, %v2193_v32  ;;  %v539_v47 = vsel %vm9101_vm2, %v534_v11, %v538_v4  ;;  %v562_v8 = vrot.slane %v561_v53, 4  ;;  %v566_v2 = vrot.slane %v564_v37, 5  ;;  %v8332_v37 = vld [vmem:[#allocation2 + $0x208] sm:$0xff] }
 0x12d   :  { %v9918_v32 = vsel %vm9138_vm5, %v7720_v60, %v795_v35  ;;  %v8308_v35 = vld [vmem:[#allocation2 + $0x148] sm:$0xff]  ;;  %v14753_v60 = vunpack.c.l.b16 %v8992_v29  ;;  %v574_v59 = vrot.slane %v572_v38, 5  ;;  %v1081_v14 = vunpack.c.l.b16 %v539_v47  ;;  %2627 = vmatpush.bf16.msra.mxu0 %v8332_v37 }
 0x12e   :  { %14752 = vst [vmem:[#allocation81_spill] sm:$0xff] %v9902_v54  ;;  %v14520_v54 = vunpack.c.l.b16 %v9918_v32  ;;  %2360 = vmatpush.bf16.msra.mxu1 %v8308_v35 }
 0x12f   :  { %2328 = vmatmul.bf16.gmra.mxu0 %v1236_v31  ;;  %v2106_v3 = vpop.f32.mrf.mxu2  ;;  %v1202_v53 = vpack.c.b16 %v14754_v34, %v14753_v60 }
 0x130   :  { %v2107_v61 = vadd.f32 %v2106_v3, %v9788_v30  ;;  %v9924_v12 = vpop.f32.mrf.mxu3  ;;  %v9929_v30 = vld [vmem:[%s14419_s0 + $0x110] sm:$0xf]  ;;  %v1082_v3 = vunpack.c.l.b16 %v553_v41 }
 0x131   :  { %v2024_v31 = vpop.f32.mrf.mxu1  ;;  %v583_v11 = vshrl.u32 %v9929_v30, 16  ;;  %v586_v36 = vshll.u32 %v9929_v30, 16 }
 0x132   :  { %v2196_v43 = vadd.f32 %v9694_v7, %v2107_v61  ;;  %v9933_v4 = vadd.f32 %v2024_v31, %v1936_v5  ;;  %v14519_v7 = vunpack.c.l.b16 %v9922_v26  ;;  %v567_v5 = vsel %vm9101_vm2, %v562_v8, %v566_v2 }
 0x133   :  { %v585_v38 = vrot.slane %v583_v11, 4  ;;  %v588_v47 = vrot.slane %v586_v36, 5  ;;  %v1939_v61 = vadd.f32 %v9599_v9, %v9550_v42  ;;  %v575_v31 = vor.u32 %v574_v59, %v571_v13  ;;  %v9969_v42 = vld [vmem:[%s14419_s0 + $0x114] sm:$0x1] }
 0x134   :  { %v9935_v44 = vpop.f32.mrf.mxu0  ;;  %v9947_v29 = vadd.f32 %v9790_v33, %v2196_v43  ;;  %v1083_v60 = vunpack.c.l.b16 %v567_v5  ;;  %v1101_v2 = vpack.c.b16 %v1082_v3, %v1081_v14  ;;  %v9961_v33 = vpack.c.b16 %v14519_v7, %v14520_v54 }
 0x135   :  { %v578_v43 = vshll.u32 %v9952_v57, 16  ;;  %v576_v37 = vrot.slane %v575_v31, 4  ;;  %v589_v36 = vor.u32 %v588_v47, %v585_v38  ;;  %v592_v14 = vshll.u32 %v9969_v42, 16  ;;  %v9988_v31 = vld [vmem:[%s14419_s0 + $0x118] sm:$0xf] }
 0x136   :  { %2249 = vmatmul.bf16.gmra.mxu3 %v1202_v53  ;;  %v1237_v35 = vpack.c.b16 %v1083_v60, %v1082_v3  ;;  %v7722_v5 = vrot.slane %v9804_v15, 9  ;;  %v597_v38 = vshrl.u32 %v9988_v31, 16  ;;  %v600_v47 = vshll.u32 %v9988_v31, 16 }
 0x137   :  { %v2108_v41 = vpop.f32.mrf.mxu2  ;;  %v580_v59 = vrot.slane %v578_v43, 5 }
 0x138   :  { %v2109_v8 = vadd.f32 %v2108_v41, %v9838_v21  ;;  %v9964_v34 = vpop.f32.mrf.mxu3  ;;  %v803_v41 = vrot.slane %v9853_v62, 5 }
 0x139   :  { %v2027_v11 = vpop.f32.mrf.mxu1 }
 0x13a   :  { %v2198_v21 = vadd.f32 %v9740_v27, %v2109_v8  ;;  %v9972_v13 = vadd.f32 %v2027_v11, %v1939_v61  ;;  %v7723_v27 = vrot.slane %v9811_v46, 9  ;;  %v807_v61 = vrot.slane %v9861_v58, 5 }
 0x13b   :  { %v581_v46 = vsel %vm9101_vm2, %v576_v37, %v580_v59  ;;  %v590_v58 = vrot.slane %v589_v36, 4  ;;  %v594_v8 = vrot.slane %v592_v14, 5  ;;  %v804_v43 = vsel %vm9138_vm5, %v7722_v5, %v803_v41 }
 0x13c   :  { %v9974_v53 = vpop.f32.mrf.mxu0  ;;  %2066 = vmatmul.bf16.gmra.mxu1 %v1101_v2  ;;  %2150 = vmatmul.bf16.gmra.mxu2 %v9961_v33  ;;  %v9979_v3 = vadd.f32 %v9840_v24, %v2198_v21  ;;  %v1941_v24 = vadd.f32 %v9599_v9, %v9585_v51  ;;  %v10001_v11 = vsel %vm9138_vm5, %v7723_v27, %v807_v61  ;;  %v10008_v51 = vld [vmem:[%s14419_s0 + $0x120] sm:$0xf]  ;;  %v14755_v36 = vunpack.c.l.b16 %v9046_v63 }
 0x13d   :  { %v14756_v14 = vunpack.c.l.b16 %v9110_v18  ;;  %v599_v41 = vrot.slane %v597_v38, 4  ;;  %v602_v27 = vrot.slane %v600_v47, 5  ;;  %v614_v61 = vshll.u32 %v10008_v51, 16 }
 0x13e   :  { %v1145_v7 = vunpack.c.l.b16 %v804_v43  ;;  %v14521_v54 = vunpack.c.l.b16 %v10001_v11  ;;  %v1944_v43 = vadd.f32 %v9599_v9, %v9295_v23 }
 0x13f   :  { %2333 = vmatmul.bf16.gmra.mxu0 %v1237_v35  ;;  %v2111_v15 = vpop.f32.mrf.mxu2  ;;  %v1203_v5 = vpack.c.b16 %v14756_v14, %v14755_v36  ;;  %v616_v38 = vrot.slane %v614_v61, 5 }
 0x140   :  { %v2112_v62 = vadd.f32 %v2111_v15, %v9888_v10  ;;  %v10003_v35 = vpop.f32.mrf.mxu3  ;;  %v611_v10 = vshrl.u32 %v10008_v51, 16  ;;  %v1084_v15 = vunpack.c.l.b16 %v581_v46 }
 0x141   :  { %v2029_v2 = vpop.f32.mrf.mxu1 }
 0x142   :  { %v2201_v21 = vadd.f32 %v9785_v0, %v2112_v62  ;;  %v10012_v37 = vadd.f32 %v2029_v2, %v1941_v24  ;;  %v10025_v0 = vld [vmem:[%s14419_s0 + $0x11c] sm:$0x1]  ;;  %v595_v24 = vsel %vm9101_vm2, %v590_v58, %v594_v8  ;;  %v613_v18 = vrot.slane %v611_v10, 4 }
 0x143   :  { %v603_v62 = vor.u32 %v602_v27, %v599_v41  ;;  %v606_v46 = vshll.u32 %v10025_v0, 16  ;;  %v10033_v2 = vunpack.c.l.b16 %v595_v24  ;;  %v10038_v14 = vpack.c.b16 %v1084_v15, %v1083_v60  ;;  %v8315_v24 = vld [vmem:[#allocation2 + $0x180] sm:$0xff] }
 0x144   :  { %v10014_v59 = vpop.f32.mrf.mxu0  ;;  %v10030_v63 = vadd.f32 %v9890_v45, %v2201_v21  ;;  %v1165_v45 = vpack.c.b16 %v14521_v54, %v1145_v7  ;;  %v10048_v21 = vld [vmem:[%s14419_s0 + $0x124] sm:$0x1]  ;;  %v7724_v7 = vrot.slane %v9818_v16, 9  ;;  %v811_v27 = vrot.slane %v9885_v56, 5  ;;  %2450 = vmatpush.bf16.msra.mxu2 %v8315_v24  ;;  %v10067_v16 = vld [vmem:[%s14419_s0 + $0x128] sm:$0xf] }
 0x145   :  { %v1238_v8 = vpack.c.b16 %v10033_v2, %v1084_v15  ;;  %v604_v60 = vrot.slane %v603_v62, 4  ;;  %v608_v41 = vrot.slane %v606_v46, 5  ;;  %v617_v61 = vor.u32 %v616_v38, %v613_v18 }
 0x146   :  { %2254 = vmatmul.bf16.gmra.mxu3 %v1203_v5  ;;  %v620_v15 = vshll.u32 %v10048_v21, 16  ;;  %v815_v62 = vrot.slane %v9952_v57, 5  ;;  %v625_v56 = vshrl.u32 %v10067_v16, 16  ;;  %v628_v18 = vshll.u32 %v10067_v16, 16 }
 0x147   :  { %v2113_v47 = vpop.f32.mrf.mxu2  ;;  %v10078_v46 = vsel %vm9138_vm5, %v7724_v7, %v811_v27  ;;  %v8307_v27 = vld [vmem:[#allocation2 + $0x140] sm:$0xff] }
 0x148   :  { %v2114_v36 = vadd.f32 %v2113_v47, %v9933_v4  ;;  %v10043_v10 = vpop.f32.mrf.mxu3  ;;  %v8323_v47 = vld [vmem:[#allocation2 + $0x1c0] sm:$0xff]  ;;  %2361 = vmatpush.bf16.msra.mxu1 %v8307_v27 }
 0x149   :  { %v2032_v58 = vpop.f32.mrf.mxu1  ;;  %2539 = vmatpush.bf16.msrb.mxu3 %v8323_v47  ;;  %v627_v47 = vrot.slane %v625_v56, 4  ;;  %v10113_v56 = vld [vmem:[%s14419_s0 + $0x12c] sm:$0x1] }
 0x14a   :  { %v2203_v5 = vadd.f32 %v9835_v39, %v2114_v36  ;;  %v10051_v23 = vadd.f32 %v2032_v58, %v1944_v43  ;;  %v7725_v43 = vrot.slane %v9895_v6, 9  ;;  %v609_v6 = vsel %vm9101_vm2, %v604_v60, %v608_v41  ;;  %v10083_v58 = vld [vmem:[%s14419_s0 + $0x130] sm:$0xf] }
 0x14b   :  { %v618_v36 = vrot.slane %v617_v61, 4  ;;  %14758 = vst [vmem:[#allocation83_spill] sm:$0xff] %v10083_v58  ;;  %v14522_v61 = vunpack.c.l.b16 %v10083_v58  ;;  %v879_v24 = vshll.u32 %v10083_v58, 16 }
 0x14c   :  { %v10053_v4 = vpop.f32.mrf.mxu0  ;;  %2071 = vmatmul.bf16.gmra.mxu1 %v10038_v14  ;;  %2155 = vmatmul.bf16.gmra.mxu2 %v1165_v45  ;;  %v10060_v39 = vadd.f32 %v9935_v44, %v2203_v5  ;;  %v1946_v44 = vadd.f32 %v9599_v9, %v9324_v22  ;;  %v622_v45 = vrot.slane %v620_v15, 5  ;;  %v10087_v22 = vsel %vm9138_vm5, %v7725_v43, %v815_v62  ;;  %v8331_v15 = vld [vmem:[#allocation2 + $0x200] sm:$0xff] }
 0x14d   :  { %v1086_v43 = vunpack.c.l.b16 %v609_v6  ;;  %v14524_v62 = vunpack.c.l.b16 %v10078_v46  ;;  %v14523_v54 = vunpack.c.l.b16 %v10087_v22  ;;  %2628 = vmatpush.bf16.msra.mxu0 %v8331_v15  ;;  %v881_v6 = vrot.slane %v879_v24, 5 }
 0x14e   :  { %14757 = vst [vmem:[#allocation82_spill] sm:$0xff] %v10060_v39 }
 0x14f   :  { %2338 = vmatmul.bf16.gmra.mxu0 %v1238_v8  ;;  %v2116_v38 = vpop.f32.mrf.mxu2 }
 0x150   :  { %v2117_v57 = vadd.f32 %v2116_v38, %v9972_v13  ;;  %v10089_v5 = vpop.f32.mrf.mxu3  ;;  %v876_v13 = vshrl.u32 %v10083_v58, 16  ;;  %v630_v38 = vrot.slane %v628_v18, 5 }
 0x151   :  { %v2034_v8 = vpop.f32.mrf.mxu1 }
 0x152   :  { %v2206_v60 = vadd.f32 %v9880_v49, %v2117_v57  ;;  %v10093_v41 = vadd.f32 %v2034_v8, %v1946_v44  ;;  %v623_v49 = vsel %vm9101_vm2, %v618_v36, %v622_v45  ;;  %v14759_v44 = vunpack.c.l.b16 %v9115_v20 }
 0x153   :  { %v878_v18 = vrot.slane %v876_v13, 4  ;;  %v1949_v36 = vadd.f32 %v9599_v9, %v9356_v25  ;;  %v10118_v20 = vpack.c.b16 %v1086_v43, %v10033_v2  ;;  %v1087_v27 = vunpack.c.l.b16 %v623_v49 }
 0x154   :  { %v10095_v7 = vpop.f32.mrf.mxu0  ;;  %v1204_v57 = vpack.c.b16 %v14522_v61, %v14759_v44  ;;  %v10108_v8 = vadd.f32 %v9974_v53, %v2206_v60  ;;  %v152_v53 = vld [vmem:[%s14419_s0 + $0x134] sm:$0x1]  ;;  %v10128_v13 = vpack.c.b16 %v14523_v54, %v14524_v62  ;;  %v631_v15 = vor.u32 %v630_v38, %v627_v47 }
 0x155   :  { %v634_v25 = vshll.u32 %v10113_v56, 16  ;;  %v1239_v44 = vpack.c.b16 %v1087_v27, %v1086_v43  ;;  %v882_v39 = vor.u32 %v881_v6, %v878_v18  ;;  %v7726_v47 = vrot.slane %v9929_v30, 9 }
 0x156   :  { %2259 = vmatmul.bf16.gmra.mxu3 %v1204_v57  ;;  %v819_v38 = vrot.slane %v9969_v42, 5  ;;  %v7727_v43 = vrot.slane %v9988_v31, 9  ;;  %v823_v62 = vrot.slane %v10025_v0, 5  ;;  %v1951_v18 = vadd.f32 %v9599_v9, %v9379_v48 }
 0x157   :  { %v2118_v45 = vpop.f32.mrf.mxu2  ;;  %v636_v54 = vrot.slane %v634_v25, 5 }
 0x158   :  { %v2119_v60 = vadd.f32 %v2118_v45, %v10012_v37  ;;  %v10131_v2 = vpop.f32.mrf.mxu3  ;;  %v885_v37 = vshll.u32 %v152_v53, 16  ;;  %v632_v45 = vrot.slane %v631_v15, 4  ;;  %v10149_v30 = vsel %vm9138_vm5, %v7726_v47, %v819_v38 }
 0x159   :  { %v2037_v24 = vpop.f32.mrf.mxu1  ;;  %v10153_v42 = vsel %vm9138_vm5, %v7727_v43, %v823_v62 }
 0x15a   :  { %v2208_v49 = vadd.f32 %v9924_v12, %v2119_v60  ;;  %v2038_v57 = vadd.f32 %v2037_v24, %v1949_v36  ;;  %v883_v12 = vrot.slane %v882_v39, 4  ;;  %v887_v36 = vrot.slane %v885_v37, 5  ;;  %v14761_v37 = vld [vmem:[#allocation26_spill] sm:$0xff] }
 0x15b   :  { %v637_v15 = vsel %vm9101_vm2, %v632_v45, %v636_v54  ;;  %v14528_v54 = vunpack.c.l.b16 %v10149_v30  ;;  %v14527_v24 = vunpack.c.l.b16 %v10153_v42  ;;  %v14762_v45 = vld [vmem:[#allocation45_spill] sm:$0xff] }
 0x15c   :  { %v10134_v61 = vpop.f32.mrf.mxu0  ;;  %2076 = vmatmul.bf16.gmra.mxu1 %v10118_v20  ;;  %2160 = vmatmul.bf16.gmra.mxu2 %v10128_v13  ;;  %v888_v48 = vsel %vm9101_vm2, %v883_v12, %v887_v36  ;;  %v1088_v25 = vunpack.c.l.b16 %v637_v15  ;;  %v7729_v15 = vrot.slane %v10067_v16, 9 }
 0x15d   :  { %v10176_v43 = vpack.c.b16 %v14527_v24, %v14528_v54 }
 0x15e   :  { %v10170_v38 = vpack.c.b16 %v1088_v25, %v1087_v27  ;;  %v7728_v27 = vrot.slane %v10008_v51, 9 }
 0x15f   :  { %2343 = vmatmul.bf16.gmra.mxu0 %v1239_v44  ;;  %v2121_v60 = vpop.f32.mrf.mxu2  ;;  %v10164_v44 = vunpack.c.l.b16 %v888_v48  ;;  %v831_v48 = vrot.slane %v10113_v56, 5 }
 0x160   :  { %v2122_v6 = vadd.f32 %v2121_v60, %v10051_v23  ;;  %v10160_v23 = vpop.f32.mrf.mxu3 }
 0x161   :  { %v2039_v53 = vpop.f32.mrf.mxu1  ;;  %14760 = vst [vmem:[#allocation84_spill] sm:$0xff] %v10164_v44  ;;  %v1240_v36 = vpack.c.b16 %v10164_v44, %v1088_v25 }
 0x162   :  { %v2211_v31 = vadd.f32 %v9964_v34, %v2122_v6  ;;  %v2040_v0 = vadd.f32 %v2039_v53, %v1951_v18  ;;  %v1954_v34 = vadd.f32 %v9599_v9, %v14762_v45  ;;  %v827_v53 = vrot.slane %v10048_v21, 5 }
 0x163   :  { %v10204_v21 = vsel %vm9138_vm5, %v7729_v15, %v831_v48 }
 0x164   :  { %v10156_v39 = vpop.f32.mrf.mxu0  ;;  %v10200_v51 = vsel %vm9138_vm5, %v7728_v27, %v827_v53  ;;  %v10218_v53 = vadd.f32 %v10053_v4, %v2211_v31  ;;  %v14767_v4 = vld [vmem:[#allocation25_spill] sm:$0xff]  ;;  %v14768_v31 = vld [vmem:[#allocation30_spill] sm:$0xff] }
 0x166   :  { %2540 = vmatmul.bf16.vlgmr.msrb.gmra.mxu3 %v14761_v37  ;;  %v10194_v37 = vadd.f32 %v10014_v59, %v2208_v49  ;;  %v8346_v59 = vld [vmem:[%s14423_s4 + $0x38] sm:$0xff]  ;;  %v14526_v49 = vunpack.c.l.b16 %v10200_v51 }
 0x167   :  { %v2123_v62 = vpop.f32.mrf.mxu2  ;;  %6684 = vmatpush.bf16.msrb.mxu1 %v8346_v59 }
 0x168   :  { %v2124_v47 = vadd.f32 %v2123_v62, %v10093_v41  ;;  %v8354_v41 = vld [vmem:[%s14423_s4 + $0x78] sm:$0xff]  ;;  %14763 = vst [vmem:[#allocation26_spill] sm:$0xff] %v10194_v37  ;;  %v14764_v62 = vld [vmem:[#allocation48_spill] sm:$0xff] }
 0x169   :  { %v2042_v12 = vpop.f32.mrf.mxu1  ;;  %6773 = vmatpush.bf16.msrb.mxu2 %v8354_v41  ;;  %v1956_v45 = vadd.f32 %v9599_v9, %v14764_v62 }
 0x16a   :  { %v2213_v60 = vadd.f32 %v10003_v35, %v2124_v47  ;;  %v2043_v18 = vadd.f32 %v2042_v12, %v1954_v34  ;;  %v10191_v35 = vpop.f32.mrf.mxu3 }
 0x16c   :  { %v10180_v6 = vpop.f32.mrf.mxu0  ;;  %2081 = vmatmul.bf16.gmra.mxu1 %v10170_v38  ;;  %2165 = vmatmul.bf16.gmra.mxu2 %v10176_v43 }
 0x16f   :  { %2348 = vmatmul.bf16.gmra.mxu0 %v1240_v36  ;;  %v2126_v25 = vpop.f32.mrf.mxu2  ;;  %v14765_v36 = vld [vmem:[#allocation29_spill] sm:$0xff] }
 0x170   :  { %v2127_v34 = vadd.f32 %v2126_v25, %v2038_v57  ;;  %v14525_v57 = vunpack.c.l.b16 %v10204_v21 }
 0x171   :  { %v2044_v47 = vpop.f32.mrf.mxu1 }
 0x172   :  { %v2216_v16 = vadd.f32 %v10043_v10, %v2127_v34  ;;  %v2045_v56 = vadd.f32 %v2044_v47, %v1956_v45  ;;  %v10215_v27 = vpop.f32.mrf.mxu3  ;;  %v14766_v10 = vld [vmem:[#allocation54_spill] sm:$0xff]  ;;  %v10226_v25 = vpack.c.b16 %v14525_v57, %v14526_v49 }
 0x173   :  { %v1959_v15 = vadd.f32 %v9599_v9, %v14766_v10 }
 0x174   :  { %v10207_v12 = vpop.f32.mrf.mxu0 }
 0x176   :  { %2545 = vmatmul.bf16.gmra.mxu3 %v14765_v36  ;;  %v14770_v36 = vld [vmem:[#allocation56_spill] sm:$0xff] }
 0x177   :  { %v2128_v41 = vpop.f32.mrf.mxu2 }
 0x178   :  { %v2129_v48 = vadd.f32 %v2128_v41, %v2040_v0  ;;  %v10235_v0 = vadd.f32 %v10095_v7, %v2213_v60  ;;  %v1961_v41 = vadd.f32 %v9599_v9, %v14770_v36  ;;  %v14773_v7 = vld [vmem:[#allocation63_spill] sm:$0xff]  ;;  %v14774_v36 = vld [vmem:[#allocation28_spill] sm:$0xff] }
 0x179   :  { %v2047_v62 = vpop.f32.mrf.mxu1  ;;  %v1964_v60 = vadd.f32 %v9599_v9, %v14773_v7  ;;  %v14779_v7 = vld [vmem:[#allocation15_spill] sm:$0xff] }
 0x17a   :  { %v2218_v45 = vadd.f32 %v10089_v5, %v2129_v48  ;;  %v2048_v34 = vadd.f32 %v2047_v62, %v1959_v15  ;;  %14769 = vst [vmem:[#allocation45_spill] sm:$0xff] %v10235_v0  ;;  %v10239_v49 = vpop.f32.mrf.mxu3  ;;  %v14772_v62 = vld [vmem:[#allocation34_spill] sm:$0xff] }
 0x17c   :  { %v10229_v47 = vpop.f32.mrf.mxu0  ;;  %2170 = vmatmul.bf16.gmra.mxu2 %v10226_v25  ;;  %2362 = vmatmul.bf16.vlgmr.msra.gmra.mxu1 %v14767_v4 }
 0x17f   :  { %2629 = vmatmul.bf16.vlgmr.msra.gmra.mxu0 %v14768_v31  ;;  %v2131_v59 = vpop.f32.mrf.mxu2  ;;  %v10246_v31 = vadd.f32 %v10134_v61, %v2216_v16 }
 0x180   :  { %v2132_v10 = vadd.f32 %v2131_v59, %v2043_v18  ;;  %v14775_v18 = vunpack.c.l.b16 %v14774_v36  ;;  %v14776_v59 = vld [vmem:[#allocation31_spill] sm:$0xff]  ;;  %v8353_v36 = vld [vmem:[%s14423_s4 + $0x70] sm:$0xff] }
 0x181   :  { %v2049_v57 = vpop.f32.mrf.mxu1  ;;  %v14777_v54 = vunpack.c.l.b16 %v14776_v59  ;;  %6774 = vmatpush.bf16.msrb.mxu2 %v8353_v36  ;;  %v10289_v36 = vadd.f32 %v10156_v39, %v2218_v45 }
 0x182   :  { %v2221_v5 = vadd.f32 %v10131_v2, %v2132_v10  ;;  %v2050_v15 = vadd.f32 %v2049_v57, %v1961_v41  ;;  %v10257_v2 = vld [vmem:[%s14419_s0 + $0x48] sm:$0xf] }
 0x183   :  { %v1262_v0 = vpack.c.b16 %v14777_v54, %v14775_v18  ;;  %v914_v41 = vshrl.u32 %v10257_v2, 16  ;;  %v917_v61 = vshll.u32 %v10257_v2, 16  ;;  %v94_v18 = vld [vmem:[%s14419_s0 + $0x4c] sm:$0x1]  ;;  %14783 = vst [vmem:[#allocation25_spill] sm:$0xff] %v10289_v36 }
 0x184   :  { %v10242_v48 = vpop.f32.mrf.mxu0 }
 0x185   :  { %14771 = vst [vmem:[#allocation48_spill] sm:$0xff] %v10242_v48  ;;  %v919_v54 = vrot.slane %v917_v61, 5  ;;  %v14781_v61 = vld [vmem:[#allocation65_spill] sm:$0xff] }
 0x186   :  { %2550 = vmatmul.bf16.gmra.mxu3 %v14772_v62  ;;  %v10266_v62 = vpop.f32.mrf.mxu3 }
 0x187   :  { %v2133_v4 = vpop.f32.mrf.mxu2 }
 0x188   :  { %v2134_v24 = vadd.f32 %v2133_v4, %v2045_v56  ;;  %v916_v4 = vrot.slane %v914_v41, 4 }
 0x189   :  { %v2052_v57 = vpop.f32.mrf.mxu1 }
 0x18a   :  { %v10262_v16 = vadd.f32 %v10160_v23, %v2134_v24  ;;  %v2053_v10 = vadd.f32 %v2052_v57, %v1964_v60  ;;  %v14780_v23 = vld [vmem:[#allocation35_spill] sm:$0xff]  ;;  %v920_v24 = vor.u32 %v919_v54, %v916_v4  ;;  %v923_v60 = vshll.u32 %v94_v18, 16  ;;  %v8345_v4 = vld [vmem:[%s14423_s4 + $0x30] sm:$0xff] }
 0x18b   :  { %6685 = vmatpush.bf16.msrb.mxu1 %v8345_v4 }
 0x18c   :  { %v10264_v56 = vpop.f32.mrf.mxu0  ;;  %2367 = vmatmul.bf16.gmra.mxu1 %v1262_v0  ;;  %2451 = vmatmul.bf16.vlgmr.msra.gmra.mxu2 %v14779_v7  ;;  %v921_v57 = vrot.slane %v920_v24, 4  ;;  %v925_v41 = vrot.slane %v923_v60, 5  ;;  %v1966_v0 = vadd.f32 %v9599_v9, %v14781_v61  ;;  %v14784_v9 = vld [vmem:[#allocation33_spill] sm:$0xff] }
 0x18d   :  { %14778 = vst [vmem:[#allocation29_spill] sm:$0xff] %v10264_v56 }
 0x18e   :  { %v926_v56 = vsel %vm9101_vm2, %v921_v57, %v925_v41  ;;  %v14786_v57 = vld [vmem:[#allocation32_spill] sm:$0xff]  ;;  %v14788_v41 = vld [vmem:[#allocation37_spill] sm:$0xff] }
 0x18f   :  { %2634 = vmatmul.bf16.gmra.mxu0 %v14780_v23  ;;  %v2136_v59 = vpop.f32.mrf.mxu2  ;;  %v1305_v54 = vunpack.c.l.b16 %v926_v56  ;;  %v2235_v23 = vpop.f32.mrf.mxu3  ;;  %v14787_v56 = vunpack.c.l.b16 %v14786_v57  ;;  %v14789_v39 = vunpack.c.l.b16 %v14788_v41  ;;  %v14794_v41 = vld [vmem:[#allocation39_spill] sm:$0xff] }
 0x190   :  { %v2137_v7 = vadd.f32 %v2136_v59, %v2048_v34 }
 0x191   :  { %v2054_v48 = vpop.f32.mrf.mxu1  ;;  %v1309_v34 = vpack.c.b16 %v1305_v54, %v14784_v9  ;;  %v1263_v45 = vpack.c.b16 %v14789_v39, %v14787_v56  ;;  %v14792_v54 = vld [vmem:[#allocation17_spill] sm:$0xff]  ;;  %v8645_v9 = vld [vmem:[%s14419_s0 + $0x40] sm:$0xf] }
 0x192   :  { %v10281_v37 = vadd.f32 %v10191_v35, %v2137_v7  ;;  %v2055_v58 = vadd.f32 %v2054_v48, %v1966_v0  ;;  %v10295_v35 = vld [vmem:[%s14422_s3] ss:$0 sm:$0xff]  ;;  %v14785_v48 = vld [vmem:[#allocation36_spill] sm:$0xff] }
 0x193   :  { %v1969_v60 = vadd.f32 %v10295_v35, %v14785_v48  ;;  %v14793_v48 = vld [vmem:[#allocation40_spill] sm:$0xff]  ;;  %v1971_v39 = vadd.f32 %v10295_v35, %v14794_v41  ;;  %v14797_v41 = vld [vmem:[#allocation41_spill] sm:$0xff] }
 0x194   :  { %v10283_v44 = vpop.f32.mrf.mxu0 }
 0x195   :  { %14782 = vst [vmem:[#allocation54_spill] sm:$0xff] %v10283_v44  ;;  %v14796_v44 = vld [vmem:[#allocation44_spill] sm:$0xff] }
 0x196   :  { %2555 = vmatmul.bf16.gmra.mxu3 %v1309_v34  ;;  %v8646_v34 = vld [vmem:[%s14419_s0 + $0x44] sm:$0x1] }
 0x197   :  { %v2138_v24 = vpop.f32.mrf.mxu2  ;;  %v2237_v56 = vpop.f32.mrf.mxu3 }
 0x198   :  { %v2139_v59 = vadd.f32 %v2138_v24, %v2050_v15  ;;  %v7730_v15 = vrot.slane %v8645_v9, 9  ;;  %v899_v24 = vrot.slane %v8646_v34, 5 }
 0x199   :  { %v2057_v61 = vpop.f32.mrf.mxu1 }
 0x19a   :  { %v10304_v0 = vadd.f32 %v10215_v27, %v2139_v59  ;;  %v2058_v7 = vadd.f32 %v2057_v61, %v1969_v60  ;;  %v7734_v27 = vrot.slane %v10257_v2, 9  ;;  %v979_v60 = vrot.slane %v94_v18, 5 }
 0x19b   :  { %v10318_v59 = vadd.f32 %v10180_v6, %v2221_v5 }
 0x19c   :  { %14790 = vst [vmem:[#allocation30_spill] sm:$0xff] %v10304_v0  ;;  %v10306_v4 = vpop.f32.mrf.mxu0  ;;  %2372 = vmatmul.bf16.gmra.mxu1 %v1263_v45  ;;  %2456 = vmatmul.bf16.gmra.mxu2 %v14792_v54  ;;  %v900_v54 = vsel %vm9138_vm5, %v7730_v15, %v899_v24  ;;  %v980_v18 = vsel %vm9138_vm5, %v7734_v27, %v979_v60  ;;  %v14798_v0 = vld [vmem:[#allocation38_spill] sm:$0xff]  ;;  %v14801_v60 = vld [vmem:[#allocation19_spill] sm:$0xff] }
 0x19d   :  { %14791 = vst [vmem:[#allocation56_spill] sm:$0xff] %v10306_v4  ;;  %v1317_v5 = vunpack.c.l.b16 %v980_v18  ;;  %v14799_v15 = vunpack.c.l.b16 %v14798_v0  ;;  %v14803_v0 = vld [vmem:[#allocation43_spill] sm:$0xff] }
 0x19f   :  { %2639 = vmatmul.bf16.gmra.mxu0 %v14793_v48  ;;  %v2141_v57 = vpop.f32.mrf.mxu2  ;;  %v1257_v48 = vunpack.c.l.b16 %v900_v54  ;;  %v1976_v54 = vadd.f32 %v10295_v35, %v14803_v0 }
 0x1a0   :  { %v2142_v45 = vadd.f32 %v2141_v57, %v2053_v10  ;;  %v1974_v10 = vadd.f32 %v10295_v35, %v14797_v41  ;;  %v8344_v41 = vld [vmem:[%s14423_s4 + $0x28] sm:$0xff] }
 0x1a1   :  { %v2059_v61 = vpop.f32.mrf.mxu1  ;;  %v1264_v24 = vpack.c.b16 %v1257_v48, %v14799_v15  ;;  %6686 = vmatpush.bf16.msrb.mxu1 %v8344_v41  ;;  %v14805_v15 = vld [vmem:[#allocation52_spill] sm:$0xff] }
 0x1a2   :  { %v10325_v9 = vadd.f32 %v10239_v49, %v2142_v45  ;;  %v2060_v34 = vadd.f32 %v2059_v61, %v1971_v39  ;;  %v2240_v45 = vpop.f32.mrf.mxu3  ;;  %v1321_v39 = vpack.c.b16 %v1317_v5, %v1257_v48 }
 0x1a4   :  { %v10329_v6 = vpop.f32.mrf.mxu0 }
 0x1a5   :  { %14795 = vst [vmem:[#allocation34_spill] sm:$0xff] %v10329_v6 }
 0x1a6   :  { %2560 = vmatmul.bf16.gmra.mxu3 %v14796_v44  ;;  %v8352_v44 = vld [vmem:[%s14423_s4 + $0x68] sm:$0xff] }
 0x1a7   :  { %v2143_v4 = vpop.f32.mrf.mxu2  ;;  %6775 = vmatpush.bf16.msrb.mxu2 %v8352_v44 }
 0x1a8   :  { %v2144_v57 = vadd.f32 %v2143_v4, %v2055_v58 }
 0x1a9   :  { %v2062_v49 = vpop.f32.mrf.mxu1 }
 0x1aa   :  { %v10337_v61 = vadd.f32 %v10266_v62, %v2144_v57  ;;  %v2063_v27 = vadd.f32 %v2062_v49, %v1974_v10  ;;  %v2242_v10 = vpop.f32.mrf.mxu3  ;;  %v1293_v57 = vunpack.c.l.b16 %v10257_v2 }
 0x1ac   :  { %14800 = vst [vmem:[#allocation63_spill] sm:$0xff] %v10337_v61  ;;  %2377 = vmatmul.bf16.gmra.mxu1 %v1264_v24  ;;  %2461 = vmatmul.bf16.gmra.mxu2 %v14801_v60  ;;  %v10343_v4 = vpop.f32.mrf.mxu0  ;;  %v14806_v24 = vld [vmem:[#allocation46_spill] sm:$0xff] }
 0x1ad   :  { %14802 = vst [vmem:[#allocation28_spill] sm:$0xff] %v10343_v4  ;;  %v1979_v49 = vadd.f32 %v10295_v35, %v14806_v24  ;;  %v10364_v4 = vadd.f32 %v10207_v12, %v10262_v16 }
 0x1af   :  { %2644 = vmatmul.bf16.gmra.mxu0 %v1321_v39  ;;  %v2146_v58 = vpop.f32.mrf.mxu2  ;;  %14813 = vst [vmem:[#allocation15_spill] sm:$0xff] %v10364_v4 }
 0x1b0   :  { %v2147_v18 = vadd.f32 %v2146_v58, %v2058_v7  ;;  %v14807_v7 = vld [vmem:[#allocation42_spill] sm:$0xff] }
 0x1b1   :  { %v2064_v48 = vpop.f32.mrf.mxu1  ;;  %v14808_v44 = vunpack.c.l.b16 %v14807_v7 }
 0x1b2   :  { %v10347_v62 = vadd.f32 %v2235_v23, %v2147_v18  ;;  %v2065_v5 = vadd.f32 %v2064_v48, %v1976_v54  ;;  %v14809_v23 = vld [vmem:[#allocation49_spill] sm:$0xff]  ;;  %v14811_v54 = vld [vmem:[#allocation27_spill] sm:$0xff] }
 0x1b3   :  { %v14810_v58 = vunpack.c.l.b16 %v14809_v23  ;;  %v14812_v18 = vunpack.c.l.b16 %v14811_v54 }
 0x1b4   :  { %14804 = vst [vmem:[#allocation31_spill] sm:$0xff] %v10347_v62  ;;  %v10366_v41 = vpop.f32.mrf.mxu0 }
 0x1b5   :  { %v1265_v0 = vpack.c.b16 %v14810_v58, %v14808_v44  ;;  %v1297_v48 = vpack.c.b16 %v1293_v57, %v14812_v18  ;;  %14814 = vst [vmem:[#allocation35_spill] sm:$0xff] %v10366_v41  ;;  %v14817_v44 = vld [vmem:[#allocation51_spill] sm:$0xff]  ;;  %v14820_v18 = vld [vmem:[#allocation61_spill] sm:$0xff] }
 0x1b6   :  { %2565 = vmatmul.bf16.gmra.mxu3 %v14805_v15  ;;  %v1981_v23 = vadd.f32 %v10295_v35, %v14817_v44  ;;  %v14824_v41 = vld [vmem:[#allocation57_spill] sm:$0xff] }
 0x1b7   :  { %v2148_v39 = vpop.f32.mrf.mxu2  ;;  %v14825_v6 = vunpack.c.l.b16 %v14824_v41  ;;  %v114_v41 = vld [vmem:[%s14419_s0 + $0x9c] sm:$0x1] }
 0x1b8   :  { %v2149_v60 = vadd.f32 %v2148_v39, %v2060_v34  ;;  %v2245_v34 = vpop.f32.mrf.mxu3  ;;  %v14816_v39 = vld [vmem:[#allocation53_spill] sm:$0xff] }
 0x1b9   :  { %v2067_v2 = vpop.f32.mrf.mxu1 }
 0x1ba   :  { %v10368_v15 = vadd.f32 %v2237_v56, %v2149_v60  ;;  %v2068_v24 = vadd.f32 %v2067_v2, %v1979_v49  ;;  %v14821_v60 = vld [vmem:[#allocation55_spill] sm:$0xff]  ;;  %v14822_v2 = vld [vmem:[#allocation50_spill] sm:$0xff] }
 0x1bc   :  { %14815 = vst [vmem:[#allocation65_spill] sm:$0xff] %v10368_v15  ;;  %2382 = vmatmul.bf16.gmra.mxu1 %v1265_v0  ;;  %2466 = vmatmul.bf16.gmra.mxu2 %v1297_v48  ;;  %v10375_v16 = vpop.f32.mrf.mxu0  ;;  %v1984_v0 = vadd.f32 %v10295_v35, %v14821_v60 }
 0x1bd   :  { %14819 = vst [vmem:[#allocation36_spill] sm:$0xff] %v10375_v16 }
 0x1bf   :  { %2649 = vmatmul.bf16.gmra.mxu0 %v14816_v39  ;;  %v2151_v7 = vpop.f32.mrf.mxu2  ;;  %v14823_v39 = vunpack.c.l.b16 %v14822_v2  ;;  %v14829_v2 = vld [vmem:[#allocation62_spill] sm:$0xff] }
 0x1c0   :  { %v2152_v57 = vadd.f32 %v2151_v7, %v2063_v27  ;;  %v2247_v49 = vpop.f32.mrf.mxu3 }
 0x1c1   :  { %v2069_v58 = vpop.f32.mrf.mxu1  ;;  %v1266_v44 = vpack.c.b16 %v14825_v6, %v14823_v39  ;;  %v8351_v6 = vld [vmem:[%s14423_s4 + $0x60] sm:$0xff] }
 0x1c2   :  { %v10373_v54 = vadd.f32 %v2240_v45, %v2152_v57  ;;  %v2070_v12 = vadd.f32 %v2069_v58, %v1981_v23  ;;  %v10387_v45 = vld [vmem:[%s14419_s0 + $0x98] sm:$0xf]  ;;  %6776 = vmatpush.bf16.msrb.mxu2 %v8351_v6  ;;  %v14832_v6 = vld [vmem:[#allocation59_spill] sm:$0xff] }
 0x1c3   :  { %v928_v7 = vshrl.u32 %v10387_v45, 16  ;;  %v931_v23 = vshll.u32 %v10387_v45, 16 }
 0x1c4   :  { %14818 = vst [vmem:[#allocation33_spill] sm:$0xff] %v10373_v54  ;;  %v10400_v60 = vpop.f32.mrf.mxu0 }
 0x1c5   :  { %14828 = vst [vmem:[#allocation37_spill] sm:$0xff] %v10400_v60 }
 0x1c6   :  { %2570 = vmatmul.bf16.gmra.mxu3 %v14820_v18  ;;  %v930_v18 = vrot.slane %v928_v7, 4 }
 0x1c7   :  { %v2153_v56 = vpop.f32.mrf.mxu2 }
 0x1c8   :  { %v2154_v48 = vadd.f32 %v2153_v56, %v2065_v5  ;;  %v933_v5 = vrot.slane %v931_v23, 5  ;;  %v14827_v56 = vld [vmem:[#allocation11_spill] sm:$0xff]  ;;  %v2250_v16 = vpop.f32.mrf.mxu3 }
 0x1c9   :  { %v2072_v27 = vpop.f32.mrf.mxu1 }
 0x1ca   :  { %v10391_v57 = vadd.f32 %v2242_v10, %v2154_v48  ;;  %v2073_v58 = vadd.f32 %v2072_v27, %v1984_v0  ;;  %v934_v10 = vor.u32 %v933_v5, %v930_v18  ;;  %v937_v48 = vshll.u32 %v114_v41, 16  ;;  %v14830_v27 = vld [vmem:[#allocation60_spill] sm:$0xff]  ;;  %v8343_v18 = vld [vmem:[%s14423_s4 + $0x20] sm:$0xff] }
 0x1cb   :  { %v1986_v7 = vadd.f32 %v10295_v35, %v14830_v27  ;;  %6687 = vmatpush.bf16.msrb.mxu1 %v8343_v18 }
 0x1cc   :  { %14826 = vst [vmem:[#allocation32_spill] sm:$0xff] %v10391_v57  ;;  %2387 = vmatmul.bf16.gmra.mxu1 %v1266_v44  ;;  %2471 = vmatmul.bf16.gmra.mxu2 %v14827_v56  ;;  %v935_v39 = vrot.slane %v934_v10, 4  ;;  %v939_v44 = vrot.slane %v937_v48, 5  ;;  %v10413_v48 = vpop.f32.mrf.mxu0 }
 0x1cd   :  { %14833 = vst [vmem:[#allocation40_spill] sm:$0xff] %v10413_v48 }
 0x1ce   :  { %v940_v57 = vsel %vm9101_vm2, %v935_v39, %v939_v44  ;;  %v14835_v39 = vld [vmem:[#allocation58_spill] sm:$0xff] }
 0x1cf   :  { %2654 = vmatmul.bf16.gmra.mxu0 %v14829_v2  ;;  %v2156_v0 = vpop.f32.mrf.mxu2  ;;  %v1306_v5 = vunpack.c.l.b16 %v940_v57  ;;  %v14837_v44 = vld [vmem:[#allocation66_spill] sm:$0xff] }
 0x1d0   :  { %v2157_v23 = vadd.f32 %v2156_v0, %v2068_v24  ;;  %v14834_v24 = vld [vmem:[#allocation64_spill] sm:$0xff]  ;;  %v2252_v18 = vpop.f32.mrf.mxu3 }
 0x1d1   :  { %v2074_v56 = vpop.f32.mrf.mxu1  ;;  %v1310_v2 = vpack.c.b16 %v1306_v5, %v14832_v6  ;;  %v1989_v0 = vadd.f32 %v10295_v35, %v14834_v24  ;;  %v14840_v5 = vld [vmem:[#allocation13_spill] sm:$0xff] }
 0x1d2   :  { %v10407_v54 = vadd.f32 %v2245_v34, %v2157_v23  ;;  %v2075_v60 = vadd.f32 %v2074_v56, %v1986_v7  ;;  %v14836_v34 = vunpack.c.l.b16 %v14835_v39  ;;  %v14838_v7 = vunpack.c.l.b16 %v14837_v44  ;;  %v8647_v6 = vld [vmem:[%s14419_s0 + $0x90] sm:$0xf]  ;;  %v14842_v39 = vld [vmem:[#allocation68_spill] sm:$0xff] }
 0x1d3   :  { %v14841_v24 = vld [vmem:[#allocation69_spill] sm:$0xff] }
 0x1d4   :  { %14831 = vst [vmem:[#allocation17_spill] sm:$0xff] %v10407_v54  ;;  %v1267_v23 = vpack.c.b16 %v14838_v7, %v14836_v34  ;;  %v1991_v34 = vadd.f32 %v10295_v35, %v14842_v39  ;;  %v14846_v39 = vld [vmem:[#allocation70_spill] sm:$0xff] }
 0x1d6   :  { %2575 = vmatmul.bf16.gmra.mxu3 %v1310_v2  ;;  %v7731_v2 = vrot.slane %v8647_v6, 9 }
 0x1d7   :  { %v2158_v10 = vpop.f32.mrf.mxu2 }
 0x1d8   :  { %v2159_v27 = vadd.f32 %v2158_v10, %v2070_v12  ;;  %v8648_v12 = vld [vmem:[%s14419_s0 + $0x94] sm:$0x1]  ;;  %v2255_v48 = vpop.f32.mrf.mxu3 }
 0x1d9   :  { %v2077_v56 = vpop.f32.mrf.mxu1  ;;  %v903_v10 = vrot.slane %v8648_v12, 5 }
 0x1da   :  { %v10421_v54 = vadd.f32 %v2247_v49, %v2159_v27  ;;  %v2078_v57 = vadd.f32 %v2077_v56, %v1989_v0  ;;  %v7735_v49 = vrot.slane %v10387_v45, 9  ;;  %v983_v27 = vrot.slane %v114_v41, 5 }
 0x1db   :  { %v904_v56 = vsel %vm9138_vm5, %v7731_v2, %v903_v10 }
 0x1dc   :  { %14839 = vst [vmem:[#allocation39_spill] sm:$0xff] %v10421_v54  ;;  %2392 = vmatmul.bf16.gmra.mxu1 %v1267_v23  ;;  %2476 = vmatmul.bf16.gmra.mxu2 %v14840_v5  ;;  %v10434_v23 = vpop.f32.mrf.mxu0  ;;  %v984_v12 = vsel %vm9138_vm5, %v7735_v49, %v983_v27  ;;  %v14845_v54 = vld [vmem:[#allocation73_spill] sm:$0xff]  ;;  %v14851_v49 = vld [vmem:[#allocation16_spill] sm:$0xff] }
 0x1dd   :  { %14843 = vst [vmem:[#allocation44_spill] sm:$0xff] %v10434_v23  ;;  %v1318_v41 = vunpack.c.l.b16 %v984_v12  ;;  %v14847_v23 = vld [vmem:[#allocation67_spill] sm:$0xff]  ;;  %v14852_v27 = vld [vmem:[#allocation72_spill] sm:$0xff] }
 0x1de   :  { %v14848_v61 = vunpack.c.l.b16 %v14847_v23 }
 0x1df   :  { %2659 = vmatmul.bf16.gmra.mxu0 %v14841_v24  ;;  %v2161_v0 = vpop.f32.mrf.mxu2  ;;  %v1258_v24 = vunpack.c.l.b16 %v904_v56 }
 0x1e0   :  { %v2162_v44 = vadd.f32 %v2161_v0, %v2073_v58  ;;  %v1994_v58 = vadd.f32 %v10295_v35, %v14846_v39 }
 0x1e1   :  { %v2079_v7 = vpop.f32.mrf.mxu1  ;;  %v1268_v62 = vpack.c.b16 %v1258_v24, %v14848_v61  ;;  %v1996_v61 = vadd.f32 %v10295_v35, %v14852_v27  ;;  %v14861_v35 = vld [vmem:[#allocation47_spill] sm:$0xff] }
 0x1e2   :  { %v10438_v5 = vadd.f32 %v2250_v16, %v2162_v44  ;;  %v2080_v6 = vadd.f32 %v2079_v7, %v1991_v34  ;;  %v1322_v16 = vpack.c.b16 %v1318_v41, %v1258_v24  ;;  %v14856_v24 = vld [vmem:[#allocation78_spill] sm:$0xff] }
 0x1e4   :  { %14844 = vst [vmem:[#allocation41_spill] sm:$0xff] %v10438_v5  ;;  %v10449_v44 = vpop.f32.mrf.mxu0 }
 0x1e5   :  { %14850 = vst [vmem:[#allocation19_spill] sm:$0xff] %v10449_v44 }
 0x1e6   :  { %2580 = vmatmul.bf16.gmra.mxu3 %v14845_v54  ;;  %v8350_v54 = vld [vmem:[%s14423_s4 + $0x58] sm:$0xff] }
 0x1e7   :  { %v2163_v15 = vpop.f32.mrf.mxu2  ;;  %6777 = vmatpush.bf16.msrb.mxu2 %v8350_v54 }
 0x1e8   :  { %v2164_v0 = vadd.f32 %v2163_v15, %v2075_v60  ;;  %v2257_v60 = vpop.f32.mrf.mxu3 }
 0x1e9   :  { %v2082_v2 = vpop.f32.mrf.mxu1 }
 0x1ea   :  { %v10447_v10 = vadd.f32 %v2252_v18, %v2164_v0  ;;  %v2083_v34 = vadd.f32 %v2082_v2, %v1994_v58  ;;  %v14857_v58 = vld [vmem:[#allocation71_spill] sm:$0xff]  ;;  %v14859_v2 = vld [vmem:[#allocation74_spill] sm:$0xff] }
 0x1eb   :  { %v14858_v0 = vunpack.c.l.b16 %v14857_v58 }
 0x1ec   :  { %14849 = vst [vmem:[#allocation38_spill] sm:$0xff] %v10447_v10  ;;  %2397 = vmatmul.bf16.gmra.mxu1 %v1268_v62  ;;  %2481 = vmatmul.bf16.gmra.mxu2 %v14851_v49  ;;  %v1294_v62 = vunpack.c.l.b16 %v10387_v45  ;;  %v10462_v12 = vpop.f32.mrf.mxu0 }
 0x1ed   :  { %14855 = vst [vmem:[#allocation46_spill] sm:$0xff] %v10462_v12 }
 0x1ef   :  { %2664 = vmatmul.bf16.gmra.mxu0 %v1322_v16  ;;  %v2166_v15 = vpop.f32.mrf.mxu2  ;;  %v14860_v16 = vunpack.c.l.b16 %v14859_v2  ;;  %v14872_v2 = vunpack.c.l.b16 %v9829_v17 }
 0x1f0   :  { %v2167_v7 = vadd.f32 %v2166_v15, %v2078_v57  ;;  %v14862_v57 = vunpack.c.l.b16 %v14861_v35 }
 0x1f1   :  { %v2084_v18 = vpop.f32.mrf.mxu1  ;;  %v1269_v49 = vpack.c.b16 %v14860_v16, %v14858_v0 }
 0x1f2   :  { %v10457_v23 = vadd.f32 %v2255_v48, %v2167_v7  ;;  %v10459_v56 = vadd.f32 %v2084_v18, %v1996_v61  ;;  %v1298_v54 = vpack.c.b16 %v1294_v62, %v14862_v57  ;;  %v2260_v48 = vpop.f32.mrf.mxu3  ;;  %v14864_v61 = vld [vmem:[#allocation77_spill] sm:$0xff]  ;;  %v14865_v7 = vld [vmem:[#allocation79_spill] sm:$0xff]  ;;  %v14870_v62 = vld [vmem:[#allocation76_spill] sm:$0xff] }
 0x1f4   :  { %14853 = vst [vmem:[#allocation43_spill] sm:$0xff] %v10457_v23  ;;  %v10475_v18 = vpop.f32.mrf.mxu0 }
 0x1f5   :  { %14854 = vst [vmem:[#allocation52_spill] sm:$0xff] %v10459_v56 }
 0x1f6   :  { %2585 = vmatmul.bf16.gmra.mxu3 %v14856_v24  ;;  %14866 = vst [vmem:[#allocation49_spill] sm:$0xff] %v10475_v18 }
 0x1f7   :  { %v2168_v41 = vpop.f32.mrf.mxu2 }
 0x1f8   :  { %v2169_v39 = vadd.f32 %v2168_v41, %v2080_v6 }
 0x1f9   :  { %v2363_v15 = vpop.f32.mrf.mxu1 }
 0x1fa   :  { %v10471_v27 = vadd.f32 %v2257_v60, %v2169_v39  ;;  %v2364_v45 = vadd.f32 %v2363_v15, %v14864_v61  ;;  %v10481_v0 = vpop.f32.mrf.mxu3  ;;  %v14871_v39 = vunpack.c.l.b16 %v14870_v62  ;;  %v14876_v62 = vunpack.c.l.b16 %v9918_v32 }
 0x1fb   :  { %14868 = vst [vmem:[#allocation53_spill] sm:$0xff] %v10481_v0 }
 0x1fc   :  { %14863 = vst [vmem:[#allocation42_spill] sm:$0xff] %v10471_v27  ;;  %2402 = vmatmul.bf16.gmra.mxu1 %v1269_v49  ;;  %2486 = vmatmul.bf16.gmra.mxu2 %v1298_v54  ;;  %v1270_v16 = vpack.c.b16 %v14872_v2, %v14871_v39  ;;  %v10490_v49 = vpop.f32.mrf.mxu0 }
 0x1fd   :  { %14873 = vst [vmem:[#allocation61_spill] sm:$0xff] %v10490_v49 }
 0x1ff   :  { %2669 = vmatmul.bf16.gmra.mxu0 %v14865_v7  ;;  %v2171_v6 = vpop.f32.mrf.mxu2 }
 0x200   :  { %v2172_v24 = vadd.f32 %v2171_v6, %v2083_v34  ;;  %v14874_v34 = vld [vmem:[#allocation20_spill] sm:$0xff] }
 0x201   :  { %v10477_v41 = vpop.f32.mrf.mxu1 }
 0x202   :  { %v10479_v58 = vadd.f32 %v2260_v48, %v2172_v24  ;;  %v2541_v57 = vpop.f32.mrf.mxu3  ;;  %v14875_v24 = vunpack.c.l.b16 %v9833_v50 }
 0x204   :  { %14867 = vst [vmem:[#allocation27_spill] sm:$0xff] %v10479_v58  ;;  %v2630_v61 = vpop.f32.mrf.mxu0  ;;  %v1271_v39 = vpack.c.b16 %v14876_v62, %v14875_v24 }
 0x206   :  { %2590 = vmatmul.bf16.gmra.mxu3 %v9870_v52 }
 0x207   :  { %v10484_v60 = vpop.f32.mrf.mxu2 }
 0x208   :  { %14869 = vst [vmem:[#allocation51_spill] sm:$0xff] %v10484_v60 }
 0x209   :  { %v2368_v35 = vpop.f32.mrf.mxu1 }
 0x20a   :  { %v10498_v6 = vpop.f32.mrf.mxu3  ;;  %v2369_v50 = vadd.f32 %v2368_v35, %v9856_v55  ;;  %v14879_v35 = vld [vmem:[#allocation14_spill] sm:$0xff] }
 0x20c   :  { %2407 = vmatmul.bf16.gmra.mxu1 %v1270_v16  ;;  %2491 = vmatmul.bf16.gmra.mxu2 %v14874_v34  ;;  %v8649_v16 = vld [vmem:[%s14419_s0 + $0xe0] sm:$0xf]  ;;  %v2632_v62 = vpop.f32.mrf.mxu0 }
 0x20d   :  { %v7732_v34 = vrot.slane %v8649_v16, 9 }
 0x20f   :  { %2674 = vmatmul.bf16.gmra.mxu0 %v9876_v40  ;;  %v2452_v54 = vpop.f32.mrf.mxu2 }
 0x210   :  { %v2453_v48 = vadd.f32 %v2452_v54, %v2364_v45  ;;  %v14877_v45 = vld [vmem:[#allocation12_spill] sm:$0xff] }
 0x211   :  { %v10494_v15 = vpop.f32.mrf.mxu1 }
 0x212   :  { %v2542_v52 = vadd.f32 %v2541_v57, %v2453_v48  ;;  %v8650_v57 = vld [vmem:[%s14419_s0 + $0xe4] sm:$0x1] }
 0x213   :  { %v907_v54 = vrot.slane %v8650_v57, 5 }
 0x214   :  { %v10496_v7 = vadd.f32 %v2630_v61, %v2542_v52  ;;  %v2635_v57 = vpop.f32.mrf.mxu0 }
 0x215   :  { %v10518_v61 = vsel %vm9138_vm5, %v7732_v34, %v907_v54  ;;  %v133_v34 = vld [vmem:[%s14419_s0 + $0xe8] sm:$0xf] }
 0x217   :  { %v10500_v17 = vpop.f32.mrf.mxu2 }
 0x219   :  { %v2373_v2 = vpop.f32.mrf.mxu1 }
 0x21a   :  { %v2374_v40 = vadd.f32 %v2373_v2, %v9947_v29  ;;  %v2546_v29 = vpop.f32.mrf.mxu3  ;;  %v14878_v2 = vunpack.c.l.b16 %v9922_v26  ;;  %v945_v26 = vshll.u32 %v133_v34, 16 }
 0x21c   :  { %2412 = vmatmul.bf16.gmra.mxu1 %v1271_v39  ;;  %2496 = vmatmul.bf16.gmra.mxu2 %v14877_v45  ;;  %v14531_v39 = vunpack.c.l.b16 %v10518_v61 }
 0x21e   :  { %v1272_v45 = vpack.c.b16 %v14531_v39, %v14878_v2 }
 0x21f   :  { %2679 = vmatmul.bf16.gmra.mxu0 %v9961_v33  ;;  %v2457_v32 = vpop.f32.mrf.mxu2 }
 0x220   :  { %v2458_v48 = vadd.f32 %v2457_v32, %v2369_v50  ;;  %v942_v50 = vshrl.u32 %v133_v34, 16 }
 0x221   :  { %v2375_v52 = vpop.f32.mrf.mxu1 }
 0x222   :  { %v2547_v24 = vadd.f32 %v2546_v29, %v2458_v48  ;;  %v10532_v54 = vpop.f32.mrf.mxu3  ;;  %v10536_v29 = vpop.f32.mrf.mxu0  ;;  %v944_v2 = vrot.slane %v942_v50, 4  ;;  %v2376_v27 = vadd.f32 %v2375_v52, %v9979_v3 }
 0x227   :  { %v10525_v16 = vpop.f32.mrf.mxu2 }
 0x229   :  { %v2378_v33 = vpop.f32.mrf.mxu1 }
 0x22a   :  { %v2379_v55 = vadd.f32 %v2378_v33, %v10030_v63  ;;  %v134_v63 = vld [vmem:[%s14419_s0 + $0xec] sm:$0x1]  ;;  %v2551_v49 = vpop.f32.mrf.mxu3  ;;  %v2640_v10 = vpop.f32.mrf.mxu0 }
 0x22b   :  { %v951_v33 = vshll.u32 %v134_v63, 16 }
 0x22c   :  { %2417 = vmatmul.bf16.gmra.mxu1 %v1272_v45  ;;  %2501 = vmatmul.bf16.gmra.mxu2 %v14879_v35  ;;  %v947_v45 = vrot.slane %v945_v26, 5  ;;  %v14880_v26 = vunpack.c.l.b16 %v10001_v11 }
 0x22d   :  { %v953_v18 = vrot.slane %v951_v33, 5 }
 0x22e   :  { %v948_v39 = vor.u32 %v947_v45, %v944_v2 }
 0x22f   :  { %v2462_v32 = vpop.f32.mrf.mxu2 }
 0x230   :  { %v2463_v35 = vadd.f32 %v2462_v32, %v2374_v40  ;;  %v949_v23 = vrot.slane %v948_v39, 4  ;;  %v14881_v32 = vunpack.c.l.b16 %v10078_v46 }
 0x231   :  { %v10534_v48 = vpop.f32.mrf.mxu1 }
 0x232   :  { %v2552_v44 = vadd.f32 %v2551_v49, %v2463_v35  ;;  %v954_v0 = vsel %vm9101_vm2, %v949_v23, %v953_v18  ;;  %v1273_v2 = vpack.c.b16 %v14881_v32, %v14880_v26  ;;  %v14882_v23 = vld [vmem:[#allocation75_spill] sm:$0xff]  ;;  %v10569_v49 = vadd.f32 %v2635_v57, %v2547_v24  ;;  %v10588_v24 = vpop.f32.mrf.mxu0  ;;  %v8341_v26 = vld [vmem:[%s14423_s4 + $0x10] sm:$0xff] }
 0x233   :  { %v1307_v40 = vunpack.c.l.b16 %v954_v0  ;;  %v7736_v57 = vrot.slane %v133_v34, 9  ;;  %v987_v35 = vrot.slane %v134_v63, 5 }
 0x234   :  { %v10542_v5 = vadd.f32 %v2640_v10, %v2552_v44  ;;  %v8342_v10 = vld [vmem:[%s14423_s4 + $0x18] sm:$0xff]  ;;  %v1295_v44 = vunpack.c.l.b16 %v133_v34 }
 0x235   :  { %v1311_v3 = vpack.c.b16 %v1307_v40, %v9863_v28  ;;  %6688 = vmatpush.bf16.msrb.mxu1 %v8342_v10  ;;  %v8349_v28 = vld [vmem:[%s14423_s4 + $0x50] sm:$0xff] }
 0x236   :  { %6778 = vmatpush.bf16.msrb.mxu2 %v8349_v28  ;;  %v14890_v28 = vunpack.c.l.b16 %v10149_v30 }
 0x237   :  { %v2464_v58 = vpop.f32.mrf.mxu2  ;;  %2595 = vmatmul.bf16.gmra.mxu3 %v1311_v3 }
 0x238   :  { %v10546_v60 = vadd.f32 %v2464_v58, %v2376_v27  ;;  %v14883_v27 = vunpack.c.l.b16 %v14882_v23 }
 0x239   :  { %v2383_v12 = vpop.f32.mrf.mxu1  ;;  %6689 = vmatpush.bf16.msrb.mxu1 %v8341_v26 }
 0x23a   :  { %v2384_v50 = vadd.f32 %v2383_v12, %v10108_v8  ;;  %v1299_v18 = vpack.c.b16 %v1295_v44, %v14883_v27  ;;  %v14884_v8 = vld [vmem:[#allocation80_spill] sm:$0xff]  ;;  %v2645_v63 = vpop.f32.mrf.mxu0 }
 0x23b   :  { %v2366_v12 = vadd.f32 %v10477_v41, %v14884_v8  ;;  %v10575_v41 = vmul.f32 0.70710677, %v10569_v49 }
 0x23c   :  { %2422 = vmatmul.bf16.gmra.mxu1 %v1273_v2  ;;  %2506 = vmatmul.bf16.gmra.mxu2 %v1299_v18  ;;  %v988_v2 = vsel %vm9138_vm5, %v7736_v57, %v987_v35  ;;  %v14886_v18 = vunpack.c.l.b16 %v10518_v61 }
 0x23d   :  { %v2455_v11 = vadd.f32 %v10500_v17, %v2366_v12  ;;  %v10577_v17 = vpop.f32.mrf.mxu3  ;;  %v1319_v44 = vunpack.c.l.b16 %v988_v2  ;;  %v10617_v2 = vmul.f32 0.70710677, %v10496_v7  ;;  %vm3832_vm4 = vcmp.ge.f32.partialorder %v10575_v41, 0.0 }
 0x23f   :  { %v2544_v46 = vadd.f32 %v10498_v6, %v2455_v11  ;;  %v2467_v58 = vpop.f32.mrf.mxu2  ;;  %v14885_v6 = vld [vmem:[#allocation18_spill] sm:$0xff]  ;;  %v1323_v8 = vpack.c.b16 %v1319_v44, %v14886_v18  ;;  %v14893_v18 = vunpack.c.l.b16 %v10200_v51 }
 0x240   :  { %v2468_v32 = vadd.f32 %v2467_v58, %v2379_v55  ;;  %v14888_v55 = vld [vmem:[#allocation21_spill] sm:$0xff] }
 0x241   :  { %v10567_v0 = vadd.f32 %v2632_v62, %v2544_v46  ;;  %v10590_v62 = vpop.f32.mrf.mxu1  ;;  %2684 = vmatmul.bf16.gmra.mxu0 %v1323_v8  ;;  %v14889_v46 = vunpack.c.l.b16 %v10087_v22 }
 0x243   :  { %v10572_v52 = vmul.f32 0.70710677, %v10567_v0  ;;  %v1274_v58 = vpack.c.b16 %v14890_v28, %v14889_v46 }
 0x245   :  { %v10581_v39 = vand.u32 2147483647, %v10572_v52  ;;  %v2556_v3 = vpop.f32.mrf.mxu3  ;;  %vm3831_vm3 = vcmp.ge.f32.partialorder %v10572_v52, 0.0 }
 0x246   :  { %v2557_v34 = vadd.f32 %v2556_v3, %v2468_v32 }
 0x247   :  { %2600 = vmatmul.bf16.gmra.mxu3 %v10038_v14  ;;  %v10583_v45 = vpop.f32.mrf.mxu2  ;;  %v10586_v14 = vand.u32 2147483647, %v10575_v41  ;;  %v2807_v33 = vmul.f32 0.3275911, %v10581_v39 }
 0x248   :  { %v10602_v11 = vadd.f32 %v2645_v63, %v2557_v34 }
 0x249   :  { %v2808_v40 = vmul.f32 0.3275911, %v10586_v14  ;;  %v2839_v10 = vadd.f32 1.0, %v2807_v33  ;;  %v2388_v12 = vpop.f32.mrf.mxu1 }
 0x24a   :  { %14887 = vst [vmem:[#allocation55_spill] sm:$0xff] %v10602_v11  ;;  %v2389_v44 = vadd.f32 %v2388_v12, %v10218_v53 }
 0x24b   :  { %v2840_v23 = vadd.f32 1.0, %v2808_v40  ;;  %8494 = vrcp.f32 %v2839_v10  ;;  %vm2890_vm8 = vweird.f32 %v2839_v10  ;;  %v2894_v28 = vand.u32 2147483647, %v2839_v10 }
 0x24c   :  { %2511 = vmatmul.bf16.gmra.mxu2 %v14885_v6  ;;  %2427 = vmatmul.bf16.gmra.mxu1 %v1274_v58 }
 0x24d   :  { %8496 = vrcp.f32 %v2840_v23  ;;  %v2911_v58 = vand.u32 2147483648, %v2840_v23  ;;  %vm2905_vm10 = vweird.f32 %v2840_v23  ;;  %v2909_v12 = vand.u32 2147483647, %v2840_v23 }
 0x24e   :  { %vm2895_vm12 = vcmp.eq.f32.partialorder %v2894_v28, 8.507059e+37 }
 0x24f   :  { %v2472_v27 = vpop.f32.mrf.mxu2  ;;  %v2912_v51 = vor.u32 1.1754944e-38, %v2911_v58  ;;  %vm2910_vm13 = vcmp.eq.f32.partialorder %v2909_v12, 8.507059e+37  ;;  %v3639_v12 = vsub.f32 0.0, %v10581_v39 }
 0x250   :  { %v10609_v57 = vadd.f32 %v2472_v27, %v2384_v50  ;;  %v14891_v50 = vld [vmem:[#allocation24_spill] sm:$0xff]  ;;  %v10623_v27 = vand.u32 2147483647, %v10617_v2 }
 0x251   :  { %v10613_v35 = vpop.f32.mrf.mxu1  ;;  %2689 = vmatmul.bf16.gmra.mxu0 %v10128_v13  ;;  %v2896_v13 = vand.u32 2147483648, %v2839_v10 }
 0x252   :  { %v2806_v53 = vmul.f32 0.3275911, %v10623_v27 }
 0x257   :  { %2605 = vmatmul.bf16.gmra.mxu3 %v10118_v20  ;;  %v8495_v20 = vpop.eup %8494  ;;  %v10611_v61 = vpop.f32.mrf.mxu2 }
 0x258   :  { %v8497_v6 = vpop.eup %8496  ;;  %v2886_v33 = vmul.f32 %v8495_v20, %v2839_v10  ;;  %vm2891_vm6 = vweird.f32 %v8495_v20 }
 0x259   :  { %v2901_v40 = vmul.f32 %v8497_v6, %v2840_v23  ;;  %v2393_v34 = vpop.f32.mrf.mxu1  ;;  %vm2906_vm7 = vweird.f32 %v8497_v6  ;;  %vm2892_vm9 = vmor %vm2890_vm8, %vm2891_vm6  ;;  %v8348_v23 = vld [vmem:[%s14423_s4 + $0x48] sm:$0xff]  ;;  %vm4286_vm6 = vcmask 1040384  }
 0x25a   :  { %v2887_v26 = vsub.f32 1.0, %v2886_v33  ;;  %vm2907_vm11 = vmor %vm2905_vm10, %vm2906_vm7  ;;  %6779 = vmatpush.bf16.msrb.mxu2 %v8348_v23  ;;  %vm4287_vm7 = vsmask.f32 256  ;;  %vm4323_vm10 = vsmask.f32 4352 }
 0x25b   :  { %v2902_v32 = vsub.f32 1.0, %v2901_v40  ;;  %vm10750_vm8 = vmand %vm4286_vm6, %vm4287_vm7 }
 0x25c   :  { %2516 = vmatmul.bf16.gmra.mxu2 %v14888_v55  ;;  %v2888_v22 = vmul.f32 %v8495_v20, %v2887_v26  ;;  %v2838_v26 = vadd.f32 1.0, %v2806_v53 }
 0x25d   :  { %v2903_v30 = vmul.f32 %v8497_v6, %v2902_v32 }
 0x25e   :  { %v2889_v63 = vadd.f32 %v8495_v20, %v2888_v22  ;;  %8498 = vrcp.f32 %v2838_v26  ;;  %vm2875_vm15 = vweird.f32 %v2838_v26 }
 0x25f   :  { %v2477_v3 = vpop.f32.mrf.mxu2  ;;  %v2904_v46 = vadd.f32 %v8497_v6, %v2903_v30 }
 0x260   :  { %v10629_v55 = vadd.f32 %v2477_v3, %v2389_v44  ;;  %v2893_v33 = vsel %vm2892_vm9, %v8495_v20, %v2889_v63  ;;  %vm4322_vm9 = vcmask 1044480  }
 0x261   :  { %v2908_v40 = vsel %vm2907_vm11, %v8497_v6, %v2904_v46  ;;  %v10632_v30 = vpop.f32.mrf.mxu1  ;;  %2694 = vmatmul.bf16.gmra.mxu0 %v10176_v43  ;;  %v8340_v43 = vld [vmem:[%s14423_s4 + $0x8] sm:$0xff]  ;;  %vm10760_vm11 = vmand %vm4322_vm9, %vm4323_vm10 }
 0x262   :  { %v2913_v22 = vsel %vm2910_vm13, %v2912_v51, %v2908_v40  ;;  %14894 = vst [vmem:[#allocation50_spill] sm:$0xff] %v10632_v30  ;;  %6690 = vmatpush.bf16.msrb.mxu1 %v8340_v43  ;;  %v3640_v40 = vsub.f32 0.0, %v10586_v14  ;;  %v3671_v51 = vmul.f32 %v3639_v12, %v10581_v39 }
 0x263   :  { %v3352_v3 = vmul.f32 1.0614054, %v2913_v22 }
 0x264   :  { %v8499_v6 = vpop.eup %8498  ;;  %v3672_v23 = vmul.f32 %v3640_v40, %v10586_v14 }
 0x265   :  { %vm2876_vm14 = vweird.f32 %v8499_v6 }
 0x266   :  { %vm2877_vm0 = vmor %vm2875_vm15, %vm2876_vm14  ;;  %v3706_v43 = vmul.f32 1.442695, %v3672_v23 }
 0x267   :  { %2610 = vmatmul.bf16.gmra.mxu3 %v10170_v38  ;;  %v14892_v38 = vunpack.c.l.b16 %v10153_v42  ;;  %v2897_v42 = vor.u32 1.1754944e-38, %v2896_v13  ;;  %v10641_v46 = vpop.f32.mrf.mxu2 }
 0x269   :  { %v1275_v8 = vpack.c.b16 %v14893_v18, %v14892_v38  ;;  %v2898_v32 = vsel %vm2895_vm12, %v2897_v42, %v2893_v33  ;;  %v2398_v63 = vpop.f32.mrf.mxu1  ;;  %v2871_v18 = vmul.f32 %v8499_v6, %v2838_v26  ;;  %vm3830_vm12 = vcmp.ge.f32.partialorder %v10617_v2, 0.0 }
 0x26a   :  { %v3351_v10 = vmul.f32 1.0614054, %v2898_v32 }
 0x26b   :  { %2432 = vmatmul.bf16.gmra.mxu1 %v1275_v8  ;;  %v10639_v8 = vadd.f32 %v2398_v63, %v10318_v59  ;;  %v2872_v58 = vsub.f32 1.0, %v2871_v18  ;;  %v2879_v63 = vand.u32 2147483647, %v2838_v26  ;;  %v3704_v18 = vmul.f32 1.442695, %v3671_v51 }
 0x26c   :  { %2521 = vmatmul.bf16.gmra.mxu2 %v14891_v50  ;;  %v3383_v20 = vadd.f32 -1.4531521, %v3351_v10  ;;  %v3384_v50 = vadd.f32 -1.4531521, %v3352_v3 }
 0x26d   :  { %v2873_v42 = vmul.f32 %v8499_v6, %v2872_v58  ;;  %vm2880_vm1 = vcmp.eq.f32.partialorder %v2879_v63, 8.507059e+37  ;;  %8500 = vpow2.f32 %v3704_v18 }
 0x26e   :  { %v3415_v44 = vmul.f32 %v3383_v20, %v2898_v32  ;;  %v3416_v38 = vmul.f32 %v3384_v50, %v2913_v22  ;;  %v2881_v50 = vand.u32 2147483648, %v2838_v26  ;;  %8502 = vpow2.f32 %v3706_v43  ;;  %v8652_v26 = vld [vmem:[%s14419_s0 + $0x134] sm:$0x1] }
 0x26f   :  { %v2874_v3 = vadd.f32 %v8499_v6, %v2873_v42  ;;  %v2482_v20 = vpop.f32.mrf.mxu2  ;;  %v911_v12 = vrot.slane %v8652_v26, 5 }
 0x270   :  { %v3447_v13 = vadd.f32 1.4214138, %v3415_v44  ;;  %v3448_v28 = vadd.f32 1.4214138, %v3416_v38  ;;  %v2394_v44 = vadd.f32 %v2393_v34, %v10246_v31  ;;  %v2882_v39 = vor.u32 1.1754944e-38, %v2881_v50  ;;  %v8347_v50 = vld [vmem:[%s14423_s4 + $0x40] sm:$0xff] }
 0x271   :  { %2699 = vmatmul.bf16.gmra.mxu0 %v10226_v25  ;;  %v2878_v25 = vsel %vm2877_vm0, %v8499_v6, %v2874_v3  ;;  %v8651_v31 = vld [vmem:[%s14419_s0 + $0x130] sm:$0xf]  ;;  %6780 = vmatpush.bf16.msrb.mxu2 %v8347_v50 }
 0x272   :  { %v3479_v53 = vmul.f32 %v3447_v13, %v2898_v32  ;;  %v3480_v33 = vmul.f32 %v3448_v28, %v2913_v22  ;;  %v10652_v28 = vadd.f32 %v2482_v20, %v2394_v44  ;;  %v7733_v34 = vrot.slane %v8651_v31, 9  ;;  %v14895_v3 = vld [vmem:[#allocation81_spill] sm:$0xff] }
 0x273   :  { %v8501_v40 = vpop.eup %8500  ;;  %v2371_v23 = vadd.f32 %v10494_v15, %v14895_v3 }
 0x274   :  { %v3511_v59 = vadd.f32 -0.28449672, %v3479_v53  ;;  %v3512_v10 = vadd.f32 -0.28449672, %v3480_v33  ;;  %v10654_v53 = vsel %vm2880_vm1, %v2882_v39, %v2878_v25  ;;  %v8503_v51 = vpop.eup %8502 }
 0x275   :  { %v3350_v6 = vmul.f32 1.0614054, %v10654_v53 }
 0x276   :  { %v3543_v38 = vmul.f32 %v3511_v59, %v2898_v32  ;;  %v3544_v13 = vmul.f32 %v3512_v10, %v2913_v22  ;;  %v10665_v59 = vsel %vm9138_vm5, %v7733_v34, %v911_v12  ;;  %v154_v12 = vld [vmem:[%s14419_s0 + $0x13c] sm:$0x1] }
 0x277   :  { %v3382_v10 = vadd.f32 -1.4531521, %v3350_v6  ;;  %v1260_v63 = vunpack.c.l.b16 %v10665_v59 }
 0x278   :  { %v3575_v58 = vadd.f32 0.2548296, %v3543_v38  ;;  %v3576_v14 = vadd.f32 0.2548296, %v3544_v13  ;;  %v14896_v38 = vunpack.c.l.b16 %v10204_v21 }
 0x279   :  { %v3414_v18 = vmul.f32 %v3382_v10, %v10654_v53  ;;  %v965_v10 = vshll.u32 %v154_v12, 16 }
 0x27a   :  { %v3607_v33 = vmul.f32 %v3575_v58, %v2898_v32  ;;  %v3608_v42 = vmul.f32 %v3576_v14, %v2913_v22  ;;  %v10676_v32 = vld [vmem:[%s14419_s0 + $0x138] sm:$0xf]  ;;  %v2460_v22 = vadd.f32 %v10525_v16, %v2371_v23  ;;  %v1276_v15 = vpack.c.b16 %v1260_v63, %v14896_v38  ;;  %v8339_v16 = vld [vmem:[%s14423_s4] sm:$0xff] }
 0x27b   :  { %v956_v25 = vshrl.u32 %v10676_v32, 16  ;;  %v959_v43 = vshll.u32 %v10676_v32, 16  ;;  %v3446_v14 = vadd.f32 1.4214138, %v3414_v18  ;;  %6691 = vmatpush.bf16.msrb.mxu1 %v8339_v16  ;;  %v967_v41 = vrot.slane %v965_v10, 5 }
 0x27c   :  { %v3767_v20 = vmul.f32 %v8501_v40, %v3607_v33  ;;  %v3768_v44 = vmul.f32 %v8503_v51, %v3608_v42  ;;  %2437 = vmatmul.bf16.gmra.mxu1 %v1276_v15  ;;  %v2549_v58 = vadd.f32 %v10532_v54, %v2460_v22  ;;  %v3638_v33 = vsub.f32 0.0, %v10623_v27  ;;  %v10700_v40 = vpop.f32.mrf.mxu1 }
 0x27d   :  { %v958_v31 = vrot.slane %v956_v25, 4  ;;  %v961_v34 = vrot.slane %v959_v43, 5  ;;  %v3478_v54 = vmul.f32 %v3446_v14, %v10654_v53  ;;  %14897 = vst [vmem:[#allocation57_spill] sm:$0xff] %v10700_v40  ;;  %v2711_v38 = vmul.f32 0.5, %v10567_v0 }
 0x27e   :  { %v3799_v13 = vsub.f32 1.0, %v3767_v20  ;;  %v3800_v39 = vsub.f32 1.0, %v3768_v44  ;;  %v10694_v6 = vadd.f32 %v10536_v29, %v2549_v58  ;;  %v10705_v20 = vpop.f32.mrf.mxu2  ;;  %v3670_v29 = vmul.f32 %v3638_v33, %v10623_v27 }
 0x27f   :  { %v962_v51 = vor.u32 %v961_v34, %v958_v31  ;;  %14898 = vst [vmem:[#allocation11_spill] sm:$0xff] %v10705_v20  ;;  %v3510_v44 = vadd.f32 -0.28449672, %v3478_v54  ;;  %v2712_v15 = vmul.f32 0.5, %v10569_v49  ;;  %v2315_v0 = vadd.f32 %v10229_v47, %v10281_v37 }
 0x280   :  { %v3863_v21 = vsub.f32 0.0, %v3799_v13  ;;  %v3864_v26 = vsub.f32 0.0, %v3800_v39  ;;  %v10703_v23 = vmul.f32 0.70710677, %v10694_v6  ;;  %v3702_v43 = vmul.f32 1.442695, %v3670_v29  ;;  %v10726_v29 = vpop.f32.mrf.mxu3 }
 0x281   :  { %v963_v22 = vrot.slane %v962_v51, 4  ;;  %v3542_v25 = vmul.f32 %v3510_v44, %v10654_v53  ;;  %v7737_v51 = vrot.slane %v10676_v32, 9  ;;  %v991_v44 = vrot.slane %v154_v12, 5 }
 0x282   :  { %v3895_v42 = vsel %vm3831_vm3, %v3799_v13, %v3863_v21  ;;  %v3896_v3 = vsel %vm3832_vm4, %v3800_v39, %v3864_v26  ;;  %v10711_v18 = vand.u32 2147483647, %v10703_v23  ;;  %8504 = vpow2.f32 %v3702_v43  ;;  %v14899_v26 = vld [vmem:[#allocation84_spill] sm:$0xff] }
 0x283   :  { %v3927_v50 = vadd.f32 1.0, %v3895_v42  ;;  %v3928_v52 = vadd.f32 1.0, %v3896_v3  ;;  %v968_v27 = vsel %vm9101_vm2, %v963_v22, %v967_v41  ;;  %v3574_v49 = vadd.f32 0.2548296, %v3542_v25 }
 0x284   :  { %v2809_v58 = vmul.f32 0.3275911, %v10711_v18  ;;  %v2403_v16 = vpop.f32.mrf.mxu1  ;;  %v1308_v21 = vunpack.c.l.b16 %v968_v27  ;;  %v1296_v42 = vunpack.c.l.b16 %v10676_v32  ;;  %v992_v32 = vsel %vm9138_vm5, %v7737_v51, %v991_v44 }
 0x285   :  { %v3959_v13 = vmul.f32 %v3927_v50, %v2711_v38  ;;  %v3960_v39 = vmul.f32 %v3928_v52, %v2712_v15  ;;  %v10720_v54 = vadd.f32 %v2403_v16, %v2315_v0  ;;  %v14900_v50 = vld [vmem:[#allocation83_spill] sm:$0xff]  ;;  %v3606_v22 = vmul.f32 %v3574_v49, %v10654_v53  ;;  %v10745_v16 = vpop.f32.mrf.mxu0 }
 0x286   :  { %v2487_v34 = vpop.f32.mrf.mxu2  ;;  %v1312_v33 = vpack.c.b16 %v1308_v21, %v14899_v26  ;;  %v10724_v10 = vadd.f32 1.0, %v2809_v58  ;;  %v14901_v37 = vunpack.c.l.b16 %v14900_v50  ;;  %v10735_v38 = vmul.f32 0.70710677, %v10542_v5 }
 0x287   :  { %v3991_v14 = vpack.c.bf16 %v3959_v13, %v3959_v13  ;;  %v3992_v31 = vpack.c.bf16 %v3960_v39, %v3960_v39  ;;  %v10731_v52 = vadd.f32 %v2487_v34, %v10639_v8  ;;  %v1320_v25 = vunpack.c.l.b16 %v992_v32 }
 0x288   :  { %2615 = vmatmul.bf16.gmra.mxu3 %v1312_v33  ;;  %v1300_v47 = vpack.c.b16 %v1296_v42, %v14901_v37  ;;  %v8505_v15 = vpop.eup %8504  ;;  %8506 = vrcp.f32 %v10724_v10  ;;  %v10741_v8 = vand.u32 2147483647, %v10735_v38  ;;  %v14903_v33 = vmov 0 }
 0x289   :  { %v4037_v3 = vshrl.u32 %v3991_v14, 16  ;;  %14902 = vst [vmem:[#allocation62_spill] sm:$0xff] %v10731_v52  ;;  %v4044_v41 = vshrl.u32 %v3992_v31, 16  ;;  %v3766_v43 = vmul.f32 %v8505_v15, %v3606_v22  ;;  %v4040_v39 = vshll.u32 %v3991_v14, 16 }
 0x28a   :  { %2526 = vmatmul.bf16.gmra.mxu2 %v1300_v47  ;;  %v1324_v53 = vpack.c.b16 %v1320_v25, %v1260_v63  ;;  %v4047_v27 = vshll.u32 %v3992_v31, 16  ;;  %v2810_v34 = vmul.f32 0.3275911, %v10741_v8  ;;  %v8736_v14 = vmov 0  }
 0x28b   :  { %v4039_v13 = vrot.slane %v4037_v3, 7  ;;  %v4046_v12 = vrot.slane %v4044_v41, 7  ;;  %v3798_v21 = vsub.f32 1.0, %v3766_v43  ;;  %v4025_v26 = vrot.slane %v8736_v14, 7 }
 0x28c   :  { %2704 = vmatmul.bf16.gmra.mxu0 %v1324_v53  ;;  %v14904_v33 = vsel %vm10750_vm8, 4294967295, %v14903_v33  ;;  %v14906_v51 = vmov 0  ;;  %v10764_v3 = vadd.f32 1.0, %v2810_v34  ;;  %v4358_v43 = vlaneseq }
 0x28d   :  { %v4042_v58 = vor.u32 %v4040_v39, %v4039_v13  ;;  %v4049_v0 = vor.u32 %v4047_v27, %v4046_v12  ;;  %14905 = vst [vmem:[#allocation60_spill] sm:$0xff] %v14904_v33  ;;  %v3862_v63 = vsub.f32 0.0, %v3798_v21  ;;  %v14907_v51 = vsel %vm10760_vm11, 4294967295, %v14906_v51 }
 0x28e   :  { %v10747_v49 = vpop.eup %8506  ;;  %14908 = vst [vmem:[#allocation59_spill] sm:$0xff] %v14907_v51  ;;  %v4289_v50 = vsel %vm10750_vm8, 0, %v4025_v26  ;;  %8508 = vrcp.f32 %v10764_v3  ;;  %v2710_v53 = vmul.f32 0.5, %v10496_v7  ;;  %v10799_v26 = vand.u32 127, %v4358_v43 }
 0x28f   :  { %v4291_v59 = vsel %vm10750_vm8, 0, %v4042_v58  ;;  %v4292_v31 = vsel %vm10750_vm8, 0, %v4049_v0  ;;  %v2916_v42 = vmul.f32 %v10747_v49, %v10724_v10  ;;  %v3894_v44 = vsel %vm3830_vm12, %v3798_v21, %v3862_v63 }
 0x290   :  { %v10770_v37 = vsel %vm10760_vm11, %v4291_v59, 0  ;;  %v10775_v47 = vsel %vm10760_vm11, %v4292_v31, 0  ;;  %v10779_v41 = vsel %vm10760_vm11, %v4289_v50, 0  ;;  %v3926_v25 = vadd.f32 1.0, %v3894_v44 }
 0x291   :  { %v2917_v22 = vsub.f32 1.0, %v2916_v42  ;;  %14909 = vst [vmem:[#allocation64_spill] sm:$0xff] %v10779_v41  ;;  %v4428_v32 = vunpack.c.l.b16 %v10770_v37  ;;  %v4429_v15 = vunpack.c.h.b16 %v10770_v37  ;;  %v4430_v13 = vunpack.c.l.b16 %v10775_v47 }
 0x292   :  { %v4431_v2 = vunpack.c.h.b16 %v10775_v47  ;;  %v4424_v12 = vunpack.c.l.b16 %v10779_v41  ;;  %v3958_v14 = vmul.f32 %v3926_v25, %v2710_v53  ;;  %vm2921_vm13 = vweird.f32 %v10747_v49 }
 0x293   :  { %v2918_v39 = vmul.f32 %v10747_v49, %v2917_v22  ;;  %v10789_v27 = vpack.c.b16 %v4428_v32, %v4428_v32  ;;  %v10791_v58 = vpack.c.b16 %v4429_v15, %v4429_v15  ;;  %v10793_v21 = vpack.c.b16 %v4430_v13, %v4430_v13 }
 0x294   :  { %v10795_v0 = vpack.c.b16 %v4431_v2, %v4431_v2  ;;  %v10797_v34 = vpop.eup %8508  ;;  %v10801_v59 = vpack.c.b16 %v4424_v12, %v4424_v12  ;;  %vm2920_vm14 = vweird.f32 %v10724_v10  ;;  %v2926_v7 = vand.u32 2147483648, %v10724_v10 }
 0x295   :  { %v2919_v63 = vadd.f32 %v10747_v49, %v2918_v39  ;;  %v8028_v31 = vrot.slane %v10789_v27, 9  ;;  %v5136_v42 = vrot.slane %v10791_v58, 5  ;;  %v2924_v50 = vand.u32 2147483647, %v10724_v10  ;;  %vm2922_vm15 = vmor %vm2920_vm14, %vm2921_vm13 }
 0x296   :  { %v2931_v44 = vmul.f32 %v10797_v34, %v10764_v3  ;;  %v8029_v22 = vrot.slane %v10793_v21, 9  ;;  %v5140_v32 = vrot.slane %v10795_v0, 5  ;;  %v3990_v15 = vpack.c.bf16 %v3958_v14, %v3958_v14 }
 0x297   :  { %vm4361_vm0 = vcmp.lt.s32.totalorder %v10799_v26, 16  ;;  %v4425_v13 = vunpack.c.h.b16 %v10779_v41  ;;  %v2923_v2 = vsel %vm2922_vm15, %v10747_v49, %v2919_v63  ;;  %v4541_v25 = vshrl.u32 %v10801_v59, 16 }
 0x298   :  { %v4544_v43 = vshll.u32 %v10801_v59, 16  ;;  %v2927_v10 = vor.u32 1.1754944e-38, %v2926_v7  ;;  %v10821_v12 = vsel %vm9138_vm5, %v8028_v31, %v5136_v42  ;;  %vm2925_vm1 = vcmp.eq.f32.partialorder %v2924_v50, 8.507059e+37  ;;  %vm10827_vm3 = vmpackc.low %vm4361_vm0, %vm4361_vm0 }
 0x299   :  { %v2932_v39 = vsub.f32 1.0, %v2931_v44  ;;  %v10825_v53 = vsel %vm9138_vm5, %v8029_v22, %v5140_v32  ;;  %v4030_v14 = vshrl.u32 %v3990_v15, 16  ;;  %v2554_v63 = vadd.f32 %v10577_v17, %v10546_v60 }
 0x29a   :  { %14910 = vst [vmem:[#allocation58_spill] sm:$0xff] %v10825_v53  ;;  %v10831_v49 = vsel %vm2925_vm1, %v2927_v10, %v2923_v2  ;;  %v6337_v7 = vsel %vm10827_vm3, %v10821_v12, 0  ;;  %v10838_v31 = vpack.c.b16 %v4425_v13, %v4425_v13  ;;  %v4543_v42 = vrot.slane %v4541_v25, 4 }
 0x29b   :  { %v4546_v50 = vrot.slane %v4544_v43, 5  ;;  %v6338_v44 = vsel %vm10827_vm3, %v10825_v53, 0  ;;  %v3353_v22 = vmul.f32 1.0614054, %v10831_v49  ;;  %v2933_v32 = vmul.f32 %v10797_v34, %v2932_v39 }
 0x29c   :  { %v6491_v2 = vunpack.c.l.b16 %v6337_v7  ;;  %v6492_v10 = vunpack.c.l.b16 %v6338_v44  ;;  %v4032_v52 = vrot.slane %v4030_v14, 7  ;;  %v10846_v60 = vadd.f32 %v10588_v24, %v2554_v63 }
 0x29d   :  { %v4033_v40 = vshll.u32 %v3990_v15, 16  ;;  %v4550_v13 = vshll.u32 %v10838_v31, 16  ;;  %v4547_v25 = vor.u32 %v4546_v50, %v4543_v42  ;;  %v3385_v43 = vadd.f32 -1.4531521, %v3353_v22  ;;  %v14914_v22 = vld [vmem:[#allocation82_spill] sm:$0xff] }
 0x29e   :  { %v6520_v17 = vpack.c.b16 %v6492_v10, %v6491_v2  ;;  %v2934_v4 = vadd.f32 %v10797_v34, %v2933_v32  ;;  %vm2936_vm4 = vweird.f32 %v10797_v34  ;;  %v2941_v39 = vand.u32 2147483648, %v10764_v3 }
 0x29f   :  { %v4035_v53 = vor.u32 %v4033_v40, %v4032_v52  ;;  %v10853_v7 = vmul.f32 0.70710677, %v10846_v60  ;;  %vm4975_vm6 = vcmp.ge.s32.totalorder %v10799_v26, 16  ;;  %vm4976_vm7 = vcmp.lt.s32.totalorder %v10799_v26, 32  ;;  %v10861_v52 = vpop.f32.mrf.mxu2 }
 0x2a0   :  { %6781 = vmatmul.bf16.vlgmr.msrb.gmra.mxu2 %v6520_v17  ;;  %vm2935_vm9 = vweird.f32 %v10764_v3  ;;  %v2939_v24 = vand.u32 2147483647, %v10764_v3  ;;  %v4548_v15 = vrot.slane %v4547_v25, 4  ;;  %v4552_v14 = vrot.slane %v4550_v13, 5  ;;  %14913 = vst [vmem:[#allocation66_spill] sm:$0xff] %v10861_v52  ;;  %vm4977_vm12 = vmand %vm4975_vm6, %vm4976_vm7 }
 0x2a1   :  { %vm2937_vm10 = vmor %vm2935_vm9, %vm2936_vm4  ;;  %v3417_v63 = vmul.f32 %v3385_v43, %v10831_v49  ;;  %v4290_v42 = vsel %vm10750_vm8, 0, %v4035_v53  ;;  %v2942_v50 = vor.u32 1.1754944e-38, %v2941_v39  ;;  %v10866_v44 = vand.u32 2147483647, %v10853_v7 }
 0x2a2   :  { %v2938_v40 = vsel %vm2937_vm10, %v10797_v34, %v2934_v4  ;;  %vm2940_vm13 = vcmp.eq.f32.partialorder %v2939_v24, 8.507059e+37  ;;  %v2381_v3 = vadd.f32 %v10534_v48, %v14914_v22  ;;  %v10874_v2 = vsel %vm10760_vm11, %v4290_v42, 0  ;;  %vm10880_vm14 = vmpackc.low %vm4977_vm12, %vm4977_vm12 }
 0x2a3   :  { %v10870_v32 = vsel %vm2940_vm13, %v2942_v50, %v2938_v40  ;;  %v10878_v4 = vsel %vm9101_vm2, %v4548_v15, %v4552_v14  ;;  %v14916_v34 = vmov 0  ;;  %v3449_v53 = vadd.f32 1.4214138, %v3417_v63 }
 0x2a4   :  { %14915 = vst [vmem:[#allocation13_spill] sm:$0xff] %v10878_v4  ;;  %v14917_v34 = vsel %vm10880_vm14, 4294967295, %v14916_v34  ;;  %v2470_v10 = vadd.f32 %v10583_v45, %v2381_v3  ;;  %v2811_v17 = vmul.f32 0.3275911, %v10866_v44  ;;  %v3354_v48 = vmul.f32 1.0614054, %v10870_v32 }
 0x2a5   :  { %14918 = vst [vmem:[#allocation69_spill] sm:$0xff] %v14917_v34  ;;  %v4366_v13 = vsel %vm10827_vm3, %v10779_v41, 0  ;;  %v4426_v25 = vunpack.c.l.b16 %v10874_v2  ;;  %v4981_v43 = vsel %vm10880_vm14, %v10878_v4, 0  ;;  %v3481_v39 = vmul.f32 %v3449_v53, %v10831_v49 }
 0x2a6   :  { %v2559_v24 = vadd.f32 %v10726_v29, %v2470_v10  ;;  %v3641_v45 = vsub.f32 0.0, %v10711_v18  ;;  %v10897_v15 = vadd.f32 1.0, %v2811_v17  ;;  %v5010_v14 = vunpack.c.l.bf16 %v4366_v13 }
 0x2a7   :  { %v5039_v63 = vunpack.c.l.bf16 %v4981_v43  ;;  %vm5271_vm15 = vcmp.ge.s32.totalorder %v10799_v26, 32  ;;  %v3386_v40 = vadd.f32 -1.4531521, %v3354_v48  ;;  %v2492_v42 = vpop.f32.mrf.mxu2  ;;  %v10900_v50 = vpack.c.b16 %v4426_v25, %v4426_v25 }
 0x2a8   :  { %vm5272_vm0 = vcmp.lt.s32.totalorder %v10799_v26, 48  ;;  %v10904_v22 = vmul.f32 0.70710677, %v10602_v11  ;;  %v10907_v3 = vadd.f32 %v2492_v42, %v10720_v54  ;;  %v3513_v29 = vadd.f32 -0.28449672, %v3481_v39 }
 0x2a9   :  { %v10910_v53 = vadd.f32 %v10745_v16, %v2559_v24  ;;  %v8026_v10 = vrot.slane %v10801_v59, 9  ;;  %v5128_v17 = vrot.slane %v10838_v31, 5  ;;  %v3673_v48 = vmul.f32 %v3641_v45, %v10711_v18  ;;  %vm5273_vm1 = vmand %vm5271_vm15, %vm5272_vm0  ;;  %v2561_v16 = vpop.f32.mrf.mxu3 }
 0x2aa   :  { %14919 = vst [vmem:[#allocation68_spill] sm:$0xff] %v10907_v3  ;;  %8510 = vrcp.f32 %v10897_v15  ;;  %v3418_v13 = vmul.f32 %v3386_v40, %v10870_v32  ;;  %v4555_v25 = vshrl.u32 %v10900_v50, 16  ;;  %v4558_v54 = vshll.u32 %v10900_v50, 16  ;;  %vm10932_vm4 = vmpackc.low %vm5273_vm1, %vm5273_vm1 }
 0x2ab   :  { %14920 = vst [vmem:[#allocation73_spill] sm:$0xff] %v10910_v53  ;;  %v5068_v43 = vadd.f32 %v5039_v63, %v5010_v14  ;;  %v10920_v39 = vand.u32 2147483647, %v10904_v22  ;;  %v3545_v59 = vmul.f32 %v3513_v29, %v10831_v49  ;;  %v10924_v31 = vmul.f32 0.70710677, %v10910_v53 }
 0x2ac   :  { %v2562_v18 = vadd.f32 %v2561_v16, %v10609_v57  ;;  %v4427_v24 = vunpack.c.h.b16 %v10874_v2  ;;  %v10930_v45 = vsel %vm9138_vm5, %v8026_v10, %v5128_v17  ;;  %v14922_v40 = vmov 0  ;;  %v2650_v57 = vpop.f32.mrf.mxu0 }
 0x2ad   :  { %14921 = vst [vmem:[#allocation70_spill] sm:$0xff] %v10930_v45  ;;  %v14923_v40 = vsel %vm10932_vm4, 4294967295, %v14922_v40  ;;  %v3708_v14 = vmul.f32 1.442695, %v3673_v48  ;;  %v3450_v63 = vadd.f32 1.4214138, %v3418_v13  ;;  %v5097_v41 = vpack.c.bf16 %v5068_v43, %v5068_v43 }
 0x2ae   :  { %14924 = vst [vmem:[#allocation67_spill] sm:$0xff] %v14923_v40  ;;  %v4557_v29 = vrot.slane %v4555_v25, 4  ;;  %v4560_v4 = vrot.slane %v4558_v54, 5  ;;  %v2812_v3 = vmul.f32 0.3275911, %v10920_v39  ;;  %v5277_v16 = vsel %vm10932_vm4, %v10930_v45, 0 }
 0x2af   :  { %v3577_v10 = vadd.f32 0.2548296, %v3545_v59  ;;  %v10943_v17 = vand.u32 2147483647, %v10924_v31  ;;  %v10945_v52 = vadd.f32 %v2650_v57, %v2562_v18  ;;  %v10947_v48 = vpack.c.b16 %v4427_v24, %v4427_v24  ;;  %v14926_v43 = vld [vmem:[#allocation26_spill] sm:$0xff] }
 0x2b0   :  { %v10936_v42 = vpop.eup %8510  ;;  %8512 = vpow2.f32 %v3708_v14  ;;  %v3642_v13 = vsub.f32 0.0, %v10741_v8  ;;  %v3482_v25 = vmul.f32 %v3450_v63, %v10870_v32  ;;  %v2386_v20 = vadd.f32 %v10590_v62, %v14926_v43 }
 0x2b1   :  { %14925 = vst [vmem:[#allocation16_spill] sm:$0xff] %v10945_v52  ;;  %v2946_v54 = vmul.f32 %v10936_v42, %v10897_v15  ;;  %v4561_v45 = vor.u32 %v4560_v4, %v4557_v29  ;;  %v5306_v59 = vunpack.c.l.bf16 %v5097_v41  ;;  %v5335_v30 = vunpack.c.l.bf16 %v5277_v16 }
 0x2b2   :  { %v10955_v36 = vadd.f32 1.0, %v2812_v3  ;;  %v3609_v18 = vmul.f32 %v3577_v10, %v10831_v49  ;;  %v2813_v24 = vmul.f32 0.3275911, %v10943_v17  ;;  %v10960_v14 = vmul.f32 0.70710677, %v10945_v52  ;;  %v2563_v49 = vpop.f32.mrf.mxu3 }
 0x2b3   :  { %v2475_v63 = vadd.f32 %v10611_v61, %v2386_v20  ;;  %v4564_v57 = vshll.u32 %v10947_v48, 16  ;;  %vm5422_vm6 = vcmp.ge.s32.totalorder %v10799_v26, 48  ;;  %vm5423_vm7 = vcmp.lt.s32.totalorder %v10799_v26, 64 }
 0x2b4   :  { %14927 = vst [vmem:[#allocation72_spill] sm:$0xff] %v10960_v14  ;;  %v3674_v62 = vmul.f32 %v3642_v13, %v10741_v8  ;;  %v3514_v41 = vadd.f32 -0.28449672, %v3482_v25  ;;  %v2947_v4 = vsub.f32 1.0, %v2946_v54  ;;  %v4562_v29 = vrot.slane %v4561_v45, 4  ;;  %vm5424_vm9 = vmand %vm5422_vm6, %vm5423_vm7  ;;  %v2652_v54 = vpop.f32.mrf.mxu0 }
 0x2b5   :  { %8514 = vrcp.f32 %v10955_v36  ;;  %v10968_v10 = vadd.f32 1.0, %v2813_v24  ;;  %v10971_v61 = vand.u32 2147483647, %v10960_v14  ;;  %v2564_v20 = vadd.f32 %v2563_v49, %v2475_v63  ;;  %vm10979_vm10 = vmpackc.low %vm5424_vm9, %vm5424_vm9 }
 0x2b6   :  { %v8513_v3 = vpop.eup %8512  ;;  %v4566_v43 = vrot.slane %v4564_v57, 5  ;;  %v5364_v52 = vadd.f32 %v5335_v30, %v5306_v59  ;;  %v3710_v53 = vmul.f32 1.442695, %v3674_v62  ;;  %v3546_v8 = vmul.f32 %v3514_v41, %v10870_v32 }
 0x2b7   :  { %v3769_v16 = vmul.f32 %v8513_v3, %v3609_v18  ;;  %v2948_v13 = vmul.f32 %v10936_v42, %v2947_v4  ;;  %v14928_v25 = vmov 0  ;;  %8516 = vrcp.f32 %v10968_v10 }
 0x2b8   :  { %v10977_v45 = vsel %vm9101_vm2, %v4562_v29, %v4566_v43  ;;  %v14929_v25 = vsel %vm10979_vm10, 4294967295, %v14928_v25  ;;  %v2814_v24 = vmul.f32 0.3275911, %v10971_v61  ;;  %v10985_v30 = vadd.f32 %v2652_v54, %v2564_v20 }
 0x2b9   :  { %14930 = vst [vmem:[#allocation78_spill] sm:$0xff] %v14929_v25  ;;  %v3801_v18 = vsub.f32 1.0, %v3769_v16  ;;  %v5393_v63 = vpack.c.bf16 %v5364_v52, %v5364_v52  ;;  %8518 = vpow2.f32 %v3710_v53  ;;  %v5428_v57 = vsel %vm10979_vm10, %v10874_v2, 0 }
 0x2ba   :  { %14931 = vst [vmem:[#allocation71_spill] sm:$0xff] %v10985_v30  ;;  %v3578_v62 = vadd.f32 0.2548296, %v3546_v8  ;;  %v2949_v41 = vadd.f32 %v10936_v42, %v2948_v13  ;;  %vm2951_vm12 = vweird.f32 %v10936_v42  ;;  %v4982_v4 = vsel %vm10880_vm14, %v10977_v45, 0 }
 0x2bb   :  { %v10987_v59 = vpop.eup %8514  ;;  %vm2950_vm13 = vweird.f32 %v10897_v15  ;;  %v2954_v3 = vand.u32 2147483647, %v10897_v15  ;;  %v2956_v52 = vand.u32 2147483648, %v10897_v15  ;;  %v3865_v53 = vsub.f32 0.0, %v3801_v18 }
 0x2bc   :  { %v2961_v29 = vmul.f32 %v10987_v59, %v10955_v36  ;;  %v11002_v49 = vadd.f32 1.0, %v2814_v24  ;;  %v11005_v16 = vmul.f32 0.70710677, %v10985_v30  ;;  %v11007_v20 = vunpack.c.l.bf16 %v5393_v63  ;;  %vm11009_vm15 = vmor %vm2950_vm13, %vm2951_vm12 }
 0x2bd   :  { %v5489_v43 = vunpack.c.l.bf16 %v5428_v57  ;;  %v11013_v13 = vpop.eup %8516  ;;  %v4367_v15 = vsel %vm10827_vm3, %v10874_v2, 0  ;;  %vm3833_vm0 = vcmp.ge.f32.partialorder %v10703_v23, 0.0  ;;  %v3610_v54 = vmul.f32 %v3578_v62, %v10870_v32 }
 0x2be   :  { %14932 = vst [vmem:[#allocation74_spill] sm:$0xff] %v11007_v20  ;;  %v2953_v24 = vsel %vm11009_vm15, %v10936_v42, %v2949_v41  ;;  %v5040_v57 = vunpack.c.l.bf16 %v4982_v4  ;;  %vm2955_vm1 = vcmp.eq.f32.partialorder %v2954_v3, 8.507059e+37  ;;  %v2957_v34 = vor.u32 1.1754944e-38, %v2956_v52 }
 0x2bf   :  { %v8519_v63 = vpop.eup %8518  ;;  %v3643_v30 = vsub.f32 0.0, %v10866_v44  ;;  %v3897_v11 = vsel %vm3833_vm0, %v3801_v18, %v3865_v53  ;;  %v2962_v14 = vsub.f32 1.0, %v2961_v29  ;;  %8520 = vrcp.f32 %v11002_v49 }
 0x2c0   :  { %v11026_v2 = vand.u32 2147483647, %v11005_v16  ;;  %v5011_v23 = vunpack.c.l.bf16 %v4367_v15  ;;  %v5521_v32 = vadd.f32 %v5489_v43, %v11007_v20  ;;  %v11029_v62 = vsel %vm2955_vm1, %v2957_v34, %v2953_v24 }
 0x2c1   :  { %v2976_v42 = vmul.f32 %v11013_v13, %v10968_v10  ;;  %v3770_v41 = vmul.f32 %v8519_v63, %v3610_v54  ;;  %v3929_v3 = vadd.f32 1.0, %v3897_v11  ;;  %v3675_v52 = vmul.f32 %v3643_v30, %v10866_v44 }
 0x2c2   :  { %v5069_v4 = vadd.f32 %v5040_v57, %v5011_v23  ;;  %v3355_v18 = vmul.f32 1.0614054, %v11029_v62  ;;  %v2963_v53 = vmul.f32 %v10987_v59, %v2962_v14  ;;  %v2815_v29 = vmul.f32 0.3275911, %v11026_v2 }
 0x2c3   :  { %v5553_v8 = vpack.c.bf16 %v5521_v32, %v5521_v32  ;;  %v2713_v15 = vmul.f32 0.5, %v10694_v6  ;;  %v11039_v34 = vmul.f32 0.5, %v10542_v5  ;;  %v2977_v43 = vsub.f32 1.0, %v2976_v42 }
 0x2c4   :  { %v8027_v54 = vrot.slane %v10900_v50, 9  ;;  %v5132_v11 = vrot.slane %v10947_v48, 5  ;;  %v3802_v44 = vsub.f32 1.0, %v3770_v41  ;;  %vm3834_vm6 = vcmp.ge.f32.partialorder %v10735_v38, 0.0 }
 0x2c5   :  { %v11041_v24 = vpop.eup %8520  ;;  %v5098_v30 = vpack.c.bf16 %v5069_v4, %v5069_v4  ;;  %v5429_v14 = vsel %vm10979_vm10, %v10770_v37, 0  ;;  %v3961_v63 = vmul.f32 %v3929_v3, %v2713_v15  ;;  %v3712_v6 = vmul.f32 1.442695, %v3675_v52 }
 0x2c6   :  { %v3387_v57 = vadd.f32 -1.4531521, %v3355_v18  ;;  %v2964_v5 = vadd.f32 %v10987_v59, %v2963_v53  ;;  %vm2966_vm7 = vweird.f32 %v10987_v59  ;;  %v11051_v23 = vadd.f32 1.0, %v2815_v29 }
 0x2c7   :  { %v11053_v50 = vunpack.c.l.bf16 %v5553_v8  ;;  %v2971_v48 = vand.u32 2147483648, %v10955_v36  ;;  %v2978_v32 = vmul.f32 %v11013_v13, %v2977_v43  ;;  %v2991_v42 = vmul.f32 %v11041_v24, %v11002_v49 }
 0x2c8   :  { %v11059_v41 = vunpack.c.l.bf16 %v5429_v14  ;;  %v3866_v4 = vsub.f32 0.0, %v3802_v44  ;;  %vm2965_vm9 = vweird.f32 %v10955_v36  ;;  %v2969_v3 = vand.u32 2147483647, %v10955_v36 }
 0x2c9   :  { %v5307_v52 = vunpack.c.l.bf16 %v5098_v30  ;;  %v11063_v18 = vpack.c.bf16 %v3961_v63, %v3961_v63  ;;  %8522 = vpow2.f32 %v3712_v6  ;;  %vm11065_vm12 = vmor %vm2965_vm9, %vm2966_vm7  ;;  %v3419_v8 = vmul.f32 %v3387_v57, %v11029_v62  ;;  %v2566_v63 = vpop.f32.mrf.mxu3 }
 0x2ca   :  { %v2968_v15 = vsel %vm11065_vm12, %v10987_v59, %v2964_v5  ;;  %v2984_v43 = vand.u32 2147483647, %v10968_v10  ;;  %8524 = vrcp.f32 %v11051_v23  ;;  %v2972_v36 = vor.u32 1.1754944e-38, %v2971_v48 }
 0x2cb   :  { %v2979_v30 = vadd.f32 %v11013_v13, %v2978_v32  ;;  %vm2981_vm13 = vweird.f32 %v11013_v13  ;;  %v2992_v14 = vsub.f32 1.0, %v2991_v42  ;;  %v11080_v6 = vsel %vm3834_vm6, %v3802_v44, %v3866_v4  ;;  %v2655_v44 = vpop.f32.mrf.mxu0 }
 0x2cc   :  { %vm2970_vm15 = vcmp.eq.f32.partialorder %v2969_v3, 8.507059e+37  ;;  %v2986_v57 = vand.u32 2147483648, %v10968_v10  ;;  %v2567_v59 = vadd.f32 %v2566_v63, %v10629_v55  ;;  %vm2980_vm0 = vweird.f32 %v10968_v10 }
 0x2cd   :  { %v11084_v5 = vsel %vm2970_vm15, %v2972_v36, %v2968_v15  ;;  %v4569_v48 = vshrl.u32 %v10789_v27, 16  ;;  %v4572_v32 = vshll.u32 %v10789_v27, 16  ;;  %v3451_v53 = vadd.f32 1.4214138, %v3419_v8  ;;  %vm11089_vm1 = vmor %vm2980_vm0, %vm2981_vm13 }
 0x2ce   :  { %vm11093_vm6 = vcmp.eq.f32.partialorder %v2984_v43, 8.507059e+37  ;;  %vm5851_vm7 = vcmp.ge.s32.totalorder %v10799_v26, 80  ;;  %vm5852_vm9 = vcmp.lt.s32.totalorder %v10799_v26, 96  ;;  %v2983_v10 = vsel %vm11089_vm1, %v11013_v13, %v2979_v30 }
 0x2cf   :  { %v11099_v55 = vpop.eup %8522  ;;  %v2993_v27 = vmul.f32 %v11041_v24, %v2992_v14  ;;  %v4571_v4 = vrot.slane %v4569_v48, 4  ;;  %v4574_v3 = vrot.slane %v4572_v32, 5  ;;  %v3356_v15 = vmul.f32 1.0614054, %v11084_v5  ;;  %vm11112_vm12 = vmand %vm5851_vm7, %vm5852_vm9 }
 0x2d0   :  { %v11105_v8 = vpop.eup %8524  ;;  %v2987_v43 = vor.u32 1.1754944e-38, %v2986_v57  ;;  %v11108_v36 = vadd.f32 %v2655_v44, %v2567_v59  ;;  %v5133_v63 = vsel %vm9138_vm5, %v8027_v54, %v5132_v11  ;;  %vm5665_vm13 = vcmp.ge.s32.totalorder %v10799_v26, 64 }
 0x2d1   :  { %v4575_v13 = vor.u32 %v4574_v3, %v4571_v4  ;;  %v5278_v30 = vsel %vm10932_vm4, %v5133_v63, 0  ;;  %vm5666_vm15 = vcmp.lt.s32.totalorder %v10799_v26, 80  ;;  %vm2995_vm0 = vweird.f32 %v11002_v49 }
 0x2d2   :  { %v11122_v14 = vsel %vm11093_vm6, %v2987_v43, %v2983_v10  ;;  %v4578_v54 = vshll.u32 %v10791_v58, 16  ;;  %v5336_v11 = vunpack.c.l.bf16 %v5278_v30  ;;  %vm5667_vm1 = vmand %vm5665_vm13, %vm5666_vm15  ;;  %v2994_v57 = vadd.f32 %v11041_v24, %v2993_v27 }
 0x2d3   :  { %vm2996_vm7 = vweird.f32 %v11041_v24  ;;  %v3001_v59 = vand.u32 2147483648, %v11002_v49  ;;  %v3006_v48 = vmul.f32 %v11105_v8, %v11051_v23  ;;  %vm11131_vm9 = vmpackc.low %vm5667_vm1, %vm5667_vm1  ;;  %v14943_v32 = vmov 0 }
 0x2d4   :  { %v14944_v32 = vsel %vm11131_vm9, 4294967295, %v14943_v32  ;;  %v11136_v42 = vmul.f32 0.70710677, %v11108_v36  ;;  %v4576_v38 = vrot.slane %v4575_v13, 4  ;;  %v5365_v58 = vadd.f32 %v5336_v11, %v5307_v52  ;;  %vm11145_vm6 = vmpackc.low %vm11112_vm12, %vm11112_vm12 }
 0x2d5   :  { %14945 = vst [vmem:[#allocation47_spill] sm:$0xff] %v14944_v32  ;;  %v5671_v10 = vsel %vm11131_vm9, %v10977_v45, 0  ;;  %v2999_v27 = vand.u32 2147483647, %v11002_v49  ;;  %v14947_v44 = vmov 0  ;;  %vm6017_vm13 = vcmp.ge.s32.totalorder %v10799_v26, 96  ;;  %vm11157_vm1 = vmor %vm2995_vm0, %vm2996_vm7 }
 0x2d6   :  { %14946 = vst [vmem:[#allocation77_spill] sm:$0xff] %v11136_v42  ;;  %v14948_v44 = vsel %vm11145_vm6, 4294967295, %v14947_v44  ;;  %v5735_v4 = vunpack.c.l.bf16 %v5671_v10  ;;  %vm6018_vm15 = vcmp.lt.s32.totalorder %v10799_v26, 112  ;;  %v3483_v52 = vmul.f32 %v3451_v53, %v11029_v62 }
 0x2d7   :  { %14949 = vst [vmem:[#allocation79_spill] sm:$0xff] %v14948_v44  ;;  %v3357_v3 = vmul.f32 1.0614054, %v11122_v14  ;;  %v4580_v29 = vrot.slane %v4578_v54, 5  ;;  %v5394_v43 = vpack.c.bf16 %v5365_v58, %v5365_v58  ;;  %v2998_v13 = vsel %vm11157_vm1, %v11041_v24, %v2994_v57  ;;  %vm6019_vm12 = vmand %vm6017_vm13, %vm6018_vm15 }
 0x2d8   :  { %v3002_v30 = vor.u32 1.1754944e-38, %v3001_v59  ;;  %v3007_v11 = vsub.f32 1.0, %v3006_v48  ;;  %v5767_v53 = vadd.f32 %v5735_v4, %v11053_v50  ;;  %v11166_v10 = vand.u32 2147483647, %v11136_v42  ;;  %vm11186_vm7 = vmpackc.low %vm6019_vm12, %vm6019_vm12 }
 0x2d9   :  { %v11170_v49 = vsel %vm9101_vm2, %v4576_v38, %v4580_v29  ;;  %v5461_v20 = vunpack.c.l.bf16 %v5394_v43  ;;  %v5857_v54 = vsel %vm11145_vm6, %v5133_v63, 0  ;;  %v3388_v58 = vadd.f32 -1.4531521, %v3356_v15 }
 0x2da   :  { %vm3000_vm0 = vcmp.eq.f32.partialorder %v2999_v27, 8.507059e+37  ;;  %v4583_v24 = vshrl.u32 %v10793_v21, 16  ;;  %v5799_v57 = vpack.c.bf16 %v5767_v53, %v5767_v53  ;;  %v3930_v50 = vadd.f32 1.0, %v11080_v6 }
 0x2db   :  { %v11178_v59 = vsel %vm3000_vm0, %v3002_v30, %v2998_v13  ;;  %v4586_v48 = vshll.u32 %v10793_v21, 16  ;;  %v5522_v38 = vadd.f32 %v11059_v41, %v5461_v20  ;;  %v3008_v4 = vmul.f32 %v11105_v8, %v3007_v11 }
 0x2dc   :  { %v5672_v63 = vsel %vm11131_vm9, %v11170_v49, 0  ;;  %v5889_v45 = vunpack.c.l.bf16 %v5799_v57  ;;  %v5921_v15 = vunpack.c.l.bf16 %v5857_v54  ;;  %v14952_v27 = vmov 0 }
 0x2dd   :  { %v14953_v27 = vsel %vm11186_vm7, 4294967295, %v14952_v27  ;;  %v3515_v29 = vadd.f32 -0.28449672, %v3483_v52  ;;  %v3389_v6 = vadd.f32 -1.4531521, %v3357_v3  ;;  %v5554_v13 = vpack.c.bf16 %v5522_v38, %v5522_v38 }
 0x2de   :  { %14954 = vst [vmem:[#allocation76_spill] sm:$0xff] %v14953_v27  ;;  %v2816_v43 = vmul.f32 0.3275911, %v11166_v10  ;;  %v3420_v21 = vmul.f32 %v3388_v58, %v11084_v5  ;;  %v3358_v20 = vmul.f32 1.0614054, %v11178_v59  ;;  %v4585_v41 = vrot.slane %v4583_v24, 4 }
 0x2df   :  { %v5953_v30 = vadd.f32 %v5921_v15, %v5889_v45  ;;  %v4588_v11 = vrot.slane %v4586_v48, 5  ;;  %v5704_v53 = vunpack.c.l.bf16 %v5554_v13  ;;  %v5736_v32 = vunpack.c.l.bf16 %v5672_v63 }
 0x2e0   :  { %v6023_v54 = vsel %vm11186_vm7, %v10770_v37, 0  ;;  %v3009_v57 = vadd.f32 %v11105_v8, %v3008_v4  ;;  %vm3011_vm13 = vweird.f32 %v11105_v8  ;;  %v3016_v52 = vand.u32 2147483648, %v11051_v23 }
 0x2e1   :  { %v5985_v3 = vpack.c.bf16 %v5953_v30, %v5953_v30  ;;  %vm3010_vm15 = vweird.f32 %v11051_v23  ;;  %v3014_v58 = vand.u32 2147483647, %v11051_v23  ;;  %v11201_v24 = vadd.f32 1.0, %v2816_v43 }
 0x2e2   :  { %v5768_v48 = vadd.f32 %v5736_v32, %v5704_v53  ;;  %v3390_v38 = vadd.f32 -1.4531521, %v3358_v20  ;;  %v5858_v63 = vsel %vm11145_vm6, %v10821_v12, 0  ;;  %v6084_v15 = vunpack.c.l.bf16 %v6023_v54  ;;  %vm11207_vm1 = vmor %vm3010_vm15, %vm3011_vm13 }
 0x2e3   :  { %v6052_v45 = vunpack.c.l.bf16 %v5985_v3  ;;  %v3452_v4 = vadd.f32 1.4214138, %v3420_v21  ;;  %v3421_v13 = vmul.f32 %v3389_v6, %v11122_v14  ;;  %v4589_v30 = vor.u32 %v4588_v11, %v4585_v41  ;;  %v14961_v3 = vld [vmem:[#allocation45_spill] sm:$0xff] }
 0x2e4   :  { %v5800_v25 = vpack.c.bf16 %v5768_v48, %v5768_v48  ;;  %v3013_v23 = vsel %vm11207_vm1, %v11105_v8, %v3009_v57  ;;  %v3017_v32 = vor.u32 1.1754944e-38, %v3016_v52  ;;  %vm6177_vm12 = vcmp.ge.s32.totalorder %v10799_v26, 112 }
 0x2e5   :  { %v6113_v43 = vadd.f32 %v6084_v15, %v6052_v45  ;;  %8526 = vrcp.f32 %v11201_v24  ;;  %v5922_v20 = vunpack.c.l.bf16 %v5858_v63  ;;  %v4592_v21 = vshll.u32 %v10795_v0, 16  ;;  %vm11224_vm13 = vmpackc.low %vm6177_vm12, %vm6177_vm12 }
 0x2e6   :  { %v5890_v6 = vunpack.c.l.bf16 %v5800_v25  ;;  %v4051_v53 = vshrl.u32 %v11063_v18, 16  ;;  %v14957_v41 = vsub.f32 0.0, %v10920_v39  ;;  %v3422_v54 = vmul.f32 %v3390_v38, %v11178_v59 }
 0x2e7   :  { %vm3015_vm0 = vcmp.eq.f32.partialorder %v3014_v58, 8.507059e+37  ;;  %v4590_v42 = vrot.slane %v4589_v30, 4  ;;  %v6145_v26 = vpack.c.bf16 %v6113_v43, %v6113_v43  ;;  %v14958_v52 = vmov 0 }
 0x2e8   :  { %v3676_v11 = vmul.f32 %v14957_v41, %v10920_v39  ;;  %v11222_v8 = vsel %vm3015_vm0, %v3017_v32, %v3013_v23  ;;  %v5954_v57 = vadd.f32 %v5922_v20, %v5890_v6  ;;  %v14959_v52 = vsel %vm11224_vm13, 4294967295, %v14958_v52  ;;  %v2568_v41 = vpop.f32.mrf.mxu3 }
 0x2e9   :  { %14960 = vst [vmem:[#allocation20_spill] sm:$0xff] %v14959_v52  ;;  %v3962_v0 = vmul.f32 %v3930_v50, %v11039_v34  ;;  %v3453_v25 = vadd.f32 1.4214138, %v3421_v13  ;;  %v2391_v48 = vadd.f32 %v10613_v35, %v14961_v3  ;;  %v6024_v39 = vsel %vm11186_vm7, %v10775_v47, 0 }
 0x2ea   :  { %v3547_v58 = vmul.f32 %v3515_v29, %v11029_v62  ;;  %v3484_v38 = vmul.f32 %v3452_v4, %v11084_v5  ;;  %v4594_v63 = vrot.slane %v4592_v21, 5  ;;  %v5986_v45 = vpack.c.bf16 %v5954_v57, %v5954_v57 }
 0x2eb   :  { %v3454_v15 = vadd.f32 1.4214138, %v3422_v54  ;;  %v3359_v30 = vmul.f32 1.0614054, %v11222_v8  ;;  %v2480_v23 = vadd.f32 %v10641_v46, %v2391_v48  ;;  %v6183_v34 = vsel %vm11224_vm13, %v11170_v49, 0  ;;  %v11241_v35 = vpop.eup %8526 }
 0x2ec   :  { %v11245_v50 = vsel %vm9101_vm2, %v4590_v42, %v4594_v63  ;;  %v6053_v29 = vunpack.c.l.bf16 %v5986_v45  ;;  %v6085_v13 = vunpack.c.l.bf16 %v6024_v39  ;;  %v6212_v4 = vunpack.c.l.bf16 %v6145_v26 }
 0x2ed   :  { %v4054_v32 = vshll.u32 %v11063_v18, 16  ;;  %v3994_v43 = vpack.c.bf16 %v3962_v0, %v3962_v0  ;;  %v3485_v20 = vmul.f32 %v3453_v25, %v11122_v14  ;;  %v3645_v46 = vsub.f32 0.0, %v10943_v17 }
 0x2ee   :  { %v3579_v21 = vadd.f32 0.2548296, %v3547_v58  ;;  %v3516_v6 = vadd.f32 -0.28449672, %v3484_v38  ;;  %v6114_v54 = vadd.f32 %v6085_v13, %v6053_v29  ;;  %v6244_v57 = vunpack.c.l.bf16 %v6183_v34 }
 0x2ef   :  { %v3391_v3 = vadd.f32 -1.4531521, %v3359_v30  ;;  %v3021_v42 = vmul.f32 %v11241_v35, %v11201_v24  ;;  %v2569_v48 = vadd.f32 %v2568_v41, %v2480_v23  ;;  %v6184_v26 = vsel %vm11224_vm13, %v11245_v50, 0  ;;  %v2657_v23 = vpop.f32.mrf.mxu0 }
 0x2f0   :  { %v3714_v18 = vmul.f32 1.442695, %v3676_v11  ;;  %v3486_v0 = vmul.f32 %v3454_v15, %v11178_v59  ;;  %v6146_v25 = vpack.c.bf16 %v6114_v54, %v6114_v54  ;;  %v6273_v39 = vadd.f32 %v6244_v57, %v6212_v4 }
 0x2f1   :  { %v4058_v63 = vshrl.u32 %v3994_v43, 16  ;;  %v3517_v58 = vadd.f32 -0.28449672, %v3485_v20  ;;  %v3677_v38 = vmul.f32 %v3645_v46, %v10943_v17  ;;  %v3646_v45 = vsub.f32 0.0, %v10971_v61 }
 0x2f2   :  { %v3611_v30 = vmul.f32 %v3579_v21, %v11029_v62  ;;  %v3548_v34 = vmul.f32 %v3516_v6, %v11084_v5  ;;  %v6213_v29 = vunpack.c.l.bf16 %v6146_v25  ;;  %v6245_v13 = vunpack.c.l.bf16 %v6184_v26 }
 0x2f3   :  { %v4053_v41 = vrot.slane %v4051_v53, 7  ;;  %v3423_v11 = vmul.f32 %v3391_v3, %v11222_v8  ;;  %v3022_v52 = vsub.f32 1.0, %v3021_v42  ;;  %v11261_v15 = vadd.f32 %v2657_v23, %v2569_v48 }
 0x2f4   :  { %8528 = vpow2.f32 %v3714_v18  ;;  %v3518_v4 = vadd.f32 -0.28449672, %v3486_v0  ;;  %v6274_v20 = vadd.f32 %v6245_v13, %v6213_v29  ;;  %v6305_v54 = vpack.c.bf16 %v6273_v39, %v6273_v39  ;;  %v11272_v39 = vpop.f32.mrf.mxu1  ;;  %v11282_v13 = vpop.f32.mrf.mxu2 }
 0x2f5   :  { %14962 = vst [vmem:[#allocation12_spill] sm:$0xff] %v11261_v15  ;;  %v4060_v17 = vrot.slane %v4058_v63, 7  ;;  %v3549_v46 = vmul.f32 %v3517_v58, %v11122_v14  ;;  %v3716_v57 = vmul.f32 1.442695, %v3677_v38  ;;  %v3678_v62 = vmul.f32 %v3646_v45, %v10971_v61 }
 0x2f6   :  { %v3771_v21 = vmul.f32 %v11099_v55, %v3611_v30  ;;  %v3580_v6 = vadd.f32 0.2548296, %v3548_v34  ;;  %v3647_v53 = vsub.f32 0.0, %v11026_v2  ;;  %v6306_v26 = vpack.c.bf16 %v6274_v20, %v6274_v20  ;;  %14964 = vst [vmem:[#allocation75_spill] sm:$0xff] %v11272_v39 }
 0x2f7   :  { %v4061_v3 = vshll.u32 %v3994_v43, 16  ;;  %v3455_v42 = vadd.f32 1.4214138, %v3423_v11  ;;  %v3023_v48 = vmul.f32 %v11241_v35, %v3022_v52  ;;  %v11269_v18 = vmul.f32 0.70710677, %v11261_v15  ;;  %14965 = vst [vmem:[#allocation80_spill] sm:$0xff] %v11282_v13 }
 0x2f8   :  { %v4056_v0 = vor.u32 %v4054_v32, %v4053_v41  ;;  %v3550_v25 = vmul.f32 %v3518_v4, %v11178_v59  ;;  %v6398_v63 = vunpack.c.l.b16 %v6305_v54  ;;  %v6399_v61 = vunpack.c.l.b16 %v6306_v26 }
 0x2f9   :  { %14963 = vst [vmem:[#allocation14_spill] sm:$0xff] %v11269_v18  ;;  %v4063_v58 = vor.u32 %v4061_v3, %v4060_v17  ;;  %v3581_v55 = vadd.f32 0.2548296, %v3549_v46  ;;  %8530 = vpow2.f32 %v3716_v57  ;;  %v3718_v38 = vmul.f32 1.442695, %v3678_v62 }
 0x2fa   :  { %v8529_v45 = vpop.eup %8528  ;;  %v3803_v30 = vsub.f32 1.0, %v3771_v21  ;;  %v3612_v43 = vmul.f32 %v3580_v6, %v11084_v5  ;;  %v3679_v52 = vmul.f32 %v3647_v53, %v11026_v2  ;;  %v6430_v34 = vpack.c.b16 %v6399_v61, %v6398_v63 }
 0x2fb   :  { %v3487_v23 = vmul.f32 %v3455_v42, %v11222_v8  ;;  %v3024_v32 = vadd.f32 %v11241_v35, %v3023_v48  ;;  %vm3026_vm15 = vweird.f32 %v11241_v35  ;;  %v11280_v29 = vand.u32 2147483647, %v11269_v18 }
 0x2fc   :  { %v3582_v41 = vadd.f32 0.2548296, %v3550_v25  ;;  %v3031_v11 = vand.u32 2147483648, %v11201_v24  ;;  %6692 = vmatmul.bf16.vlgmr.msrb.gmra.mxu1 %v6430_v34  ;;  %v3613_v5 = vmul.f32 %v3581_v55, %v11122_v14  ;;  %8532 = vpow2.f32 %v3718_v38 }
 0x2fd   :  { %vm3025_vm1 = vweird.f32 %v11201_v24  ;;  %v3029_v2 = vand.u32 2147483647, %v11201_v24  ;;  %v4293_v4 = vsel %vm10750_vm8, 0, %v4056_v0  ;;  %v4294_v20 = vsel %vm10750_vm8, 0, %v4063_v58 }
 0x2fe   :  { %v3867_v54 = vsub.f32 0.0, %v3803_v30  ;;  %v3772_v17 = vmul.f32 %v8529_v45, %v3612_v43  ;;  %vm3027_vm12 = vmor %vm3025_vm1, %vm3026_vm15  ;;  %v3519_v57 = vadd.f32 -0.28449672, %v3487_v23  ;;  %v3720_v62 = vmul.f32 1.442695, %v3679_v52  ;;  %v2497_v23 = vpop.f32.mrf.mxu2 }
 0x2ff   :  { %v8531_v46 = vpop.eup %8530  ;;  %v3028_v21 = vsel %vm3027_vm12, %v11241_v35, %v3024_v32  ;;  %v2817_v14 = vmul.f32 0.3275911, %v11280_v29  ;;  %v3614_v6 = vmul.f32 %v3582_v41, %v11178_v59  ;;  %v3032_v53 = vor.u32 1.1754944e-38, %v3031_v11  ;;  %v14966_v35 = vld [vmem:[#allocation29_spill] sm:$0xff]  ;;  %v2408_v59 = vpop.f32.mrf.mxu1 }
 0x300   :  { %v11297_v24 = vsel %vm10760_vm11, %v4293_v4, 0  ;;  %v11301_v26 = vsel %vm10760_vm11, %v4294_v20, 0  ;;  %v3773_v3 = vmul.f32 %v8531_v46, %v3613_v5  ;;  %vm3030_vm0 = vcmp.eq.f32.partialorder %v3029_v2, 8.507059e+37 }
 0x301   :  { %vm3835_vm15 = vcmp.ge.f32.partialorder %v10853_v7, 0.0  ;;  %v3804_v42 = vsub.f32 1.0, %v3772_v17  ;;  %v11304_v48 = vsel %vm3030_vm0, %v3032_v53, %v3028_v21  ;;  %v2320_v0 = vadd.f32 %v14966_v35, %v10325_v9 }
 0x302   :  { %v8533_v25 = vpop.eup %8532  ;;  %v3899_v63 = vsel %vm3835_vm15, %v3803_v30, %v3867_v54  ;;  %v3551_v61 = vmul.f32 %v3519_v57, %v11222_v8  ;;  %8534 = vpow2.f32 %v3720_v62  ;;  %v11309_v58 = vadd.f32 1.0, %v2817_v14  ;;  %v2571_v14 = vpop.f32.mrf.mxu3 }
 0x303   :  { %v3774_v55 = vmul.f32 %v8533_v25, %v3614_v6  ;;  %v4432_v38 = vunpack.c.l.b16 %v11297_v24  ;;  %v4433_v45 = vunpack.c.h.b16 %v11297_v24  ;;  %v4434_v7 = vunpack.c.l.b16 %v11301_v26 }
 0x304   :  { %v3805_v43 = vsub.f32 1.0, %v3773_v3  ;;  %v3360_v52 = vmul.f32 1.0614054, %v11304_v48  ;;  %v2409_v34 = vadd.f32 %v2408_v59, %v2320_v0  ;;  %v4435_v9 = vunpack.c.h.b16 %v11301_v26 }
 0x305   :  { %v3868_v30 = vsub.f32 0.0, %v3804_v42  ;;  %v11316_v32 = vpack.c.b16 %v4432_v38, %v4432_v38  ;;  %v11318_v41 = vpack.c.b16 %v4433_v45, %v4433_v45  ;;  %v11320_v11 = vpack.c.b16 %v4434_v7, %v4434_v7 }
 0x306   :  { %v3583_v5 = vadd.f32 0.2548296, %v3551_v61  ;;  %8536 = vrcp.f32 %v11309_v58  ;;  %v11323_v2 = vpack.c.b16 %v4435_v9, %v4435_v9  ;;  %v11325_v4 = vadd.f32 %v2497_v23, %v2409_v34  ;;  %v11703_v51 = vpop.f32.mrf.mxu2 }
 0x307   :  { %v3806_v20 = vsub.f32 1.0, %v3774_v55  ;;  %v8030_v54 = vrot.slane %v11316_v32, 9  ;;  %v5144_v17 = vrot.slane %v11318_v41, 5  ;;  %v8031_v46 = vrot.slane %v11320_v11, 9 }
 0x308   :  { %14967 = vst [vmem:[#allocation18_spill] sm:$0xff] %v11325_v4  ;;  %v8535_v57 = vpop.eup %8534  ;;  %v3869_v62 = vsub.f32 0.0, %v3805_v43  ;;  %v3392_v21 = vadd.f32 -1.4531521, %v3360_v52  ;;  %v5148_v6 = vrot.slane %v11323_v2, 5  ;;  %vm3836_vm1 = vcmp.ge.f32.partialorder %v10904_v22, 0.0 }
 0x309   :  { %v2572_v53 = vadd.f32 %v2571_v14, %v10652_v28  ;;  %v11335_v3 = vsel %vm9138_vm5, %v8030_v54, %v5144_v17  ;;  %v3931_v35 = vadd.f32 1.0, %v3899_v63  ;;  %v3615_v0 = vmul.f32 %v3583_v5, %v11222_v8  ;;  %v2660_v8 = vpop.f32.mrf.mxu0  ;;  %v14970_v54 = vld [vmem:[#allocation55_spill] sm:$0xff] }
 0x30a   :  { %v11340_v59 = vsel %vm9138_vm5, %v8031_v46, %v5148_v6  ;;  %v6339_v25 = vsel %vm10827_vm3, %v11335_v3, 0  ;;  %v3900_v61 = vsel %vm3836_vm1, %v3804_v42, %v3868_v30  ;;  %vm3837_vm12 = vcmp.ge.f32.partialorder %v10924_v31, 0.0  ;;  %v14969_v31 = vld [vmem:[#allocation72_spill] sm:$0xff] }
 0x30b   :  { %v3870_v22 = vsub.f32 0.0, %v3806_v20  ;;  %v2715_v55 = vmul.f32 0.5, %v10846_v60  ;;  %v3901_v38 = vsel %vm3837_vm12, %v3805_v43, %v3869_v62  ;;  %v3424_v63 = vmul.f32 %v3392_v21, %v11304_v48  ;;  %v14971_v62 = vld [vmem:[#allocation73_spill] sm:$0xff] }
 0x30c   :  { %v11346_v28 = vpop.eup %8536  ;;  %v6340_v45 = vsel %vm10827_vm3, %v11340_v59, 0  ;;  %v11353_v7 = vadd.f32 %v2660_v8, %v2572_v53  ;;  %v6493_v52 = vunpack.c.l.b16 %v6339_v25  ;;  %v3932_v9 = vadd.f32 1.0, %v3900_v61 }
 0x30d   :  { %v6494_v34 = vunpack.c.l.b16 %v6340_v45  ;;  %v3963_v42 = vmul.f32 %v3931_v35, %v2715_v55  ;;  %vm3838_vm0 = vcmp.ge.f32.partialorder %v14969_v31, 0.0  ;;  %v3775_v23 = vmul.f32 %v8535_v57, %v3615_v0 }
 0x30e   :  { %14968 = vst [vmem:[#allocation21_spill] sm:$0xff] %v11353_v7  ;;  %v3933_v30 = vadd.f32 1.0, %v3901_v38  ;;  %v3902_v5 = vsel %vm3838_vm0, %v3806_v20, %v3870_v22  ;;  %v3036_v60 = vmul.f32 %v11346_v28, %v11309_v58  ;;  %v2716_v17 = vmul.f32 0.5, %v14970_v54  ;;  %v14973_v20 = vld [vmem:[#allocation16_spill] sm:$0xff] }
 0x30f   :  { %v6521_v43 = vpack.c.b16 %v6494_v34, %v6493_v52  ;;  %v3456_v46 = vadd.f32 1.4214138, %v3424_v63  ;;  %v2717_v21 = vmul.f32 0.5, %v14971_v62  ;;  %v11361_v14 = vmul.f32 0.70710677, %v11353_v7 }
 0x310   :  { %v3964_v6 = vmul.f32 %v3932_v9, %v2716_v17  ;;  %v3934_v53 = vadd.f32 1.0, %v3902_v5  ;;  %v3807_v35 = vsub.f32 1.0, %v3775_v23  ;;  %v3995_v25 = vpack.c.bf16 %v3963_v42, %v3963_v42 }
 0x311   :  { %14972 = vst [vmem:[#allocation24_spill] sm:$0xff] %v11361_v14  ;;  %6786 = vmatmul.bf16.gmra.mxu2 %v6521_v43  ;;  %v3965_v57 = vmul.f32 %v3933_v30, %v2717_v21  ;;  %v3037_v0 = vsub.f32 1.0, %v3036_v60  ;;  %v2718_v61 = vmul.f32 0.5, %v14973_v20  ;;  %v3488_v22 = vmul.f32 %v3456_v46, %v11304_v48 }
 0x312   :  { %v3648_v55 = vsub.f32 0.0, %v11166_v10  ;;  %v11367_v38 = vand.u32 2147483647, %v11361_v14  ;;  %v3996_v63 = vpack.c.bf16 %v3964_v6, %v3964_v6  ;;  %v3871_v45 = vsub.f32 0.0, %v3807_v35 }
 0x313   :  { %v3966_v8 = vmul.f32 %v3934_v53, %v2718_v61  ;;  %v4065_v52 = vshrl.u32 %v3995_v25, 16  ;;  %v3997_v34 = vpack.c.bf16 %v3965_v57, %v3965_v57  ;;  %v3038_v9 = vmul.f32 %v11346_v28, %v3037_v0  ;;  %v14974_v0 = vld [vmem:[#allocation71_spill] sm:$0xff]  ;;  %v14975_v61 = vld [vmem:[#allocation25_spill] sm:$0xff] }
 0x314   :  { %v3520_v31 = vadd.f32 -0.28449672, %v3488_v22  ;;  %v3680_v42 = vmul.f32 %v3648_v55, %v11166_v10  ;;  %vm3839_vm15 = vcmp.ge.f32.partialorder %v11005_v16, 0.0  ;;  %v2818_v23 = vmul.f32 0.3275911, %v11367_v38  ;;  %v14976_v22 = vld [vmem:[#allocation50_spill] sm:$0xff] }
 0x315   :  { %v4368_v30 = vsel %vm10827_vm3, %v10770_v37, 0  ;;  %v4072_v5 = vshrl.u32 %v3996_v63, 16  ;;  %v3998_v60 = vpack.c.bf16 %v3966_v8, %v3966_v8  ;;  %v3903_v43 = vsel %vm3839_vm15, %v3807_v35, %v3871_v45  ;;  %15013 = vst [vmem:[#allocation71_spill] sm:$0xff] %v11703_v51 }
 0x316   :  { %v4067_v54 = vrot.slane %v4065_v52, 7  ;;  %v4079_v17 = vshrl.u32 %v3997_v34, 16  ;;  %v3039_v46 = vadd.f32 %v11346_v28, %v3038_v9  ;;  %vm3041_vm1 = vweird.f32 %v11346_v28 }
 0x317   :  { %v4068_v62 = vshll.u32 %v3995_v25, 16  ;;  %v3552_v10 = vmul.f32 %v3520_v31, %v11304_v48  ;;  %v3722_v21 = vmul.f32 1.442695, %v3680_v42  ;;  %v3046_v16 = vand.u32 2147483648, %v11309_v58 }
 0x318   :  { %v3935_v6 = vadd.f32 1.0, %v3903_v43  ;;  %vm3040_vm12 = vweird.f32 %v11309_v58  ;;  %v3044_v37 = vand.u32 2147483647, %v11309_v58  ;;  %v11382_v53 = vadd.f32 1.0, %v2818_v23 }
 0x319   :  { %v4074_v35 = vrot.slane %v4072_v5, 7  ;;  %v4086_v57 = vshrl.u32 %v3998_v60, 16  ;;  %v2719_v20 = vmul.f32 0.5, %v14974_v0  ;;  %v2396_v55 = vadd.f32 %v14976_v22, %v14975_v61  ;;  %vm11387_vm0 = vmor %vm3040_vm12, %vm3041_vm1 }
 0x31a   :  { %v4070_v8 = vor.u32 %v4068_v62, %v4067_v54  ;;  %v4081_v45 = vrot.slane %v4079_v17, 7  ;;  %v3043_v52 = vsel %vm11387_vm0, %v11346_v28, %v3039_v46  ;;  %v3649_v58 = vsub.f32 0.0, %v11280_v29  ;;  %v14979_v54 = vld [vmem:[#allocation11_spill] sm:$0xff]  ;;  %v2573_v46 = vpop.f32.mrf.mxu3 }
 0x31b   :  { %v4075_v9 = vshll.u32 %v3996_v63, 16  ;;  %v3584_v31 = vadd.f32 0.2548296, %v3552_v10  ;;  %8538 = vpow2.f32 %v3722_v21  ;;  %v3047_v42 = vor.u32 1.1754944e-38, %v3046_v16 }
 0x31c   :  { %v4082_v23 = vshll.u32 %v3997_v34, 16  ;;  %v3967_v5 = vmul.f32 %v3935_v6, %v2719_v20  ;;  %vm3045_vm15 = vcmp.eq.f32.partialorder %v3044_v37, 8.507059e+37  ;;  %8540 = vrcp.f32 %v11382_v53  ;;  %v14980_v37 = vld [vmem:[#allocation30_spill] sm:$0xff] }
 0x31d   :  { %v4077_v43 = vor.u32 %v4075_v9, %v4074_v35  ;;  %v4088_v0 = vrot.slane %v4086_v57, 7  ;;  %v11396_v61 = vsel %vm3045_vm15, %v3047_v42, %v3043_v52  ;;  %v2485_v17 = vadd.f32 %v14979_v54, %v2396_v55  ;;  %v14981_v35 = vld [vmem:[#allocation48_spill] sm:$0xff] }
 0x31e   :  { %v4084_v62 = vor.u32 %v4082_v23, %v4081_v45  ;;  %v3681_v28 = vmul.f32 %v3649_v58, %v11280_v29  ;;  %v4369_v63 = vsel %vm10827_vm3, %v10775_v47, 0  ;;  %v4089_v10 = vshll.u32 %v3998_v60, 16 }
 0x31f   :  { %v3616_v34 = vmul.f32 %v3584_v31, %v11304_v48  ;;  %v5012_v21 = vunpack.c.l.bf16 %v4368_v30  ;;  %v11404_v16 = vpack.c.bf16 %v3967_v5, %v3967_v5  ;;  %v3361_v6 = vmul.f32 1.0614054, %v11396_v61 }
 0x320   :  { %v11409_v57 = vadd.f32 %v14981_v35, %v14980_v37  ;;  %v4295_v29 = vsel %vm10750_vm8, 0, %v4070_v8  ;;  %v4296_v22 = vsel %vm10750_vm8, 0, %v4077_v43  ;;  %v4091_v55 = vor.u32 %v4089_v10, %v4088_v0  ;;  %v2662_v8 = vpop.f32.mrf.mxu0 }
 0x321   :  { %v8539_v20 = vpop.eup %8538  ;;  %v2574_v60 = vadd.f32 %v2573_v46, %v2485_v17  ;;  %v5013_v48 = vunpack.c.l.bf16 %v4369_v63  ;;  %v4297_v30 = vsel %vm10750_vm8, 0, %v4084_v62  ;;  %v11420_v45 = vmul.f32 0.5, %v11108_v36  ;;  %v14986_v46 = vld [vmem:[#allocation57_spill] sm:$0xff] }
 0x322   :  { %14982 = vst [vmem:[#allocation81_spill] sm:$0xff] %v11409_v57  ;;  %v11415_v25 = vpop.eup %8540  ;;  %v3724_v52 = vmul.f32 1.442695, %v3681_v28  ;;  %v11422_v58 = vmul.f32 %v8539_v20, %v3616_v34  ;;  %v3650_v9 = vsub.f32 0.0, %v11367_v38  ;;  %v4983_v42 = vsel %vm10880_vm14, %v11170_v49, 0  ;;  %v14985_v28 = vld [vmem:[#allocation15_spill] sm:$0xff] }
 0x323   :  { %v4984_v23 = vsel %vm10880_vm14, %v11245_v50, 0  ;;  %v11433_v5 = vsel %vm10760_vm11, %v4295_v29, 0  ;;  %v11437_v36 = vsel %vm10760_vm11, %v4296_v22, 0  ;;  %v4093_v43 = vshrl.u32 %v11404_v16, 16 }
 0x324   :  { %v3393_v0 = vadd.f32 -1.4531521, %v3361_v6  ;;  %v11442_v54 = vsel %vm10760_vm11, %v4297_v30, 0  ;;  %v4298_v49 = vsel %vm10750_vm8, 0, %v4091_v55  ;;  %v3051_v17 = vmul.f32 %v11415_v25, %v11382_v53  ;;  %v2576_v30 = vpop.f32.mrf.mxu3 }
 0x325   :  { %v11448_v62 = vadd.f32 %v2662_v8, %v2574_v60  ;;  %8542 = vpow2.f32 %v3724_v52  ;;  %v11452_v63 = vadd.f32 %v14986_v46, %v14985_v28  ;;  %v5041_v10 = vunpack.c.l.bf16 %v4983_v42  ;;  %v14989_v42 = vld [vmem:[#allocation62_spill] sm:$0xff] }
 0x326   :  { %v5042_v34 = vunpack.c.l.bf16 %v4984_v23  ;;  %v14554_v37 = vsub.f32 1.0, %v11422_v58  ;;  %v11458_v20 = vmul.f32 %v3650_v9, %v11367_v38  ;;  %v11462_v29 = vsel %vm10760_vm11, %v4298_v49, 0 }
 0x327   :  { %14984 = vst [vmem:[#allocation84_spill] sm:$0xff] %v11448_v62  ;;  %v11464_v22 = vrot.slane %v4093_v43, 7  ;;  %v11467_v55 = vmul.f32 %v3393_v0, %v11396_v61  ;;  %v3052_v52 = vsub.f32 1.0, %v3051_v17  ;;  %v11471_v8 = vmul.f32 0.70710677, %v11448_v62 }
 0x328   :  { %14987 = vst [vmem:[#allocation83_spill] sm:$0xff] %v11462_v29  ;;  %v2577_v23 = vadd.f32 %v2576_v30, %v14989_v42  ;;  %v4597_v38 = vshrl.u32 %v11316_v32, 16  ;;  %v5070_v9 = vadd.f32 %v5041_v10, %v5012_v21  ;;  %v5071_v28 = vadd.f32 %v5042_v34, %v5013_v48  ;;  %v14991_v42 = vld [vmem:[#allocation58_spill] sm:$0xff] }
 0x329   :  { %14988 = vst [vmem:[#allocation82_spill] sm:$0xff] %v11471_v8  ;;  %v4600_v49 = vshll.u32 %v11316_v32, 16  ;;  %v4611_v43 = vshrl.u32 %v11320_v11, 16  ;;  %v11479_v0 = vsub.f32 0.0, %v14554_v37  ;;  %v5279_v17 = vsel %vm10932_vm4, %v10821_v12, 0  ;;  %v2665_v37 = vpop.f32.mrf.mxu0 }
 0x32a   :  { %v4599_v46 = vrot.slane %v4597_v38, 4  ;;  %v4614_v6 = vshll.u32 %v11320_v11, 16  ;;  %v5280_v21 = vsel %vm10932_vm4, %v14991_v42, 0  ;;  %v4606_v48 = vshll.u32 %v11318_v41, 16 }
 0x32b   :  { %v11485_v30 = vpop.eup %8542  ;;  %v4602_v32 = vrot.slane %v4600_v49, 5  ;;  %v4613_v10 = vrot.slane %v4611_v43, 4  ;;  %v3053_v34 = vmul.f32 %v11415_v25, %v3052_v52  ;;  %v11493_v60 = vand.u32 2147483647, %v11471_v8 }
 0x32c   :  { %14990 = vst [vmem:[#allocation26_spill] sm:$0xff] %v11485_v30  ;;  %v4616_v12 = vrot.slane %v4614_v6, 5  ;;  %v4620_v38 = vshll.u32 %v11323_v2, 16  ;;  %v11496_v11 = vadd.f32 %v2665_v37, %v2577_v23  ;;  %v5099_v4 = vpack.c.bf16 %v5070_v9, %v5070_v9 }
 0x32d   :  { %v4603_v35 = vor.u32 %v4602_v32, %v4599_v46  ;;  %v5100_v62 = vpack.c.bf16 %v5071_v28, %v5071_v28  ;;  %v5337_v7 = vunpack.c.l.bf16 %v5279_v17  ;;  %v5338_v14 = vunpack.c.l.bf16 %v5280_v21  ;;  %v14994_v32 = vld [vmem:[#allocation77_spill] sm:$0xff] }
 0x32e   :  { %14992 = vst [vmem:[#allocation45_spill] sm:$0xff] %v11496_v11  ;;  %v4370_v41 = vsel %vm10827_vm3, %v11297_v24, 0  ;;  %v4617_v49 = vor.u32 %v4616_v12, %v4613_v10  ;;  %v4608_v43 = vrot.slane %v4606_v48, 5  ;;  %v5308_v8 = vunpack.c.l.bf16 %v5099_v4 }
 0x32f   :  { %v4604_v52 = vrot.slane %v4603_v35, 4  ;;  %v5309_v15 = vunpack.c.l.bf16 %v5100_v62  ;;  %vm3056_vm1 = vweird.f32 %v11415_v25  ;;  %v2819_v2 = vmul.f32 0.3275911, %v11493_v60 }
 0x330   :  { %v4618_v6 = vrot.slane %v4617_v49, 4  ;;  %v4622_v37 = vrot.slane %v4620_v38, 5  ;;  %v5430_v9 = vsel %vm10979_vm10, %v10775_v47, 0  ;;  %v4371_v28 = vsel %vm10827_vm3, %v11301_v26, 0 }
 0x331   :  { %v11511_v35 = vsel %vm9101_vm2, %v4604_v52, %v4608_v43  ;;  %v5366_v4 = vadd.f32 %v5337_v7, %v5308_v8  ;;  %v5367_v62 = vadd.f32 %v5338_v14, %v5309_v15  ;;  %vm3055_vm12 = vweird.f32 %v11382_v53 }
 0x332   :  { %v11516_v17 = vsel %vm9101_vm2, %v4618_v6, %v4622_v37  ;;  %v4985_v47 = vsel %vm10880_vm14, %v11511_v35, 0  ;;  %v5014_v46 = vunpack.c.l.bf16 %v4370_v41  ;;  %v5431_v21 = vsel %vm10979_vm10, %v11297_v24, 0  ;;  %vm11560_vm0 = vmor %vm3055_vm12, %vm3056_vm1 }
 0x333   :  { %v4986_v7 = vsel %vm10880_vm14, %v11516_v17, 0  ;;  %v5043_v15 = vunpack.c.l.bf16 %v4985_v47  ;;  %v5395_v14 = vpack.c.bf16 %v5366_v4, %v5366_v4  ;;  %v5396_v8 = vpack.c.bf16 %v5367_v62, %v5367_v62 }
 0x334   :  { %v11528_v48 = vadd.f32 1.0, %v2819_v2  ;;  %v5015_v10 = vunpack.c.l.bf16 %v4371_v28  ;;  %v5044_v12 = vunpack.c.l.bf16 %v4986_v7  ;;  %v5491_v38 = vunpack.c.l.bf16 %v5430_v9 }
 0x335   :  { %v5072_v49 = vadd.f32 %v5043_v15, %v5014_v46  ;;  %v5462_v41 = vunpack.c.l.bf16 %v5395_v14  ;;  %v5463_v52 = vunpack.c.l.bf16 %v5396_v8  ;;  %v5492_v43 = vunpack.c.l.bf16 %v5431_v21 }
 0x336   :  { %v3054_v6 = vadd.f32 %v11415_v25, %v3053_v34  ;;  %v14995_v37 = vand.u32 2147483647, %v11382_v53  ;;  %v5281_v2 = vsel %vm10932_vm4, %v11335_v3, 0  ;;  %v5282_v9 = vsel %vm10932_vm4, %v11340_v59, 0 }
 0x337   :  { %v5073_v28 = vadd.f32 %v5044_v12, %v5015_v10  ;;  %v5101_v4 = vpack.c.bf16 %v5072_v49, %v5072_v49  ;;  %v5523_v62 = vadd.f32 %v5491_v38, %v5462_v41  ;;  %v5524_v47 = vadd.f32 %v5492_v43, %v5463_v52 }
 0x338   :  { %vm11533_vm15 = vcmp.eq.f32.partialorder %v14995_v37, 8.507059e+37  ;;  %v5673_v46 = vsel %vm11131_vm9, %v11245_v50, 0  ;;  %8544 = vrcp.f32 %v11528_v48  ;;  %v11548_v21 = vmul.f32 0.70710677, %v11496_v11 }
 0x339   :  { %v5102_v7 = vpack.c.bf16 %v5073_v28, %v5073_v28  ;;  %v5674_v15 = vsel %vm11131_vm9, %v11511_v35, 0  ;;  %v5339_v14 = vunpack.c.l.bf16 %v5281_v2  ;;  %v5310_v8 = vunpack.c.l.bf16 %v5101_v4 }
 0x33a   :  { %14999 = vst [vmem:[#allocation29_spill] sm:$0xff] %v11548_v21  ;;  %v5555_v10 = vpack.c.bf16 %v5523_v62, %v5523_v62  ;;  %v5556_v12 = vpack.c.bf16 %v5524_v47, %v5524_v47  ;;  %v11554_v38 = vmul.f32 1.442695, %v11458_v20  ;;  %v5340_v49 = vunpack.c.l.bf16 %v5282_v9 }
 0x33b   :  { %v5311_v41 = vunpack.c.l.bf16 %v5102_v7  ;;  %v5737_v50 = vunpack.c.l.bf16 %v5673_v46  ;;  %v11564_v43 = vadd.f32 %v5339_v14, %v5310_v8  ;;  %v5738_v28 = vunpack.c.l.bf16 %v5674_v15 }
 0x33c   :  { %v5705_v37 = vunpack.c.l.bf16 %v5555_v10  ;;  %v5706_v2 = vunpack.c.l.bf16 %v5556_v12  ;;  %v3457_v4 = vadd.f32 1.4214138, %v11467_v55  ;;  %v3058_v20 = vsel %vm11560_vm0, %v11415_v25, %v3054_v6 }
 0x33d   :  { %v11571_v9 = vand.u32 2147483647, %v11548_v21  ;;  %v11573_v62 = vadd.f32 %v5340_v49, %v5311_v41  ;;  %v15002_v47 = vsub.f32 1.0, %v11422_v58  ;;  %vm15003_vm1 = vcmp.ge.f32.partialorder %v14994_v32, 0.0 }
 0x33e   :  { %v15004_v7 = vand.u32 2147483648, %v11382_v53  ;;  %v5769_v14 = vadd.f32 %v5737_v50, %v5705_v37  ;;  %v5770_v55 = vadd.f32 %v5738_v28, %v5706_v2  ;;  %v11582_v8 = vpop.eup %8544  ;;  %v5860_v25 = vsel %vm11145_vm6, %v11335_v3, 0 }
 0x33f   :  { %v3904_v46 = vsel %vm15003_vm1, %v15002_v47, %v11479_v0  ;;  %v5859_v6 = vsel %vm11145_vm6, %v14991_v42, 0  ;;  %v4436_v58 = vunpack.c.l.b16 %v11433_v5  ;;  %v4437_v32 = vunpack.c.h.b16 %v11433_v5  ;;  %v15005_v42 = vld [vmem:[#allocation66_spill] sm:$0xff] }
 0x340   :  { %v3062_v15 = vor.u32 1.1754944e-38, %v15004_v7  ;;  %v5801_v10 = vpack.c.bf16 %v5769_v14, %v5769_v14  ;;  %v5802_v12 = vpack.c.bf16 %v5770_v55, %v5770_v55  ;;  %v11597_v49 = vadd.f32 1.0, %v3904_v46  ;;  %v2578_v7 = vpop.f32.mrf.mxu3 }
 0x341   :  { %v11600_v3 = vmul.f32 %v3457_v4, %v11396_v61  ;;  %v2820_v41 = vmul.f32 0.3275911, %v11571_v9  ;;  %v2490_v50 = vadd.f32 %v15005_v42, %v11452_v63  ;;  %v5924_v52 = vunpack.c.l.bf16 %v5860_v25 }
 0x342   :  { %v11595_v53 = vsel %vm11533_vm15, %v3062_v15, %v3058_v20  ;;  %v5891_v37 = vunpack.c.l.bf16 %v5801_v10  ;;  %v5892_v2 = vunpack.c.l.bf16 %v5802_v12  ;;  %v5923_v28 = vunpack.c.l.bf16 %v5859_v6 }
 0x343   :  { %v11606_v13 = vmul.f32 1.0614054, %v11595_v53  ;;  %v3066_v20 = vmul.f32 %v11582_v8, %v11528_v48  ;;  %v11610_v47 = vpack.c.b16 %v4436_v58, %v4436_v58  ;;  %v11612_v46 = vpack.c.b16 %v4437_v32, %v4437_v32 }
 0x344   :  { %v3076_v4 = vand.u32 2147483648, %v11528_v48  ;;  %v5955_v15 = vadd.f32 %v5923_v28, %v5891_v37  ;;  %v5956_v14 = vadd.f32 %v5924_v52, %v5892_v2  ;;  %v4438_v63 = vunpack.c.l.b16 %v11437_v36 }
 0x345   :  { %v2579_v55 = vadd.f32 %v2578_v7, %v2490_v50  ;;  %v6025_v25 = vsel %vm11186_vm7, %v11297_v24, 0  ;;  %v6026_v6 = vsel %vm11186_vm7, %v11301_v26, 0  ;;  %v4439_v58 = vunpack.c.h.b16 %v11437_v36  ;;  %v2667_v24 = vpop.f32.mrf.mxu0 }
 0x346   :  { %v11623_v32 = vadd.f32 1.0, %v2820_v41  ;;  %v5987_v10 = vpack.c.bf16 %v5955_v15, %v5955_v15  ;;  %v5988_v12 = vpack.c.bf16 %v5956_v14, %v5956_v14  ;;  %v11625_v42 = vpack.c.b16 %v4438_v63, %v4438_v63 }
 0x347   :  { %v3067_v52 = vsub.f32 1.0, %v3066_v20  ;;  %v11627_v37 = vpack.c.b16 %v4439_v58, %v4439_v58  ;;  %v8032_v50 = vrot.slane %v11610_v47, 9  ;;  %v5152_v2 = vrot.slane %v11612_v46, 5 }
 0x348   :  { %v6054_v28 = vunpack.c.l.bf16 %v5987_v10  ;;  %v6055_v7 = vunpack.c.l.bf16 %v5988_v12  ;;  %v6086_v0 = vunpack.c.l.bf16 %v6025_v25  ;;  %v6087_v11 = vunpack.c.l.bf16 %v6026_v6 }
 0x349   :  { %v11632_v41 = vor.u32 1.1754944e-38, %v3076_v4  ;;  %v11634_v15 = vadd.f32 %v2667_v24, %v2579_v55  ;;  %v8033_v14 = vrot.slane %v11625_v42, 9  ;;  %vm3070_vm12 = vweird.f32 %v11528_v48 }
 0x34a   :  { %v6115_v20 = vadd.f32 %v6086_v0, %v6054_v28  ;;  %v6116_v63 = vadd.f32 %v6087_v11, %v6055_v7  ;;  %v6185_v29 = vsel %vm11224_vm13, %v11511_v35, 0  ;;  %v6186_v25 = vsel %vm11224_vm13, %v11516_v17, 0 }
 0x34b   :  { %15006 = vst [vmem:[#allocation72_spill] sm:$0xff] %v11634_v15  ;;  %8546 = vrcp.f32 %v11623_v32  ;;  %v3091_v4 = vand.u32 2147483648, %v11623_v32  ;;  %v11648_v55 = vsel %vm9138_vm5, %v8032_v50, %v5152_v2  ;;  %v5156_v6 = vrot.slane %v11627_v37, 5 }
 0x34c   :  { %v3068_v11 = vmul.f32 %v11582_v8, %v3067_v52  ;;  %v6147_v0 = vpack.c.bf16 %v6115_v20, %v6115_v20  ;;  %v6148_v10 = vpack.c.bf16 %v6116_v63, %v6116_v63  ;;  %v4625_v35 = vshrl.u32 %v11610_v47, 16 }
 0x34d   :  { %v11654_v12 = vmul.f32 0.70710677, %v11634_v15  ;;  %v6246_v24 = vunpack.c.l.bf16 %v6185_v29  ;;  %v6247_v28 = vunpack.c.l.bf16 %v6186_v25  ;;  %v11658_v7 = vsel %vm9138_vm5, %v8033_v14, %v5156_v6 }
 0x34e   :  { %v6214_v21 = vunpack.c.l.bf16 %v6147_v0  ;;  %v6215_v50 = vunpack.c.l.bf16 %v6148_v10  ;;  %v6341_v2 = vsel %vm10827_vm3, %v11648_v55, 0  ;;  %v4628_v52 = vshll.u32 %v11610_v47, 16 }
 0x34f   :  { %15008 = vst [vmem:[#allocation55_spill] sm:$0xff] %v11654_v12  ;;  %vm3071_vm0 = vweird.f32 %v11582_v8  ;;  %v11666_v63 = vor.u32 1.1754944e-38, %v3091_v4  ;;  %v6342_v29 = vsel %vm10827_vm3, %v11658_v7, 0  ;;  %v11672_v14 = vadd.f32 %v11582_v8, %v3068_v11 }
 0x350   :  { %v6275_v25 = vadd.f32 %v6246_v24, %v6214_v21  ;;  %v6276_v6 = vadd.f32 %v6247_v28, %v6215_v50  ;;  %v4627_v0 = vrot.slane %v4625_v35, 4  ;;  %v11677_v47 = vand.u32 2147483647, %v11654_v12  ;;  %vm11687_vm15 = vmor %vm3070_vm12, %vm3071_vm0  ;;  %v11691_v35 = vpop.f32.mrf.mxu1 }
 0x351   :  { %v11674_v10 = vpop.eup %8546  ;;  %v5397_v20 = vpack.c.bf16 %v11564_v43, %v11564_v43  ;;  %v6495_v4 = vunpack.c.l.b16 %v6341_v2  ;;  %v6496_v15 = vunpack.c.l.b16 %v6342_v29  ;;  %v5398_v39 = vpack.c.bf16 %v11573_v62, %v11573_v62  ;;  %15012 = vst [vmem:[#allocation16_spill] sm:$0xff] %v11691_v35 }
 0x352   :  { %15009 = vst [vmem:[#allocation73_spill] sm:$0xff] %v11677_v47  ;;  %v6307_v57 = vpack.c.bf16 %v6275_v25, %v6275_v25  ;;  %v6308_v18 = vpack.c.bf16 %v6276_v6, %v6276_v6  ;;  %v4630_v11 = vrot.slane %v4628_v52, 5  ;;  %v4634_v43 = vshll.u32 %v11612_v46, 16 }
 0x353   :  { %v6522_v24 = vpack.c.b16 %v6496_v15, %v6495_v4  ;;  %v4639_v28 = vshrl.u32 %v11625_v42, 16  ;;  %v4642_v62 = vshll.u32 %v11625_v42, 16  ;;  %v3081_v25 = vmul.f32 %v11674_v10, %v11623_v32 }
 0x354   :  { %v6400_v2 = vunpack.c.l.b16 %v6307_v57  ;;  %v6401_v52 = vunpack.c.l.b16 %v6308_v18  ;;  %v4631_v29 = vor.u32 %v4630_v11, %v4627_v0  ;;  %v4648_v46 = vshll.u32 %v11627_v37, 16 }
 0x355   :  { %6791 = vmatmul.bf16.gmra.mxu2 %v6522_v24  ;;  %v4641_v6 = vrot.slane %v4639_v28, 4  ;;  %v4644_v15 = vrot.slane %v4642_v62, 5  ;;  %v5464_v4 = vunpack.c.l.bf16 %v5397_v20  ;;  %v4636_v42 = vrot.slane %v4634_v43, 5 }
 0x356   :  { %v6431_v35 = vpack.c.b16 %v6401_v52, %v6400_v2  ;;  %v4632_v12 = vrot.slane %v4631_v29, 4  ;;  %v5465_v30 = vunpack.c.l.bf16 %v5398_v39  ;;  %v4372_v18 = vsel %vm10827_vm3, %v11433_v5, 0 }
 0x357   :  { %v4645_v57 = vor.u32 %v4644_v15, %v4641_v6  ;;  %v5432_v0 = vsel %vm10979_vm10, %v11301_v26, 0  ;;  %v2821_v11 = vmul.f32 0.3275911, %v11677_v47  ;;  %v5433_v39 = vsel %vm10979_vm10, %v11433_v5, 0 }
 0x358   :  { %6697 = vmatmul.bf16.gmra.mxu1 %v6431_v35  ;;  %v11714_v37 = vsel %vm9101_vm2, %v4632_v12, %v4636_v42  ;;  %v5493_v20 = vunpack.c.l.bf16 %v5432_v0  ;;  %v4650_v43 = vrot.slane %v4648_v46, 5  ;;  %v5494_v62 = vunpack.c.l.bf16 %v5433_v39  ;;  %v2413_v0 = vpop.f32.mrf.mxu1 }
 0x359   :  { %v4646_v24 = vrot.slane %v4645_v57, 4  ;;  %v4987_v28 = vsel %vm10880_vm14, %v11714_v37, 0  ;;  %v4373_v26 = vsel %vm10827_vm3, %v11437_v36, 0  ;;  %v5016_v35 = vunpack.c.l.bf16 %v4372_v18  ;;  %v2581_v18 = vpop.f32.mrf.mxu3 }
 0x35a   :  { %v5045_v2 = vunpack.c.l.bf16 %v4987_v28  ;;  %v5525_v12 = vadd.f32 %v5493_v20, %v5464_v4  ;;  %v3082_v52 = vsub.f32 1.0, %v3081_v25  ;;  %v5675_v29 = vsel %vm11131_vm9, %v11516_v17, 0  ;;  %v15016_v28 = vld [vmem:[#allocation56_spill] sm:$0xff] }
 0x35b   :  { %v11730_v6 = vsel %vm9101_vm2, %v4646_v24, %v4650_v43  ;;  %v5526_v15 = vadd.f32 %v5494_v62, %v5465_v30  ;;  %v5676_v4 = vsel %vm11131_vm9, %v11714_v37, 0  ;;  %v11738_v25 = vadd.f32 1.0, %v2821_v11  ;;  %v15014_v24 = vld [vmem:[#allocation68_spill] sm:$0xff]  ;;  %v15015_v30 = vld [vmem:[#allocation31_spill] sm:$0xff] }
 0x35c   :  { %v4988_v46 = vsel %vm10880_vm14, %v11730_v6, 0  ;;  %v5074_v42 = vadd.f32 %v5045_v2, %v5016_v35  ;;  %v5557_v57 = vpack.c.bf16 %v5525_v12, %v5525_v12  ;;  %v5017_v17 = vunpack.c.l.bf16 %v4373_v26 }
 0x35d   :  { %v5046_v39 = vunpack.c.l.bf16 %v4988_v46  ;;  %v5558_v20 = vpack.c.bf16 %v5526_v15, %v5526_v15  ;;  %v2582_v43 = vadd.f32 %v2581_v18, %v15014_v24  ;;  %v2325_v62 = vadd.f32 %v15016_v28, %v15015_v30 }
 0x35e   :  { %v5739_v50 = vunpack.c.l.bf16 %v5675_v29  ;;  %v5707_v51 = vunpack.c.l.bf16 %v5557_v57  ;;  %v3083_v35 = vmul.f32 %v11674_v10, %v3082_v52  ;;  %v5740_v31 = vunpack.c.l.bf16 %v5676_v4  ;;  %v2670_v29 = vpop.f32.mrf.mxu0  ;;  %v2502_v57 = vpop.f32.mrf.mxu2 }
 0x35f   :  { %v5075_v2 = vadd.f32 %v5046_v39, %v5017_v17  ;;  %v5708_v12 = vunpack.c.l.bf16 %v5558_v20  ;;  %v15017_v11 = vand.u32 2147483647, %v11528_v48  ;;  %vm3086_vm0 = vweird.f32 %v11674_v10 }
 0x360   :  { %v2414_v26 = vadd.f32 %v2413_v0, %v2325_v62  ;;  %v5103_v15 = vpack.c.bf16 %v5074_v42, %v5074_v42  ;;  %v5771_v46 = vadd.f32 %v5739_v50, %v5707_v51  ;;  %8548 = vrcp.f32 %v11738_v25 }
 0x361   :  { %vm11746_vm1 = vcmp.eq.f32.partialorder %v15017_v11, 8.507059e+37  ;;  %v5861_v52 = vsel %vm11145_vm6, %v11340_v59, 0  ;;  %v5104_v48 = vpack.c.bf16 %v5075_v2, %v5075_v2  ;;  %v5772_v4 = vadd.f32 %v5740_v31, %v5708_v12 }
 0x362   :  { %v11756_v18 = vadd.f32 %v2670_v29, %v2582_v43  ;;  %v5862_v17 = vsel %vm11145_vm6, %v11648_v55, 0  ;;  %v11761_v39 = vadd.f32 %v2502_v57, %v2414_v26  ;;  %v5803_v42 = vpack.c.bf16 %v5771_v46, %v5771_v46 }
 0x363   :  { %v3084_v51 = vadd.f32 %v11674_v10, %v3083_v35  ;;  %v5283_v50 = vsel %vm10932_vm4, %v11648_v55, 0  ;;  %v5284_v59 = vsel %vm10932_vm4, %v11658_v7, 0  ;;  %v5804_v31 = vpack.c.bf16 %v5772_v4, %v5772_v4 }
 0x364   :  { %v5925_v0 = vunpack.c.l.bf16 %v5861_v52  ;;  %v5312_v20 = vunpack.c.l.bf16 %v5103_v15  ;;  %v5313_v24 = vunpack.c.l.bf16 %v5104_v48  ;;  %v5893_v43 = vunpack.c.l.bf16 %v5803_v42 }
 0x365   :  { %v5926_v30 = vunpack.c.l.bf16 %v5862_v17  ;;  %v5894_v28 = vunpack.c.l.bf16 %v5804_v31  ;;  %v5589_v62 = vunpack.c.l.b16 %v11442_v54  ;;  %v5590_v2 = vunpack.c.h.b16 %v11442_v54 }
 0x366   :  { %v15020_v35 = vand.u32 2147483647, %v11623_v32  ;;  %v11779_v55 = vmul.f32 0.70710677, %v11756_v18  ;;  %v5341_v11 = vunpack.c.l.bf16 %v5283_v50  ;;  %v5342_v26 = vunpack.c.l.bf16 %v5284_v59  ;;  %v11781_v46 = vpop.eup %8548 }
 0x367   :  { %v5957_v15 = vadd.f32 %v5925_v0, %v5893_v43  ;;  %v5958_v29 = vadd.f32 %v5926_v30, %v5894_v28  ;;  %v6027_v52 = vsel %vm11186_vm7, %v11433_v5, 0  ;;  %v11786_v57 = vpack.c.b16 %v5589_v62, %v5589_v62  ;;  %v15027_v30 = vld [vmem:[#allocation70_spill] sm:$0xff] }
 0x368   :  { %vm11774_vm12 = vcmp.eq.f32.partialorder %v15020_v35, 8.507059e+37  ;;  %v11788_v48 = vpack.c.b16 %v5590_v2, %v5590_v2  ;;  %v5370_v4 = vadd.f32 %v5341_v11, %v5312_v20  ;;  %v5371_v17 = vadd.f32 %v5342_v26, %v5313_v24 }
 0x369   :  { %v5989_v42 = vpack.c.bf16 %v5957_v15, %v5957_v15  ;;  %v6028_v50 = vsel %vm11186_vm7, %v11437_v36, 0  ;;  %v15023_v59 = vsel %vm11687_vm15, %v11582_v8, %v11672_v14  ;;  %vm15024_vm4 = vweird.f32 %v11623_v32 }
 0x36a   :  { %v11801_v5 = vsel %vm11746_vm1, %v11632_v41, %v15023_v59  ;;  %vm11807_vm14 = vmor %vm15024_vm4, %vm3086_vm0  ;;  %v5990_v0 = vpack.c.bf16 %v5958_v29, %v5958_v29  ;;  %v8055_v20 = vrot.slane %v11786_v57, 9  ;;  %v5833_v21 = vrot.slane %v11788_v48, 5 }
 0x36b   :  { %v3088_v8 = vsel %vm11807_vm14, %v11674_v10, %v3084_v51  ;;  %v3096_v41 = vmul.f32 %v11781_v46, %v11738_v25  ;;  %v6056_v14 = vunpack.c.l.bf16 %v5989_v42  ;;  %v6088_v47 = vunpack.c.l.bf16 %v6027_v52 }
 0x36c   :  { %v6057_v24 = vunpack.c.l.bf16 %v5990_v0  ;;  %v6089_v32 = vunpack.c.l.bf16 %v6028_v50  ;;  %v11820_v43 = vsel %vm9138_vm5, %v8055_v20, %v5833_v21  ;;  %v6344_v28 = vsel %vm10827_vm3, %v15027_v30, 0 }
 0x36d   :  { %v11826_v62 = vand.u32 2147483647, %v11779_v55  ;;  %v5399_v2 = vpack.c.bf16 %v5370_v4, %v5370_v4  ;;  %v6117_v10 = vadd.f32 %v6088_v47, %v6056_v14  ;;  %v5400_v51 = vpack.c.bf16 %v5371_v17, %v5371_v17 }
 0x36e   :  { %v6118_v35 = vadd.f32 %v6089_v32, %v6057_v24  ;;  %v6187_v11 = vsel %vm11224_vm13, %v11714_v37, 0  ;;  %v6188_v26 = vsel %vm11224_vm13, %v11730_v6, 0  ;;  %v6343_v15 = vsel %vm10827_vm3, %v11820_v43, 0 }
 0x36f   :  { %v6149_v29 = vpack.c.bf16 %v6117_v10, %v6117_v10  ;;  %v6497_v52 = vunpack.c.l.b16 %v6343_v15  ;;  %v11837_v42 = vunpack.c.l.b16 %v6344_v28  ;;  %v5434_v4 = vsel %vm10979_vm10, %v11437_v36, 0 }
 0x370   :  { %v3363_v17 = vmul.f32 1.0614054, %v11801_v5  ;;  %v11846_v37 = vsel %vm11774_vm12, %v11666_v63, %v3088_v8  ;;  %v6150_v50 = vpack.c.bf16 %v6118_v35, %v6118_v35  ;;  %v5435_v59 = vsel %vm10979_vm10, %v11442_v54, 0 }
 0x371   :  { %15028 = vst [vmem:[#allocation25_spill] sm:$0xff] %v11837_v42  ;;  %v3097_v31 = vsub.f32 1.0, %v3096_v41  ;;  %v2822_v0 = vmul.f32 0.3275911, %v11826_v62  ;;  %v5466_v20 = vunpack.c.l.bf16 %v5399_v2  ;;  %v5467_v21 = vunpack.c.l.bf16 %v5400_v51 }
 0x372   :  { %v6216_v14 = vunpack.c.l.bf16 %v6149_v29  ;;  %v6248_v47 = vunpack.c.l.bf16 %v6187_v11  ;;  %v6249_v36 = vunpack.c.l.bf16 %v6188_v26  ;;  %v5495_v24 = vunpack.c.l.bf16 %v5434_v4 }
 0x373   :  { %v6217_v32 = vunpack.c.l.bf16 %v6150_v50  ;;  %v6523_v30 = vpack.c.b16 %v11837_v42, %v6497_v52  ;;  %v5496_v12 = vunpack.c.l.bf16 %v5435_v59  ;;  %v5606_v63 = vshrl.u32 %v11786_v57, 16 }
 0x374   :  { %v3968_v8 = vmul.f32 %v11597_v49, %v11420_v45  ;;  %v3394_v28 = vadd.f32 -1.4531521, %v11606_v13  ;;  %v3395_v41 = vadd.f32 -1.4531521, %v3363_v17  ;;  %v6277_v10 = vadd.f32 %v6248_v47, %v6216_v14 }
 0x375   :  { %v3521_v2 = vadd.f32 -0.28449672, %v11600_v3  ;;  %v6278_v51 = vadd.f32 %v6249_v36, %v6217_v32  ;;  %6796 = vmatmul.bf16.gmra.mxu2 %v6523_v30  ;;  %v5527_v35 = vadd.f32 %v5495_v24, %v5466_v20  ;;  %v5528_v11 = vadd.f32 %v5496_v12, %v5467_v21 }
 0x376   :  { %v3364_v26 = vmul.f32 1.0614054, %v11846_v37  ;;  %v3098_v15 = vmul.f32 %v11781_v46, %v3097_v31  ;;  %v11860_v29 = vadd.f32 1.0, %v2822_v0  ;;  %v6309_v52 = vpack.c.bf16 %v6277_v10, %v6277_v10 }
 0x377   :  { %v6310_v4 = vpack.c.bf16 %v6278_v51, %v6278_v51  ;;  %v5559_v50 = vpack.c.bf16 %v5527_v35, %v5527_v35  ;;  %v5608_v45 = vrot.slane %v5606_v63, 4  ;;  %v5609_v49 = vshll.u32 %v11786_v57, 16 }
 0x378   :  { %v11863_v13 = vpack.c.bf16 %v3968_v8, %v3968_v8  ;;  %v3426_v3 = vmul.f32 %v3394_v28, %v11595_v53  ;;  %v3427_v17 = vmul.f32 %v3395_v41, %v11801_v5  ;;  %v5677_v59 = vsel %vm11131_vm9, %v11730_v6, 0 }
 0x379   :  { %v6402_v20 = vunpack.c.l.b16 %v6309_v52  ;;  %v6403_v31 = vunpack.c.l.b16 %v6310_v4  ;;  %v5611_v0 = vrot.slane %v5609_v49, 5  ;;  %v5615_v21 = vshll.u32 %v11788_v48, 16 }
 0x37a   :  { %v3396_v14 = vadd.f32 -1.4531521, %v3364_v26  ;;  %v3099_v47 = vadd.f32 %v11781_v46, %v3098_v15  ;;  %vm3101_vm14 = vweird.f32 %v11781_v46  ;;  %8550 = vrcp.f32 %v11860_v29 }
 0x37b   :  { %v5741_v57 = vunpack.c.l.bf16 %v5677_v59  ;;  %v6432_v36 = vpack.c.b16 %v6403_v31, %v6402_v20  ;;  %v5612_v24 = vor.u32 %v5611_v0, %v5608_v45  ;;  %v5709_v32 = vunpack.c.l.bf16 %v5559_v50 }
 0x37c   :  { %v3458_v30 = vadd.f32 1.4214138, %v3426_v3  ;;  %vm3100_vm4 = vweird.f32 %v11738_v25  ;;  %v3104_v6 = vand.u32 2147483647, %v11738_v25  ;;  %v3106_v12 = vand.u32 2147483648, %v11738_v25 }
 0x37d   :  { %6702 = vmatmul.bf16.gmra.mxu1 %v6432_v36  ;;  %v5560_v48 = vpack.c.bf16 %v5528_v11, %v5528_v11  ;;  %v5613_v63 = vrot.slane %v5612_v24, 4  ;;  %v5617_v8 = vrot.slane %v5615_v21, 5  ;;  %v5773_v28 = vadd.f32 %v5741_v57, %v5709_v32  ;;  %vm11883_vm15 = vmor %vm3100_vm4, %vm3101_vm14 }
 0x37e   :  { %v15029_v41 = vshll.u32 %v11404_v16, 16  ;;  %v3459_v51 = vadd.f32 1.4214138, %v3427_v17  ;;  %v3428_v35 = vmul.f32 %v3396_v14, %v11846_v37  ;;  %v5863_v25 = vsel %vm11145_vm6, %v11658_v7, 0 }
 0x37f   :  { %v3553_v11 = vmul.f32 %v3521_v2, %v11396_v61  ;;  %v3103_v16 = vsel %vm11883_vm15, %v11781_v46, %v3099_v47  ;;  %v5805_v15 = vpack.c.bf16 %v5773_v28, %v5773_v28  ;;  %v4100_v4 = vshrl.u32 %v11863_v13, 16 }
 0x380   :  { %v4098_v10 = vor.u32 %v15029_v41, %v11464_v22  ;;  %v11896_v22 = vsel %vm9101_vm2, %v5613_v63, %v5617_v8  ;;  %v11898_v52 = vpop.eup %8550  ;;  %v3490_v50 = vmul.f32 %v3458_v30, %v11595_v53  ;;  %vm3105_vm1 = vcmp.eq.f32.partialorder %v3104_v6, 8.507059e+37 }
 0x381   :  { %v3107_v45 = vor.u32 1.1754944e-38, %v3106_v12  ;;  %v5927_v7 = vunpack.c.l.bf16 %v5863_v25  ;;  %v5678_v2 = vsel %vm11131_vm9, %v11896_v22, 0  ;;  %v5710_v49 = vunpack.c.l.bf16 %v5560_v48 }
 0x382   :  { %v5895_v46 = vunpack.c.l.bf16 %v5805_v15  ;;  %v4299_v3 = vsel %vm10750_vm8, 0, %v4098_v10  ;;  %v3491_v17 = vmul.f32 %v3459_v51, %v11801_v5  ;;  %v3460_v59 = vadd.f32 1.4214138, %v3428_v35 }
 0x383   :  { %v11908_v20 = vsel %vm3105_vm1, %v3107_v45, %v3103_v16  ;;  %v3585_v31 = vadd.f32 0.2548296, %v3553_v11  ;;  %v3111_v0 = vmul.f32 %v11898_v52, %v11860_v29  ;;  %v5742_v21 = vunpack.c.l.bf16 %v5678_v2 }
 0x384   :  { %v5959_v14 = vadd.f32 %v5927_v7, %v5895_v46  ;;  %v4102_v47 = vrot.slane %v4100_v4, 7  ;;  %v3522_v57 = vadd.f32 -0.28449672, %v3490_v50  ;;  %v3651_v36 = vsub.f32 0.0, %v11493_v60 }
 0x385   :  { %v3652_v24 = vsub.f32 0.0, %v11571_v9  ;;  %v3365_v32 = vmul.f32 1.0614054, %v11908_v20  ;;  %v5774_v30 = vadd.f32 %v5742_v21, %v5710_v49  ;;  %v6029_v12 = vsel %vm11186_vm7, %v11442_v54, 0  ;;  %v15033_v49 = vld [vmem:[#allocation64_spill] sm:$0xff] }
 0x386   :  { %v5991_v6 = vpack.c.bf16 %v5959_v14, %v5959_v14  ;;  %v4103_v48 = vshll.u32 %v11863_v13, 16  ;;  %8552 = vpow2.f32 %v11554_v38  ;;  %v3523_v63 = vadd.f32 -0.28449672, %v3491_v17 }
 0x387   :  { %v3492_v8 = vmul.f32 %v3460_v59, %v11846_v37  ;;  %v3112_v28 = vsub.f32 1.0, %v3111_v0  ;;  %v5864_v41 = vsel %vm11145_vm6, %v11820_v43, 0  ;;  %v5806_v10 = vpack.c.bf16 %v5774_v30, %v5774_v30 }
 0x388   :  { %v6058_v51 = vunpack.c.l.bf16 %v5991_v6  ;;  %v11926_v26 = vsel %vm10760_vm11, %v4299_v3, 0  ;;  %v3617_v54 = vmul.f32 %v3585_v31, %v11396_v61  ;;  %v3683_v13 = vmul.f32 %v3651_v36, %v11493_v60  ;;  %v15034_v3 = vld [vmem:[#allocation26_spill] sm:$0xff] }
 0x389   :  { %v6090_v25 = vunpack.c.l.bf16 %v6029_v12  ;;  %v4105_v38 = vor.u32 %v4103_v48, %v4102_v47  ;;  %v3554_v11 = vmul.f32 %v3522_v57, %v11595_v53  ;;  %v3684_v16 = vmul.f32 %v3652_v24, %v11571_v9 }
 0x38a   :  { %v3397_v15 = vadd.f32 -1.4531521, %v3365_v32  ;;  %v3555_v4 = vmul.f32 %v3523_v63, %v11801_v5  ;;  %v5928_v43 = vunpack.c.l.bf16 %v5864_v41  ;;  %v5896_v50 = vunpack.c.l.bf16 %v5806_v10  ;;  %v15046_v10 = vld [vmem:[#allocation80_spill] sm:$0xff] }
 0x38b   :  { %v6119_v45 = vadd.f32 %v6090_v25, %v6058_v51  ;;  %v3524_v7 = vadd.f32 -0.28449672, %v3492_v8  ;;  %v3113_v2 = vmul.f32 %v11898_v52, %v3112_v28  ;;  %v6030_v61 = vsel %vm11186_vm7, %v15033_v49, 0 }
 0x38c   :  { %v6189_v60 = vsel %vm11224_vm13, %v11896_v22, 0  ;;  %v8553_v46 = vpop.eup %8552  ;;  %v11941_v9 = vmul.f32 %v15034_v3, %v3617_v54  ;;  %v3728_v17 = vmul.f32 1.442695, %v3683_v13  ;;  %v5960_v59 = vadd.f32 %v5928_v43, %v5896_v50  ;;  %v15038_v13 = vld [vmem:[#allocation13_spill] sm:$0xff] }
 0x38d   :  { %v6151_v31 = vpack.c.bf16 %v6119_v45, %v6119_v45  ;;  %v4300_v0 = vsel %vm10750_vm8, 0, %v4105_v38  ;;  %v3586_v21 = vadd.f32 0.2548296, %v3554_v11  ;;  %v3730_v14 = vmul.f32 1.442695, %v3684_v16 }
 0x38e   :  { %v3429_v47 = vmul.f32 %v3397_v15, %v11908_v20  ;;  %v5992_v57 = vpack.c.bf16 %v5960_v59, %v5960_v59  ;;  %v11946_v36 = vunpack.c.l.bf16 %v6030_v61  ;;  %v6250_v32 = vunpack.c.l.bf16 %v6189_v60  ;;  %v15039_v15 = vld [vmem:[#allocation14_spill] sm:$0xff]  ;;  %v15041_v61 = vld [vmem:[#allocation73_spill] sm:$0xff] }
 0x38f   :  { %v6218_v24 = vunpack.c.l.bf16 %v6151_v31  ;;  %v3587_v22 = vadd.f32 0.2548296, %v3555_v4  ;;  %v3556_v30 = vmul.f32 %v3524_v7, %v11846_v37  ;;  %v3114_v6 = vadd.f32 %v11898_v52, %v3113_v2 }
 0x390   :  { %15035 = vst [vmem:[#allocation50_spill] sm:$0xff] %v11946_v36  ;;  %vm3116_vm12 = vweird.f32 %v11898_v52  ;;  %v11953_v12 = vsel %vm10760_vm11, %v4300_v0, 0  ;;  %8554 = vpow2.f32 %v3728_v17  ;;  %v6059_v48 = vunpack.c.l.bf16 %v5992_v57  ;;  %v15042_v0 = vld [vmem:[#allocation81_spill] sm:$0xff] }
 0x391   :  { %v6279_v63 = vadd.f32 %v6250_v32, %v6218_v24  ;;  %v3618_v8 = vmul.f32 %v3586_v21, %v11595_v53  ;;  %8556 = vpow2.f32 %v3730_v14  ;;  %vm3115_vm0 = vweird.f32 %v11860_v29  ;;  %v15043_v21 = vld [vmem:[#allocation75_spill] sm:$0xff] }
 0x392   :  { %v3121_v28 = vand.u32 2147483648, %v11860_v29  ;;  %v3461_v41 = vadd.f32 1.4214138, %v3429_v47  ;;  %vm11958_vm14 = vmor %vm3115_vm0, %vm3116_vm12  ;;  %v3119_v51 = vand.u32 2147483647, %v11860_v29  ;;  %v6120_v54 = vadd.f32 %v11946_v36, %v6059_v48  ;;  %v15044_v32 = vld [vmem:[#allocation83_spill] sm:$0xff] }
 0x393   :  { %v6190_v25 = vsel %vm11224_vm13, %v15038_v13, 0  ;;  %v3619_v53 = vmul.f32 %v3587_v22, %v11801_v5  ;;  %v3588_v38 = vadd.f32 0.2548296, %v3556_v30  ;;  %v3118_v11 = vsel %vm11958_vm14, %v11898_v52, %v3114_v6 }
 0x394   :  { %v4442_v16 = vunpack.c.l.b16 %v11926_v26  ;;  %vm3841_vm4 = vcmp.ge.f32.partialorder %v15039_v15, 0.0  ;;  %v6152_v4 = vpack.c.bf16 %v6120_v54, %v6120_v54  ;;  %v4443_v29 = vunpack.c.h.b16 %v11926_v26 }
 0x395   :  { %v4444_v43 = vunpack.c.l.b16 %v11953_v12  ;;  %v4445_v50 = vunpack.c.h.b16 %v11953_v12  ;;  %v3809_v45 = vsub.f32 1.0, %v11941_v9  ;;  %v3778_v7 = vmul.f32 %v8553_v46, %v3618_v8 }
 0x396   :  { %v3122_v5 = vor.u32 1.1754944e-38, %v3121_v28  ;;  %v11977_v2 = vunpack.c.l.bf16 %v6190_v25  ;;  %v8555_v49 = vpop.eup %8554  ;;  %v3493_v52 = vmul.f32 %v3461_v41, %v11908_v20  ;;  %v3653_v60 = vsub.f32 0.0, %v15041_v61 }
 0x397   :  { %vm3120_vm15 = vcmp.eq.f32.partialorder %v3119_v51, 8.507059e+37  ;;  %v6219_v3 = vunpack.c.l.bf16 %v6152_v4  ;;  %v8557_v17 = vpop.eup %8556  ;;  %v3779_v59 = vmul.f32 %v8555_v49, %v3619_v53  ;;  %v3620_v31 = vmul.f32 %v3588_v38, %v11846_v37 }
 0x398   :  { %15040 = vst [vmem:[#allocation11_spill] sm:$0xff] %v11977_v2  ;;  %v2406_v14 = vadd.f32 %v15043_v21, %v15042_v0  ;;  %v11984_v47 = vsel %vm3120_vm15, %v3122_v5, %v3118_v11  ;;  %v11986_v46 = vpack.c.b16 %v4442_v16, %v4442_v16  ;;  %v11988_v9 = vpack.c.b16 %v4443_v29, %v4443_v29  ;;  %v2583_v29 = vpop.f32.mrf.mxu3 }
 0x399   :  { %v11990_v57 = vpack.c.b16 %v4444_v43, %v4444_v43  ;;  %v11992_v24 = vpack.c.b16 %v4445_v50, %v4445_v50  ;;  %v15045_v22 = vunpack.c.l.b16 %v15044_v32  ;;  %v3873_v6 = vsub.f32 0.0, %v3809_v45 }
 0x39a   :  { %v6280_v37 = vadd.f32 %v11977_v2, %v6219_v3  ;;  %v6311_v48 = vpack.c.bf16 %v6279_v63, %v6279_v63  ;;  %v3810_v8 = vsub.f32 1.0, %v3778_v7  ;;  %v3525_v28 = vadd.f32 -0.28449672, %v3493_v52 }
 0x39b   :  { %v11997_v30 = vpack.c.b16 %v15045_v22, %v15045_v22  ;;  %v3685_v41 = vmul.f32 %v3653_v60, %v15041_v61  ;;  %v2495_v51 = vadd.f32 %v15046_v10, %v2406_v14  ;;  %v3811_v54 = vsub.f32 1.0, %v3779_v59  ;;  %v15047_v61 = vld [vmem:[#allocation12_spill] sm:$0xff] }
 0x39c   :  { %v3780_v13 = vmul.f32 %v8557_v17, %v3620_v31  ;;  %v3366_v25 = vmul.f32 1.0614054, %v11984_v47  ;;  %v6312_v53 = vpack.c.bf16 %v6280_v37, %v6280_v37  ;;  %v8035_v38 = vrot.slane %v11986_v46, 9  ;;  %v15048_v22 = vld [vmem:[#allocation24_spill] sm:$0xff]  ;;  %v2672_v37 = vpop.f32.mrf.mxu0 }
 0x39d   :  { %v5164_v11 = vrot.slane %v11988_v9, 5  ;;  %v8036_v16 = vrot.slane %v11990_v57, 9  ;;  %v5168_v4 = vrot.slane %v11992_v24, 5  ;;  %v3905_v63 = vsel %vm3841_vm4, %v3809_v45, %v3873_v6  ;;  %v15049_v6 = vld [vmem:[#allocation82_spill] sm:$0xff] }
 0x39e   :  { %v6404_v43 = vunpack.c.l.b16 %v6311_v48  ;;  %v6405_v50 = vunpack.c.l.b16 %v6312_v53  ;;  %v3874_v7 = vsub.f32 0.0, %v3810_v8  ;;  %v3557_v5 = vmul.f32 %v3525_v28, %v11908_v20 }
 0x39f   :  { %v3732_v49 = vmul.f32 1.442695, %v3685_v41  ;;  %v2584_v52 = vadd.f32 %v2583_v29, %v2495_v51  ;;  %v2721_v60 = vmul.f32 0.5, %v15047_v61  ;;  %v3875_v3 = vsub.f32 0.0, %v3811_v54 }
 0x3a0   :  { %v3398_v17 = vadd.f32 -1.4531521, %v3366_v25  ;;  %v6433_v59 = vpack.c.b16 %v6405_v50, %v6404_v43  ;;  %v4653_v31 = vshrl.u32 %v11997_v30, 16  ;;  %v3812_v0 = vsub.f32 1.0, %v3780_v13 }
 0x3a1   :  { %v12014_v15 = vsel %vm9138_vm5, %v8035_v38, %v5164_v11  ;;  %v12018_v45 = vsel %vm9138_vm5, %v8036_v16, %v5168_v4  ;;  %v4656_v21 = vshll.u32 %v11997_v30, 16  ;;  %v3937_v14 = vadd.f32 1.0, %v3905_v63 }
 0x3a2   :  { %vm3842_vm1 = vcmp.ge.f32.partialorder %v15048_v22, 0.0  ;;  %vm3843_vm12 = vcmp.ge.f32.partialorder %v15049_v6, 0.0  ;;  %6707 = vmatmul.bf16.gmra.mxu1 %v6433_v59  ;;  %v3589_v28 = vadd.f32 0.2548296, %v3557_v5  ;;  %8558 = vpow2.f32 %v3732_v49  ;;  %v15053_v49 = vld [vmem:[#allocation29_spill] sm:$0xff] }
 0x3a3   :  { %v3906_v48 = vsel %vm3842_vm1, %v3810_v8, %v3874_v7  ;;  %v12023_v41 = vadd.f32 %v2672_v37, %v2584_v52  ;;  %v3907_v10 = vsel %vm3843_vm12, %v3811_v54, %v3875_v3  ;;  %v3430_v51 = vmul.f32 %v3398_v17, %v11984_v47  ;;  %v15052_v7 = vld [vmem:[#allocation21_spill] sm:$0xff]  ;;  %v15054_v17 = vld [vmem:[#allocation84_spill] sm:$0xff] }
 0x3a4   :  { %v6345_v13 = vsel %vm10827_vm3, %v12014_v15, 0  ;;  %v6346_v25 = vsel %vm10827_vm3, %v12018_v45, 0  ;;  %v4441_v53 = vunpack.c.h.b16 %v15044_v32  ;;  %v4655_v38 = vrot.slane %v4653_v31, 4 }
 0x3a5   :  { %15050 = vst [vmem:[#allocation30_spill] sm:$0xff] %v12023_v41  ;;  %v3876_v11 = vsub.f32 0.0, %v3812_v0  ;;  %v4658_v8 = vrot.slane %v4656_v21, 5  ;;  %v3969_v16 = vmul.f32 %v3937_v14, %v2721_v60  ;;  %v3938_v4 = vadd.f32 1.0, %v3906_v48 }
 0x3a6   :  { %v6500_v63 = vunpack.c.l.b16 %v6346_v25  ;;  %v3939_v29 = vadd.f32 1.0, %v3907_v10  ;;  %v3621_v54 = vmul.f32 %v3589_v28, %v11908_v20  ;;  %v12035_v43 = vmul.f32 0.70710677, %v12023_v41 }
 0x3a7   :  { %v6499_v50 = vunpack.c.l.b16 %v6345_v13  ;;  %v2722_v5 = vmul.f32 0.5, %v15052_v7  ;;  %vm3844_vm0 = vcmp.ge.f32.partialorder %v15053_v49, 0.0  ;;  %v3462_v52 = vadd.f32 1.4214138, %v3430_v51 }
 0x3a8   :  { %15051 = vst [vmem:[#allocation48_spill] sm:$0xff] %v12035_v43  ;;  %v8559_v61 = vpop.eup %8558  ;;  %v12039_v3 = vpack.c.b16 %v4441_v53, %v4441_v53  ;;  %v2723_v59 = vmul.f32 0.5, %v15054_v17  ;;  %v3908_v60 = vsel %vm3844_vm0, %v3812_v0, %v3876_v11  ;;  %v4001_v21 = vpack.c.bf16 %v3969_v16, %v3969_v16  ;;  %v15055_v0 = vld [vmem:[#allocation45_spill] sm:$0xff] }
 0x3a9   :  { %v6524_v31 = vpack.c.b16 %v6500_v63, %v6499_v50  ;;  %v3970_v14 = vmul.f32 %v3938_v4, %v2722_v5  ;;  %v3781_v20 = vmul.f32 %v8559_v61, %v3621_v54  ;;  %v12043_v6 = vand.u32 2147483647, %v12035_v43 }
 0x3aa   :  { %v3971_v22 = vmul.f32 %v3939_v29, %v2723_v59  ;;  %v4659_v37 = vor.u32 %v4658_v8, %v4655_v38  ;;  %v3940_v48 = vadd.f32 1.0, %v3908_v60  ;;  %v3494_v28 = vmul.f32 %v3462_v52, %v11984_v47 }
 0x3ab   :  { %6801 = vmatmul.bf16.gmra.mxu2 %v6524_v31  ;;  %v4662_v10 = vshll.u32 %v12039_v3, 16  ;;  %v3654_v51 = vsub.f32 0.0, %v11826_v62  ;;  %v4107_v13 = vshrl.u32 %v4001_v21, 16  ;;  %v4002_v25 = vpack.c.bf16 %v3970_v14, %v3970_v14  ;;  %v15056_v14 = vld [vmem:[#allocation52_spill] sm:$0xff] }
 0x3ac   :  { %v2724_v53 = vmul.f32 0.5, %v15055_v0  ;;  %v4003_v11 = vpack.c.bf16 %v3971_v22, %v3971_v22  ;;  %v3813_v16 = vsub.f32 1.0, %v3781_v20  ;;  %v2823_v4 = vmul.f32 0.3275911, %v12043_v6  ;;  %v15057_v22 = vld [vmem:[#allocation51_spill] sm:$0xff] }
 0x3ad   :  { %v4660_v63 = vrot.slane %v4659_v37, 4  ;;  %v3526_v54 = vadd.f32 -0.28449672, %v3494_v28  ;;  %v4664_v50 = vrot.slane %v4662_v10, 5  ;;  %v3686_v38 = vmul.f32 %v3654_v51, %v11826_v62  ;;  %v15058_v62 = vld [vmem:[#allocation55_spill] sm:$0xff] }
 0x3ae   :  { %v3972_v29 = vmul.f32 %v3940_v48, %v2724_v53  ;;  %v4109_v8 = vrot.slane %v4107_v13, 7  ;;  %v4114_v7 = vshrl.u32 %v4002_v25, 16  ;;  %v4121_v5 = vshrl.u32 %v4003_v11, 16  ;;  %v15059_v48 = vld [vmem:[#allocation69_spill] sm:$0xff] }
 0x3af   :  { %v3877_v49 = vsub.f32 0.0, %v3813_v16  ;;  %v12051_v52 = vadd.f32 1.0, %v2823_v4  ;;  %v12055_v61 = vsel %vm9101_vm2, %v4660_v63, %v4664_v50  ;;  %v4110_v17 = vshll.u32 %v4001_v21, 16  ;;  %v2586_v21 = vpop.f32.mrf.mxu3  ;;  %v15061_v63 = vld [vmem:[#allocation18_spill] sm:$0xff] }
 0x3b0   :  { %v4004_v59 = vpack.c.bf16 %v3972_v29, %v3972_v29  ;;  %v3558_v60 = vmul.f32 %v3526_v54, %v11984_v47  ;;  %v3734_v31 = vmul.f32 1.442695, %v3686_v38  ;;  %v2174_v20 = vadd.f32 %v15057_v22, %v15056_v14  ;;  %v2675_v14 = vpop.f32.mrf.mxu0 }
 0x3b1   :  { %v4112_v37 = vor.u32 %v4110_v17, %v4109_v8  ;;  %vm3845_vm14 = vcmp.ge.f32.partialorder %v15058_v62, 0.0  ;;  %vm15060_vm4 = vnez %v15059_v48  ;;  %v4116_v10 = vrot.slane %v4114_v7, 7 }
 0x3b2   :  { %v4989_v28 = vsel %vm15060_vm4, %v12055_v61, 0  ;;  %v4123_v51 = vrot.slane %v4121_v5, 7  ;;  %v3909_v13 = vsel %vm3845_vm14, %v3813_v16, %v3877_v49  ;;  %8560 = vrcp.f32 %v12051_v52 }
 0x3b3   :  { %v4374_v0 = vsel %vm10827_vm3, %v15044_v32, 0  ;;  %v4128_v53 = vshrl.u32 %v4004_v59, 16  ;;  %v3590_v4 = vadd.f32 0.2548296, %v3558_v60  ;;  %v2587_v29 = vadd.f32 %v2586_v21, %v15061_v63  ;;  %v15062_v60 = vld [vmem:[#allocation72_spill] sm:$0xff]  ;;  %v15066_v63 = vld [vmem:[#allocation63_spill] sm:$0xff] }
 0x3b4   :  { %v4117_v54 = vshll.u32 %v4002_v25, 16  ;;  %v4124_v50 = vshll.u32 %v4003_v11, 16  ;;  %8562 = vpow2.f32 %v3734_v31  ;;  %v5047_v38 = vunpack.c.l.bf16 %v4989_v28  ;;  %v15064_v28 = vld [vmem:[#allocation53_spill] sm:$0xff] }
 0x3b5   :  { %v5436_v8 = vsel %vm10979_vm10, %v15044_v32, 0  ;;  %v3941_v16 = vadd.f32 1.0, %v3909_v13  ;;  %v5018_v7 = vunpack.c.l.bf16 %v4374_v0  ;;  %v4301_v5 = vsel %vm10750_vm8, 0, %v4112_v37 }
 0x3b6   :  { %v4119_v49 = vor.u32 %v4117_v54, %v4116_v10  ;;  %v4126_v17 = vor.u32 %v4124_v50, %v4123_v51  ;;  %v4130_v22 = vrot.slane %v4128_v53, 7  ;;  %v2725_v62 = vmul.f32 0.5, %v15062_v60  ;;  %v15068_v50 = vld [vmem:[#allocation65_spill] sm:$0xff] }
 0x3b7   :  { %v3622_v25 = vmul.f32 %v3590_v4, %v11984_v47  ;;  %v12076_v11 = vadd.f32 %v2675_v14, %v2587_v29  ;;  %v12081_v21 = vadd.f32 %v15064_v28, %v2174_v20  ;;  %v4667_v32 = vshrl.u32 %v11986_v46, 16  ;;  %v15067_v29 = vld [vmem:[#allocation54_spill] sm:$0xff]  ;;  %v15072_v28 = vld [vmem:[#allocation28_spill] sm:$0xff] }
 0x3b8   :  { %v12078_v31 = vpop.eup %8560  ;;  %v4670_v13 = vshll.u32 %v11986_v46, 16  ;;  %v5076_v37 = vadd.f32 %v5047_v38, %v5018_v7  ;;  %v5497_v10 = vunpack.c.l.bf16 %v5436_v8  ;;  %v12087_v51 = vsel %vm10760_vm11, %v4301_v5, 0  ;;  %v15069_v46 = vld [vmem:[#allocation34_spill] sm:$0xff] }
 0x3b9   :  { %15063 = vst [vmem:[#allocation15_spill] sm:$0xff] %v12076_v11  ;;  %v4131_v0 = vshll.u32 %v4004_v59, 16  ;;  %v3973_v53 = vmul.f32 %v3941_v16, %v2725_v62  ;;  %v4302_v4 = vsel %vm10750_vm8, 0, %v4119_v49  ;;  %v4303_v20 = vsel %vm10750_vm8, 0, %v4126_v17  ;;  %v15071_v62 = vld [vmem:[#allocation33_spill] sm:$0xff] }
 0x3ba   :  { %15065 = vst [vmem:[#allocation57_spill] sm:$0xff] %v12081_v21  ;;  %v8563_v47 = vpop.eup %8562  ;;  %v2322_v54 = vadd.f32 %v15067_v29, %v15066_v63  ;;  %v12097_v38 = vadd.f32 %v15069_v46, %v15068_v50  ;;  %v3126_v59 = vmul.f32 %v12078_v31, %v12051_v52  ;;  %v12106_v16 = vmul.f32 0.70710677, %v12076_v11  ;;  %v15078_v50 = vld [vmem:[#allocation37_spill] sm:$0xff]  ;;  %v15085_v21 = vld [vmem:[#allocation71_spill] sm:$0xff] }
 0x3bb   :  { %v12099_v8 = vor.u32 %v4131_v0, %v4130_v22  ;;  %v12101_v7 = vmul.f32 %v8563_v47, %v3622_v25  ;;  %v4669_v5 = vrot.slane %v4667_v32, 4  ;;  %v4672_v49 = vrot.slane %v4670_v13, 5  ;;  %v15073_v22 = vld [vmem:[#allocation32_spill] sm:$0xff]  ;;  %v15074_v25 = vld [vmem:[#allocation35_spill] sm:$0xff] }
 0x3bc   :  { %15070 = vst [vmem:[#allocation62_spill] sm:$0xff] %v12106_v16  ;;  %v5105_v17 = vpack.c.bf16 %v5076_v37, %v5076_v37  ;;  %v8034_v14 = vrot.slane %v11997_v30, 9  ;;  %v12109_v60 = vpack.c.bf16 %v3973_v53, %v3973_v53  ;;  %v12113_v63 = vadd.f32 %v15072_v28, %v15071_v62  ;;  %v15075_v30 = vld [vmem:[#allocation17_spill] sm:$0xff]  ;;  %v15076_v13 = vld [vmem:[#allocation36_spill] sm:$0xff]  ;;  %v15077_v53 = vld [vmem:[#allocation39_spill] sm:$0xff] }
 0x3bd   :  { %v12117_v0 = vadd.f32 %v15074_v25, %v15073_v22  ;;  %v5160_v47 = vrot.slane %v12039_v3, 5  ;;  %v12122_v29 = vsel %vm10760_vm11, %v4302_v4, 0  ;;  %v12125_v32 = vmul.f32 0.5, %v11756_v18 }
 0x3be   :  { %v12129_v37 = vadd.f32 %v15076_v13, %v15075_v30  ;;  %v12133_v46 = vadd.f32 %v15078_v50, %v15077_v53  ;;  %v12137_v62 = vsel %vm10760_vm11, %v4303_v20, 0  ;;  %v3814_v3 = vsub.f32 1.0, %v12101_v7  ;;  %v15083_v53 = vld [vmem:[#allocation16_spill] sm:$0xff] }
 0x3bf   :  { %15080 = vst [vmem:[#allocation77_spill] sm:$0xff] %v12137_v62  ;;  %v3127_v28 = vsub.f32 1.0, %v3126_v59  ;;  %v12141_v4 = vand.u32 2147483647, %v12106_v16  ;;  %v4673_v22 = vor.u32 %v4672_v49, %v4669_v5  ;;  %v5161_v25 = vsel %vm9138_vm5, %v8034_v14, %v5160_v47  ;;  %v15084_v49 = vld [vmem:[#allocation74_spill] sm:$0xff] }
 0x3c0   :  { %15079 = vst [vmem:[#allocation58_spill] sm:$0xff] %v12133_v46  ;;  %v5314_v30 = vunpack.c.l.bf16 %v5105_v17  ;;  %v4135_v13 = vshrl.u32 %v12109_v60, 16  ;;  %vm3846_vm15 = vcmp.ge.f32.partialorder %v11779_v55, 0.0  ;;  %v4681_v20 = vshrl.u32 %v11990_v57, 16 }
 0x3c1   :  { %15081 = vst [vmem:[#allocation66_spill] sm:$0xff] %v12141_v4  ;;  %v4684_v7 = vshll.u32 %v11990_v57, 16  ;;  %vm15082_vm1 = vnez %v14923_v40  ;;  %v2411_v50 = vadd.f32 %v15083_v53, %v2322_v54  ;;  %v4676_v18 = vshll.u32 %v11988_v9, 16 }
 0x3c2   :  { %v5285_v59 = vsel %vm15082_vm1, %v5161_v25, 0  ;;  %v5529_v2 = vadd.f32 %v5497_v10, %v15084_v49  ;;  %v3878_v14 = vsub.f32 0.0, %v3814_v3  ;;  %v3128_v17 = vmul.f32 %v12078_v31, %v3127_v28 }
 0x3c3   :  { %v5343_v5 = vunpack.c.l.bf16 %v5285_v59  ;;  %v2824_v47 = vmul.f32 0.3275911, %v12141_v4  ;;  %v5679_v36 = vsel %vm11131_vm9, %v12055_v61, 0  ;;  %v3134_v57 = vand.u32 2147483647, %v12051_v52 }
 0x3c4   :  { %v2500_v42 = vadd.f32 %v15085_v21, %v2411_v50  ;;  %v4674_v62 = vrot.slane %v4673_v22, 4  ;;  %v4683_v53 = vrot.slane %v4681_v20, 4  ;;  %v4686_v9 = vrot.slane %v4684_v7, 5  ;;  %v2588_v22 = vpop.f32.mrf.mxu3 }
 0x3c5   :  { %v5372_v54 = vadd.f32 %v5343_v5, %v5314_v30  ;;  %v5437_v10 = vsel %vm10979_vm10, %v11926_v26, 0  ;;  %v5561_v59 = vpack.c.bf16 %v5529_v2, %v5529_v2  ;;  %v3136_v28 = vand.u32 2147483648, %v12051_v52 }
 0x3c6   :  { %v4678_v49 = vrot.slane %v4676_v18, 5  ;;  %v5743_v11 = vunpack.c.l.bf16 %v5679_v36  ;;  %v12169_v61 = vadd.f32 %v12078_v31, %v3128_v17  ;;  %vm3131_vm12 = vweird.f32 %v12078_v31 }
 0x3c7   :  { %v5401_v16 = vpack.c.bf16 %v5372_v54, %v5372_v54  ;;  %v12172_v21 = vadd.f32 1.0, %v2824_v47  ;;  %v5711_v30 = vunpack.c.l.bf16 %v5561_v59  ;;  %v2589_v20 = vadd.f32 %v2588_v22, %v2500_v42 }
 0x3c8   :  { %v12176_v7 = vsel %vm9101_vm2, %v4674_v62, %v4678_v49  ;;  %v5498_v50 = vunpack.c.l.bf16 %v5437_v10  ;;  %v12178_v5 = vrot.slane %v4135_v13, 7  ;;  %vm3130_vm0 = vweird.f32 %v12051_v52  ;;  %v2677_v52 = vpop.f32.mrf.mxu0 }
 0x3c9   :  { %v5468_v2 = vunpack.c.l.bf16 %v5401_v16  ;;  %v4687_v36 = vor.u32 %v4686_v9, %v4683_v53  ;;  %v5775_v18 = vadd.f32 %v5743_v11, %v5711_v30  ;;  %v3910_v17 = vsel %vm3846_vm15, %v3814_v3, %v3878_v14  ;;  %vm12183_vm14 = vmor %vm3130_vm0, %vm3131_vm12 }
 0x3ca   :  { %v3137_v42 = vor.u32 1.1754944e-38, %v3136_v28  ;;  %v5865_v62 = vsel %vm11145_vm6, %v5161_v25, 0  ;;  %v3133_v16 = vsel %vm12183_vm14, %v12078_v31, %v12169_v61  ;;  %v4690_v11 = vshll.u32 %v11992_v24, 16 }
 0x3cb   :  { %v5530_v54 = vadd.f32 %v5498_v50, %v5468_v2  ;;  %v5680_v55 = vsel %vm11131_vm9, %v12176_v7, 0  ;;  %v5807_v3 = vpack.c.bf16 %v5775_v18, %v5775_v18  ;;  %vm12197_vm15 = vcmp.eq.f32.partialorder %v3134_v57, 8.507059e+37 }
 0x3cc   :  { %8564 = vrcp.f32 %v12172_v21  ;;  %v12202_v25 = vadd.f32 %v2677_v52, %v2589_v20  ;;  %v5866_v31 = vsel %vm11145_vm6, %v12014_v15, 0  ;;  %v4688_v14 = vrot.slane %v4687_v36, 4 }
 0x3cd   :  { %v5562_v49 = vpack.c.bf16 %v5530_v54, %v5530_v54  ;;  %v5897_v24 = vunpack.c.l.bf16 %v5807_v3  ;;  %v5929_v53 = vunpack.c.l.bf16 %v5865_v62  ;;  %v4446_v9 = vunpack.c.l.b16 %v12087_v51 }
 0x3ce   :  { %15090 = vst [vmem:[#allocation68_spill] sm:$0xff] %v12202_v25  ;;  %v5744_v59 = vunpack.c.l.bf16 %v5680_v55  ;;  %v4447_v57 = vunpack.c.h.b16 %v12087_v51  ;;  %v4448_v28 = vunpack.c.l.b16 %v12122_v29  ;;  %v4692_v61 = vrot.slane %v4690_v11, 5 }
 0x3cf   :  { %v5712_v10 = vunpack.c.l.bf16 %v5562_v49  ;;  %v5961_v22 = vadd.f32 %v5929_v53, %v5897_v24  ;;  %v4449_v30 = vunpack.c.h.b16 %v12122_v29  ;;  %v12211_v20 = vpack.c.b16 %v4446_v9, %v4446_v9 }
 0x3d0   :  { %v6031_v50 = vsel %vm11186_vm7, %v11926_v26, 0  ;;  %v12216_v36 = vpack.c.b16 %v4447_v57, %v4447_v57  ;;  %v12218_v18 = vpack.c.b16 %v4448_v28, %v4448_v28  ;;  %v12221_v47 = vmul.f32 0.70710677, %v12202_v25 }
 0x3d1   :  { %v5776_v2 = vadd.f32 %v5744_v59, %v5712_v10  ;;  %v12225_v54 = vsel %vm9101_vm2, %v4688_v14, %v4692_v61  ;;  %v5993_v62 = vpack.c.bf16 %v5961_v22, %v5961_v22  ;;  %v12227_v52 = vpack.c.b16 %v4449_v30, %v4449_v30 }
 0x3d2   :  { %15091 = vst [vmem:[#allocation31_spill] sm:$0xff] %v12221_v47  ;;  %v12229_v11 = vpop.eup %8564  ;;  %v5930_v55 = vunpack.c.l.bf16 %v5866_v31  ;;  %v4375_v3 = vsel %vm10827_vm3, %v11926_v26, 0  ;;  %v4990_v49 = vsel %vm15060_vm4, %v12176_v7, 0  ;;  %v6092_v9 = vunpack.c.l.bf16 %v6031_v50 }
 0x3d3   :  { %v5808_v24 = vpack.c.bf16 %v5776_v2, %v5776_v2  ;;  %v6060_v53 = vunpack.c.l.bf16 %v5993_v62  ;;  %v8037_v14 = vrot.slane %v12211_v20, 9  ;;  %v5172_v10 = vrot.slane %v12216_v36, 5 }
 0x3d4   :  { %v4991_v59 = vsel %vm15060_vm4, %v12225_v54, 0  ;;  %v8038_v57 = vrot.slane %v12218_v18, 9  ;;  %v5176_v26 = vrot.slane %v12227_v52, 5  ;;  %v12246_v28 = vsel %vm12197_vm15, %v3137_v42, %v3133_v16 }
 0x3d5   :  { %v5898_v31 = vunpack.c.l.bf16 %v5808_v24  ;;  %v12249_v61 = vand.u32 2147483647, %v12221_v47  ;;  %v5048_v22 = vunpack.c.l.bf16 %v4990_v49  ;;  %v6121_v30 = vadd.f32 %v6092_v9, %v6060_v53 }
 0x3d6   :  { %v3942_v2 = vadd.f32 1.0, %v3910_v17  ;;  %v4376_v50 = vsel %vm10827_vm3, %v11953_v12, 0  ;;  %v5019_v62 = vunpack.c.l.bf16 %v4375_v3  ;;  %v5049_v25 = vunpack.c.l.bf16 %v4991_v59 }
 0x3d7   :  { %15092 = vst [vmem:[#allocation56_spill] sm:$0xff] %v12249_v61  ;;  %v5962_v24 = vadd.f32 %v5930_v55, %v5898_v31  ;;  %v6032_v43 = vsel %vm11186_vm7, %v11953_v12, 0  ;;  %v6153_v13 = vpack.c.bf16 %v6121_v30, %v6121_v30  ;;  %v12259_v42 = vsel %vm9138_vm5, %v8037_v14, %v5172_v10  ;;  %v2591_v14 = vpop.f32.mrf.mxu3 }
 0x3d8   :  { %v3367_v16 = vmul.f32 1.0614054, %v12246_v28  ;;  %v6191_v17 = vsel %vm11224_vm13, %v12176_v7, 0  ;;  %v12267_v55 = vsel %vm9138_vm5, %v8038_v57, %v5176_v26  ;;  %v2825_v3 = vmul.f32 0.3275911, %v12249_v61 }
 0x3d9   :  { %v5994_v49 = vpack.c.bf16 %v5962_v24, %v5962_v24  ;;  %v5020_v53 = vunpack.c.l.bf16 %v4376_v50  ;;  %v5077_v9 = vadd.f32 %v5048_v22, %v5019_v62  ;;  %v6220_v59 = vunpack.c.l.bf16 %v6153_v13  ;;  %v12279_v22 = vpop.f32.mrf.mxu1 }
 0x3da   :  { %v3974_v31 = vmul.f32 %v3942_v2, %v12125_v32  ;;  %v6093_v30 = vunpack.c.l.bf16 %v6032_v43  ;;  %v6347_v24 = vsel %vm10827_vm3, %v12259_v42, 0  ;;  %v3141_v7 = vmul.f32 %v12229_v11, %v12172_v21 }
 0x3db   :  { %v6061_v10 = vunpack.c.l.bf16 %v5994_v49  ;;  %v5078_v1 = vadd.f32 %v5049_v25, %v5020_v53  ;;  %v6252_v57 = vunpack.c.l.bf16 %v6191_v17  ;;  %v6348_v26 = vsel %vm10827_vm3, %v12267_v55, 0  ;;  %v2680_v25 = vpop.f32.mrf.mxu0  ;;  %v12286_v17 = vpop.f32.mrf.mxu2 }
 0x3dc   :  { %v6192_v43 = vsel %vm11224_vm13, %v12225_v54, 0  ;;  %v6501_v32 = vunpack.c.l.b16 %v6347_v24  ;;  %v6502_v2 = vunpack.c.l.b16 %v6348_v26  ;;  %v3399_v62 = vadd.f32 -1.4531521, %v3367_v16 }
 0x3dd   :  { %v6122_v50 = vadd.f32 %v6093_v30, %v6061_v10  ;;  %v12284_v13 = vadd.f32 1.0, %v2825_v3  ;;  %v5106_v49 = vpack.c.bf16 %v5077_v9, %v5077_v9  ;;  %v6281_v47 = vadd.f32 %v6252_v57, %v6220_v59 }
 0x3de   :  { %v6525_v41 = vpack.c.b16 %v6502_v2, %v6501_v32  ;;  %v4695_v61 = vshrl.u32 %v12211_v20, 16  ;;  %v4698_v10 = vshll.u32 %v12211_v20, 16  ;;  %v3142_v30 = vsub.f32 1.0, %v3141_v7 }
 0x3df   :  { %v6154_v53 = vpack.c.bf16 %v6122_v50, %v6122_v50  ;;  %v5107_v46 = vpack.c.bf16 %v5078_v1, %v5078_v1  ;;  %v6253_v4 = vunpack.c.l.bf16 %v6192_v43  ;;  %v4704_v24 = vshll.u32 %v12216_v36, 16  ;;  %v12301_v2 = vpop.f32.mrf.mxu3 }
 0x3e0   :  { %6806 = vmatmul.bf16.gmra.mxu2 %v6525_v41  ;;  %v4697_v16 = vrot.slane %v4695_v61, 4  ;;  %v4700_v3 = vrot.slane %v4698_v10, 5  ;;  %v4709_v9 = vshrl.u32 %v12218_v18, 16  ;;  %8566 = vrcp.f32 %v12284_v13 }
 0x3e1   :  { %v6221_v26 = vunpack.c.l.bf16 %v6154_v53  ;;  %v5286_v59 = vsel %vm15082_vm1, %v12014_v15, 0  ;;  %v5287_v20 = vsel %vm15082_vm1, %v12018_v45, 0  ;;  %v4712_v1 = vshll.u32 %v12218_v18, 16 }
 0x3e2   :  { %v5315_v7 = vunpack.c.l.bf16 %v5106_v49  ;;  %v6313_v57 = vpack.c.bf16 %v6281_v47, %v6281_v47  ;;  %v4701_v41 = vor.u32 %v4700_v3, %v4697_v16  ;;  %v2592_v61 = vadd.f32 %v2591_v14, %v11761_v39  ;;  %v12307_v47 = vpop.f32.mrf.mxu1 }
 0x3e3   :  { %v6282_v36 = vadd.f32 %v6253_v4, %v6221_v26  ;;  %v5316_v50 = vunpack.c.l.bf16 %v5107_v46  ;;  %v4711_v43 = vrot.slane %v4709_v9, 4  ;;  %v4714_v32 = vrot.slane %v4712_v1, 5 }
 0x3e4   :  { %v5344_v53 = vunpack.c.l.bf16 %v5286_v59  ;;  %v4702_v15 = vrot.slane %v4701_v41, 4  ;;  %v4706_v58 = vrot.slane %v4704_v24, 5  ;;  %v4138_v27 = vshll.u32 %v12109_v60, 16  ;;  %v12330_v59 = vpop.f32.mrf.mxu0 }
 0x3e5   :  { %v6314_v10 = vpack.c.bf16 %v6282_v36, %v6282_v36  ;;  %v12304_v44 = vpack.c.bf16 %v3974_v31, %v3974_v31  ;;  %v5345_v18 = vunpack.c.l.bf16 %v5287_v20  ;;  %v4718_v4 = vshll.u32 %v12227_v52, 16 }
 0x3e6   :  { %v5373_v49 = vadd.f32 %v5344_v53, %v5315_v7  ;;  %v6406_v39 = vunpack.c.l.b16 %v6313_v57  ;;  %v12311_v14 = vsel %vm9101_vm2, %v4702_v15, %v4706_v58  ;;  %v12313_v26 = vpop.eup %8566  ;;  %v3431_v24 = vmul.f32 %v3399_v62, %v12246_v28  ;;  %v2507_v62 = vpop.f32.mrf.mxu2 }
 0x3e7   :  { %v6407_v46 = vunpack.c.l.b16 %v6314_v10  ;;  %v12316_v16 = vadd.f32 %v2680_v25, %v2592_v61  ;;  %v5374_v60 = vadd.f32 %v5345_v18, %v5316_v50  ;;  %v4715_v31 = vor.u32 %v4714_v32, %v4711_v43 }
 0x3e8   :  { %v15093_v52 = vsel %vm10750_vm8, 0, %v12099_v8  ;;  %v12327_v9 = vor.u32 %v4138_v27, %v12178_v5  ;;  %v3143_v58 = vmul.f32 %v12229_v11, %v3142_v30  ;;  %v4377_v20 = vsel %vm10827_vm3, %v12087_v51, 0 }
 0x3e9   :  { %v12324_v3 = vsel %vm10760_vm11, %v15093_v52, 0  ;;  %v6434_v25 = vpack.c.b16 %v6407_v46, %v6406_v39  ;;  %v4716_v1 = vrot.slane %v4715_v31, 4  ;;  %v4720_v7 = vrot.slane %v4718_v4, 5  ;;  %v2596_v39 = vpop.f32.mrf.mxu3 }
 0x3ea   :  { %15094 = vst [vmem:[#allocation70_spill] sm:$0xff] %v12324_v3  ;;  %v4992_v8 = vsel %vm15060_vm4, %v12311_v14, 0  ;;  %v5402_v27 = vpack.c.bf16 %v5373_v49, %v5373_v49  ;;  %v4378_v5 = vsel %vm10827_vm3, %v12122_v29, 0  ;;  %v3463_v57 = vadd.f32 1.4214138, %v3431_v24 }
 0x3eb   :  { %6712 = vmatmul.bf16.gmra.mxu1 %v6434_v25  ;;  %v5050_v30 = vunpack.c.l.bf16 %v4992_v8  ;;  %v12343_v41 = vmul.f32 0.70710677, %v12316_v16  ;;  %v5403_v61 = vpack.c.bf16 %v5374_v60, %v5374_v60  ;;  %v12347_v50 = vsel %vm9101_vm2, %v4716_v1, %v4720_v7 }
 0x3ec   :  { %v3144_v43 = vadd.f32 %v12229_v11, %v3143_v58  ;;  %vm3146_vm12 = vweird.f32 %v12229_v11  ;;  %v4993_v32 = vsel %vm15060_vm4, %v12347_v50, 0  ;;  %v5021_v53 = vunpack.c.l.bf16 %v4377_v20  ;;  %v2420_v20 = vpop.f32.mrf.mxu1 }
 0x3ed   :  { %v3156_v10 = vmul.f32 %v12313_v26, %v12284_v13  ;;  %v5022_v15 = vunpack.c.l.bf16 %v4378_v5  ;;  %v5051_v18 = vunpack.c.l.bf16 %v4993_v32  ;;  %v5438_v4 = vsel %vm10979_vm10, %v11953_v12, 0 }
 0x3ee   :  { %v2416_v49 = vadd.f32 %v12279_v22, %v12097_v38  ;;  %v5469_v46 = vunpack.c.l.bf16 %v5402_v27  ;;  %v5079_v24 = vadd.f32 %v5050_v30, %v5021_v53  ;;  %v5439_v60 = vsel %vm10979_vm10, %v12087_v51, 0  ;;  %v2685_v30 = vpop.f32.mrf.mxu0 }
 0x3ef   :  { %vm3145_vm0 = vweird.f32 %v12172_v21  ;;  %v12366_v31 = vand.u32 2147483647, %v12343_v41  ;;  %v5470_v52 = vunpack.c.l.bf16 %v5403_v61  ;;  %v5080_v58 = vadd.f32 %v5051_v18, %v5022_v15  ;;  %v2509_v61 = vpop.f32.mrf.mxu2 }
 0x3f0   :  { %v3149_v25 = vand.u32 2147483647, %v12172_v21  ;;  %v3151_v12 = vand.u32 2147483648, %v12172_v21  ;;  %v2505_v38 = vadd.f32 %v12286_v17, %v2416_v49  ;;  %v5499_v22 = vunpack.c.l.bf16 %v5438_v4  ;;  %vm12375_vm14 = vmor %vm3145_vm0, %vm3146_vm12 }
 0x3f1   :  { %v3495_v1 = vmul.f32 %v3463_v57, %v12246_v28  ;;  %v3655_v7 = vsub.f32 0.0, %v12043_v6  ;;  %v3157_v27 = vsub.f32 1.0, %v3156_v10  ;;  %v5500_v5 = vunpack.c.l.bf16 %v5439_v60 }
 0x3f2   :  { %v3148_v21 = vsel %vm12375_vm14, %v12229_v11, %v3144_v43  ;;  %v5288_v17 = vsel %vm15082_vm1, %v12259_v42, 0  ;;  %v5108_v57 = vpack.c.bf16 %v5079_v24, %v5079_v24  ;;  %v5531_v32 = vadd.f32 %v5499_v22, %v5469_v46 }
 0x3f3   :  { %v2826_v53 = vmul.f32 0.3275911, %v12366_v31  ;;  %v5289_v15 = vsel %vm15082_vm1, %v12267_v55, 0  ;;  %v5109_v10 = vpack.c.bf16 %v5080_v58, %v5080_v58  ;;  %v5532_v18 = vadd.f32 %v5500_v5, %v5470_v52 }
 0x3f4   :  { %vm3150_vm15 = vcmp.eq.f32.partialorder %v3149_v25, 8.507059e+37  ;;  %v3152_v4 = vor.u32 1.1754944e-38, %v3151_v12  ;;  %v2419_v11 = vadd.f32 %v12307_v47, %v12113_v63  ;;  %v2594_v43 = vadd.f32 %v12301_v2, %v2505_v38  ;;  %v2598_v2 = vpop.f32.mrf.mxu3 }
 0x3f5   :  { %v3158_v49 = vmul.f32 %v12313_v26, %v3157_v27  ;;  %v5346_v60 = vunpack.c.l.bf16 %v5288_v17  ;;  %v5317_v24 = vunpack.c.l.bf16 %v5108_v57  ;;  %v5318_v46 = vunpack.c.l.bf16 %v5109_v10 }
 0x3f6   :  { %v12393_v22 = vsel %vm3150_vm15, %v3152_v4, %v3148_v21  ;;  %v2508_v8 = vadd.f32 %v2507_v62, %v2419_v11  ;;  %v5347_v36 = vunpack.c.l.bf16 %v5289_v15  ;;  %v5563_v48 = vpack.c.bf16 %v5531_v32, %v5531_v32 }
 0x3f7   :  { %v4145_v58 = vshll.u32 %v12304_v44, 16  ;;  %v3687_v52 = vmul.f32 %v3655_v7, %v12043_v6  ;;  %v12397_v25 = vadd.f32 1.0, %v2826_v53  ;;  %v12399_v12 = vadd.f32 %v5346_v60, %v5317_v24  ;;  %v2423_v7 = vpop.f32.mrf.mxu1 }
 0x3f8   :  { %v12402_v63 = vadd.f32 %v12330_v59, %v2594_v43  ;;  %v5681_v47 = vsel %vm11131_vm9, %v12225_v54, 0  ;;  %v12407_v38 = vadd.f32 %v5347_v36, %v5318_v46  ;;  %v5564_v62 = vpack.c.bf16 %v5532_v18, %v5532_v18 }
 0x3f9   :  { %v3368_v27 = vmul.f32 1.0614054, %v12393_v22  ;;  %v3159_v5 = vadd.f32 %v12313_v26, %v3158_v49  ;;  %vm3161_vm12 = vweird.f32 %v12313_v26  ;;  %v5682_v6 = vsel %vm11131_vm9, %v12311_v14, 0 }
 0x3fa   :  { %v3527_v59 = vadd.f32 -0.28449672, %v3495_v1  ;;  %v2597_v21 = vadd.f32 %v2596_v39, %v2508_v8  ;;  %v5713_v17 = vunpack.c.l.bf16 %v5563_v48  ;;  %v5714_v57 = vunpack.c.l.bf16 %v5564_v62  ;;  %v2687_v48 = vpop.f32.mrf.mxu0  ;;  %v2512_v39 = vpop.f32.mrf.mxu2 }
 0x3fb   :  { %vm3160_vm0 = vweird.f32 %v12284_v13  ;;  %v3166_v54 = vand.u32 2147483648, %v12284_v13  ;;  %8568 = vrcp.f32 %v12397_v25  ;;  %v5745_v36 = vunpack.c.l.bf16 %v5681_v47 }
 0x3fc   :  { %vm12418_vm14 = vmor %vm3160_vm0, %vm3161_vm12  ;;  %v3164_v53 = vand.u32 2147483647, %v12284_v13  ;;  %v2421_v15 = vadd.f32 %v2420_v20, %v12117_v0  ;;  %v12425_v1 = vmul.f32 0.70710677, %v12402_v63  ;;  %v5746_v10 = vunpack.c.l.bf16 %v5682_v6 }
 0x3fd   :  { %v3400_v18 = vadd.f32 -1.4531521, %v3368_v27  ;;  %v3163_v4 = vsel %vm12418_vm14, %v12313_v26, %v3159_v5  ;;  %v2424_v11 = vadd.f32 %v2423_v7, %v12129_v37  ;;  %v5777_v43 = vadd.f32 %v5745_v36, %v5713_v17 }
 0x3fe   :  { %v12431_v49 = vadd.f32 %v2685_v30, %v2597_v21  ;;  %v2510_v60 = vadd.f32 %v2509_v61, %v2421_v15  ;;  %v5867_v0 = vsel %vm11145_vm6, %v12018_v45, 0  ;;  %v5778_v20 = vadd.f32 %v5746_v10, %v5714_v57 }
 0x3ff   :  { %v3167_v24 = vor.u32 1.1754944e-38, %v3166_v54  ;;  %v2513_v46 = vadd.f32 %v2512_v39, %v2424_v11  ;;  %v5868_v8 = vsel %vm11145_vm6, %v12259_v42, 0  ;;  %v5809_v47 = vpack.c.bf16 %v5777_v43, %v5777_v43  ;;  %v2601_v42 = vpop.f32.mrf.mxu3 }
 0x400   :  { %v3736_v62 = vmul.f32 1.442695, %v3687_v52  ;;  %vm3165_vm15 = vcmp.eq.f32.partialorder %v3164_v53, 8.507059e+37  ;;  %v12440_v37 = vand.u32 2147483647, %v12425_v1  ;;  %v5810_v26 = vpack.c.bf16 %v5778_v20, %v5778_v20 }
 0x401   :  { %v12442_v30 = vpop.eup %8568  ;;  %v3559_v61 = vmul.f32 %v3527_v59, %v12246_v28  ;;  %v12445_v27 = vsel %vm3165_vm15, %v3167_v24, %v3163_v4  ;;  %v5931_v45 = vunpack.c.l.bf16 %v5867_v0  ;;  %v5899_v5 = vunpack.c.l.bf16 %v5809_v47 }
 0x402   :  { %v12448_v6 = vmul.f32 0.70710677, %v12431_v49  ;;  %v2599_v7 = vadd.f32 %v2598_v2, %v2510_v60  ;;  %v5932_v21 = vunpack.c.l.bf16 %v5868_v8  ;;  %v5900_v52 = vunpack.c.l.bf16 %v5810_v26  ;;  %v2690_v0 = vpop.f32.mrf.mxu0 }
 0x403   :  { %v15100_v17 = vshrl.u32 %v12304_v44, 16  ;;  %v3432_v54 = vmul.f32 %v3400_v18, %v12393_v22  ;;  %v2602_v36 = vadd.f32 %v2601_v42, %v2513_v46  ;;  %v5963_v32 = vadd.f32 %v5931_v45, %v5899_v5 }
 0x404   :  { %v3171_v59 = vmul.f32 %v12442_v30, %v12397_v25  ;;  %v2827_v53 = vmul.f32 0.3275911, %v12440_v37  ;;  %v5964_v15 = vadd.f32 %v5932_v21, %v5900_v52  ;;  %v6033_v2 = vsel %vm11186_vm7, %v12087_v51, 0 }
 0x405   :  { %v4144_v57 = vrot.slane %v15100_v17, 7  ;;  %v3591_v10 = vadd.f32 0.2548296, %v3559_v61  ;;  %v3369_v4 = vmul.f32 1.0614054, %v12445_v27  ;;  %v5995_v11 = vpack.c.bf16 %v5963_v32, %v5963_v32 }
 0x406   :  { %v6034_v18 = vsel %vm11186_vm7, %v12122_v29, 0  ;;  %8570 = vpow2.f32 %v3736_v62  ;;  %v12464_v43 = vand.u32 2147483647, %v12448_v6  ;;  %v12466_v60 = vadd.f32 %v2687_v48, %v2599_v7 }
 0x407   :  { %v5996_v20 = vpack.c.bf16 %v5964_v15, %v5964_v15  ;;  %v3464_v24 = vadd.f32 1.4214138, %v3432_v54  ;;  %v12468_v46 = vadd.f32 %v2690_v0, %v2602_v36  ;;  %v6062_v51 = vunpack.c.l.bf16 %v5995_v11  ;;  %v15106_v36 = vld [vmem:[#allocation66_spill] sm:$0xff] }
 0x408   :  { %15102 = vst [vmem:[#allocation64_spill] sm:$0xff] %v12466_v60  ;;  %v6094_v8 = vunpack.c.l.bf16 %v6033_v2  ;;  %v3172_v47 = vsub.f32 1.0, %v3171_v59  ;;  %v12470_v26 = vadd.f32 1.0, %v2827_v53  ;;  %v6095_v45 = vunpack.c.l.bf16 %v6034_v18 }
 0x409   :  { %15103 = vst [vmem:[#allocation26_spill] sm:$0xff] %v12468_v46  ;;  %v6063_v61 = vunpack.c.l.bf16 %v5996_v20  ;;  %v4147_v62 = vor.u32 %v4145_v58, %v4144_v57  ;;  %v3623_v5 = vmul.f32 %v3591_v10, %v12246_v28  ;;  %v3401_v42 = vadd.f32 -1.4531521, %v3369_v4 }
 0x40a   :  { %v6123_v48 = vadd.f32 %v6094_v8, %v6062_v51  ;;  %v2828_v7 = vmul.f32 0.3275911, %v12464_v43  ;;  %v12477_v21 = vmul.f32 0.70710677, %v12466_v60  ;;  %v6193_v54 = vsel %vm11224_vm13, %v12311_v14, 0  ;;  %v15111_v60 = vld [vmem:[#allocation56_spill] sm:$0xff] }
 0x40b   :  { %v6124_v52 = vadd.f32 %v6095_v45, %v6063_v61  ;;  %v3656_v32 = vsub.f32 0.0, %v15106_v36  ;;  %v12484_v59 = vmul.f32 0.70710677, %v12468_v46  ;;  %v6194_v28 = vsel %vm11224_vm13, %v12347_v50, 0 }
 0x40c   :  { %15104 = vst [vmem:[#allocation13_spill] sm:$0xff] %v12477_v21  ;;  %v6155_v44 = vpack.c.bf16 %v6123_v48, %v6123_v48  ;;  %v8571_v58 = vpop.eup %8570  ;;  %v3496_v57 = vmul.f32 %v3464_v24, %v12393_v22  ;;  %v3173_v53 = vmul.f32 %v12442_v30, %v3172_v47  ;;  %8572 = vrcp.f32 %v12470_v26 }
 0x40d   :  { %15107 = vst [vmem:[#allocation14_spill] sm:$0xff] %v12484_v59  ;;  %v6156_v15 = vpack.c.bf16 %v6124_v52, %v6124_v52  ;;  %v4306_v14 = vsel %vm10750_vm8, 0, %v4147_v62  ;;  %v3433_v2 = vmul.f32 %v3401_v42, %v12445_v27  ;;  %v6254_v4 = vunpack.c.l.bf16 %v6193_v54  ;;  %v2425_v62 = vpop.f32.mrf.mxu1 }
 0x40e   :  { %v6222_v10 = vunpack.c.l.bf16 %v6155_v44  ;;  %v12495_v11 = vadd.f32 1.0, %v2828_v7  ;;  %v12498_v18 = vand.u32 2147483647, %v12477_v21  ;;  %v6255_v20 = vunpack.c.l.bf16 %v6194_v28 }
 0x40f   :  { %v6223_v0 = vunpack.c.l.bf16 %v6156_v15  ;;  %v12500_v24 = vmul.f32 %v8571_v58, %v3623_v5  ;;  %v3688_v51 = vmul.f32 %v3656_v32, %v15106_v36  ;;  %v12504_v8 = vand.u32 2147483647, %v12484_v59  ;;  %v2514_v32 = vpop.f32.mrf.mxu2 }
 0x410   :  { %v6283_v47 = vadd.f32 %v6254_v4, %v6222_v10  ;;  %v3528_v61 = vadd.f32 -0.28449672, %v3496_v57  ;;  %v3174_v45 = vadd.f32 %v12442_v30, %v3173_v53  ;;  %vm3176_vm12 = vweird.f32 %v12442_v30 }
 0x411   :  { %v6284_v42 = vadd.f32 %v6255_v20, %v6223_v0  ;;  %v3465_v48 = vadd.f32 1.4214138, %v3433_v2  ;;  %vm3175_vm0 = vweird.f32 %v12397_v25  ;;  %v3181_v7 = vand.u32 2147483648, %v12397_v25 }
 0x412   :  { %v6315_v5 = vpack.c.bf16 %v6283_v47, %v6283_v47  ;;  %v12510_v52 = vpop.eup %8572  ;;  %v3179_v54 = vand.u32 2147483647, %v12397_v25  ;;  %8574 = vrcp.f32 %v12495_v11  ;;  %v2829_v36 = vmul.f32 0.3275911, %v12498_v18  ;;  %vm12523_vm14 = vmor %vm3175_vm0, %vm3176_vm12 }
 0x413   :  { %v6316_v44 = vpack.c.bf16 %v6284_v42, %v6284_v42  ;;  %v4305_v28 = vsel %vm10750_vm8, 0, %v12327_v9  ;;  %v4342_v58 = vsel %vm10760_vm11, %v4306_v14, 0  ;;  %v3815_v57 = vsub.f32 1.0, %v12500_v24  ;;  %v15110_v24 = vld [vmem:[#allocation58_spill] sm:$0xff] }
 0x414   :  { %v2830_v25 = vmul.f32 0.3275911, %v12504_v8  ;;  %v3738_v15 = vmul.f32 1.442695, %v3688_v51  ;;  %v3178_v2 = vsel %vm12523_vm14, %v12442_v30, %v3174_v45  ;;  %v6408_v10 = vunpack.c.l.b16 %v6315_v5  ;;  %v15112_v30 = vld [vmem:[#allocation41_spill] sm:$0xff]  ;;  %v15113_v45 = vld [vmem:[#allocation40_spill] sm:$0xff] }
 0x415   :  { %v6409_v9 = vunpack.c.l.b16 %v6316_v44  ;;  %v3560_v4 = vmul.f32 %v3528_v61, %v12393_v22  ;;  %v3497_v14 = vmul.f32 %v3465_v48, %v12445_v27  ;;  %v3182_v0 = vor.u32 1.1754944e-38, %v3181_v7 }
 0x416   :  { %v3186_v20 = vmul.f32 %v12510_v52, %v12470_v26  ;;  %vm3180_vm15 = vcmp.eq.f32.partialorder %v3179_v54, 8.507059e+37  ;;  %v2426_v47 = vadd.f32 %v2425_v62, %v15110_v24  ;;  %v12536_v42 = vadd.f32 1.0, %v2829_v36  ;;  %v15115_v62 = vld [vmem:[#allocation38_spill] sm:$0xff]  ;;  %v15116_v36 = vld [vmem:[#allocation44_spill] sm:$0xff] }
 0x417   :  { %v6435_v51 = vpack.c.b16 %v6409_v9, %v6408_v10  ;;  %v3657_v46 = vsub.f32 0.0, %v15111_v60  ;;  %v12539_v53 = vsel %vm3180_vm15, %v3182_v0, %v3178_v2  ;;  %v2340_v5 = vadd.f32 %v15113_v45, %v15112_v30  ;;  %v2603_v10 = vpop.f32.mrf.mxu3  ;;  %v15117_v2 = vld [vmem:[#allocation30_spill] sm:$0xff] }
 0x418   :  { %v12543_v61 = vadd.f32 1.0, %v2830_v25  ;;  %v12545_v48 = vpop.eup %8574  ;;  %v12549_v7 = vsel %vm10760_vm11, %v4305_v28, 0  ;;  %v4454_v54 = vunpack.c.l.b16 %v4342_v58  ;;  %v12553_v44 = vadd.f32 %v15116_v36, %v15115_v62  ;;  %v2428_v28 = vpop.f32.mrf.mxu1  ;;  %v15119_v36 = vld [vmem:[#allocation48_spill] sm:$0xff] }
 0x419   :  { %15114 = vst [vmem:[#allocation73_spill] sm:$0xff] %v12549_v7  ;;  %v2515_v9 = vadd.f32 %v2514_v32, %v2426_v47  ;;  %6717 = vmatmul.bf16.gmra.mxu1 %v6435_v51  ;;  %v2727_v0 = vmul.f32 0.5, %v15117_v2  ;;  %v3592_v24 = vadd.f32 0.2548296, %v3560_v4  ;;  %8576 = vpow2.f32 %v3738_v15  ;;  %v2517_v51 = vpop.f32.mrf.mxu2 }
 0x41a   :  { %v3187_v25 = vsub.f32 1.0, %v3186_v20  ;;  %v3879_v30 = vsub.f32 0.0, %v3815_v57  ;;  %v3529_v45 = vadd.f32 -0.28449672, %v3497_v14  ;;  %v3370_v59 = vmul.f32 1.0614054, %v12539_v53  ;;  %v2692_v20 = vpop.f32.mrf.mxu0 }
 0x41b   :  { %8578 = vrcp.f32 %v12536_v42  ;;  %v4381_v7 = vsel %vm10827_vm3, %v4342_v58, 0  ;;  %v3689_v62 = vmul.f32 %v3657_v46, %v15111_v60  ;;  %v3201_v32 = vmul.f32 %v12545_v48, %v12495_v11 }
 0x41c   :  { %8580 = vrcp.f32 %v12543_v61  ;;  %v4455_v4 = vunpack.c.h.b16 %v4342_v58  ;;  %v12564_v15 = vpack.c.b16 %v4454_v54, %v4454_v54  ;;  %v5444_v14 = vsel %vm10979_vm10, %v4342_v58, 0 }
 0x41d   :  { %v2604_v47 = vadd.f32 %v2603_v10, %v2515_v9  ;;  %vm3847_vm12 = vcmp.ge.f32.partialorder %v15119_v36, 0.0  ;;  %v3624_v2 = vmul.f32 %v3592_v24, %v12393_v22  ;;  %v3188_v60 = vmul.f32 %v12510_v52, %v3187_v25 }
 0x41e   :  { %15118 = vst [vmem:[#allocation81_spill] sm:$0xff] %v12564_v15  ;;  %v2429_v46 = vadd.f32 %v2428_v28, %v2340_v5  ;;  %v12571_v17 = vunpack.c.l.bf16 %v4381_v7  ;;  %v3911_v21 = vsel %vm3847_vm12, %v3815_v57, %v3879_v30  ;;  %v3561_v39 = vmul.f32 %v3529_v45, %v12445_v27 }
 0x41f   :  { %v3402_v54 = vadd.f32 -1.4531521, %v3370_v59  ;;  %v8577_v40 = vpop.eup %8576  ;;  %v12574_v19 = vunpack.c.l.bf16 %v5444_v14  ;;  %v3740_v58 = vmul.f32 1.442695, %v3689_v62  ;;  %v3202_v23 = vsub.f32 1.0, %v3201_v32  ;;  %v2606_v32 = vpop.f32.mrf.mxu3 }
 0x420   :  { %15120 = vst [vmem:[#allocation75_spill] sm:$0xff] %v12571_v17  ;;  %v2518_v10 = vadd.f32 %v2517_v51, %v2429_v46  ;;  %v12578_v36 = vpack.c.b16 %v4455_v4, %v4455_v4  ;;  %v4751_v22 = vshrl.u32 %v12564_v15, 16  ;;  %v4754_v5 = vshll.u32 %v12564_v15, 16 }
 0x421   :  { %15121 = vst [vmem:[#allocation83_spill] sm:$0xff] %v12574_v19  ;;  %v12576_v9 = vpop.eup %8578  ;;  %v12582_v7 = vadd.f32 %v2692_v20, %v2604_v47  ;;  %v3943_v24 = vadd.f32 1.0, %v3911_v21  ;;  %v3784_v59 = vmul.f32 %v8577_v40, %v3624_v2  ;;  %v3189_v25 = vadd.f32 %v12510_v52, %v3188_v60  ;;  %v15132_v21 = vld [vmem:[#allocation43_spill] sm:$0xff]  ;;  %v15136_v40 = vld [vmem:[#allocation62_spill] sm:$0xff] }
 0x422   :  { %15122 = vst [vmem:[#allocation80_spill] sm:$0xff] %v12578_v36  ;;  %v12584_v57 = vpop.eup %8580  ;;  %vm3191_vm0 = vweird.f32 %v12510_v52  ;;  %v3593_v30 = vadd.f32 0.2548296, %v3561_v39  ;;  %v3434_v45 = vmul.f32 %v3402_v54, %v12539_v53  ;;  %v3194_v28 = vand.u32 2147483647, %v12470_v26 }
 0x423   :  { %15123 = vst [vmem:[#allocation12_spill] sm:$0xff] %v12582_v7  ;;  %v3196_v62 = vand.u32 2147483648, %v12470_v26  ;;  %8582 = vpow2.f32 %v3740_v58  ;;  %vm3190_vm14 = vweird.f32 %v12470_v26  ;;  %v3203_v4 = vmul.f32 %v12545_v48, %v3202_v23  ;;  %v2695_v58 = vpop.f32.mrf.mxu0 }
 0x424   :  { %v2607_v14 = vadd.f32 %v2606_v32, %v2518_v10  ;;  %vm12594_vm15 = vmor %vm3190_vm14, %vm3191_vm0  ;;  %v3216_v39 = vmul.f32 %v12576_v9, %v12536_v42  ;;  %v3231_v20 = vmul.f32 %v12584_v57, %v12543_v61  ;;  %v12603_v47 = vmul.f32 0.70710677, %v12582_v7 }
 0x425   :  { %v12605_v51 = vrot.slane %v4751_v22, 4  ;;  %v3975_v26 = vmul.f32 %v3943_v24, %v2727_v0  ;;  %v3816_v23 = vsub.f32 1.0, %v3784_v59  ;;  %v3193_v2 = vsel %vm12594_vm15, %v12510_v52, %v3189_v25 }
 0x426   :  { %15126 = vst [vmem:[#allocation24_spill] sm:$0xff] %v12603_v47  ;;  %v3625_v60 = vmul.f32 %v3593_v30, %v12445_v27  ;;  %v3466_v46 = vadd.f32 1.4214138, %v3434_v45  ;;  %vm3195_vm12 = vcmp.eq.f32.partialorder %v3194_v28, 8.507059e+37  ;;  %v3197_v54 = vor.u32 1.1754944e-38, %v3196_v62 }
 0x427   :  { %15127 = vst [vmem:[#allocation82_spill] sm:$0xff] %v12605_v51  ;;  %v3204_v10 = vadd.f32 %v12545_v48, %v3203_v4  ;;  %vm3206_vm0 = vweird.f32 %v12545_v48  ;;  %v3211_v32 = vand.u32 2147483648, %v12495_v11  ;;  %v12614_v22 = vadd.f32 %v2695_v58, %v2607_v14 }
 0x428   :  { %v12616_v0 = vsel %vm3195_vm12, %v3197_v54, %v3193_v2  ;;  %v3217_v24 = vsub.f32 1.0, %v3216_v39  ;;  %v3232_v59 = vsub.f32 1.0, %v3231_v20  ;;  %v12619_v52 = vand.u32 2147483647, %v12603_v47 }
 0x429   :  { %15128 = vst [vmem:[#allocation21_spill] sm:$0xff] %v12614_v22  ;;  %v8583_v27 = vpop.eup %8582  ;;  %v12621_v25 = vrot.slane %v4754_v5, 5  ;;  %v12623_v30 = vpack.c.bf16 %v3975_v26, %v3975_v26  ;;  %vm3205_vm14 = vweird.f32 %v12495_v11  ;;  %v3209_v45 = vand.u32 2147483647, %v12495_v11  ;;  %v15133_v5 = vld [vmem:[#allocation19_spill] sm:$0xff] }
 0x42a   :  { %v3880_v28 = vsub.f32 0.0, %v3816_v23  ;;  %v12627_v62 = vmul.f32 %v8583_v27, %v3625_v60  ;;  %v3658_v4 = vsub.f32 0.0, %v12366_v31  ;;  %vm12632_vm15 = vmor %vm3205_vm14, %vm3206_vm0  ;;  %v12638_v39 = vadd.f32 %v15133_v5, %v15132_v21  ;;  %v15135_v5 = vld [vmem:[#allocation15_spill] sm:$0xff] }
 0x42b   :  { %15129 = vst [vmem:[#allocation29_spill] sm:$0xff] %v12621_v25  ;;  %v3498_v20 = vmul.f32 %v3466_v46, %v12539_v53  ;;  %v3371_v26 = vmul.f32 1.0614054, %v12616_v0  ;;  %v3208_v11 = vsel %vm12632_vm15, %v12545_v48, %v3204_v10  ;;  %v12646_v2 = vmul.f32 0.70710677, %v12614_v22 }
 0x42c   :  { %v3212_v60 = vor.u32 1.1754944e-38, %v3211_v32  ;;  %v3218_v54 = vmul.f32 %v12576_v9, %v3217_v24  ;;  %v3233_v58 = vmul.f32 %v12584_v57, %v3232_v59  ;;  %v2831_v27 = vmul.f32 0.3275911, %v12619_v52 }
 0x42d   :  { %15134 = vst [vmem:[#allocation84_spill] sm:$0xff] %v12646_v2  ;;  %v12653_v46 = vmul.f32 0.5, %v15135_v5  ;;  %vm3848_vm12 = vcmp.ge.f32.partialorder %v15136_v40, 0.0  ;;  %vm3210_vm0 = vcmp.eq.f32.partialorder %v3209_v45, 8.507059e+37  ;;  %v14620_v48 = vsub.f32 1.0, %v12627_v62 }
 0x42e   :  { %v3912_v14 = vsel %vm3848_vm12, %v3816_v23, %v3880_v28  ;;  %v3690_v10 = vmul.f32 %v3658_v4, %v12366_v31  ;;  %v12658_v32 = vsel %vm3210_vm0, %v3212_v60, %v3208_v11  ;;  %v3530_v24 = vadd.f32 -0.28449672, %v3498_v20  ;;  %v2430_v11 = vpop.f32.mrf.mxu1 }
 0x42f   :  { %v3403_v17 = vadd.f32 -1.4531521, %v3371_v26  ;;  %vm3221_vm14 = vweird.f32 %v12576_v9  ;;  %v12662_v59 = vand.u32 2147483647, %v12646_v2  ;;  %v3219_v5 = vadd.f32 %v12576_v9, %v3218_v54 }
 0x430   :  { %v3234_v21 = vadd.f32 %v12584_v57, %v3233_v58  ;;  %vm3236_vm15 = vweird.f32 %v12584_v57  ;;  %v12667_v40 = vadd.f32 1.0, %v2831_v27  ;;  %v3372_v23 = vmul.f32 1.0614054, %v12658_v32 }
 0x431   :  { %vm3220_vm12 = vweird.f32 %v12536_v42  ;;  %v3226_v31 = vand.u32 2147483648, %v12536_v42  ;;  %v3241_v45 = vand.u32 2147483648, %v12543_v61  ;;  %v3742_v28 = vmul.f32 1.442695, %v3690_v10 }
 0x432   :  { %vm12673_vm0 = vmor %vm3220_vm12, %vm3221_vm14  ;;  %v3224_v20 = vand.u32 2147483647, %v12536_v42  ;;  %vm3235_vm13 = vweird.f32 %v12543_v61  ;;  %v3239_v26 = vand.u32 2147483647, %v12543_v61  ;;  %v3944_v54 = vadd.f32 1.0, %v3912_v14 }
 0x433   :  { %v3562_v58 = vmul.f32 %v3530_v24, %v12539_v53  ;;  %vm12684_vm7 = vmor %vm3235_vm13, %vm3236_vm15  ;;  %v2832_v10 = vmul.f32 0.3275911, %v12662_v59  ;;  %v3881_v42 = vsub.f32 0.0, %v14620_v48  ;;  %v3223_v61 = vsel %vm12673_vm0, %v12576_v9, %v3219_v5  ;;  %v2519_v24 = vpop.f32.mrf.mxu2 }
 0x434   :  { %v3238_v14 = vsel %vm12684_vm7, %v12584_v57, %v3234_v21  ;;  %8584 = vrcp.f32 %v12667_v40  ;;  %v3435_v60 = vmul.f32 %v3403_v17, %v12616_v0  ;;  %v3404_v19 = vadd.f32 -1.4531521, %v3372_v23  ;;  %v15141_v21 = vld [vmem:[#allocation77_spill] sm:$0xff] }
 0x435   :  { %v3227_v15 = vor.u32 1.1754944e-38, %v3226_v31  ;;  %v3242_v25 = vor.u32 1.1754944e-38, %v3241_v45  ;;  %8586 = vpow2.f32 %v3742_v28  ;;  %vm3225_vm13 = vcmp.eq.f32.partialorder %v3224_v20, 8.507059e+37  ;;  %v2608_v20 = vpop.f32.mrf.mxu3 }
 0x436   :  { %vm3240_vm14 = vcmp.eq.f32.partialorder %v3239_v26, 8.507059e+37  ;;  %v2431_v48 = vadd.f32 %v2430_v11, %v12553_v44  ;;  %v3594_v51 = vadd.f32 0.2548296, %v3562_v58  ;;  %v12704_v5 = vadd.f32 1.0, %v2832_v10 }
 0x437   :  { %v12700_v4 = vsel %vm3225_vm13, %v3227_v15, %v3223_v61  ;;  %v12702_v9 = vsel %vm3240_vm14, %v3242_v25, %v3238_v14  ;;  %v4450_v27 = vunpack.c.l.b16 %v15141_v21  ;;  %v4451_v17 = vunpack.c.h.b16 %v15141_v21  ;;  %v2433_v61 = vpop.f32.mrf.mxu1 }
 0x438   :  { %v2520_v57 = vadd.f32 %v2519_v24, %v2431_v48  ;;  %v4452_v23 = vunpack.c.l.b16 %v12324_v3  ;;  %v3467_v31 = vadd.f32 1.4214138, %v3435_v60  ;;  %v3659_v45 = vsub.f32 0.0, %v12440_v37 }
 0x439   :  { %v3436_v28 = vmul.f32 %v3404_v19, %v12658_v32  ;;  %v4453_v44 = vunpack.c.h.b16 %v12324_v3  ;;  %v3373_v25 = vmul.f32 1.0614054, %v12700_v4  ;;  %v12715_v26 = vpack.c.b16 %v4450_v27, %v4450_v27 }
 0x43a   :  { %v12712_v15 = vpop.eup %8584  ;;  %v12717_v48 = vpack.c.b16 %v4451_v17, %v4451_v17  ;;  %v12719_v11 = vpack.c.b16 %v4452_v23, %v4452_v23  ;;  %v3626_v58 = vmul.f32 %v3594_v51, %v12539_v53  ;;  %v3374_v60 = vmul.f32 1.0614054, %v12702_v9 }
 0x43b   :  { %8588 = vrcp.f32 %v12704_v5  ;;  %v12724_v19 = vpack.c.b16 %v4453_v44, %v4453_v44  ;;  %v8587_v10 = vpop.eup %8586  ;;  %v2609_v14 = vadd.f32 %v2608_v20, %v2520_v57  ;;  %v8039_v24 = vrot.slane %v12715_v26, 9  ;;  %v15144_v44 = vld [vmem:[#allocation31_spill] sm:$0xff]  ;;  %v2697_v57 = vpop.f32.mrf.mxu0 }
 0x43c   :  { %15142 = vst [vmem:[#allocation45_spill] sm:$0xff] %v12719_v11  ;;  %v5180_v27 = vrot.slane %v12717_v48, 5  ;;  %v8040_v17 = vrot.slane %v12719_v11, 9  ;;  %v3976_v23 = vmul.f32 %v3944_v54, %v12653_v46  ;;  %v3499_v22 = vmul.f32 %v3467_v31, %v12616_v0  ;;  %v2522_v3 = vpop.f32.mrf.mxu2 }
 0x43d   :  { %15143 = vst [vmem:[#allocation52_spill] sm:$0xff] %v12724_v19  ;;  %v3246_v53 = vmul.f32 %v12712_v15, %v12667_v40  ;;  %v5184_v51 = vrot.slane %v12724_v19, 5  ;;  %vm3849_vm7 = vcmp.ge.f32.partialorder %v15144_v44, 0.0  ;;  %v3468_v7 = vadd.f32 1.4214138, %v3436_v28 }
 0x43e   :  { %v3405_v2 = vadd.f32 -1.4531521, %v3373_v25  ;;  %v12737_v47 = vsel %vm9138_vm5, %v8039_v24, %v5180_v27  ;;  %v3691_v11 = vmul.f32 %v3659_v45, %v12440_v37  ;;  %v2434_v46 = vadd.f32 %v2433_v61, %v12638_v39 }
 0x43f   :  { %v12743_v54 = vsel %vm9138_vm5, %v8040_v17, %v5184_v51  ;;  %v6349_v31 = vsel %vm10827_vm3, %v12737_v47, 0  ;;  %v15147_v28 = vsub.f32 1.0, %v12627_v62  ;;  %v3786_v44 = vmul.f32 %v8587_v10, %v3626_v58 }
 0x440   :  { %15146 = vst [vmem:[#allocation51_spill] sm:$0xff] %v12743_v54  ;;  %v3406_v19 = vadd.f32 -1.4531521, %v3374_v60  ;;  %v12750_v24 = vadd.f32 %v2697_v57, %v2609_v14  ;;  %v3531_v37 = vadd.f32 -0.28449672, %v3499_v22  ;;  %v3247_v45 = vsub.f32 1.0, %v3246_v53  ;;  %v2611_v57 = vpop.f32.mrf.mxu3 }
 0x441   :  { %v3913_v25 = vsel %vm3849_vm7, %v15147_v28, %v3881_v42  ;;  %v12752_v27 = vpop.eup %8588  ;;  %v6350_v39 = vsel %vm10827_vm3, %v12743_v54, 0  ;;  %v2523_v61 = vadd.f32 %v2522_v3, %v2434_v46  ;;  %v3500_v17 = vmul.f32 %v3468_v7, %v12658_v32  ;;  %v15149_v46 = vld [vmem:[#allocation68_spill] sm:$0xff] }
 0x442   :  { %15148 = vst [vmem:[#allocation55_spill] sm:$0xff] %v12750_v24  ;;  %v3437_v51 = vmul.f32 %v3405_v2, %v12700_v4  ;;  %v6503_v20 = vunpack.c.l.b16 %v6349_v31  ;;  %v6504_v62 = vunpack.c.l.b16 %v6350_v39  ;;  %v12759_v42 = vpack.c.bf16 %v3976_v23, %v3976_v23 }
 0x443   :  { %v3945_v58 = vadd.f32 1.0, %v3913_v25  ;;  %v3744_v60 = vmul.f32 1.442695, %v3691_v11  ;;  %v3660_v10 = vsub.f32 0.0, %v12464_v43  ;;  %v3818_v14 = vsub.f32 1.0, %v3786_v44 }
 0x444   :  { %v3438_v22 = vmul.f32 %v3406_v19, %v12702_v9  ;;  %v12764_v53 = vmul.f32 0.70710677, %v12750_v24  ;;  %v6526_v3 = vpack.c.b16 %v6504_v62, %v6503_v20  ;;  %v2729_v7 = vmul.f32 0.5, %v15149_v46 }
 0x445   :  { %v3248_v2 = vmul.f32 %v12712_v15, %v3247_v45  ;;  %v3261_v23 = vmul.f32 %v12752_v27, %v12704_v5  ;;  %v2612_v31 = vadd.f32 %v2611_v57, %v2523_v61  ;;  %v15150_v11 = vshrl.u32 %v12623_v30, 16  ;;  %v2700_v57 = vpop.f32.mrf.mxu0 }
 0x446   :  { %v3563_v25 = vmul.f32 %v3531_v37, %v12616_v0  ;;  %v3532_v44 = vadd.f32 -0.28449672, %v3500_v17  ;;  %v3469_v19 = vadd.f32 1.4214138, %v3437_v51  ;;  %6811 = vmatmul.bf16.gmra.mxu2 %v6526_v3  ;;  %v4156_v39 = vshrl.u32 %v12759_v42, 16 }
 0x447   :  { %v4151_v28 = vrot.slane %v15150_v11, 7  ;;  %v3977_v54 = vmul.f32 %v3945_v58, %v2729_v7  ;;  %vm3850_vm15 = vcmp.ge.f32.partialorder %v12343_v41, 0.0  ;;  %v3692_v20 = vmul.f32 %v3660_v10, %v12464_v43 }
 0x448   :  { %v3882_v45 = vsub.f32 0.0, %v3818_v14  ;;  %8590 = vpow2.f32 %v3744_v60  ;;  %v3470_v62 = vadd.f32 1.4214138, %v3438_v22  ;;  %v12777_v61 = vand.u32 2147483647, %v12764_v53 }
 0x449   :  { %v3249_v46 = vadd.f32 %v12712_v15, %v3248_v2  ;;  %vm3251_vm12 = vweird.f32 %v12712_v15  ;;  %v3262_v37 = vsub.f32 1.0, %v3261_v23  ;;  %v12781_v17 = vadd.f32 %v2700_v57, %v2612_v31 }
 0x44a   :  { %v3595_v51 = vadd.f32 0.2548296, %v3563_v25  ;;  %v3564_v58 = vmul.f32 %v3532_v44, %v12658_v32  ;;  %v3501_v3 = vmul.f32 %v3469_v19, %v12700_v4  ;;  %v3256_v43 = vand.u32 2147483648, %v12667_v40 }
 0x44b   :  { %15151 = vst [vmem:[#allocation18_spill] sm:$0xff] %v12781_v17  ;;  %v3746_v60 = vmul.f32 1.442695, %v3692_v20  ;;  %v3661_v10 = vsub.f32 0.0, %v12498_v18  ;;  %vm3250_vm0 = vweird.f32 %v12667_v40  ;;  %v3254_v22 = vand.u32 2147483647, %v12667_v40 }
 0x44c   :  { %v2730_v7 = vmul.f32 0.5, %v12316_v16  ;;  %v3914_v2 = vsel %vm3850_vm15, %v3818_v14, %v3882_v45  ;;  %v3502_v23 = vmul.f32 %v3470_v62, %v12702_v9  ;;  %vm12793_vm13 = vmor %vm3250_vm0, %vm3251_vm12  ;;  %v2833_v11 = vmul.f32 0.3275911, %v12777_v61 }
 0x44d   :  { %v3662_v25 = vsub.f32 0.0, %v12504_v8  ;;  %v3253_v44 = vsel %vm12793_vm13, %v12712_v15, %v3249_v46  ;;  %v3263_v40 = vmul.f32 %v12752_v27, %v3262_v37  ;;  %v12804_v16 = vmul.f32 0.70710677, %v12781_v17 }
 0x44e   :  { %v8591_v41 = vpop.eup %8590  ;;  %v3627_v14 = vmul.f32 %v3595_v51, %v12616_v0  ;;  %v3596_v19 = vadd.f32 0.2548296, %v3564_v58  ;;  %v3533_v20 = vadd.f32 -0.28449672, %v3501_v3  ;;  %v3257_v45 = vor.u32 1.1754944e-38, %v3256_v43 }
 0x44f   :  { %v12807_v62 = vpack.c.bf16 %v3977_v54, %v3977_v54  ;;  %8592 = vpow2.f32 %v3746_v60  ;;  %v3693_v57 = vmul.f32 %v3661_v10, %v12498_v18  ;;  %vm3255_vm14 = vcmp.eq.f32.partialorder %v3254_v22, 8.507059e+37 }
 0x450   :  { %v3946_v24 = vadd.f32 1.0, %v3914_v2  ;;  %v3534_v31 = vadd.f32 -0.28449672, %v3502_v23  ;;  %v12810_v15 = vsel %vm3255_vm14, %v3257_v45, %v3253_v44  ;;  %v12812_v46 = vadd.f32 1.0, %v2833_v11 }
 0x451   :  { %v3694_v37 = vmul.f32 %v3662_v25, %v12504_v8  ;;  %v3264_v17 = vadd.f32 %v12752_v27, %v3263_v40  ;;  %vm3266_vm7 = vweird.f32 %v12752_v27  ;;  %v12818_v0 = vand.u32 2147483647, %v12804_v16 }
 0x452   :  { %v3787_v54 = vmul.f32 %v8591_v41, %v3627_v14  ;;  %v3628_v51 = vmul.f32 %v3596_v19, %v12658_v32  ;;  %v3565_v18 = vmul.f32 %v3533_v20, %v12700_v4  ;;  %v3271_v58 = vand.u32 2147483648, %v12704_v5 }
 0x453   :  { %v3748_v3 = vmul.f32 1.442695, %v3693_v57  ;;  %v3375_v43 = vmul.f32 1.0614054, %v12810_v15  ;;  %vm3265_vm15 = vweird.f32 %v12704_v5  ;;  %v3269_v8 = vand.u32 2147483647, %v12704_v5 }
 0x454   :  { %v15154_v60 = vshll.u32 %v12623_v30, 16  ;;  %v4158_v22 = vrot.slane %v4156_v39, 7  ;;  %v3566_v2 = vmul.f32 %v3534_v31, %v12702_v9  ;;  %vm12829_vm12 = vmor %vm3265_vm15, %vm3266_vm7  ;;  %8594 = vrcp.f32 %v12812_v46 }
 0x455   :  { %v8593_v32 = vpop.eup %8592  ;;  %v3978_v11 = vmul.f32 %v3946_v24, %v2730_v7  ;;  %v3750_v25 = vmul.f32 1.442695, %v3694_v37  ;;  %v3268_v44 = vsel %vm12829_vm12, %v12752_v27, %v3264_v17  ;;  %v2834_v5 = vmul.f32 0.3275911, %v12818_v0 }
 0x456   :  { %v4154_v10 = vor.u32 %v15154_v60, %v4151_v28  ;;  %v3819_v30 = vsub.f32 1.0, %v3787_v54  ;;  %v3788_v28 = vmul.f32 %v8593_v32, %v3628_v51  ;;  %v3597_v39 = vadd.f32 0.2548296, %v3565_v18 }
 0x457   :  { %v3272_v40 = vor.u32 1.1754944e-38, %v3271_v58  ;;  %v4163_v41 = vshrl.u32 %v12807_v62, 16  ;;  %8596 = vpow2.f32 %v3748_v3  ;;  %v3407_v14 = vadd.f32 -1.4531521, %v3375_v43  ;;  %v15159_v43 = vld [vmem:[#allocation42_spill] sm:$0xff] }
 0x458   :  { %vm3270_vm0 = vcmp.eq.f32.partialorder %v3269_v8, 8.507059e+37  ;;  %v15157_v19 = vshll.u32 %v12578_v36, 16  ;;  %v4159_v24 = vshll.u32 %v12759_v42, 16  ;;  %v3598_v7 = vadd.f32 0.2548296, %v3566_v2  ;;  %v15160_v8 = vld [vmem:[#allocation46_spill] sm:$0xff] }
 0x459   :  { %v12844_v45 = vsel %vm3270_vm0, %v3272_v40, %v3268_v44  ;;  %v4307_v27 = vsel %vm10750_vm8, 0, %v4154_v10  ;;  %v12848_v17 = vpack.c.bf16 %v3978_v11, %v3978_v11  ;;  %8598 = vpow2.f32 %v3750_v25 }
 0x45a   :  { %v12841_v20 = vrot.slane %v15157_v19, 5  ;;  %v12850_v57 = vadd.f32 1.0, %v2834_v5  ;;  %v12852_v31 = vpop.eup %8594  ;;  %v12854_v37 = vor.u32 %v4159_v24, %v4158_v22  ;;  %v3883_v54 = vsub.f32 0.0, %v3819_v30 }
 0x45b   :  { %v3820_v51 = vsub.f32 1.0, %v3788_v28  ;;  %v3629_v18 = vmul.f32 %v3597_v39, %v12700_v4  ;;  %v4165_v42 = vrot.slane %v4163_v41, 7  ;;  %v3439_v58 = vmul.f32 %v3407_v14, %v12810_v15 }
 0x45c   :  { %15158 = vst [vmem:[#allocation72_spill] sm:$0xff] %v12841_v20  ;;  %v3376_v3 = vmul.f32 1.0614054, %v12844_v45  ;;  %v2347_v60 = vadd.f32 %v15160_v8, %v15159_v43  ;;  %v12863_v10 = vsel %vm10760_vm11, %v4307_v27, 0  ;;  %v4166_v2 = vshll.u32 %v12807_v62, 16 }
 0x45d   :  { %15161 = vst [vmem:[#allocation53_spill] sm:$0xff] %v12863_v10  ;;  %v3630_v22 = vmul.f32 %v3598_v7, %v12702_v9  ;;  %v3663_v23 = vsub.f32 0.0, %v12619_v52  ;;  %v8597_v32 = vpop.eup %8596  ;;  %v4170_v4 = vshrl.u32 %v12848_v17, 16  ;;  %vm3851_vm13 = vcmp.ge.f32.partialorder %v12425_v1, 0.0 }
 0x45e   :  { %v3276_v11 = vmul.f32 %v12852_v31, %v12812_v46  ;;  %8600 = vrcp.f32 %v12850_v57  ;;  %v3915_v44 = vsel %vm3851_vm13, %v3819_v30, %v3883_v54  ;;  %v3884_v62 = vsub.f32 0.0, %v3820_v51 }
 0x45f   :  { %v12876_v5 = vmul.f32 %v8597_v32, %v3629_v18  ;;  %v8599_v9 = vpop.eup %8598  ;;  %v12878_v28 = vor.u32 %v4166_v2, %v4165_v42  ;;  %v3471_v39 = vadd.f32 1.4214138, %v3439_v58  ;;  %v5869_v1 = vsel %vm11145_vm6, %v12267_v55, 0  ;;  %v2435_v18 = vpop.f32.mrf.mxu1 }
 0x460   :  { %v3408_v40 = vadd.f32 -1.4531521, %v3376_v3  ;;  %v12884_v41 = vmul.f32 0.5, %v12402_v63  ;;  %v12887_v14 = vmul.f32 0.5, %v12431_v49  ;;  %v12889_v19 = vmul.f32 %v8599_v9, %v3630_v22 }
 0x461   :  { %v3695_v30 = vmul.f32 %v3663_v23, %v12619_v52  ;;  %v12892_v24 = vrot.slane %v4170_v4, 7  ;;  %v12894_v7 = vadd.f32 1.0, %v3915_v44  ;;  %vm3852_vm14 = vcmp.ge.f32.partialorder %v12448_v6, 0.0 }
 0x462   :  { %v3277_v27 = vsub.f32 1.0, %v3276_v11  ;;  %v12897_v54 = vsel %vm3852_vm14, %v3820_v51, %v3884_v62  ;;  %v12900_v63 = vunpack.c.l.bf16 %v5869_v1  ;;  %v5404_v49 = vpack.c.bf16 %v12399_v12, %v12399_v12 }
 0x463   :  { %v3503_v52 = vmul.f32 %v3471_v39, %v12810_v15  ;;  %v3440_v58 = vmul.f32 %v3408_v40, %v12844_v45  ;;  %v5405_v6 = vpack.c.bf16 %v12407_v38, %v12407_v38  ;;  %v4723_v51 = vshrl.u32 %v12715_v26, 16 }
 0x464   :  { %v12904_v42 = vpop.eup %8600  ;;  %v12912_v43 = vmul.f32 1.442695, %v3695_v30  ;;  %v5683_v8 = vsel %vm11131_vm9, %v12347_v50, 0  ;;  %v4726_v12 = vshll.u32 %v12715_v26, 16  ;;  %v12919_v22 = vadd.f32 %v2435_v18, %v2347_v60 }
 0x465   :  { %v3278_v23 = vmul.f32 %v12852_v31, %v3277_v27  ;;  %v4725_v32 = vrot.slane %v4723_v51, 4  ;;  %v5471_v38 = vunpack.c.l.bf16 %v5404_v49  ;;  %v3291_v4 = vmul.f32 %v12904_v42, %v12850_v57 }
 0x466   :  { %v4728_v11 = vrot.slane %v4726_v12, 5  ;;  %v4732_v44 = vshll.u32 %v12717_v48, 16  ;;  %v3535_v62 = vadd.f32 -0.28449672, %v3503_v52  ;;  %v3472_v9 = vadd.f32 1.4214138, %v3440_v58 }
 0x467   :  { %v5472_v39 = vunpack.c.l.bf16 %v5405_v6  ;;  %v5747_v50 = vunpack.c.l.bf16 %v5683_v8  ;;  %v3286_v26 = vand.u32 2147483648, %v12812_v46  ;;  %v5440_v40 = vsel %vm10979_vm10, %v12122_v29, 0  ;;  %v15163_v29 = vld [vmem:[#allocation45_spill] sm:$0xff] }
 0x468   :  { %v4729_v1 = vor.u32 %v4728_v11, %v4725_v32  ;;  %v5441_v30 = vsel %vm10979_vm10, %v15141_v21, 0  ;;  %v3279_v27 = vadd.f32 %v12852_v31, %v3278_v23  ;;  %vm3281_vm7 = vweird.f32 %v12852_v31 }
 0x469   :  { %v5501_v48 = vunpack.c.l.bf16 %v5440_v40  ;;  %v5502_v18 = vunpack.c.l.bf16 %v5441_v30  ;;  %vm3280_vm15 = vweird.f32 %v12812_v46  ;;  %v3292_v49 = vsub.f32 1.0, %v3291_v4 }
 0x46a   :  { %v4730_v52 = vrot.slane %v4729_v1, 4  ;;  %v4734_v58 = vrot.slane %v4732_v44, 5  ;;  %v4379_v6 = vsel %vm10827_vm3, %v15141_v21, 0  ;;  %v4737_v51 = vshrl.u32 %v15163_v29, 16  ;;  %vm12939_vm12 = vmor %vm3280_vm15, %vm3281_vm7 }
 0x46b   :  { %v5533_v8 = vadd.f32 %v5501_v48, %v5471_v38  ;;  %v5534_v12 = vadd.f32 %v5502_v18, %v5472_v39  ;;  %v3284_v23 = vand.u32 2147483647, %v12812_v46  ;;  %v3287_v11 = vor.u32 1.1754944e-38, %v3286_v26 }
 0x46c   :  { %v12946_v4 = vsel %vm9101_vm2, %v4730_v52, %v4734_v58  ;;  %v4740_v44 = vshll.u32 %v15163_v29, 16  ;;  %v3283_v1 = vsel %vm12939_vm12, %v12852_v31, %v3279_v27  ;;  %v5290_v39 = vsel %vm15082_vm1, %v12737_v47, 0 }
 0x46d   :  { %v4994_v48 = vsel %vm15060_vm4, %v12946_v4, 0  ;;  %v5565_v46 = vpack.c.bf16 %v5533_v8, %v5533_v8  ;;  %v5023_v26 = vunpack.c.l.bf16 %v4379_v6  ;;  %v5566_v25 = vpack.c.bf16 %v5534_v12, %v5534_v12 }
 0x46e   :  { %v5052_v18 = vunpack.c.l.bf16 %v4994_v48  ;;  %v5684_v52 = vsel %vm11131_vm9, %v12946_v4, 0  ;;  %v5870_v31 = vsel %vm11145_vm6, %v12737_v47, 0  ;;  %v3293_v27 = vmul.f32 %v12904_v42, %v3292_v49  ;;  %v2524_v48 = vpop.f32.mrf.mxu2 }
 0x46f   :  { %v4739_v58 = vrot.slane %v4737_v51, 4  ;;  %v5715_v29 = vunpack.c.l.bf16 %v5565_v46  ;;  %v4742_v32 = vrot.slane %v4740_v44, 5  ;;  %v5716_v55 = vunpack.c.l.bf16 %v5566_v25 }
 0x470   :  { %v5081_v3 = vadd.f32 %v5052_v18, %v5023_v26  ;;  %v5748_v2 = vunpack.c.l.bf16 %v5684_v52  ;;  %v3567_v6 = vmul.f32 %v3535_v62, %v12810_v15  ;;  %v3504_v8 = vmul.f32 %v3472_v9, %v12844_v45 }
 0x471   :  { %vm3285_vm0 = vcmp.eq.f32.partialorder %v3284_v23, 8.507059e+37  ;;  %v5779_v12 = vadd.f32 %v5747_v50, %v5715_v29  ;;  %v5348_v36 = vunpack.c.l.bf16 %v5290_v39  ;;  %v5934_v34 = vunpack.c.l.bf16 %v5870_v31  ;;  %v2613_v23 = vpop.f32.mrf.mxu3  ;;  %v2702_v31 = vpop.f32.mrf.mxu0 }
 0x472   :  { %v12967_v20 = vsel %vm3285_vm0, %v3287_v11, %v3283_v1  ;;  %v5110_v10 = vpack.c.bf16 %v5081_v3, %v5081_v3  ;;  %v5780_v47 = vadd.f32 %v5748_v2, %v5716_v55  ;;  %v3294_v49 = vadd.f32 %v12904_v42, %v3293_v27  ;;  %v15171_v2 = vld [vmem:[#allocation52_spill] sm:$0xff] }
 0x473   :  { %vm3296_vm13 = vweird.f32 %v12904_v42  ;;  %v5811_v51 = vpack.c.bf16 %v5779_v12, %v5779_v12  ;;  %v4743_v25 = vor.u32 %v4742_v32, %v4739_v58  ;;  %v2525_v62 = vadd.f32 %v2524_v48, %v12919_v22 }
 0x474   :  { %v5319_v44 = vunpack.c.l.bf16 %v5110_v10  ;;  %v5812_v46 = vpack.c.bf16 %v5780_v47, %v5780_v47  ;;  %vm3295_vm14 = vweird.f32 %v12850_v57  ;;  %v3299_v9 = vand.u32 2147483647, %v12850_v57  ;;  %v15175_v47 = vld [vmem:[#allocation70_spill] sm:$0xff] }
 0x475   :  { %v3301_v50 = vand.u32 2147483648, %v12850_v57  ;;  %v5901_v3 = vunpack.c.l.bf16 %v5811_v51  ;;  %vm12975_vm7 = vmor %vm3295_vm14, %vm3296_vm13  ;;  %v4746_v11 = vshll.u32 %v15171_v2, 16  ;;  %v2614_v39 = vadd.f32 %v2613_v23, %v2525_v62 }
 0x476   :  { %v12980_v1 = vadd.f32 %v5348_v36, %v5319_v44  ;;  %v5902_v10 = vunpack.c.l.bf16 %v5812_v46  ;;  %v15172_v22 = vsub.f32 0.0, %v12662_v59  ;;  %v3377_v18 = vmul.f32 1.0614054, %v12967_v20  ;;  %v15173_v36 = vld [vmem:[#allocation76_spill] sm:$0xff] }
 0x477   :  { %v3298_v57 = vsel %vm12975_vm7, %v12904_v42, %v3294_v49  ;;  %v5965_v52 = vadd.f32 %v12900_v63, %v5901_v3  ;;  %v4744_v27 = vrot.slane %v4743_v25, 4  ;;  %vm15174_vm15 = vnez %v15173_v36 }
 0x478   :  { %v3696_v26 = vmul.f32 %v15172_v22, %v12662_v59  ;;  %v5966_v58 = vadd.f32 %v5934_v34, %v5902_v10  ;;  %v6035_v29 = vsel %vm15174_vm15, %v15141_v21, 0  ;;  %v12993_v32 = vadd.f32 %v2702_v31, %v2614_v39  ;;  %v15176_v21 = vld [vmem:[#allocation13_spill] sm:$0xff]  ;;  %v15177_v10 = vld [vmem:[#allocation20_spill] sm:$0xff] }
 0x479   :  { %v3536_v12 = vadd.f32 -0.28449672, %v3504_v8  ;;  %v3302_v48 = vor.u32 1.1754944e-38, %v3301_v50  ;;  %v5997_v59 = vpack.c.bf16 %v5965_v52, %v5965_v52  ;;  %v6036_v51 = vsel %vm15174_vm15, %v15175_v47, 0 }
 0x47a   :  { %v3599_v44 = vadd.f32 0.2548296, %v3567_v6  ;;  %vm3300_vm12 = vcmp.eq.f32.partialorder %v3299_v9, 8.507059e+37  ;;  %v4748_v42 = vrot.slane %v4746_v11, 5  ;;  %v5998_v63 = vpack.c.bf16 %v5966_v58, %v5966_v58 }
 0x47b   :  { %v12998_v49 = vsel %vm3300_vm12, %v3302_v48, %v3298_v57  ;;  %v6064_v34 = vunpack.c.l.bf16 %v5997_v59  ;;  %v6096_v25 = vunpack.c.l.bf16 %v6035_v29  ;;  %v13001_v46 = vmul.f32 0.70710677, %v12993_v32 }
 0x47c   :  { %vm3853_vm0 = vcmp.ge.f32.partialorder %v15176_v21, 0.0  ;;  %v3409_v8 = vadd.f32 -1.4531521, %v3377_v18  ;;  %v13006_v62 = vsel %vm9101_vm2, %v4744_v27, %v4748_v42  ;;  %v6065_v50 = vunpack.c.l.bf16 %v5998_v63 }
 0x47d   :  { %v6097_v23 = vunpack.c.l.bf16 %v6036_v51  ;;  %8602 = vpow2.f32 %v12912_v43  ;;  %v3568_v6 = vmul.f32 %v3536_v12, %v12844_v45  ;;  %v6125_v9 = vadd.f32 %v6096_v25, %v6064_v34 }
 0x47e   :  { %v13011_v3 = vand.u32 2147483647, %v13001_v46  ;;  %v3754_v55 = vmul.f32 1.442695, %v3696_v26  ;;  %v3378_v2 = vmul.f32 1.0614054, %v12998_v49  ;;  %vm15178_vm13 = vnez %v15177_v10 }
 0x47f   :  { %v6126_v11 = vadd.f32 %v6097_v23, %v6065_v50  ;;  %v6195_v39 = vsel %vm15178_vm13, %v12946_v4, 0  ;;  %v15179_v22 = vsub.f32 1.0, %v12876_v5  ;;  %v6157_v57 = vpack.c.bf16 %v6125_v9, %v6125_v9  ;;  %v15181_v50 = vld [vmem:[#allocation14_spill] sm:$0xff] }
 0x480   :  { %v6196_v43 = vsel %vm15178_vm13, %v13006_v62, 0  ;;  %v2835_v52 = vmul.f32 0.3275911, %v13011_v3  ;;  %v15180_v31 = vsub.f32 1.0, %v12889_v19  ;;  %v3631_v27 = vmul.f32 %v3599_v44, %v12810_v15 }
 0x481   :  { %v3885_v18 = vsub.f32 0.0, %v15179_v22  ;;  %v3441_v58 = vmul.f32 %v3409_v8, %v12967_v20  ;;  %v6158_v29 = vpack.c.bf16 %v6126_v11, %v6126_v11  ;;  %v3600_v12 = vadd.f32 0.2548296, %v3568_v6 }
 0x482   :  { %v3886_v26 = vsub.f32 0.0, %v15180_v31  ;;  %v6224_v4 = vunpack.c.l.bf16 %v6157_v57  ;;  %v6256_v48 = vunpack.c.l.bf16 %v6195_v39  ;;  %v13027_v59 = vadd.f32 1.0, %v2835_v52 }
 0x483   :  { %8604 = vpow2.f32 %v3754_v55  ;;  %v3410_v51 = vadd.f32 -1.4531521, %v3378_v2  ;;  %v6225_v42 = vunpack.c.l.bf16 %v6158_v29  ;;  %v6257_v63 = vunpack.c.l.bf16 %v6196_v43  ;;  %v8603_v34 = vpop.eup %8602 }
 0x484   :  { %v3948_v25 = vadd.f32 1.0, %v12897_v54  ;;  %vm3854_vm14 = vcmp.ge.f32.partialorder %v15181_v50, 0.0  ;;  %v6285_v23 = vadd.f32 %v6256_v48, %v6224_v4  ;;  %8606 = vrcp.f32 %v13027_v59  ;;  %v15186_v48 = vld [vmem:[#allocation64_spill] sm:$0xff] }
 0x485   :  { %v4173_v15 = vshll.u32 %v12848_v17, 16  ;;  %v15182_v44 = vmov %v15180_v31  ;;  %v3473_v6 = vadd.f32 1.4214138, %v3441_v58  ;;  %v6286_v9 = vadd.f32 %v6257_v63, %v6225_v42 }
 0x486   :  { %v3918_v8 = vsel %vm3854_vm14, %v15182_v44, %v3886_v26  ;;  %v15183_v55 = vmov %v15179_v22  ;;  %v3791_v11 = vmul.f32 %v8603_v34, %v3631_v27  ;;  %v3632_v54 = vmul.f32 %v3600_v12, %v12844_v45 }
 0x487   :  { %v3917_v2 = vsel %vm3853_vm0, %v15183_v55, %v3885_v18  ;;  %v6317_v39 = vpack.c.bf16 %v6285_v23, %v6285_v23  ;;  %v15184_v22 = vsel %vm10750_vm8, 0, %v12854_v37  ;;  %v4309_v19 = vsel %vm10750_vm8, 0, %v12878_v28  ;;  %v15185_v28 = vld [vmem:[#allocation26_spill] sm:$0xff] }
 0x488   :  { %v13046_v17 = vsel %vm10760_vm11, %v15184_v22, 0  ;;  %v3442_v5 = vmul.f32 %v3410_v51, %v12998_v49  ;;  %v6318_v21 = vpack.c.bf16 %v6286_v9, %v6286_v9  ;;  %v13053_v18 = vor.u32 %v4173_v15, %v12892_v24 }
 0x489   :  { %v3979_v45 = vmul.f32 %v12894_v7, %v12884_v41  ;;  %v3980_v57 = vmul.f32 %v3948_v25, %v12887_v14  ;;  %v3950_v37 = vadd.f32 1.0, %v3918_v8  ;;  %v8605_v43 = vpop.eup %8604  ;;  %v3949_v52 = vadd.f32 1.0, %v3917_v2 }
 0x48a   :  { %v3505_v31 = vmul.f32 %v3473_v6, %v12967_v20  ;;  %v6410_v26 = vunpack.c.l.b16 %v6317_v39  ;;  %v6411_v27 = vunpack.c.l.b16 %v6318_v21  ;;  %v8607_v58 = vpop.eup %8606  ;;  %v2734_v29 = vmul.f32 0.5, %v15185_v28  ;;  %v15187_v21 = vld [vmem:[#allocation24_spill] sm:$0xff] }
 0x48b   :  { %v3823_v12 = vsub.f32 1.0, %v3791_v11  ;;  %v3792_v4 = vmul.f32 %v8605_v43, %v3632_v54  ;;  %v3665_v24 = vsub.f32 0.0, %v12777_v61  ;;  %v2733_v51 = vmul.f32 0.5, %v15186_v48 }
 0x48c   :  { %v3474_v42 = vadd.f32 1.4214138, %v3442_v5  ;;  %v6436_v41 = vpack.c.b16 %v6411_v27, %v6410_v26  ;;  %v3306_v14 = vmul.f32 %v8607_v58, %v13027_v59  ;;  %v13065_v7 = vsel %vm10760_vm11, %v4309_v19, 0 }
 0x48d   :  { %v4011_v63 = vpack.c.bf16 %v3979_v45, %v3979_v45  ;;  %v4012_v34 = vpack.c.bf16 %v3980_v57, %v3980_v57  ;;  %v3982_v25 = vmul.f32 %v3950_v37, %v2734_v29  ;;  %v4310_v50 = vsel %vm10750_vm8, 0, %v13053_v18 }
 0x48e   :  { %v3981_v23 = vmul.f32 %v3949_v52, %v2733_v51  ;;  %v3537_v15 = vadd.f32 -0.28449672, %v3505_v31  ;;  %6722 = vmatmul.bf16.gmra.mxu1 %v6436_v41  ;;  %v3307_v44 = vsub.f32 1.0, %v3306_v14  ;;  %v3887_v8 = vsub.f32 0.0, %v3823_v12  ;;  %v15188_v14 = vld [vmem:[#allocation84_spill] sm:$0xff] }
 0x48f   :  { %v3824_v6 = vsub.f32 1.0, %v3792_v4  ;;  %v3697_v9 = vmul.f32 %v3665_v24, %v12777_v61  ;;  %v3316_v55 = vand.u32 2147483648, %v13027_v59  ;;  %v3506_v2 = vmul.f32 %v3474_v42, %v12998_v49 }
 0x490   :  { %v3308_v11 = vmul.f32 %v8607_v58, %v3307_v44  ;;  %vm3311_vm7 = vweird.f32 %v8607_v58  ;;  %v3314_v54 = vand.u32 2147483647, %v13027_v59  ;;  %v4177_v39 = vshrl.u32 %v4011_v63, 16 }
 0x491   :  { %v4184_v22 = vshrl.u32 %v4012_v34, 16  ;;  %v4014_v19 = vpack.c.bf16 %v3982_v25, %v3982_v25  ;;  %v3666_v5 = vsub.f32 0.0, %v12818_v0  ;;  %vm3855_vm12 = vcmp.ge.f32.partialorder %v15187_v21, 0.0 }
 0x492   :  { %v3569_v45 = vmul.f32 %v3537_v15, %v12967_v20  ;;  %v3309_v57 = vadd.f32 %v8607_v58, %v3308_v11  ;;  %vm3310_vm0 = vweird.f32 %v13027_v59  ;;  %v13078_v61 = vpack.c.bf16 %v3981_v23, %v3981_v23 }
 0x493   :  { %v3919_v37 = vsel %vm3855_vm12, %v3823_v12, %v3887_v8  ;;  %v3756_v43 = vmul.f32 1.442695, %v3697_v9  ;;  %vm3312_vm14 = vmor %vm3310_vm0, %vm3311_vm7  ;;  %v3317_v52 = vor.u32 1.1754944e-38, %v3316_v55  ;;  %v3888_v31 = vsub.f32 0.0, %v3824_v6  ;;  %v15189_v8 = vld [vmem:[#allocation12_spill] sm:$0xff] }
 0x494   :  { %v3538_v26 = vadd.f32 -0.28449672, %v3506_v2  ;;  %v3313_v27 = vsel %vm3312_vm14, %v8607_v58, %v3309_v57  ;;  %vm3315_vm13 = vcmp.eq.f32.partialorder %v3314_v54, 8.507059e+37  ;;  %v4179_v28 = vrot.slane %v4177_v39, 7  ;;  %v15190_v54 = vld [vmem:[#allocation27_spill] sm:$0xff]  ;;  %v15191_v39 = vld [vmem:[#allocation49_spill] sm:$0xff] }
 0x495   :  { %v4198_v29 = vshrl.u32 %v4014_v19, 16  ;;  %v3698_v4 = vmul.f32 %v3666_v5, %v12818_v0  ;;  %v13081_v24 = vsel %vm3315_vm13, %v3317_v52, %v3313_v27  ;;  %v4180_v48 = vshll.u32 %v4011_v63, 16  ;;  %v2438_v63 = vpop.f32.mrf.mxu1 }
 0x496   :  { %v4186_v51 = vrot.slane %v4184_v22, 7  ;;  %v3601_v42 = vadd.f32 0.2548296, %v3569_v45  ;;  %v3379_v59 = vmul.f32 1.0614054, %v13081_v24  ;;  %v4191_v12 = vshrl.u32 %v13078_v61, 16 }
 0x497   :  { %v3951_v41 = vadd.f32 1.0, %v3919_v37  ;;  %vm3856_vm7 = vcmp.ge.f32.partialorder %v15188_v14, 0.0  ;;  %8608 = vpow2.f32 %v3756_v43  ;;  %v4187_v25 = vshll.u32 %v4012_v34, 16  ;;  %v15192_v43 = vld [vmem:[#allocation73_spill] sm:$0xff] }
 0x498   :  { %v3920_v58 = vsel %vm3856_vm7, %v3824_v6, %v3888_v31  ;;  %v3570_v23 = vmul.f32 %v3538_v26, %v12998_v49  ;;  %v3411_v15 = vadd.f32 -1.4531521, %v3379_v59  ;;  %v4182_v44 = vor.u32 %v4180_v48, %v4179_v28  ;;  %v15193_v28 = vld [vmem:[#allocation21_spill] sm:$0xff] }
 0x499   :  { %v4200_v0 = vrot.slane %v4198_v29, 7  ;;  %v2735_v9 = vmul.f32 0.5, %v15189_v8  ;;  %v3758_v55 = vmul.f32 1.442695, %v3698_v4  ;;  %v4189_v2 = vor.u32 %v4187_v25, %v4186_v51  ;;  %v2527_v4 = vpop.f32.mrf.mxu2  ;;  %v2616_v25 = vpop.f32.mrf.mxu3 }
 0x49a   :  { %v3633_v11 = vmul.f32 %v3601_v42, %v12967_v20  ;;  %v2350_v22 = vadd.f32 %v15191_v39, %v15190_v54  ;;  %v3443_v5 = vmul.f32 %v3411_v15, %v13081_v24  ;;  %v4193_v21 = vrot.slane %v4191_v12, 7 }
 0x49b   :  { %v4201_v34 = vshll.u32 %v4014_v19, 16  ;;  %v3983_v6 = vmul.f32 %v3951_v41, %v2735_v9  ;;  %v3952_v45 = vadd.f32 1.0, %v3920_v58  ;;  %v3602_v37 = vadd.f32 0.2548296, %v3570_v23 }
 0x49c   :  { %v2439_v57 = vadd.f32 %v2438_v63, %v2350_v22  ;;  %v5591_v52 = vunpack.c.l.b16 %v15192_v43  ;;  %v5592_v31 = vunpack.c.h.b16 %v15192_v43  ;;  %v2736_v29 = vmul.f32 0.5, %v15193_v28 }
 0x49d   :  { %v8609_v26 = vpop.eup %8608  ;;  %v4203_v27 = vor.u32 %v4201_v34, %v4200_v0  ;;  %8610 = vpow2.f32 %v3758_v55  ;;  %v3475_v20 = vadd.f32 1.4214138, %v3443_v5  ;;  %v4311_v59 = vsel %vm10750_vm8, 0, %v4182_v44 }
 0x49e   :  { %v3793_v48 = vmul.f32 %v8609_v26, %v3633_v11  ;;  %v13095_v51 = vpack.c.b16 %v5591_v52, %v5591_v52  ;;  %v13097_v42 = vpack.c.b16 %v5592_v31, %v5592_v31  ;;  %v2528_v19 = vadd.f32 %v2527_v4, %v2439_v57 }
 0x49f   :  { %v4194_v12 = vshll.u32 %v13078_v61, 16  ;;  %v4015_v41 = vpack.c.bf16 %v3983_v6, %v3983_v6  ;;  %v3984_v14 = vmul.f32 %v3952_v45, %v2736_v29  ;;  %v3634_v58 = vmul.f32 %v3602_v37, %v12998_v49  ;;  %v2705_v61 = vpop.f32.mrf.mxu0  ;;  %v15195_v29 = vld [vmem:[#allocation25_spill] sm:$0xff] }
 0x4a0   :  { %v8056_v23 = vrot.slane %v13095_v51, 9  ;;  %v5837_v15 = vrot.slane %v13097_v42, 5  ;;  %v2617_v0 = vadd.f32 %v2616_v25, %v2528_v19  ;;  %v4312_v8 = vsel %vm10750_vm8, 0, %v4189_v2 }
 0x4a1   :  { %v4196_v9 = vor.u32 %v4194_v12, %v4193_v21  ;;  %v4314_v63 = vsel %vm10750_vm8, 0, %v4203_v27  ;;  %v3507_v44 = vmul.f32 %v3475_v20, %v13081_v24  ;;  %v3825_v55 = vsub.f32 1.0, %v3793_v48 }
 0x4a2   :  { %v3667_v11 = vsub.f32 0.0, %v13011_v3  ;;  %v13113_v49 = vsel %vm9138_vm5, %v8056_v23, %v5837_v15  ;;  %v13115_v39 = vadd.f32 %v2705_v61, %v2617_v0  ;;  %v13123_v2 = vsel %vm10760_vm11, %v4310_v50, 0 }
 0x4a3   :  { %v8611_v22 = vpop.eup %8610  ;;  %v4205_v5 = vshrl.u32 %v4015_v41, 16  ;;  %v4016_v21 = vpack.c.bf16 %v3984_v14, %v3984_v14  ;;  %v6351_v34 = vsel %vm10827_vm3, %v13113_v49, 0  ;;  %v13130_v6 = vsel %vm10760_vm11, %v4311_v59, 0 }
 0x4a4   :  { %v4350_v45 = vsel %vm10760_vm11, %v4314_v63, 0  ;;  %v3794_v57 = vmul.f32 %v8611_v22, %v3634_v58  ;;  %v6505_v37 = vunpack.c.l.b16 %v6351_v34  ;;  %v13136_v18 = vsel %vm10760_vm11, %v4312_v8, 0 }
 0x4a5   :  { %v4313_v50 = vsel %vm10750_vm8, 0, %v4196_v9  ;;  %v3539_v52 = vadd.f32 -0.28449672, %v3507_v44  ;;  %v13141_v31 = vmul.f32 0.70710677, %v13115_v39  ;;  %v3889_v26 = vsub.f32 0.0, %v3825_v55 }
 0x4a6   :  { %v4995_v27 = vsel %vm15060_vm4, %v13006_v62, 0  ;;  %v3699_v28 = vmul.f32 %v3667_v11, %v13011_v3  ;;  %v6527_v20 = vpack.c.b16 %v15195_v29, %v6505_v37  ;;  %v4468_v4 = vunpack.c.l.b16 %v4350_v45 }
 0x4a7   :  { %v4207_v48 = vrot.slane %v4205_v5, 7  ;;  %v4212_v19 = vshrl.u32 %v4016_v21, 16  ;;  %v13149_v59 = vand.u32 2147483647, %v13141_v31  ;;  %v4469_v12 = vunpack.c.h.b16 %v4350_v45 }
 0x4a8   :  { %v4208_v14 = vshll.u32 %v4015_v41, 16  ;;  %v3826_v25 = vsub.f32 1.0, %v3794_v57  ;;  %v4380_v58 = vsel %vm10827_vm3, %v15175_v47, 0  ;;  %6816 = vmatmul.bf16.gmra.mxu2 %v6527_v20  ;;  %vm3857_vm13 = vcmp.ge.f32.partialorder %v12764_v53, 0.0 }
 0x4a9   :  { %v5053_v23 = vunpack.c.l.bf16 %v4995_v27  ;;  %v3571_v3 = vmul.f32 %v3539_v52, %v13081_v24  ;;  %v2836_v15 = vmul.f32 0.3275911, %v13149_v59  ;;  %v4388_v0 = vsel %vm10827_vm3, %v4350_v45, 0 }
 0x4aa   :  { %v5452_v8 = vsel %vm10979_vm10, %v4350_v45, 0  ;;  %v3921_v41 = vsel %vm3857_vm13, %v3825_v55, %v3889_v26  ;;  %v3760_v9 = vmul.f32 1.442695, %v3699_v28  ;;  %v4210_v63 = vor.u32 %v4208_v14, %v4207_v48  ;;  %v15201_v14 = vld [vmem:[#allocation57_spill] sm:$0xff] }
 0x4ab   :  { %v4214_v44 = vrot.slane %v4212_v19, 7  ;;  %v5024_v61 = vunpack.c.l.bf16 %v4380_v58  ;;  %v13161_v11 = vadd.f32 1.0, %v2836_v15  ;;  %v13163_v22 = vpack.c.b16 %v4468_v4, %v4468_v4  ;;  %v15202_v58 = vld [vmem:[#allocation61_spill] sm:$0xff] }
 0x4ac   :  { %v13165_v53 = vpack.c.b16 %v4469_v12, %v4469_v12  ;;  %v4215_v5 = vshll.u32 %v4016_v21, 16  ;;  %v3890_v34 = vsub.f32 0.0, %v3826_v25  ;;  %v3953_v57 = vadd.f32 1.0, %v3921_v41  ;;  %v15200_v21 = vld [vmem:[#allocation55_spill] sm:$0xff]  ;;  %v15207_v4 = vld [vmem:[#allocation53_spill] sm:$0xff] }
 0x4ad   :  { %15196 = vst [vmem:[#allocation63_spill] sm:$0xff] %v13163_v22  ;;  %v5082_v37 = vadd.f32 %v5053_v23, %v5024_v61  ;;  %v3603_v52 = vadd.f32 0.2548296, %v3571_v3  ;;  %8612 = vrcp.f32 %v13161_v11  ;;  %v13170_v55 = vsel %vm10760_vm11, %v4313_v50, 0 }
 0x4ae   :  { %15197 = vst [vmem:[#allocation54_spill] sm:$0xff] %v13165_v53  ;;  %v13172_v45 = vunpack.c.l.bf16 %v4388_v0  ;;  %v13174_v26 = vunpack.c.l.bf16 %v5452_v8  ;;  %8614 = vpow2.f32 %v3760_v9  ;;  %v4315_v27 = vsel %vm10750_vm8, 0, %v4210_v63  ;;  %v15203_v63 = vld [vmem:[#allocation51_spill] sm:$0xff] }
 0x4af   :  { %v4217_v28 = vor.u32 %v4215_v5, %v4214_v44  ;;  %v2737_v20 = vmul.f32 0.5, %v15200_v21  ;;  %vm3858_vm12 = vcmp.ge.f32.partialorder %v12804_v16, 0.0  ;;  %v13185_v23 = vadd.f32 %v15202_v58, %v15201_v14 }
 0x4b0   :  { %15198 = vst [vmem:[#allocation65_spill] sm:$0xff] %v13172_v45  ;;  %v3922_v19 = vsel %vm3858_vm12, %v3826_v25, %v3890_v34  ;;  %v5111_v3 = vpack.c.bf16 %v5082_v37, %v5082_v37  ;;  %v3635_v15 = vmul.f32 %v3603_v52, %v13081_v24  ;;  %v13190_v0 = vsel %vm10760_vm11, %v4315_v27, 0  ;;  %v15204_v34 = vld [vmem:[#allocation18_spill] sm:$0xff] }
 0x4b1   :  { %15199 = vst [vmem:[#allocation34_spill] sm:$0xff] %v13174_v26  ;;  %v3985_v12 = vmul.f32 %v3953_v57, %v2737_v20  ;;  %v5406_v16 = vpack.c.bf16 %v12980_v1, %v12980_v1  ;;  %v5620_v8 = vshrl.u32 %v13095_v51, 16  ;;  %v5623_v41 = vshll.u32 %v13095_v51, 16 }
 0x4b2   :  { %v4316_v9 = vsel %vm10750_vm8, 0, %v4217_v28  ;;  %v5291_v44 = vsel %vm15082_vm1, %v15203_v63, 0  ;;  %v5871_v24 = vsel %vm11145_vm6, %v15203_v63, 0  ;;  %v3954_v61 = vadd.f32 1.0, %v3922_v19 }
 0x4b3   :  { %v8613_v25 = vpop.eup %8612  ;;  %v2738_v1 = vmul.f32 0.5, %v15204_v34  ;;  %v5442_v51 = vsel %vm10979_vm10, %v15175_v47, 0  ;;  %v5622_v37 = vrot.slane %v5620_v8, 4  ;;  %v13209_v52 = vpack.c.bf16 %v3985_v12, %v3985_v12 }
 0x4b4   :  { %v8615_v5 = vpop.eup %8614  ;;  %v3321_v57 = vmul.f32 %v8613_v25, %v13161_v11  ;;  %v5320_v27 = vunpack.c.l.bf16 %v5111_v3  ;;  %v5625_v21 = vrot.slane %v5623_v41, 5  ;;  %v13213_v20 = vsel %vm10760_vm11, %v4316_v9, 0 }
 0x4b5   :  { %v3795_v28 = vmul.f32 %v8615_v5, %v3635_v15  ;;  %15205 = vst [vmem:[#allocation33_spill] sm:$0xff] %v13213_v20  ;;  %v5349_v19 = vunpack.c.l.bf16 %v5291_v44  ;;  %v5473_v14 = vunpack.c.l.bf16 %v5406_v16  ;;  %v13215_v63 = vunpack.c.l.bf16 %v5871_v24  ;;  %v15213_v20 = vld [vmem:[#allocation72_spill] sm:$0xff] }
 0x4b6   :  { %v3322_v58 = vsub.f32 1.0, %v3321_v57  ;;  %v3986_v34 = vmul.f32 %v3954_v61, %v2738_v1  ;;  %v3331_v50 = vand.u32 2147483648, %v13161_v11  ;;  %v5503_v48 = vunpack.c.l.bf16 %v5442_v51 }
 0x4b7   :  { %vm3326_vm0 = vweird.f32 %v8613_v25  ;;  %v3329_v12 = vand.u32 2147483647, %v13161_v11  ;;  %v5626_v3 = vor.u32 %v5625_v21, %v5622_v37  ;;  %v4219_v15 = vshrl.u32 %v13209_v52, 16 }
 0x4b8   :  { %v3323_v47 = vmul.f32 %v8613_v25, %v3322_v58  ;;  %v5378_v8 = vadd.f32 %v5349_v19, %v5320_v27  ;;  %v5685_v9 = vsel %vm11131_vm9, %v13006_v62, 0  ;;  %v3827_v16 = vsub.f32 1.0, %v3795_v28 }
 0x4b9   :  { %vm3325_vm14 = vweird.f32 %v13161_v11  ;;  %v5535_v24 = vadd.f32 %v5503_v48, %v5473_v14  ;;  %v5629_v61 = vshll.u32 %v13097_v42, 16  ;;  %v13226_v1 = vpack.c.bf16 %v3986_v34, %v3986_v34  ;;  %v2440_v42 = vpop.f32.mrf.mxu1 }
 0x4ba   :  { %v3324_v44 = vadd.f32 %v8613_v25, %v3323_v47  ;;  %vm3327_vm7 = vmor %vm3325_vm14, %vm3326_vm0  ;;  %v3332_v57 = vor.u32 1.1754944e-38, %v3331_v50  ;;  %v5443_v51 = vsel %vm10979_vm10, %v15192_v43, 0  ;;  %vm3330_vm13 = vcmp.eq.f32.partialorder %v3329_v12, 8.507059e+37 }
 0x4bb   :  { %v5567_v62 = vpack.c.bf16 %v5535_v24, %v5535_v24  ;;  %v5627_v27 = vrot.slane %v5626_v3, 4  ;;  %v13231_v28 = vrot.slane %v4219_v15, 7  ;;  %v5749_v11 = vunpack.c.l.bf16 %v5685_v9 }
 0x4bc   :  { %v3328_v37 = vsel %vm3327_vm7, %v8613_v25, %v3324_v44  ;;  %v3891_v48 = vsub.f32 0.0, %v3827_v16  ;;  %v5407_v14 = vpack.c.bf16 %v5378_v8, %v5378_v8  ;;  %v5631_v58 = vrot.slane %v5629_v61, 5 }
 0x4bd   :  { %v13233_v21 = vsel %vm3330_vm13, %v3332_v57, %v3328_v37  ;;  %v5717_v50 = vunpack.c.l.bf16 %v5567_v62  ;;  %v4226_v34 = vshrl.u32 %v13226_v1, 16  ;;  %v5504_v47 = vunpack.c.l.bf16 %v5443_v51 }
 0x4be   :  { %v3380_v19 = vmul.f32 1.0614054, %v13233_v21  ;;  %v4456_v25 = vunpack.c.l.b16 %v15207_v4  ;;  %v4457_v12 = vunpack.c.h.b16 %v15207_v4  ;;  %v5474_v15 = vunpack.c.l.bf16 %v5407_v14 }
 0x4bf   :  { %v13241_v9 = vsel %vm9101_vm2, %v5627_v27, %v5631_v58  ;;  %v5781_v44 = vadd.f32 %v5749_v11, %v5717_v50  ;;  %v2441_v24 = vadd.f32 %v2440_v42, %v13185_v23  ;;  %vm3859_vm12 = vcmp.ge.f32.partialorder %v13001_v46, 0.0  ;;  %v2529_v50 = vpop.f32.mrf.mxu2 }
 0x4c0   :  { %v3412_v3 = vadd.f32 -1.4531521, %v3380_v19  ;;  %v5872_v8 = vsel %vm11145_vm6, %v13113_v49, 0  ;;  %v3668_v61 = vsub.f32 0.0, %v13149_v59  ;;  %v3923_v57 = vsel %vm3859_vm12, %v3827_v16, %v3891_v48 }
 0x4c1   :  { %v5536_v37 = vadd.f32 %v5504_v47, %v5474_v15  ;;  %v5813_v62 = vpack.c.bf16 %v5781_v44, %v5781_v44  ;;  %v13251_v19 = vmul.f32 0.5, %v12993_v32  ;;  %v5686_v23 = vsel %vm11131_vm9, %v13241_v9, 0 }
 0x4c2   :  { %v3444_v51 = vmul.f32 %v3412_v3, %v13233_v21  ;;  %v4514_v27 = vpack.c.b16 %v4456_v25, %v4456_v25  ;;  %v13256_v46 = vpack.c.b16 %v4457_v12, %v4457_v12  ;;  %v13258_v11 = vrot.slane %v4226_v34, 7  ;;  %v2618_v34 = vpop.f32.mrf.mxu3 }
 0x4c3   :  { %v5568_v42 = vpack.c.bf16 %v5536_v37, %v5536_v37  ;;  %v5903_v14 = vunpack.c.l.bf16 %v5813_v62  ;;  %v13260_v16 = vadd.f32 1.0, %v3923_v57  ;;  %v5936_v48 = vunpack.c.l.bf16 %v5872_v8 }
 0x4c4   :  { %v3476_v49 = vadd.f32 1.4214138, %v3444_v51  ;;  %v3700_v58 = vmul.f32 %v3668_v61, %v13149_v59  ;;  %v6037_v32 = vsel %vm15174_vm15, %v15192_v43, 0  ;;  %v5750_v3 = vunpack.c.l.bf16 %v5686_v23  ;;  %v2707_v43 = vpop.f32.mrf.mxu0 }
 0x4c5   :  { %v5718_v47 = vunpack.c.l.bf16 %v5568_v42  ;;  %v5967_v25 = vadd.f32 %v13215_v63, %v5903_v14  ;;  %v2530_v12 = vadd.f32 %v2529_v50, %v2441_v24  ;;  %v4458_v15 = vunpack.c.l.b16 %v13046_v17 }
 0x4c6   :  { %v4459_v44 = vunpack.c.h.b16 %v13046_v17  ;;  %v8042_v57 = vrot.slane %v4514_v27, 9  ;;  %v5192_v8 = vrot.slane %v13256_v46, 5  ;;  %v3508_v59 = vmul.f32 %v3476_v49, %v13233_v21 }
 0x4c7   :  { %v5782_v61 = vadd.f32 %v5750_v3, %v5718_v47  ;;  %v5999_v51 = vpack.c.bf16 %v5967_v25, %v5967_v25  ;;  %v2619_v37 = vadd.f32 %v2618_v34, %v2530_v12  ;;  %v13271_v62 = vpack.c.b16 %v4458_v15, %v4458_v15  ;;  %v15208_v3 = vld [vmem:[#allocation82_spill] sm:$0xff]  ;;  %v15209_v25 = vld [vmem:[#allocation29_spill] sm:$0xff] }
 0x4c8   :  { %v13273_v23 = vpack.c.b16 %v4459_v44, %v4459_v44  ;;  %v4765_v63 = vshrl.u32 %v4514_v27, 16  ;;  %v4768_v24 = vshll.u32 %v4514_v27, 16  ;;  %v6098_v50 = vunpack.c.l.bf16 %v6037_v32 }
 0x4c9   :  { %v5814_v42 = vpack.c.bf16 %v5782_v61, %v5782_v61  ;;  %v6066_v14 = vunpack.c.l.bf16 %v5999_v51  ;;  %v13275_v5 = vadd.f32 %v2707_v43, %v2619_v37  ;;  %v13279_v26 = vsel %vm9138_vm5, %v8042_v57, %v5192_v8  ;;  %v15211_v43 = vld [vmem:[#allocation81_spill] sm:$0xff] }
 0x4ca   :  { %v8043_v49 = vrot.slane %v13271_v62, 9  ;;  %v5196_v47 = vrot.slane %v13273_v23, 5  ;;  %v4757_v12 = vor.u32 %v15209_v25, %v15208_v3  ;;  %v3540_v34 = vadd.f32 -0.28449672, %v3508_v59 }
 0x4cb   :  { %v5904_v15 = vunpack.c.l.bf16 %v5814_v42  ;;  %v6127_v44 = vadd.f32 %v6098_v50, %v6066_v14  ;;  %vm15210_vm0 = vnez %v15177_v10  ;;  %v13289_v32 = vmul.f32 0.70710677, %v13275_v5  ;;  %v6930_v10 = vld [vmem:[%s14425_s6 + $0x28] sm:$0xff] }
 0x4cc   :  { %v6197_v27 = vsel %vm15210_vm0, %v13241_v9, 0  ;;  %v13293_v57 = vsel %vm9138_vm5, %v8043_v49, %v5196_v47  ;;  %v4767_v8 = vrot.slane %v4765_v63, 4  ;;  %v4770_v61 = vrot.slane %v4768_v24, 5  ;;  %v15212_v49 = vld [vmem:[#allocation80_spill] sm:$0xff] }
 0x4cd   :  { %v5968_v51 = vadd.f32 %v5936_v48, %v5904_v15  ;;  %v6159_v37 = vpack.c.bf16 %v6127_v44, %v6127_v44  ;;  %v6352_v59 = vsel %vm10827_vm3, %v13279_v26, 0  ;;  %v8041_v42 = vrot.slane %v15211_v43, 9 }
 0x4ce   :  { %v13300_v14 = vand.u32 2147483647, %v13289_v32  ;;  %v6353_v9 = vsel %vm10827_vm3, %v13293_v57, 0  ;;  %v4758_v50 = vrot.slane %v4757_v12, 4  ;;  %v5188_v47 = vrot.slane %v15212_v49, 5  ;;  %v15216_v49 = vld [vmem:[#allocation74_spill] sm:$0xff] }
 0x4cf   :  { %v3572_v63 = vmul.f32 %v3540_v34, %v13233_v21  ;;  %v6000_v48 = vpack.c.bf16 %v5968_v51, %v5968_v51  ;;  %v6226_v24 = vunpack.c.l.bf16 %v6159_v37  ;;  %v6258_v3 = vunpack.c.l.bf16 %v6197_v27 }
 0x4d0   :  { %v2837_v25 = vmul.f32 0.3275911, %v13300_v14  ;;  %v6506_v15 = vunpack.c.l.b16 %v6352_v59  ;;  %v6507_v44 = vunpack.c.l.b16 %v6353_v9  ;;  %v4771_v43 = vor.u32 %v4770_v61, %v4767_v8 }
 0x4d1   :  { %v3762_v45 = vmul.f32 1.442695, %v3700_v58  ;;  %v6067_v35 = vunpack.c.l.bf16 %v6000_v48  ;;  %v6287_v53 = vadd.f32 %v6258_v3, %v6226_v24  ;;  %v4779_v33 = vshrl.u32 %v13271_v62, 16  ;;  %v15214_v58 = vld [vmem:[#allocation50_spill] sm:$0xff] }
 0x4d2   :  { %v13309_v22 = vadd.f32 1.0, %v2837_v25  ;;  %v6528_v12 = vpack.c.b16 %v6507_v44, %v6506_v15  ;;  %v13314_v34 = vsel %vm9101_vm2, %v4758_v50, %v15213_v20  ;;  %v4774_v27 = vshll.u32 %v13256_v46, 16  ;;  %v15218_v25 = vld [vmem:[#allocation11_spill] sm:$0xff] }
 0x4d3   :  { %v4229_v51 = vshll.u32 %v13226_v1, 16  ;;  %v3987_v8 = vmul.f32 %v13260_v16, %v13251_v19  ;;  %v6128_v61 = vadd.f32 %v15214_v58, %v6067_v35  ;;  %v4782_v37 = vshll.u32 %v13271_v62, 16 }
 0x4d4   :  { %v3604_v59 = vadd.f32 0.2548296, %v3572_v63  ;;  %8616 = vrcp.f32 %v13309_v22  ;;  %6821 = vmatmul.bf16.gmra.mxu2 %v6528_v12  ;;  %v4772_v9 = vrot.slane %v4771_v43, 4  ;;  %v13325_v20 = vsel %vm9138_vm5, %v8041_v42, %v5188_v47  ;;  %v15217_v63 = vld [vmem:[#allocation83_spill] sm:$0xff] }
 0x4d5   :  { %8618 = vpow2.f32 %v3762_v45  ;;  %v6160_v46 = vpack.c.bf16 %v6128_v61, %v6128_v61  ;;  %v4781_v50 = vrot.slane %v4779_v33, 4  ;;  %v4996_v1 = vsel %vm15060_vm4, %v13314_v34, 0 }
 0x4d6   :  { %v15215_v35 = vshll.u32 %v13209_v52, 16  ;;  %v13336_v16 = vor.u32 %v4229_v51, %v13258_v11  ;;  %v4776_v62 = vrot.slane %v4774_v27, 5  ;;  %v5537_v42 = vadd.f32 %v15217_v63, %v15216_v49  ;;  %v15219_v27 = vld [vmem:[#allocation75_spill] sm:$0xff] }
 0x4d7   :  { %v13341_v45 = vmul.f32 0.5, %v13115_v39  ;;  %v6227_v33 = vunpack.c.l.bf16 %v6160_v46  ;;  %v4784_v47 = vrot.slane %v4782_v37, 5  ;;  %v5292_v48 = vsel %vm15082_vm1, %v13325_v20, 0 }
 0x4d8   :  { %v13333_v19 = vor.u32 %v15215_v35, %v13231_v28  ;;  %v3636_v52 = vmul.f32 %v3604_v59, %v13233_v21  ;;  %v13349_v28 = vsel %vm9101_vm2, %v4772_v9, %v4776_v62  ;;  %v4788_v11 = vshll.u32 %v13273_v23, 16 }
 0x4d9   :  { %v5054_v24 = vunpack.c.l.bf16 %v4996_v1  ;;  %v13352_v3 = vpack.c.bf16 %v3987_v8, %v3987_v8  ;;  %v6288_v39 = vadd.f32 %v15218_v25, %v6227_v33  ;;  %v6319_v15 = vpack.c.bf16 %v6287_v53, %v6287_v53 }
 0x4da   :  { %v4785_v44 = vor.u32 %v4784_v47, %v4781_v50  ;;  %v8617_v43 = vpop.eup %8616  ;;  %v4382_v12 = vsel %vm10827_vm3, %v15207_v4, 0  ;;  %v5350_v51 = vunpack.c.l.bf16 %v5292_v48  ;;  %v5569_v61 = vpack.c.bf16 %v5537_v42, %v5537_v42 }
 0x4db   :  { %v5083_v21 = vadd.f32 %v5054_v24, %v15219_v27  ;;  %v8619_v37 = vpop.eup %8618  ;;  %v6320_v59 = vpack.c.bf16 %v6288_v39, %v6288_v39  ;;  %v3336_v23 = vmul.f32 %v8617_v43, %v13309_v22  ;;  %v4383_v8 = vsel %vm10827_vm3, %v13046_v17, 0 }
 0x4dc   :  { %v4997_v53 = vsel %vm15060_vm4, %v13349_v28, 0  ;;  %v3796_v9 = vmul.f32 %v8619_v37, %v3636_v52  ;;  %v3344_v46 = vand.u32 2147483647, %v13309_v22  ;;  %v4786_v50 = vrot.slane %v4785_v44, 4 }
 0x4dd   :  { %v4790_v1 = vrot.slane %v4788_v11, 5  ;;  %v6412_v35 = vunpack.c.l.b16 %v6319_v15  ;;  %v6413_v62 = vunpack.c.l.b16 %v6320_v59  ;;  %v3337_v63 = vsub.f32 1.0, %v3336_v23 }
 0x4de   :  { %v5112_v42 = vpack.c.bf16 %v5083_v21, %v5083_v21  ;;  %vm3341_vm14 = vweird.f32 %v8617_v43  ;;  %v3346_v33 = vand.u32 2147483648, %v13309_v22  ;;  %v5055_v48 = vunpack.c.l.bf16 %v4997_v53 }
 0x4df   :  { %v13370_v47 = vsel %vm9101_vm2, %v4786_v50, %v4790_v1  ;;  %v6437_v24 = vpack.c.b16 %v6413_v62, %v6412_v35  ;;  %v3338_v39 = vmul.f32 %v8617_v43, %v3337_v63  ;;  %v3828_v11 = vsub.f32 1.0, %v3796_v9 }
 0x4e0   :  { %v4998_v52 = vsel %vm15060_vm4, %v13370_v47, 0  ;;  %v5321_v44 = vunpack.c.l.bf16 %v5112_v42  ;;  %v5026_v15 = vunpack.c.l.bf16 %v4382_v12  ;;  %v5687_v21 = vsel %vm11131_vm9, %v13314_v34, 0 }
 0x4e1   :  { %v5056_v27 = vunpack.c.l.bf16 %v4998_v52  ;;  %vm3860_vm7 = vcmp.ge.f32.partialorder %v13141_v31, 0.0  ;;  %6727 = vmatmul.bf16.gmra.mxu1 %v6437_v24  ;;  %v3339_v37 = vadd.f32 %v8617_v43, %v3338_v39  ;;  %vm3340_vm13 = vweird.f32 %v13309_v22 }
 0x4e2   :  { %vm3345_vm12 = vcmp.eq.f32.partialorder %v3344_v46, 8.507059e+37  ;;  %v5379_v59 = vadd.f32 %v5350_v51, %v5321_v44  ;;  %vm3342_vm11 = vmor %vm3340_vm13, %vm3341_vm14  ;;  %v3347_v23 = vor.u32 1.1754944e-38, %v3346_v33  ;;  %v5027_v53 = vunpack.c.l.bf16 %v4383_v8 }
 0x4e3   :  { %v5084_v50 = vadd.f32 %v5055_v48, %v5026_v15  ;;  %v5445_v12 = vsel %vm10979_vm10, %v15207_v4, 0  ;;  %v3343_v9 = vsel %vm3342_vm11, %v8617_v43, %v3339_v37  ;;  %v5719_v34 = vunpack.c.l.bf16 %v5569_v61 }
 0x4e4   :  { %v5408_v1 = vpack.c.bf16 %v5379_v59, %v5379_v59  ;;  %v5751_v35 = vunpack.c.l.bf16 %v5687_v21  ;;  %v13384_v62 = vsel %vm3345_vm12, %v3347_v23, %v3343_v9  ;;  %v5293_v22 = vsel %vm15082_vm1, %v13279_v26, 0 }
 0x4e5   :  { %v5874_v51 = vsel %vm11145_vm6, %v13279_v26, 0  ;;  %v5085_v8 = vadd.f32 %v5056_v27, %v5027_v53  ;;  %v3381_v46 = vmul.f32 1.0614054, %v13384_v62  ;;  %v5506_v42 = vunpack.c.l.bf16 %v5445_v12 }
 0x4e6   :  { %v5475_v63 = vunpack.c.l.bf16 %v5408_v1  ;;  %v5783_v33 = vadd.f32 %v5751_v35, %v5719_v34  ;;  %v3892_v43 = vsub.f32 0.0, %v3828_v11  ;;  %v3669_v61 = vsub.f32 0.0, %v13300_v14  ;;  %v13411_v34 = vld [vmem:[%s14424_s5] ss:$0 sm:$0xff]  ;;  %v6693_v35 = vpop.f32.mrf.mxu1 }
 0x4e7   :  { %v5113_v48 = vpack.c.bf16 %v5084_v50, %v5084_v50  ;;  %v5873_v24 = vsel %vm11145_vm6, %v13325_v20, 0  ;;  %v3413_v39 = vadd.f32 -1.4531521, %v3381_v46  ;;  %v5351_v52 = vunpack.c.l.bf16 %v5293_v22  ;;  %v6782_v22 = vpop.f32.mrf.mxu2 }
 0x4e8   :  { %v5538_v44 = vadd.f32 %v5506_v42, %v5475_v63  ;;  %v5815_v15 = vpack.c.bf16 %v5783_v33, %v5783_v33  ;;  %v5294_v26 = vsel %vm15082_vm1, %v13293_v57, 0  ;;  %v5938_v27 = vunpack.c.l.bf16 %v5874_v51 }
 0x4e9   :  { %v5114_v21 = vpack.c.bf16 %v5085_v8, %v5085_v8  ;;  %v5688_v37 = vsel %vm11131_vm9, %v13349_v28, 0  ;;  %v3445_v59 = vmul.f32 %v3413_v39, %v13384_v62  ;;  %v5937_v50 = vunpack.c.l.bf16 %v5873_v24 }
 0x4ea   :  { %v5570_v23 = vpack.c.bf16 %v5538_v44, %v5538_v44  ;;  %v5905_v53 = vunpack.c.l.bf16 %v5815_v15  ;;  %v3924_v20 = vsel %vm3860_vm7, %v3828_v11, %v3892_v43  ;;  %v3701_v12 = vmul.f32 %v3669_v61, %v13300_v14  ;;  %v6940_v14 = vld [vmem:[%s14425_s6 + $0x78] sm:$0xff] }
 0x4eb   :  { %v5322_v9 = vunpack.c.l.bf16 %v5113_v48  ;;  %v4460_v1 = vunpack.c.l.b16 %v13065_v7  ;;  %v5752_v8 = vunpack.c.l.bf16 %v5688_v37  ;;  %v6038_v31 = vsel %vm15174_vm15, %v15207_v4, 0  ;;  %6956 = vmatpush.msra.mxu3 %v6940_v14 }
 0x4ec   :  { %v5720_v51 = vunpack.c.l.bf16 %v5570_v23  ;;  %v5969_v46 = vadd.f32 %v5937_v50, %v5905_v53  ;;  %v3477_v11 = vadd.f32 1.4214138, %v3445_v59  ;;  %v4461_v63 = vunpack.c.h.b16 %v13065_v7 }
 0x4ed   :  { %v4462_v42 = vunpack.c.l.b16 %v13123_v2  ;;  %v4463_v33 = vunpack.c.h.b16 %v13123_v2  ;;  %v6694_v43 = vadd.f32 %v13411_v34, %v6693_v35  ;;  %v5323_v61 = vunpack.c.l.bf16 %v5114_v21 }
 0x4ee   :  { %v5784_v48 = vadd.f32 %v5752_v8, %v5720_v51  ;;  %v6001_v24 = vpack.c.bf16 %v5969_v46, %v5969_v46  ;;  %v4518_v39 = vpack.c.b16 %v4460_v1, %v4460_v1  ;;  %v13423_v44 = vpack.c.b16 %v4461_v63, %v4461_v63 }
 0x4ef   :  { %v13425_v4 = vpack.c.b16 %v4462_v42, %v4462_v42  ;;  %v13427_v15 = vpack.c.b16 %v4463_v33, %v4463_v33  ;;  %v13429_v37 = vadd.f32 %v6782_v22, %v6694_v43  ;;  %v6099_v53 = vunpack.c.l.bf16 %v6038_v31 }
 0x4f0   :  { %v5816_v59 = vpack.c.bf16 %v5784_v48, %v5784_v48  ;;  %v6068_v23 = vunpack.c.l.bf16 %v6001_v24  ;;  %v3509_v50 = vmul.f32 %v3477_v11, %v13384_v62  ;;  %v6198_v21 = vsel %vm15210_vm0, %v13349_v28, 0  ;;  %v13440_v48 = vpop.f32.mrf.mxu1  ;;  %v13442_v28 = vpop.f32.mrf.mxu2 }
 0x4f1   :  { %15220 = vst [vmem:[#allocation28_spill] sm:$0xff] %v13429_v37  ;;  %v8044_v35 = vrot.slane %v4518_v39, 9  ;;  %v5200_v1 = vrot.slane %v13423_v44, 5  ;;  %v8045_v46 = vrot.slane %v13425_v4, 9  ;;  %v5204_v14 = vrot.slane %v13427_v15, 5 }
 0x4f2   :  { %v5906_v51 = vunpack.c.l.bf16 %v5816_v59  ;;  %v6129_v8 = vadd.f32 %v6099_v53, %v6068_v23  ;;  %v4233_v22 = vshrl.u32 %v13352_v3, 16  ;;  %v3956_v31 = vadd.f32 1.0, %v3924_v20  ;;  %15221 = vst [vmem:[#allocation32_spill] sm:$0xff] %v13440_v48 }
 0x4f3   :  { %v5352_v42 = vunpack.c.l.bf16 %v5294_v26  ;;  %v5380_v11 = vadd.f32 %v5351_v52, %v5322_v9  ;;  %15222 = vst [vmem:[#allocation35_spill] sm:$0xff] %v13442_v28  ;;  %v13446_v24 = vsel %vm9138_vm5, %v8044_v35, %v5200_v1  ;;  %v3764_v59 = vmul.f32 1.442695, %v3701_v12 }
 0x4f4   :  { %v5970_v33 = vadd.f32 %v5938_v27, %v5906_v51  ;;  %v6161_v43 = vpack.c.bf16 %v6129_v8, %v6129_v8  ;;  %v6039_v53 = vsel %vm15174_vm15, %v13046_v17, 0  ;;  %v6259_v63 = vunpack.c.l.bf16 %v6198_v21 }
 0x4f5   :  { %v5381_v23 = vadd.f32 %v5352_v42, %v5323_v61  ;;  %v3541_v20 = vadd.f32 -0.28449672, %v3509_v50  ;;  %v13453_v27 = vsel %vm9138_vm5, %v8045_v46, %v5204_v14  ;;  %v13455_v9 = vrot.slane %v4233_v22, 7 }
 0x4f6   :  { %v6002_v26 = vpack.c.bf16 %v5970_v33, %v5970_v33  ;;  %v6228_v52 = vunpack.c.l.bf16 %v6161_v43  ;;  %v13458_v51 = vmul.f32 %v3956_v31, %v13341_v45  ;;  %v6354_v12 = vsel %vm10827_vm3, %v13446_v24, 0 }
 0x4f7   :  { %v4793_v61 = vshrl.u32 %v4518_v39, 16  ;;  %v5409_v35 = vpack.c.bf16 %v5380_v11, %v5380_v11  ;;  %v6100_v21 = vunpack.c.l.bf16 %v6039_v53  ;;  %8620 = vpow2.f32 %v3764_v59 }
 0x4f8   :  { %v6069_v1 = vunpack.c.l.bf16 %v6002_v26  ;;  %v6289_v50 = vadd.f32 %v6259_v63, %v6228_v52  ;;  %v5410_v8 = vpack.c.bf16 %v5381_v23, %v5381_v23  ;;  %v6199_v46 = vsel %vm15210_vm0, %v13370_v47, 0  ;;  %v6698_v52 = vpop.f32.mrf.mxu1 }
 0x4f9   :  { %v6355_v45 = vsel %vm10827_vm3, %v13453_v27, 0  ;;  %v3573_v14 = vmul.f32 %v3541_v20, %v13384_v62  ;;  %v6508_v31 = vunpack.c.l.b16 %v6354_v12  ;;  %v4795_v33 = vrot.slane %v4793_v61, 4  ;;  %v6787_v61 = vpop.f32.mrf.mxu2 }
 0x4fa   :  { %v6130_v22 = vadd.f32 %v6100_v21, %v6069_v1  ;;  %v6509_v42 = vunpack.c.l.b16 %v6355_v45  ;;  %v4796_v11 = vshll.u32 %v4518_v39, 16  ;;  %v4807_v43 = vshrl.u32 %v13425_v4, 16 }
 0x4fb   :  { %v4810_v63 = vshll.u32 %v13425_v4, 16  ;;  %v5476_v59 = vunpack.c.l.bf16 %v5409_v35  ;;  %v6260_v53 = vunpack.c.l.bf16 %v6199_v46  ;;  %v6699_v37 = vadd.f32 %v13411_v34, %v6698_v52 }
 0x4fc   :  { %v6162_v23 = vpack.c.bf16 %v6130_v22, %v6130_v22  ;;  %v6529_v26 = vpack.c.b16 %v6509_v42, %v6508_v31  ;;  %v4798_v28 = vrot.slane %v4796_v11, 5  ;;  %v4802_v48 = vshll.u32 %v13423_v44, 16 }
 0x4fd   :  { %v4809_v20 = vrot.slane %v4807_v43, 4  ;;  %v5477_v1 = vunpack.c.l.bf16 %v5410_v8  ;;  %v4812_v39 = vrot.slane %v4810_v63, 5  ;;  %v4816_v21 = vshll.u32 %v13427_v15, 16  ;;  %v8621_v45 = vpop.eup %8620 }
 0x4fe   :  { %v6229_v12 = vunpack.c.l.bf16 %v6162_v23  ;;  %6826 = vmatmul.bf16.gmra.mxu2 %v6529_v26  ;;  %v3605_v4 = vadd.f32 0.2548296, %v3573_v14  ;;  %v6321_v35 = vpack.c.bf16 %v6289_v50, %v6289_v50  ;;  %v13475_v22 = vadd.f32 %v6787_v61, %v6699_v37 }
 0x4ff   :  { %v4799_v46 = vor.u32 %v4798_v28, %v4795_v33  ;;  %v4384_v42 = vsel %vm10827_vm3, %v13065_v7, 0  ;;  %v4385_v44 = vsel %vm10827_vm3, %v13123_v2, 0  ;;  %v4813_v8 = vor.u32 %v4812_v39, %v4809_v20 }
 0x500   :  { %15223 = vst [vmem:[#allocation17_spill] sm:$0xff] %v13475_v22  ;;  %v6290_v31 = vadd.f32 %v6260_v53, %v6229_v12  ;;  %v4804_v43 = vrot.slane %v4802_v48, 5  ;;  %v4818_v63 = vrot.slane %v4816_v21, 5  ;;  %v5446_v15 = vsel %vm10979_vm10, %v13046_v17, 0 }
 0x501   :  { %v4800_v11 = vrot.slane %v4799_v46, 4  ;;  %v4814_v50 = vrot.slane %v4813_v8, 4  ;;  %v5447_v28 = vsel %vm10979_vm10, %v13065_v7, 0  ;;  %v5507_v14 = vunpack.c.l.bf16 %v5446_v15 }
 0x502   :  { %v6322_v37 = vpack.c.bf16 %v6290_v31, %v6290_v31  ;;  %v3637_v33 = vmul.f32 %v3605_v4, %v13384_v62  ;;  %v6414_v23 = vunpack.c.l.b16 %v6321_v35  ;;  %v5508_v48 = vunpack.c.l.bf16 %v5447_v28  ;;  %v13507_v31 = vpop.f32.mrf.mxu1 }
 0x503   :  { %v13492_v53 = vsel %vm9101_vm2, %v4800_v11, %v4804_v43  ;;  %v13496_v52 = vsel %vm9101_vm2, %v4814_v50, %v4818_v63  ;;  %v5539_v20 = vadd.f32 %v5507_v14, %v5476_v59  ;;  %v5689_v62 = vsel %vm11131_vm9, %v13370_v47, 0  ;;  %v6939_v59 = vld [vmem:[%s14425_s6 + $0x70] sm:$0xff] }
 0x504   :  { %v6415_v26 = vunpack.c.l.b16 %v6322_v37  ;;  %v4999_v17 = vsel %vm15060_vm4, %v13492_v53, 0  ;;  %v5000_v12 = vsel %vm15060_vm4, %v13496_v52, 0  ;;  %v5028_v61 = vunpack.c.l.bf16 %v4384_v42  ;;  %6957 = vmatpush.msra.mxu3 %v6939_v59 }
 0x505   :  { %v5057_v39 = vunpack.c.l.bf16 %v4999_v17  ;;  %v5058_v4 = vunpack.c.l.bf16 %v5000_v12  ;;  %v5540_v35 = vadd.f32 %v5508_v48, %v5477_v1  ;;  %v5571_v46 = vpack.c.bf16 %v5539_v20, %v5539_v20 }
 0x506   :  { %v6438_v21 = vpack.c.b16 %v6415_v26, %v6414_v23  ;;  %v13512_v8 = vmul.f32 %v8621_v45, %v3637_v33  ;;  %v5029_v11 = vunpack.c.l.bf16 %v4385_v44  ;;  %v5690_v43 = vsel %vm11131_vm9, %v13492_v53, 0  ;;  %v13529_v23 = vpop.f32.mrf.mxu2 }
 0x507   :  { %v5086_v47 = vadd.f32 %v5057_v39, %v5028_v61  ;;  %v5875_v1 = vsel %vm11145_vm6, %v13293_v57, 0  ;;  %v5753_v42 = vunpack.c.l.bf16 %v5689_v62  ;;  %v5572_v63 = vpack.c.bf16 %v5540_v35, %v5540_v35 }
 0x508   :  { %6732 = vmatmul.bf16.gmra.mxu1 %v6438_v21  ;;  %v5721_v15 = vunpack.c.l.bf16 %v5571_v46  ;;  %v5295_v45 = vsel %vm15082_vm1, %v13446_v24, 0  ;;  %v5296_v44 = vsel %vm15082_vm1, %v13453_v27, 0  ;;  %v5876_v37 = vsel %vm11145_vm6, %v13446_v24, 0 }
 0x509   :  { %v5087_v50 = vadd.f32 %v5058_v4, %v5029_v11  ;;  %v5115_v28 = vpack.c.bf16 %v5086_v47, %v5086_v47  ;;  %v5722_v14 = vunpack.c.l.bf16 %v5572_v63  ;;  %v5754_v57 = vunpack.c.l.bf16 %v5690_v43 }
 0x50a   :  { %v5785_v33 = vadd.f32 %v5753_v42, %v5721_v15  ;;  %v13533_v48 = vpack.c.bf16 %v13458_v51, %v13458_v51  ;;  %v13536_v26 = vmul.f32 0.5, %v13275_v5  ;;  %v3829_v17 = vsub.f32 1.0, %v13512_v8  ;;  %v6703_v63 = vpop.f32.mrf.mxu1 }
 0x50b   :  { %v5939_v20 = vunpack.c.l.bf16 %v5875_v1  ;;  %v5353_v62 = vunpack.c.l.bf16 %v5295_v45  ;;  %v5354_v12 = vunpack.c.l.bf16 %v5296_v44  ;;  %v5786_v24 = vadd.f32 %v5754_v57, %v5722_v14 }
 0x50c   :  { %v5817_v61 = vpack.c.bf16 %v5785_v33, %v5785_v33  ;;  %v5877_v39 = vsel %vm11145_vm6, %v13453_v27, 0  ;;  %v5940_v21 = vunpack.c.l.bf16 %v5876_v37  ;;  %v5116_v4 = vpack.c.bf16 %v5087_v50, %v5087_v50 }
 0x50d   :  { %v6040_v51 = vsel %vm15174_vm15, %v13065_v7, 0  ;;  %v5324_v35 = vunpack.c.l.bf16 %v5115_v28  ;;  %v5818_v5 = vpack.c.bf16 %v5786_v24, %v5786_v24  ;;  %v6041_v59 = vsel %vm15174_vm15, %v13123_v2, 0 }
 0x50e   :  { %v5907_v46 = vunpack.c.l.bf16 %v5817_v61  ;;  %vm3861_vm11 = vcmp.ge.f32.partialorder %v13289_v32, 0.0  ;;  %v3893_v8 = vsub.f32 0.0, %v3829_v17  ;;  %v5691_v27 = vsel %vm11131_vm9, %v13496_v52, 0 }
 0x50f   :  { %v4464_v11 = vunpack.c.l.b16 %v13130_v6  ;;  %v4465_v47 = vunpack.c.h.b16 %v13130_v6  ;;  %v5908_v43 = vunpack.c.l.bf16 %v5818_v5  ;;  %v6101_v1 = vunpack.c.l.bf16 %v6040_v51 }
 0x510   :  { %v5971_v7 = vadd.f32 %v5939_v20, %v5907_v46  ;;  %v4466_v42 = vunpack.c.l.b16 %v13136_v18  ;;  %v5325_v15 = vunpack.c.l.bf16 %v5116_v4  ;;  %v6102_v45 = vunpack.c.l.bf16 %v6041_v59  ;;  %v6792_v59 = vpop.f32.mrf.mxu2 }
 0x511   :  { %v4467_v44 = vunpack.c.h.b16 %v13136_v18  ;;  %v4522_v37 = vpack.c.b16 %v4464_v11, %v4464_v11  ;;  %v5382_v50 = vadd.f32 %v5353_v62, %v5324_v35  ;;  %v5972_v28 = vadd.f32 %v5940_v21, %v5908_v43 }
 0x512   :  { %v6003_v14 = vpack.c.bf16 %v5971_v7, %v5971_v7  ;;  %v4523_v57 = vpack.c.b16 %v4465_v47, %v4465_v47  ;;  %v4524_v33 = vpack.c.b16 %v4466_v42, %v4466_v42  ;;  %v6704_v5 = vadd.f32 %v13411_v34, %v6703_v63 }
 0x513   :  { %v13556_v24 = vpack.c.b16 %v4467_v44, %v4467_v44  ;;  %v8046_v61 = vrot.slane %v4522_v37, 9  ;;  %v6004_v20 = vpack.c.bf16 %v5972_v28, %v5972_v28  ;;  %v6200_v4 = vsel %vm15210_vm0, %v13492_v53, 0 }
 0x514   :  { %v6070_v51 = vunpack.c.l.bf16 %v6003_v14  ;;  %v5208_v46 = vrot.slane %v4523_v57, 5  ;;  %v5383_v22 = vadd.f32 %v5354_v12, %v5325_v15  ;;  %v8047_v11 = vrot.slane %v4524_v33, 9 }
 0x515   :  { %v5212_v62 = vrot.slane %v13556_v24, 5  ;;  %v13563_v21 = vadd.f32 %v6792_v59, %v6704_v5  ;;  %v5411_v35 = vpack.c.bf16 %v5382_v50, %v5382_v50  ;;  %v6071_v47 = vunpack.c.l.bf16 %v6004_v20 }
 0x516   :  { %v6131_v43 = vadd.f32 %v6101_v1, %v6070_v51  ;;  %v13567_v7 = vsel %vm9138_vm5, %v8046_v61, %v5208_v46  ;;  %v13569_v42 = vunpack.c.l.bf16 %v5877_v39  ;;  %v6201_v53 = vsel %vm15210_vm0, %v13496_v52, 0 }
 0x517   :  { %15224 = vst [vmem:[#allocation36_spill] sm:$0xff] %v13563_v21  ;;  %v13576_v12 = vsel %vm9138_vm5, %v8047_v11, %v5212_v62  ;;  %v4821_v63 = vshrl.u32 %v4522_v37, 16  ;;  %v13580_v15 = vsel %vm3861_vm11, %v3829_v17, %v3893_v8  ;;  %v6132_v1 = vadd.f32 %v6102_v45, %v6071_v47 }
 0x518   :  { %v6163_v44 = vpack.c.bf16 %v6131_v43, %v6131_v43  ;;  %v6356_v39 = vsel %vm10827_vm3, %v13567_v7, 0  ;;  %v5412_v50 = vpack.c.bf16 %v5383_v22, %v5383_v22  ;;  %v13585_v28 = vunpack.c.l.bf16 %v5691_v27 }
 0x519   :  { %v6261_v14 = vunpack.c.l.bf16 %v6200_v4  ;;  %v6357_v52 = vsel %vm10827_vm3, %v13576_v12, 0  ;;  %v5478_v61 = vunpack.c.l.bf16 %v5411_v35  ;;  %v6164_v5 = vpack.c.bf16 %v6132_v1, %v6132_v1 }
 0x51a   :  { %v6230_v20 = vunpack.c.l.bf16 %v6163_v44  ;;  %v6262_v32 = vunpack.c.l.bf16 %v6201_v53  ;;  %v6510_v17 = vunpack.c.l.b16 %v6356_v39  ;;  %v6511_v8 = vunpack.c.l.b16 %v6357_v52 }
 0x51b   :  { %v4823_v45 = vrot.slane %v4821_v63, 4  ;;  %v4824_v51 = vshll.u32 %v4522_v37, 16  ;;  %v6231_v46 = vunpack.c.l.bf16 %v6164_v5  ;;  %v4830_v11 = vshll.u32 %v4523_v57, 16 }
 0x51c   :  { %v6291_v59 = vadd.f32 %v6261_v14, %v6230_v20  ;;  %v4835_v62 = vshrl.u32 %v4524_v33, 16  ;;  %v5479_v22 = vunpack.c.l.bf16 %v5412_v50  ;;  %v6530_v27 = vpack.c.b16 %v6511_v8, %v6510_v17 }
 0x51d   :  { %v4826_v47 = vrot.slane %v4824_v51, 5  ;;  %v4838_v4 = vshll.u32 %v4524_v33, 16  ;;  %v6292_v43 = vadd.f32 %v6262_v32, %v6231_v46  ;;  %v4386_v35 = vsel %vm10827_vm3, %v13130_v6, 0 }
 0x51e   :  { %v6323_v21 = vpack.c.bf16 %v6291_v59, %v6291_v59  ;;  %v4837_v1 = vrot.slane %v4835_v62, 4  ;;  %6831 = vmatmul.bf16.gmra.mxu2 %v6530_v27  ;;  %v4387_v37 = vsel %vm10827_vm3, %v13136_v18, 0  ;;  %v4844_v57 = vshll.u32 %v13556_v24, 16  ;;  %v13616_v27 = vpop.f32.mrf.mxu1 }
 0x51f   :  { %v4827_v53 = vor.u32 %v4826_v47, %v4823_v45  ;;  %v4840_v63 = vrot.slane %v4838_v4, 5  ;;  %v6324_v44 = vpack.c.bf16 %v6292_v43, %v6292_v43  ;;  %v5297_v33 = vsel %vm15082_vm1, %v13567_v7, 0  ;;  %15225 = vst [vmem:[#allocation39_spill] sm:$0xff] %v13616_v27  ;;  %v6938_v47 = vld [vmem:[%s14425_s6 + $0x68] sm:$0xff] }
 0x520   :  { %v4832_v39 = vrot.slane %v4830_v11, 5  ;;  %v5448_v50 = vsel %vm10979_vm10, %v13123_v2, 0  ;;  %v5449_v5 = vsel %vm10979_vm10, %v13130_v6, 0  ;;  %v6416_v32 = vunpack.c.l.b16 %v6323_v21  ;;  %6958 = vmatpush.msra.mxu3 %v6938_v47 }
 0x521   :  { %v4828_v14 = vrot.slane %v4827_v53, 4  ;;  %v4841_v52 = vor.u32 %v4840_v63, %v4837_v1  ;;  %v5509_v20 = vunpack.c.l.bf16 %v5448_v50  ;;  %v6417_v17 = vunpack.c.l.b16 %v6324_v44  ;;  %v13628_v53 = vpop.f32.mrf.mxu2 }
 0x522   :  { %v5298_v24 = vsel %vm15082_vm1, %v13576_v12, 0  ;;  %v5510_v8 = vunpack.c.l.bf16 %v5449_v5  ;;  %v4846_v2 = vrot.slane %v4844_v57, 5  ;;  %v5030_v62 = vunpack.c.l.bf16 %v4386_v35  ;;  %15226 = vst [vmem:[#allocation37_spill] sm:$0xff] %v13628_v53 }
 0x523   :  { %v13611_v45 = vsel %vm9101_vm2, %v4828_v14, %v4832_v39  ;;  %v4842_v51 = vrot.slane %v4841_v52, 4  ;;  %v5541_v46 = vadd.f32 %v5509_v20, %v5478_v61  ;;  %v6439_v59 = vpack.c.b16 %v6417_v17, %v6416_v32 }
 0x524   :  { %v5001_v11 = vsel %vm15060_vm4, %v13611_v45, 0  ;;  %v5542_v21 = vadd.f32 %v5510_v8, %v5479_v22  ;;  %v5692_v61 = vsel %vm11131_vm9, %v13611_v45, 0  ;;  %v5878_v22 = vsel %vm11145_vm6, %v13567_v7, 0 }
 0x525   :  { %v13623_v4 = vsel %vm9101_vm2, %v4842_v51, %v4846_v2  ;;  %v5059_v43 = vunpack.c.l.bf16 %v5001_v11  ;;  %v5573_v1 = vpack.c.bf16 %v5541_v46, %v5541_v46  ;;  %6737 = vmatmul.bf16.gmra.mxu1 %v6439_v59  ;;  %v5031_v63 = vunpack.c.l.bf16 %v4387_v37 }
 0x526   :  { %v5002_v35 = vsel %vm15060_vm4, %v13623_v4, 0  ;;  %v5574_v57 = vpack.c.bf16 %v5542_v21, %v5542_v21  ;;  %v6042_v14 = vsel %vm15174_vm15, %v13130_v6, 0  ;;  %v5355_v52 = vunpack.c.l.bf16 %v5297_v33 }
 0x527   :  { %v5060_v44 = vunpack.c.l.bf16 %v5002_v35  ;;  %v5088_v39 = vadd.f32 %v5059_v43, %v5030_v62  ;;  %v5723_v50 = vunpack.c.l.bf16 %v5573_v1  ;;  %v5356_v5 = vunpack.c.l.bf16 %v5298_v24  ;;  %v6708_v43 = vpop.f32.mrf.mxu1 }
 0x528   :  { %v5724_v20 = vunpack.c.l.bf16 %v5574_v57  ;;  %v5756_v32 = vunpack.c.l.bf16 %v5692_v61  ;;  %v6043_v37 = vsel %vm15174_vm15, %v13136_v18, 0  ;;  %v5942_v51 = vunpack.c.l.bf16 %v5878_v22 }
 0x529   :  { %v5089_v17 = vadd.f32 %v5060_v44, %v5031_v63  ;;  %v5117_v8 = vpack.c.bf16 %v5088_v39, %v5088_v39  ;;  %v5787_v7 = vadd.f32 %v13585_v28, %v5723_v50  ;;  %v6103_v46 = vunpack.c.l.bf16 %v6042_v14 }
 0x52a   :  { %v5788_v2 = vadd.f32 %v5756_v32, %v5724_v20  ;;  %v5593_v59 = vunpack.c.l.b16 %v13170_v55  ;;  %v5594_v33 = vunpack.c.h.b16 %v13170_v55  ;;  %v5693_v24 = vsel %vm11131_vm9, %v13623_v4, 0 }
 0x52b   :  { %v5118_v11 = vpack.c.bf16 %v5089_v17, %v5089_v17  ;;  %v5326_v62 = vunpack.c.l.bf16 %v5117_v8  ;;  %v5819_v6 = vpack.c.bf16 %v5787_v7, %v5787_v7  ;;  %v6104_v28 = vunpack.c.l.bf16 %v6043_v37  ;;  %v6797_v17 = vpop.f32.mrf.mxu2 }
 0x52c   :  { %v5820_v21 = vpack.c.bf16 %v5788_v2, %v5788_v2  ;;  %v5601_v47 = vpack.c.b16 %v5593_v59, %v5593_v59  ;;  %v5602_v35 = vpack.c.b16 %v5594_v33, %v5594_v33  ;;  %v6709_v44 = vadd.f32 %v13411_v34, %v6708_v43 }
 0x52d   :  { %v5327_v1 = vunpack.c.l.bf16 %v5118_v11  ;;  %v5384_v61 = vadd.f32 %v5355_v52, %v5326_v62  ;;  %v5909_v22 = vunpack.c.l.bf16 %v5819_v6  ;;  %v5450_v39 = vsel %vm10979_vm10, %v13136_v18, 0 }
 0x52e   :  { %v5910_v63 = vunpack.c.l.bf16 %v5820_v21  ;;  %v8057_v57 = vrot.slane %v5601_v47, 9  ;;  %v5841_v32 = vrot.slane %v5602_v35, 5  ;;  %v6202_v52 = vsel %vm15210_vm0, %v13611_v45, 0 }
 0x52f   :  { %v5385_v50 = vadd.f32 %v5356_v5, %v5327_v1  ;;  %v5413_v14 = vpack.c.bf16 %v5384_v61, %v5384_v61  ;;  %v5973_v20 = vadd.f32 %v13569_v42, %v5909_v22  ;;  %v13656_v7 = vadd.f32 %v6797_v17, %v6709_v44 }
 0x530   :  { %v5974_v8 = vadd.f32 %v5942_v51, %v5910_v63  ;;  %v5451_v37 = vsel %vm10979_vm10, %v13170_v55, 0  ;;  %v13663_v18 = vsel %vm9138_vm5, %v8057_v57, %v5841_v32  ;;  %v6203_v51 = vsel %vm15210_vm0, %v13623_v4, 0 }
 0x531   :  { %15227 = vst [vmem:[#allocation16_spill] sm:$0xff] %v13656_v7  ;;  %v5480_v2 = vunpack.c.l.bf16 %v5413_v14  ;;  %v6005_v59 = vpack.c.bf16 %v5973_v20, %v5973_v20  ;;  %v5414_v42 = vpack.c.bf16 %v5385_v50, %v5385_v50  ;;  %v6358_v45 = vsel %vm10827_vm3, %v13663_v18, 0 }
 0x532   :  { %v6006_v5 = vpack.c.bf16 %v5974_v8, %v5974_v8  ;;  %v5511_v11 = vunpack.c.l.bf16 %v5450_v39  ;;  %v6512_v6 = vunpack.c.l.b16 %v6358_v45  ;;  %v5512_v21 = vunpack.c.l.bf16 %v5451_v37 }
 0x533   :  { %v6072_v62 = vunpack.c.l.bf16 %v6005_v59  ;;  %v5481_v33 = vunpack.c.l.bf16 %v5414_v42  ;;  %v5634_v61 = vshrl.u32 %v5601_v47, 16  ;;  %v5637_v22 = vshll.u32 %v5601_v47, 16 }
 0x534   :  { %v6073_v43 = vunpack.c.l.bf16 %v6006_v5  ;;  %v5543_v1 = vadd.f32 %v5511_v11, %v5480_v2  ;;  %v6531_v57 = vpack.c.b16 %v15195_v29, %v6512_v6  ;;  %v5643_v50 = vshll.u32 %v5602_v35, 16 }
 0x535   :  { %v6133_v63 = vadd.f32 %v6103_v46, %v6072_v62  ;;  %v5544_v44 = vadd.f32 %v5512_v21, %v5481_v33  ;;  %v5636_v20 = vrot.slane %v5634_v61, 4  ;;  %v5639_v32 = vrot.slane %v5637_v22, 5 }
 0x536   :  { %v6134_v14 = vadd.f32 %v6104_v28, %v6073_v43  ;;  %v5575_v4 = vpack.c.bf16 %v5543_v1, %v5543_v1  ;;  %v4240_v17 = vshrl.u32 %v13533_v48, 16  ;;  %v3957_v39 = vadd.f32 1.0, %v13580_v15  ;;  %6836 = vmatmul.bf16.gmra.mxu2 %v6531_v57  ;;  %v6937_v15 = vld [vmem:[%s14425_s6 + $0x60] sm:$0xff] }
 0x537   :  { %v6165_v8 = vpack.c.bf16 %v6133_v63, %v6133_v63  ;;  %v5576_v37 = vpack.c.bf16 %v5544_v44, %v5544_v44  ;;  %v5757_v59 = vunpack.c.l.bf16 %v5693_v24  ;;  %v5640_v42 = vor.u32 %v5639_v32, %v5636_v20  ;;  %6959 = vmatpush.msra.mxu3 %v6937_v15  ;;  %v13689_v32 = vpop.f32.mrf.mxu1  ;;  %v13710_v15 = vpop.f32.mrf.mxu2 }
 0x538   :  { %v6166_v2 = vpack.c.bf16 %v6134_v14, %v6134_v14  ;;  %v5725_v47 = vunpack.c.l.bf16 %v5575_v4  ;;  %v5879_v46 = vsel %vm11145_vm6, %v13576_v12, 0  ;;  %v6263_v28 = vunpack.c.l.bf16 %v6202_v52  ;;  %15229 = vst [vmem:[#allocation71_spill] sm:$0xff] %v13689_v32 }
 0x539   :  { %v6232_v35 = vunpack.c.l.bf16 %v6165_v8  ;;  %v6264_v5 = vunpack.c.l.bf16 %v6203_v51  ;;  %v5641_v11 = vrot.slane %v5640_v42, 4  ;;  %v5645_v62 = vrot.slane %v5643_v50, 5  ;;  %v15228_v51 = vld [vmem:[#allocation33_spill] sm:$0xff]  ;;  %15231 = vst [vmem:[#allocation79_spill] sm:$0xff] %v13710_v15 }
 0x53a   :  { %v6233_v45 = vunpack.c.l.bf16 %v6166_v2  ;;  %v5789_v6 = vadd.f32 %v5757_v59, %v5725_v47  ;;  %v5726_v24 = vunpack.c.l.bf16 %v5576_v37  ;;  %v4470_v21 = vunpack.c.l.b16 %v13190_v0 }
 0x53b   :  { %v6293_v33 = vadd.f32 %v6263_v28, %v6232_v35  ;;  %v4471_v43 = vunpack.c.h.b16 %v13190_v0  ;;  %v5646_v12 = vsel %vm9101_vm2, %v5641_v11, %v5645_v62  ;;  %v4472_v61 = vunpack.c.l.b16 %v15228_v51 }
 0x53c   :  { %v6294_v1 = vadd.f32 %v6264_v5, %v6233_v45  ;;  %v5821_v52 = vpack.c.bf16 %v5789_v6, %v5789_v6  ;;  %v3989_v22 = vmul.f32 %v3957_v39, %v13536_v26  ;;  %v5694_v57 = vsel %vm11131_vm9, %v5646_v12, 0 }
 0x53d   :  { %v6325_v63 = vpack.c.bf16 %v6293_v33, %v6293_v33  ;;  %v4473_v44 = vunpack.c.h.b16 %v15228_v51  ;;  %v5943_v50 = vunpack.c.l.bf16 %v5879_v46  ;;  %v5758_v4 = vunpack.c.l.bf16 %v5694_v57 }
 0x53e   :  { %v6326_v14 = vpack.c.bf16 %v6294_v1, %v6294_v1  ;;  %v5911_v20 = vunpack.c.l.bf16 %v5821_v52  ;;  %v5880_v37 = vsel %vm11145_vm6, %v13663_v18, 0  ;;  %v13694_v59 = vpack.c.b16 %v4470_v21, %v4470_v21 }
 0x53f   :  { %v6418_v8 = vunpack.c.l.b16 %v6325_v63  ;;  %v13696_v26 = vpack.c.b16 %v4471_v43, %v4471_v43  ;;  %v5790_v2 = vadd.f32 %v5758_v4, %v5726_v24  ;;  %v13698_v47 = vpack.c.b16 %v4472_v61, %v4472_v61  ;;  %v15232_v63 = vld [vmem:[#allocation63_spill] sm:$0xff] }
 0x540   :  { %v6419_v39 = vunpack.c.l.b16 %v6326_v14  ;;  %v5975_v42 = vadd.f32 %v5943_v50, %v5911_v20  ;;  %v6044_v46 = vsel %vm15174_vm15, %v13170_v55, 0  ;;  %v13703_v35 = vpack.c.b16 %v4473_v44, %v4473_v44 }
 0x541   :  { %v8049_v28 = vrot.slane %v13694_v59, 9  ;;  %v5220_v5 = vrot.slane %v13696_v26, 5  ;;  %v15230_v18 = vshll.u32 %v13352_v3, 16  ;;  %v5822_v62 = vpack.c.bf16 %v5790_v2, %v5790_v2 }
 0x542   :  { %v6440_v11 = vpack.c.b16 %v6419_v39, %v6418_v8  ;;  %v6007_v6 = vpack.c.bf16 %v5975_v42, %v5975_v42  ;;  %v4242_v33 = vrot.slane %v4240_v17, 7  ;;  %v4021_v24 = vpack.c.bf16 %v3989_v22, %v3989_v22 }
 0x543   :  { %v4238_v45 = vor.u32 %v15230_v18, %v13455_v9  ;;  %v5944_v21 = vunpack.c.l.bf16 %v5880_v37  ;;  %v8050_v55 = vrot.slane %v13698_v47, 9  ;;  %v5912_v43 = vunpack.c.l.bf16 %v5822_v62  ;;  %v15238_v62 = vld [vmem:[#allocation59_spill] sm:$0xff] }
 0x544   :  { %6742 = vmatmul.bf16.gmra.mxu1 %v6440_v11  ;;  %v6074_v1 = vunpack.c.l.bf16 %v6007_v6  ;;  %v6105_v52 = vunpack.c.l.bf16 %v6044_v46  ;;  %v5224_v61 = vrot.slane %v13703_v35, 5  ;;  %v15233_v57 = vshrl.u32 %v15232_v63, 16 }
 0x545   :  { %v4317_v44 = vsel %vm10750_vm8, 0, %v13333_v19  ;;  %v4243_v50 = vshll.u32 %v13533_v48, 16  ;;  %v13722_v17 = vsel %vm9138_vm5, %v8049_v28, %v5220_v5  ;;  %v4318_v22 = vsel %vm10750_vm8, 0, %v13336_v16  ;;  %v6713_v28 = vpop.f32.mrf.mxu1  ;;  %v15236_v5 = vld [vmem:[#allocation54_spill] sm:$0xff] }
 0x546   :  { %v4851_v3 = vrot.slane %v15233_v57, 4  ;;  %v5976_v14 = vadd.f32 %v5944_v21, %v5912_v43  ;;  %v6135_v4 = vadd.f32 %v6105_v52, %v6074_v1  ;;  %v13729_v20 = vsel %vm9138_vm5, %v8050_v55, %v5224_v61 }
 0x547   :  { %v15235_v8 = vshll.u32 %v15232_v63, 16  ;;  %v4319_v19 = vsel %vm10750_vm8, 0, %v4238_v45  ;;  %v13735_v48 = vor.u32 %v4243_v50, %v4242_v33  ;;  %v6204_v39 = vsel %vm15210_vm0, %v5646_v12, 0 }
 0x548   :  { %v4247_v2 = vshrl.u32 %v4021_v24, 16  ;;  %v6008_v42 = vpack.c.bf16 %v5976_v14, %v5976_v14  ;;  %v6167_v16 = vpack.c.bf16 %v6135_v4, %v6135_v4  ;;  %v6359_v46 = vsel %vm10827_vm3, %v13722_v17, 0  ;;  %v6802_v14 = vpop.f32.mrf.mxu2 }
 0x549   :  { %v4854_v37 = vrot.slane %v15235_v8, 5  ;;  %v15237_v18 = vshll.u32 %v15236_v5, 16  ;;  %vm15239_vm14 = vnez %v15238_v62  ;;  %v6360_v12 = vsel %vm10827_vm3, %v13729_v20, 0 }
 0x54a   :  { %v13746_v6 = vsel %vm15239_vm14, %v4317_v44, 0  ;;  %v13750_v45 = vsel %vm15239_vm14, %v4318_v22, 0  ;;  %v13757_v33 = vsel %vm15239_vm14, %v4319_v19, 0  ;;  %v6075_v21 = vunpack.c.l.bf16 %v6008_v42 }
 0x54b   :  { %v4860_v11 = vrot.slane %v15237_v18, 5  ;;  %v6234_v55 = vunpack.c.l.bf16 %v6167_v16  ;;  %v6265_v43 = vunpack.c.l.bf16 %v6204_v39  ;;  %v4320_v1 = vsel %vm10750_vm8, 0, %v13735_v48 }
 0x54c   :  { %v6513_v52 = vunpack.c.l.b16 %v6359_v46  ;;  %v6514_v61 = vunpack.c.l.b16 %v6360_v12  ;;  %v6714_v57 = vadd.f32 %v13411_v34, %v6713_v28  ;;  %v4249_v44 = vrot.slane %v4247_v2, 7 }
 0x54d   :  { %v6136_v50 = vadd.f32 %v15214_v58, %v6075_v21  ;;  %v6295_v22 = vadd.f32 %v6265_v43, %v6234_v55  ;;  %v4855_v4 = vor.u32 %v4854_v37, %v4851_v3  ;;  %v4250_v8 = vshll.u32 %v4021_v24, 16 }
 0x54e   :  { %v6532_v19 = vpack.c.b16 %v6514_v61, %v6513_v52  ;;  %v13764_v18 = vadd.f32 %v6802_v14, %v6714_v57  ;;  %v4863_v39 = vshrl.u32 %v13694_v59, 16  ;;  %v4866_v46 = vshll.u32 %v13694_v59, 16 }
 0x54f   :  { %v6168_v42 = vpack.c.bf16 %v6136_v50, %v6136_v50  ;;  %v6327_v16 = vpack.c.bf16 %v6295_v22, %v6295_v22  ;;  %v4856_v7 = vrot.slane %v4855_v4, 4  ;;  %v4872_v34 = vshll.u32 %v13696_v26, 16 }
 0x550   :  { %6841 = vmatmul.bf16.gmra.mxu2 %v6532_v19  ;;  %v4865_v12 = vrot.slane %v4863_v39, 4  ;;  %v4877_v2 = vshrl.u32 %v13698_v47, 16  ;;  %v4880_v28 = vshll.u32 %v13698_v47, 16  ;;  %v13771_v3 = vor.u32 %v4250_v8, %v4249_v44  ;;  %v15240_v39 = vld [vmem:[#allocation65_spill] sm:$0xff] }
 0x551   :  { %v6235_v24 = vunpack.c.l.bf16 %v6168_v42  ;;  %v4861_v37 = vsel %vm9101_vm2, %v4856_v7, %v4860_v11  ;;  %v4868_v21 = vrot.slane %v4866_v46, 5  ;;  %v4389_v55 = vsel %vm10827_vm3, %v13190_v0, 0  ;;  %v15241_v46 = vld [vmem:[#allocation34_spill] sm:$0xff] }
 0x552   :  { %v4879_v59 = vrot.slane %v4877_v2, 4  ;;  %v4882_v43 = vrot.slane %v4880_v28, 5  ;;  %v4886_v52 = vshll.u32 %v13703_v35, 16  ;;  %v4390_v47 = vsel %vm10827_vm3, %v15228_v51, 0 }
 0x553   :  { %v6296_v26 = vadd.f32 %v15218_v25, %v6235_v24  ;;  %v4869_v61 = vor.u32 %v4868_v21, %v4865_v12  ;;  %v5003_v57 = vsel %vm15060_vm4, %v4861_v37, 0  ;;  %v6420_v7 = vunpack.c.l.b16 %v6327_v16 }
 0x554   :  { %v4874_v11 = vrot.slane %v4872_v34, 5  ;;  %v4883_v44 = vor.u32 %v4882_v43, %v4879_v59  ;;  %v5061_v50 = vunpack.c.l.bf16 %v5003_v57  ;;  %v8048_v4 = vrot.slane %v15232_v63, 9 }
 0x555   :  { %v6328_v22 = vpack.c.bf16 %v6296_v26, %v6296_v26  ;;  %v4870_v14 = vrot.slane %v4869_v61, 4  ;;  %v5216_v35 = vrot.slane %v15236_v5, 5  ;;  %v4888_v19 = vrot.slane %v4886_v52, 5 }
 0x556   :  { %v4884_v8 = vrot.slane %v4883_v44, 4  ;;  %v5090_v42 = vadd.f32 %v5061_v50, %v15240_v39  ;;  %v5545_v12 = vadd.f32 %v15241_v46, %v15216_v49  ;;  %v5033_v34 = vunpack.c.l.bf16 %v4389_v55 }
 0x557   :  { %v6421_v2 = vunpack.c.l.b16 %v6328_v22  ;;  %v13792_v16 = vsel %vm9101_vm2, %v4870_v14, %v4874_v11  ;;  %v5217_v28 = vsel %vm9138_vm5, %v8048_v4, %v5216_v35  ;;  %v5695_v57 = vsel %vm11131_vm9, %v4861_v37, 0 }
 0x558   :  { %v13798_v63 = vsel %vm9101_vm2, %v4884_v8, %v4888_v19  ;;  %v5004_v5 = vsel %vm15060_vm4, %v13792_v16, 0  ;;  %v5119_v24 = vpack.c.bf16 %v5090_v42, %v5090_v42  ;;  %v5299_v49 = vsel %vm15082_vm1, %v5217_v28, 0 }
 0x559   :  { %v6441_v21 = vpack.c.b16 %v6421_v2, %v6420_v7  ;;  %v5005_v55 = vsel %vm15060_vm4, %v13798_v63, 0  ;;  %v5062_v59 = vunpack.c.l.bf16 %v5004_v5  ;;  %v5357_v43 = vunpack.c.l.bf16 %v5299_v49 }
 0x55a   :  { %v5063_v52 = vunpack.c.l.bf16 %v5005_v55  ;;  %v5328_v26 = vunpack.c.l.bf16 %v5119_v24  ;;  %v5577_v61 = vpack.c.bf16 %v5545_v12, %v5545_v12  ;;  %v5300_v11 = vsel %vm15082_vm1, %v13722_v17, 0 }
 0x55b   :  { %6747 = vmatmul.bf16.gmra.mxu1 %v6441_v21  ;;  %v5034_v44 = vunpack.c.l.bf16 %v4390_v47  ;;  %v5091_v50 = vadd.f32 %v5062_v59, %v5033_v34  ;;  %v5759_v7 = vunpack.c.l.bf16 %v5695_v57  ;;  %v13819_v22 = vsel %vm15239_vm14, %v4320_v1, 0  ;;  %v6936_v57 = vld [vmem:[%s14425_s6 + $0x58] sm:$0xff] }
 0x55c   :  { %v5301_v37 = vsel %vm15082_vm1, %v13729_v20, 0  ;;  %v5386_v14 = vadd.f32 %v5357_v43, %v5328_v26  ;;  %v5727_v4 = vunpack.c.l.bf16 %v5577_v61  ;;  %v5882_v35 = vsel %vm11145_vm6, %v13722_v17, 0  ;;  %6960 = vmatpush.msra.mxu3 %v6936_v57 }
 0x55d   :  { %v5092_v8 = vadd.f32 %v5063_v52, %v5034_v44  ;;  %v5453_v48 = vsel %vm10979_vm10, %v13190_v0, 0  ;;  %v5358_v1 = vunpack.c.l.bf16 %v5300_v11  ;;  %v5696_v39 = vsel %vm11131_vm9, %v13792_v16, 0  ;;  %v13854_v44 = vld [vmem:[%s14424_s5] ss:$0 sm:$0xff] }
 0x55e   :  { %v5415_v19 = vpack.c.bf16 %v5386_v14, %v5386_v14  ;;  %v5791_v42 = vadd.f32 %v5759_v7, %v5727_v4  ;;  %v5359_v46 = vunpack.c.l.bf16 %v5301_v37  ;;  %v5883_v12 = vsel %vm11145_vm6, %v13729_v20, 0 }
 0x55f   :  { %v5120_v2 = vpack.c.bf16 %v5091_v50, %v5091_v50  ;;  %v5881_v17 = vsel %vm11145_vm6, %v5217_v28, 0  ;;  %v5946_v34 = vunpack.c.l.bf16 %v5882_v35  ;;  %v5514_v24 = vunpack.c.l.bf16 %v5453_v48  ;;  %v6715_v28 = vpop.f32.mrf.mxu1  ;;  %v6804_v35 = vpop.f32.mrf.mxu2 }
 0x560   :  { %v5482_v5 = vunpack.c.l.bf16 %v5415_v19  ;;  %v5823_v49 = vpack.c.bf16 %v5791_v42, %v5791_v42  ;;  %v5121_v21 = vpack.c.bf16 %v5092_v8, %v5092_v8  ;;  %v5697_v55 = vsel %vm11131_vm9, %v13798_v63, 0 }
 0x561   :  { %v5760_v59 = vunpack.c.l.bf16 %v5696_v39  ;;  %v4474_v43 = vunpack.c.l.b16 %v13746_v6  ;;  %v5945_v61 = vunpack.c.l.bf16 %v5881_v17  ;;  %v6045_v20 = vsel %vm15174_vm15, %v13190_v0, 0 }
 0x562   :  { %v5546_v52 = vadd.f32 %v5514_v24, %v5482_v5  ;;  %v5913_v26 = vunpack.c.l.bf16 %v5823_v49  ;;  %v5329_v11 = vunpack.c.l.bf16 %v5120_v2  ;;  %v6716_v50 = vadd.f32 %v13854_v44, %v6715_v28 }
 0x563   :  { %v4475_v7 = vunpack.c.h.b16 %v13746_v6  ;;  %v4476_v37 = vunpack.c.l.b16 %v13750_v45  ;;  %v6046_v4 = vsel %vm15174_vm15, %v15228_v51, 0  ;;  %v4477_v8 = vunpack.c.h.b16 %v13750_v45 }
 0x564   :  { %v5578_v14 = vpack.c.bf16 %v5546_v52, %v5546_v52  ;;  %v5977_v0 = vadd.f32 %v5945_v61, %v5913_v26  ;;  %v5330_v48 = vunpack.c.l.bf16 %v5121_v21  ;;  %v13863_v19 = vadd.f32 %v6804_v35, %v6716_v50 }
 0x565   :  { %v4532_v39 = vpack.c.b16 %v4474_v43, %v4474_v43  ;;  %v4533_v42 = vpack.c.b16 %v4475_v7, %v4475_v7  ;;  %v6106_v5 = vunpack.c.l.bf16 %v6045_v20  ;;  %v4534_v24 = vpack.c.b16 %v4476_v37, %v4476_v37 }
 0x566   :  { %v5728_v2 = vunpack.c.l.bf16 %v5578_v14  ;;  %v6009_v17 = vpack.c.bf16 %v5977_v0, %v5977_v0  ;;  %v6205_v49 = vsel %vm15210_vm0, %v13792_v16, 0  ;;  %v13868_v52 = vpack.c.b16 %v4477_v8, %v4477_v8 }
 0x567   :  { %v8051_v26 = vrot.slane %v4532_v39, 9  ;;  %v5228_v61 = vrot.slane %v4533_v42, 5  ;;  %v5387_v28 = vadd.f32 %v5358_v1, %v5329_v11  ;;  %v8052_v21 = vrot.slane %v4534_v24, 9 }
 0x568   :  { %v5792_v57 = vadd.f32 %v5760_v59, %v5728_v2  ;;  %v6076_v47 = vunpack.c.l.bf16 %v6009_v17  ;;  %v5388_v50 = vadd.f32 %v5359_v46, %v5330_v48  ;;  %v6206_v43 = vsel %vm15210_vm0, %v13798_v63, 0  ;;  %v6718_v63 = vpop.f32.mrf.mxu1 }
 0x569   :  { %v5229_v20 = vsel %vm9138_vm5, %v8051_v26, %v5228_v61  ;;  %v5232_v7 = vrot.slane %v13868_v52, 5  ;;  %v13876_v37 = vunpack.c.l.bf16 %v5883_v12  ;;  %v13878_v16 = vunpack.c.l.bf16 %v5697_v55 }
 0x56a   :  { %v5824_v14 = vpack.c.bf16 %v5792_v57, %v5792_v57  ;;  %v6137_v0 = vadd.f32 %v6106_v5, %v6076_v47  ;;  %v6107_v1 = vunpack.c.l.bf16 %v6046_v4  ;;  %v6361_v46 = vsel %vm10827_vm3, %v5229_v20, 0  ;;  %v6807_v57 = vpop.f32.mrf.mxu2 }
 0x56b   :  { %v13882_v59 = vsel %vm9138_vm5, %v8052_v21, %v5232_v7  ;;  %v4891_v11 = vshrl.u32 %v4532_v39, 16  ;;  %v6266_v48 = vunpack.c.l.bf16 %v6205_v49  ;;  %v6267_v2 = vunpack.c.l.bf16 %v6206_v43 }
 0x56c   :  { %v5914_v35 = vunpack.c.l.bf16 %v5824_v14  ;;  %v6169_v8 = vpack.c.bf16 %v6137_v0, %v6137_v0  ;;  %v5416_v12 = vpack.c.bf16 %v5387_v28, %v5387_v28  ;;  %v5417_v17 = vpack.c.bf16 %v5388_v50, %v5388_v50 }
 0x56d   :  { %v6362_v47 = vsel %vm10827_vm3, %v13882_v59, 0  ;;  %v6515_v55 = vunpack.c.l.b16 %v6361_v46  ;;  %v6719_v61 = vadd.f32 %v13854_v44, %v6718_v63  ;;  %v4893_v21 = vrot.slane %v4891_v11, 4 }
 0x56e   :  { %v5978_v4 = vadd.f32 %v5946_v34, %v5914_v35  ;;  %v6236_v5 = vunpack.c.l.bf16 %v6169_v8  ;;  %v6516_v26 = vunpack.c.l.b16 %v6362_v47  ;;  %v4894_v7 = vshll.u32 %v4532_v39, 16 }
 0x56f   :  { %v4900_v15 = vshll.u32 %v4533_v42, 16  ;;  %v4905_v14 = vshrl.u32 %v4534_v24, 16  ;;  %v13890_v28 = vadd.f32 %v6807_v57, %v6719_v61  ;;  %v5483_v50 = vunpack.c.l.bf16 %v5416_v12 }
 0x570   :  { %v6010_v0 = vpack.c.bf16 %v5978_v4, %v5978_v4  ;;  %v6297_v49 = vadd.f32 %v6266_v48, %v6236_v5  ;;  %v6533_v43 = vpack.c.b16 %v6516_v26, %v6515_v55  ;;  %v4896_v32 = vrot.slane %v4894_v7, 5  ;;  %v6935_v7 = vld [vmem:[%s14425_s6 + $0x50] sm:$0xff] }
 0x571   :  { %v4907_v53 = vrot.slane %v4905_v14, 4  ;;  %v4908_v27 = vshll.u32 %v4534_v24, 16  ;;  %v5484_v46 = vunpack.c.l.bf16 %v5417_v17  ;;  %v5302_v35 = vsel %vm15082_vm1, %v5229_v20, 0  ;;  %6961 = vmatpush.msra.mxu3 %v6935_v7 }
 0x572   :  { %v6077_v34 = vunpack.c.l.bf16 %v6010_v0  ;;  %6846 = vmatmul.bf16.gmra.mxu2 %v6533_v43  ;;  %v4391_v39 = vsel %vm10827_vm3, %v13746_v6, 0  ;;  %v5884_v42 = vsel %vm11145_vm6, %v5229_v20, 0  ;;  %v4897_v63 = vor.u32 %v4896_v32, %v4893_v21  ;;  %v6809_v7 = vpop.f32.mrf.mxu2 }
 0x573   :  { %v4910_v11 = vrot.slane %v4908_v27, 5  ;;  %v4914_v8 = vshll.u32 %v13868_v52, 16  ;;  %v4392_v24 = vsel %vm10827_vm3, %v13750_v45, 0  ;;  %v4902_v12 = vrot.slane %v4900_v15, 5 }
 0x574   :  { %v6138_v48 = vadd.f32 %v6107_v1, %v6077_v34  ;;  %v5454_v17 = vsel %vm10979_vm10, %v15228_v51, 0  ;;  %v4898_v47 = vrot.slane %v4897_v63, 4  ;;  %v5455_v20 = vsel %vm10979_vm10, %v13746_v6, 0 }
 0x575   :  { %v4911_v55 = vor.u32 %v4910_v11, %v4907_v53  ;;  %v5515_v32 = vunpack.c.l.bf16 %v5454_v17  ;;  %v5360_v4 = vunpack.c.l.bf16 %v5302_v35  ;;  %v5948_v52 = vunpack.c.l.bf16 %v5884_v42 }
 0x576   :  { %v6170_v27 = vpack.c.bf16 %v6138_v48, %v6138_v48  ;;  %v5516_v1 = vunpack.c.l.bf16 %v5455_v20  ;;  %v13911_v5 = vsel %vm9101_vm2, %v4898_v47, %v4902_v12  ;;  %v4916_v26 = vrot.slane %v4914_v8, 5  ;;  %v6720_v48 = vpop.f32.mrf.mxu1 }
 0x577   :  { %v4912_v15 = vrot.slane %v4911_v55, 4  ;;  %v5547_v61 = vadd.f32 %v5515_v32, %v5483_v50  ;;  %v5006_v53 = vsel %vm15060_vm4, %v13911_v5, 0  ;;  %v5035_v51 = vunpack.c.l.bf16 %v4391_v39 }
 0x578   :  { %v6237_v57 = vunpack.c.l.bf16 %v6170_v27  ;;  %v5548_v21 = vadd.f32 %v5516_v1, %v5484_v46  ;;  %v5064_v0 = vunpack.c.l.bf16 %v5006_v53  ;;  %v5698_v50 = vsel %vm11131_vm9, %v13911_v5, 0 }
 0x579   :  { %v13921_v14 = vsel %vm9101_vm2, %v4912_v15, %v4916_v26  ;;  %v5579_v43 = vpack.c.bf16 %v5547_v61, %v5547_v61  ;;  %v6329_v35 = vpack.c.bf16 %v6297_v49, %v6297_v49  ;;  %v5036_v42 = vunpack.c.l.bf16 %v4392_v24 }
 0x57a   :  { %v6298_v34 = vadd.f32 %v6267_v2, %v6237_v57  ;;  %v5007_v46 = vsel %vm15060_vm4, %v13921_v14, 0  ;;  %v5580_v39 = vpack.c.bf16 %v5548_v21, %v5548_v21  ;;  %v5093_v11 = vadd.f32 %v5064_v0, %v5035_v51 }
 0x57b   :  { %v5065_v63 = vunpack.c.l.bf16 %v5007_v46  ;;  %v5729_v8 = vunpack.c.l.bf16 %v5579_v43  ;;  %v5303_v17 = vsel %vm15082_vm1, %v13882_v59, 0  ;;  %v5762_v55 = vunpack.c.l.bf16 %v5698_v50 }
 0x57c   :  { %v6330_v12 = vpack.c.bf16 %v6298_v34, %v6298_v34  ;;  %v5730_v47 = vunpack.c.l.bf16 %v5580_v39  ;;  %v5885_v2 = vsel %vm11145_vm6, %v13882_v59, 0  ;;  %v5122_v20 = vpack.c.bf16 %v5093_v11, %v5093_v11 }
 0x57d   :  { %v5094_v49 = vadd.f32 %v5065_v63, %v5036_v42  ;;  %v5793_v32 = vadd.f32 %v13878_v16, %v5729_v8  ;;  %v6422_v24 = vunpack.c.l.b16 %v6329_v35  ;;  %v6047_v15 = vsel %vm15174_vm15, %v13746_v6, 0 }
 0x57e   :  { %v6423_v27 = vunpack.c.l.b16 %v6330_v12  ;;  %v5794_v1 = vadd.f32 %v5762_v55, %v5730_v47  ;;  %v5331_v61 = vunpack.c.l.bf16 %v5122_v20  ;;  %v6721_v53 = vadd.f32 %v13854_v44, %v6720_v48 }
 0x57f   :  { %v5123_v26 = vpack.c.bf16 %v5094_v49, %v5094_v49  ;;  %v5825_v57 = vpack.c.bf16 %v5793_v32, %v5793_v32  ;;  %v4478_v59 = vunpack.c.l.b16 %v13757_v33  ;;  %v4479_v0 = vunpack.c.h.b16 %v13757_v33  ;;  %v6723_v32 = vpop.f32.mrf.mxu1 }
 0x580   :  { %v6442_v51 = vpack.c.b16 %v6423_v27, %v6422_v24  ;;  %v5826_v21 = vpack.c.bf16 %v5794_v1, %v5794_v1  ;;  %v5361_v16 = vunpack.c.l.bf16 %v5303_v17  ;;  %v13942_v34 = vadd.f32 %v6809_v7, %v6721_v53 }
 0x581   :  { %v5332_v43 = vunpack.c.l.bf16 %v5123_v26  ;;  %v5915_v50 = vunpack.c.l.bf16 %v5825_v57  ;;  %v4480_v6 = vunpack.c.l.b16 %v13819_v22  ;;  %v4481_v46 = vunpack.c.h.b16 %v13819_v22 }
 0x582   :  { %6752 = vmatmul.bf16.gmra.mxu1 %v6442_v51  ;;  %v5916_v35 = vunpack.c.l.bf16 %v5826_v21  ;;  %v4536_v39 = vpack.c.b16 %v4478_v59, %v4478_v59  ;;  %v5389_v42 = vadd.f32 %v5360_v4, %v5331_v61  ;;  %v6048_v11 = vsel %vm15174_vm15, %v13750_v45, 0 }
 0x583   :  { %v5979_v63 = vadd.f32 %v13876_v37, %v5915_v50  ;;  %v6108_v8 = vunpack.c.l.bf16 %v6047_v15  ;;  %v13950_v12 = vpack.c.b16 %v4479_v0, %v4479_v0  ;;  %v4538_v17 = vpack.c.b16 %v4480_v6, %v4480_v6 }
 0x584   :  { %v5980_v48 = vadd.f32 %v5948_v52, %v5916_v35  ;;  %v13952_v47 = vpack.c.b16 %v4481_v46, %v4481_v46  ;;  %v5390_v55 = vadd.f32 %v5361_v16, %v5332_v43  ;;  %v5699_v49 = vsel %vm11131_vm9, %v13921_v14, 0 }
 0x585   :  { %v6011_v20 = vpack.c.bf16 %v5979_v63, %v5979_v63  ;;  %v8053_v4 = vrot.slane %v4536_v39, 9  ;;  %v5236_v24 = vrot.slane %v13950_v12, 5  ;;  %v8054_v27 = vrot.slane %v4538_v17, 9 }
 0x586   :  { %v6012_v37 = vpack.c.bf16 %v5980_v48, %v5980_v48  ;;  %v5240_v1 = vrot.slane %v13952_v47, 5  ;;  %v5418_v52 = vpack.c.bf16 %v5389_v42, %v5389_v42  ;;  %v6109_v26 = vunpack.c.l.bf16 %v6048_v11 }
 0x587   :  { %v6078_v15 = vunpack.c.l.bf16 %v6011_v20  ;;  %v6207_v61 = vsel %vm15210_vm0, %v13911_v5, 0  ;;  %v6208_v53 = vsel %vm15210_vm0, %v13921_v14, 0  ;;  %v13967_v51 = vsel %vm9138_vm5, %v8053_v4, %v5236_v24 }
 0x588   :  { %v6079_v57 = vunpack.c.l.bf16 %v6012_v37  ;;  %v6724_v21 = vadd.f32 %v13854_v44, %v6723_v32  ;;  %v15242_v7 = vsel %vm10750_vm8, 0, %v13771_v3  ;;  %v13978_v5 = vunpack.c.l.bf16 %v5885_v2  ;;  %v6812_v3 = vpop.f32.mrf.mxu2 }
 0x589   :  { %v13976_v59 = vsel %vm15239_vm14, %v15242_v7, 0  ;;  %v6139_v0 = vadd.f32 %v6108_v8, %v6078_v15  ;;  %v13982_v14 = vsel %vm9138_vm5, %v8054_v27, %v5240_v1  ;;  %v5419_v16 = vpack.c.bf16 %v5390_v55, %v5390_v55 }
 0x58a   :  { %v13984_v43 = vunpack.c.l.bf16 %v5699_v49  ;;  %v6140_v50 = vadd.f32 %v6109_v26, %v6079_v57  ;;  %v6268_v35 = vunpack.c.l.bf16 %v6207_v61  ;;  %v5485_v6 = vunpack.c.l.bf16 %v5418_v52 }
 0x58b   :  { %v6171_v9 = vpack.c.bf16 %v6139_v0, %v6139_v0  ;;  %v6269_v46 = vunpack.c.l.bf16 %v6208_v53  ;;  %v6363_v62 = vsel %vm10827_vm3, %v13967_v51, 0  ;;  %v6364_v42 = vsel %vm10827_vm3, %v13982_v14, 0 }
 0x58c   :  { %v6172_v2 = vpack.c.bf16 %v6140_v50, %v6140_v50  ;;  %v6517_v63 = vunpack.c.l.b16 %v6363_v62  ;;  %v13992_v11 = vadd.f32 %v6812_v3, %v6724_v21  ;;  %v6518_v48 = vunpack.c.l.b16 %v6364_v42 }
 0x58d   :  { %v6238_v8 = vunpack.c.l.bf16 %v6171_v9  ;;  %v4919_v55 = vshrl.u32 %v4536_v39, 16  ;;  %v4922_v49 = vshll.u32 %v4536_v39, 16  ;;  %v5486_v20 = vunpack.c.l.bf16 %v5419_v16 }
 0x58e   :  { %v6239_v4 = vunpack.c.l.bf16 %v6172_v2  ;;  %v4928_v32 = vshll.u32 %v13950_v12, 16  ;;  %v4933_v37 = vshrl.u32 %v4538_v17, 16  ;;  %v6534_v27 = vpack.c.b16 %v6518_v48, %v6517_v63 }
 0x58f   :  { %v6299_v24 = vadd.f32 %v6268_v35, %v6238_v8  ;;  %v4921_v1 = vrot.slane %v4919_v55, 4  ;;  %v4924_v52 = vrot.slane %v4922_v49, 5  ;;  %v4393_v26 = vsel %vm10827_vm3, %v13757_v33, 0 }
 0x590   :  { %v6300_v15 = vadd.f32 %v6269_v46, %v6239_v4  ;;  %v4935_v61 = vrot.slane %v4933_v37, 4  ;;  %v4936_v57 = vshll.u32 %v4538_v17, 16  ;;  %6851 = vmatmul.bf16.gmra.mxu2 %v6534_v27  ;;  %v4394_v39 = vsel %vm10827_vm3, %v13819_v22, 0  ;;  %v6725_v27 = vpop.f32.mrf.mxu1 }
 0x591   :  { %v6331_v53 = vpack.c.bf16 %v6299_v24, %v6299_v24  ;;  %v4925_v21 = vor.u32 %v4924_v52, %v4921_v1  ;;  %v4942_v12 = vshll.u32 %v13952_v47, 16  ;;  %v5304_v0 = vsel %vm15082_vm1, %v13967_v51, 0  ;;  %v6814_v1 = vpop.f32.mrf.mxu2 }
 0x592   :  { %v6332_v7 = vpack.c.bf16 %v6300_v15, %v6300_v15  ;;  %v4938_v16 = vrot.slane %v4936_v57, 5  ;;  %v5456_v50 = vsel %vm10979_vm10, %v13750_v45, 0  ;;  %v5305_v17 = vsel %vm15082_vm1, %v13982_v14, 0 }
 0x593   :  { %v4926_v35 = vrot.slane %v4925_v21, 4  ;;  %v4930_v9 = vrot.slane %v4928_v32, 5  ;;  %v5457_v47 = vsel %vm10979_vm10, %v13757_v33, 0  ;;  %v6424_v46 = vunpack.c.l.b16 %v6331_v53 }
 0x594   :  { %v6425_v62 = vunpack.c.l.b16 %v6332_v7  ;;  %v4939_v3 = vor.u32 %v4938_v16, %v4935_v61  ;;  %v5517_v2 = vunpack.c.l.bf16 %v5456_v50  ;;  %v5886_v42 = vsel %vm11145_vm6, %v13967_v51, 0  ;;  %v6934_v51 = vld [vmem:[%s14425_s6 + $0x48] sm:$0xff] }
 0x595   :  { %v14019_v45 = vsel %vm9101_vm2, %v4926_v35, %v4930_v9  ;;  %v4944_v38 = vrot.slane %v4942_v12, 5  ;;  %v5518_v63 = vunpack.c.l.bf16 %v5457_v47  ;;  %v5362_v4 = vunpack.c.l.bf16 %v5304_v0  ;;  %6962 = vmatpush.msra.mxu3 %v6934_v51 }
 0x596   :  { %v6443_v8 = vpack.c.b16 %v6425_v62, %v6424_v46  ;;  %v4940_v48 = vrot.slane %v4939_v3, 4  ;;  %v5008_v55 = vsel %vm15060_vm4, %v14019_v45, 0  ;;  %v5549_v49 = vadd.f32 %v5517_v2, %v5485_v6 }
 0x597   :  { %v5037_v32 = vunpack.c.l.bf16 %v4393_v26  ;;  %v5066_v37 = vunpack.c.l.bf16 %v5008_v55  ;;  %v5550_v24 = vadd.f32 %v5518_v63, %v5486_v20  ;;  %v5363_v52 = vunpack.c.l.bf16 %v5305_v17 }
 0x598   :  { %6757 = vmatmul.bf16.gmra.mxu1 %v6443_v8  ;;  %v14029_v15 = vsel %vm9101_vm2, %v4940_v48, %v4944_v38  ;;  %v5581_v61 = vpack.c.bf16 %v5549_v49, %v5549_v49  ;;  %v5700_v6 = vsel %vm11131_vm9, %v14019_v45, 0  ;;  %v5595_v53 = vunpack.c.l.b16 %v13976_v59  ;;  %v6728_v49 = vpop.f32.mrf.mxu1 }
 0x599   :  { %v5009_v20 = vsel %vm15060_vm4, %v14029_v15, 0  ;;  %v5095_v26 = vadd.f32 %v5066_v37, %v5037_v32  ;;  %v5582_v57 = vpack.c.bf16 %v5550_v24, %v5550_v24  ;;  %v5950_v21 = vunpack.c.l.bf16 %v5886_v42 }
 0x59a   :  { %v5038_v12 = vunpack.c.l.bf16 %v4394_v39  ;;  %v5067_v7 = vunpack.c.l.bf16 %v5009_v20  ;;  %v5731_v0 = vunpack.c.l.bf16 %v5581_v61  ;;  %v5764_v17 = vunpack.c.l.bf16 %v5700_v6  ;;  %v6817_v20 = vpop.f32.mrf.mxu2 }
 0x59b   :  { %v5124_v16 = vpack.c.bf16 %v5095_v26, %v5095_v26  ;;  %v5732_v50 = vunpack.c.l.bf16 %v5582_v57  ;;  %v6049_v35 = vsel %vm15174_vm15, %v13757_v33, 0  ;;  %v6050_v30 = vsel %vm15174_vm15, %v13819_v22, 0 }
 0x59c   :  { %v5096_v9 = vadd.f32 %v5067_v7, %v5038_v12  ;;  %v5795_v47 = vadd.f32 %v13984_v43, %v5731_v0  ;;  %v6726_v46 = vadd.f32 %v13854_v44, %v6725_v27  ;;  %v5596_v3 = vunpack.c.h.b16 %v13976_v59 }
 0x59d   :  { %v5333_v62 = vunpack.c.l.bf16 %v5124_v16  ;;  %v5796_v39 = vadd.f32 %v5764_v17, %v5732_v50  ;;  %v5603_v2 = vpack.c.b16 %v5595_v53, %v5595_v53  ;;  %v6110_v63 = vunpack.c.l.bf16 %v6049_v35 }
 0x59e   :  { %v5125_v42 = vpack.c.bf16 %v5096_v9, %v5096_v9  ;;  %v5827_v38 = vpack.c.bf16 %v5795_v47, %v5795_v47  ;;  %v14047_v8 = vadd.f32 %v6814_v1, %v6726_v46  ;;  %v5604_v55 = vpack.c.b16 %v5596_v3, %v5596_v3 }
 0x59f   :  { %v5391_v33 = vadd.f32 %v5362_v4, %v5333_v62  ;;  %v5828_v48 = vpack.c.bf16 %v5796_v39, %v5796_v39  ;;  %v8058_v43 = vrot.slane %v5603_v2, 9  ;;  %v6111_v24 = vunpack.c.l.bf16 %v6050_v30 }
 0x5a0   :  { %v5334_v32 = vunpack.c.l.bf16 %v5125_v42  ;;  %v5917_v37 = vunpack.c.l.bf16 %v5827_v38  ;;  %v6729_v27 = vadd.f32 %v13854_v44, %v6728_v49  ;;  %v5845_v6 = vrot.slane %v5604_v55, 5 }
 0x5a1   :  { %v5420_v51 = vpack.c.bf16 %v5391_v33, %v5391_v33  ;;  %v5918_v61 = vunpack.c.l.bf16 %v5828_v48  ;;  %v5458_v26 = vsel %vm10979_vm10, %v13819_v22, 0  ;;  %v5459_v53 = vsel %vm10979_vm10, %v13976_v59, 0 }
 0x5a2   :  { %v5392_v1 = vadd.f32 %v5363_v52, %v5334_v32  ;;  %v5981_v4 = vadd.f32 %v13978_v5, %v5917_v37  ;;  %v14054_v57 = vadd.f32 %v6817_v20, %v6729_v27  ;;  %v5701_v7 = vsel %vm11131_vm9, %v14029_v15, 0  ;;  %v6730_v20 = vpop.f32.mrf.mxu1 }
 0x5a3   :  { %v5487_v12 = vunpack.c.l.bf16 %v5420_v51  ;;  %v5982_v0 = vadd.f32 %v5950_v21, %v5918_v61  ;;  %v14064_v16 = vsel %vm9138_vm5, %v8058_v43, %v5845_v6  ;;  %v6209_v5 = vsel %vm15210_vm0, %v14019_v45, 0 }
 0x5a4   :  { %v6013_v22 = vpack.c.bf16 %v5981_v4, %v5981_v4  ;;  %v6365_v60 = vsel %vm10827_vm3, %v14064_v16, 0  ;;  %v5519_v52 = vunpack.c.l.bf16 %v5458_v26  ;;  %v5421_v35 = vpack.c.bf16 %v5392_v1, %v5392_v1  ;;  %v6819_v26 = vpop.f32.mrf.mxu2  ;;  %v6932_v1 = vld [vmem:[%s14425_s6 + $0x38] sm:$0xff] }
 0x5a5   :  { %v6014_v50 = vpack.c.bf16 %v5982_v0, %v5982_v0  ;;  %v6519_v17 = vunpack.c.l.b16 %v6365_v60  ;;  %v5520_v9 = vunpack.c.l.bf16 %v5459_v53  ;;  %v5648_v30 = vshrl.u32 %v5603_v2, 16 }
 0x5a6   :  { %v6080_v47 = vunpack.c.l.bf16 %v6013_v22  ;;  %v5551_v21 = vadd.f32 %v5519_v52, %v5487_v12  ;;  %v5651_v54 = vshll.u32 %v5603_v2, 16  ;;  %v5488_v39 = vunpack.c.l.bf16 %v5421_v35 }
 0x5a7   :  { %v6081_v46 = vunpack.c.l.bf16 %v6014_v50  ;;  %v6535_v62 = vpack.c.b16 %v15195_v29, %v6519_v17  ;;  %v5657_v3 = vshll.u32 %v5604_v55, 16  ;;  %v5650_v38 = vrot.slane %v5648_v30, 4 }
 0x5a8   :  { %v6141_v42 = vadd.f32 %v6110_v63, %v6080_v47  ;;  %v5583_v45 = vpack.c.bf16 %v5551_v21, %v5551_v21  ;;  %v5653_v33 = vrot.slane %v5651_v54, 5  ;;  %v5765_v56 = vunpack.c.l.bf16 %v5701_v7  ;;  %v6931_v21 = vld [vmem:[%s14425_s6 + $0x30] sm:$0xff] }
 0x5a9   :  { %v6142_v48 = vadd.f32 %v6111_v24, %v6081_v46  ;;  %6856 = vmatmul.bf16.gmra.mxu2 %v6535_v62  ;;  %v5552_v43 = vadd.f32 %v5520_v9, %v5488_v39  ;;  %v6210_v32 = vsel %vm15210_vm0, %v14029_v15, 0  ;;  %v6270_v51 = vunpack.c.l.bf16 %v6209_v5  ;;  %v6933_v24 = vld [vmem:[%s14425_s6 + $0x40] sm:$0xff] }
 0x5aa   :  { %v6173_v49 = vpack.c.bf16 %v6141_v42, %v6141_v42  ;;  %v5654_v37 = vor.u32 %v5653_v33, %v5650_v38  ;;  %v5733_v2 = vunpack.c.l.bf16 %v5583_v45  ;;  %v5659_v63 = vrot.slane %v5657_v3, 5  ;;  %6963 = vmatpush.msra.mxu3 %v6933_v24  ;;  %v6733_v42 = vpop.f32.mrf.mxu1 }
 0x5ab   :  { %v6174_v27 = vpack.c.bf16 %v6142_v48, %v6142_v48  ;;  %v5584_v29 = vpack.c.bf16 %v5552_v43, %v5552_v43  ;;  %v5887_v15 = vsel %vm11145_vm6, %v13982_v14, 0  ;;  %v6271_v53 = vunpack.c.l.bf16 %v6210_v32 }
 0x5ac   :  { %v6240_v61 = vunpack.c.l.bf16 %v6173_v49  ;;  %v5655_v55 = vrot.slane %v5654_v37, 4  ;;  %v5797_v6 = vadd.f32 %v5765_v56, %v5733_v2  ;;  %v6731_v12 = vadd.f32 %v13854_v44, %v6730_v20  ;;  %6964 = vmatpush.msra.mxu3 %v6932_v1  ;;  %v6822_v45 = vpop.f32.mrf.mxu2 }
 0x5ad   :  { %v6241_v4 = vunpack.c.l.bf16 %v6174_v27  ;;  %v5734_v22 = vunpack.c.l.bf16 %v5584_v29  ;;  %v5951_v17 = vunpack.c.l.bf16 %v5887_v15  ;;  %v5888_v41 = vsel %vm11145_vm6, %v14064_v16, 0 }
 0x5ae   :  { %v6301_v7 = vadd.f32 %v6270_v51, %v6240_v61  ;;  %v5660_v0 = vsel %vm9101_vm2, %v5655_v55, %v5659_v63  ;;  %v5829_v5 = vpack.c.bf16 %v5797_v6, %v5797_v6  ;;  %v14090_v50 = vadd.f32 %v6819_v26, %v6731_v12  ;;  %6965 = vmatpush.msra.mxu3 %v6931_v21 }
 0x5af   :  { %v6302_v60 = vadd.f32 %v6271_v53, %v6241_v4  ;;  %v5702_v52 = vsel %vm11131_vm9, %v5660_v0, 0  ;;  %v6051_v62 = vsel %vm15174_vm15, %v13976_v59, 0  ;;  %v6734_v33 = vadd.f32 %v13854_v44, %v6733_v42  ;;  %v6928_v42 = vld [vmem:[%s14425_s6 + $0x18] sm:$0xff] }
 0x5b0   :  { %v6333_v14 = vpack.c.bf16 %v6301_v7, %v6301_v7  ;;  %v5766_v35 = vunpack.c.l.bf16 %v5702_v52  ;;  %v5919_v9 = vunpack.c.l.bf16 %v5829_v5  ;;  %v5952_v56 = vunpack.c.l.bf16 %v5888_v41  ;;  %6966 = vmatpush.msra.mxu3 %v6930_v10  ;;  %v15245_v10 = vld [vmem:[#allocation28_spill] sm:$0xff] }
 0x5b1   :  { %v6334_v47 = vpack.c.bf16 %v6302_v60, %v6302_v60  ;;  %v6112_v49 = vunpack.c.l.bf16 %v6051_v62  ;;  %v14102_v32 = vadd.f32 %v6822_v45, %v6734_v33  ;;  %v6211_v36 = vsel %vm15210_vm0, %v5660_v0, 0  ;;  %v6927_v45 = vld [vmem:[%s14425_s6 + $0x10] sm:$0xff] }
 0x5b2   :  { %v5798_v40 = vadd.f32 %v5766_v35, %v5734_v22  ;;  %v5983_v30 = vadd.f32 %v5951_v17, %v5919_v9  ;;  %v6426_v54 = vunpack.c.l.b16 %v6333_v14  ;;  %v6272_v51 = vunpack.c.l.bf16 %v6211_v36  ;;  %v6735_v29 = vpop.f32.mrf.mxu1  ;;  %v6926_v36 = vld [vmem:[%s14425_s6 + $0x8] sm:$0xff] }
 0x5b3   :  { %v6427_v46 = vunpack.c.l.b16 %v6334_v47  ;;  %v6736_v55 = vadd.f32 %v13854_v44, %v6735_v29  ;;  %vm6949_vm5 = vcmask 1041409   ;;  %vm6951_vm8 = vcmask 1042434  }
 0x5b4   :  { %v5830_v39 = vpack.c.bf16 %v5798_v40, %v5798_v40  ;;  %v6015_v3 = vpack.c.bf16 %v5983_v30, %v5983_v30  ;;  %v6824_v61 = vpop.f32.mrf.mxu2  ;;  %vm6953_vm3 = vcmask 1043459  }
 0x5b5   :  { %v6444_v38 = vpack.c.b16 %v6427_v46, %v6426_v54  ;;  %v14108_v20 = vadd.f32 %v6824_v61, %v6736_v55  ;;  %v6929_v46 = vld [vmem:[%s14425_s6 + $0x20] sm:$0xff] }
 0x5b6   :  { %v5920_v48 = vunpack.c.l.bf16 %v5830_v39  ;;  %v6082_v43 = vunpack.c.l.bf16 %v6015_v3  ;;  %6967 = vmatpush.msra.mxu3 %v6929_v46  ;;  %v15244_v61 = vld [vmem:[#allocation35_spill] sm:$0xff] }
 0x5b7   :  { %6762 = vmatmul.bf16.gmra.mxu1 %v6444_v38 }
 0x5b8   :  { %v5984_v13 = vadd.f32 %v5952_v56, %v5920_v48  ;;  %v6143_v16 = vadd.f32 %v6112_v49, %v6082_v43  ;;  %6968 = vmatpush.msra.mxu3 %v6928_v42 }
 0x5ba   :  { %v6016_v59 = vpack.c.bf16 %v5984_v13, %v5984_v13  ;;  %v6175_v37 = vpack.c.bf16 %v6143_v16, %v6143_v16  ;;  %v6738_v4 = vpop.f32.mrf.mxu1  ;;  %6969 = vmatpush.msra.mxu3 %v6927_v45  ;;  %v15251_v45 = vld [vmem:[#allocation79_spill] sm:$0xff] }
 0x5bb   :  { %v6739_v12 = vadd.f32 %v13854_v44, %v6738_v4 }
 0x5bc   :  { %v6083_v2 = vunpack.c.l.bf16 %v6016_v59  ;;  %v6242_v27 = vunpack.c.l.bf16 %v6175_v37  ;;  %v6827_v53 = vpop.f32.mrf.mxu2  ;;  %6970 = vmatpush.msra.mxu3 %v6926_v36 }
 0x5bd   :  { %v14115_v0 = vadd.f32 %v6827_v53, %v6739_v12 }
 0x5be   :  { %v6144_v63 = vadd.f32 %v15214_v58, %v6083_v2  ;;  %v6303_v6 = vadd.f32 %v6272_v51, %v6242_v27  ;;  %v15243_v2 = vld [vmem:[#allocation32_spill] sm:$0xff] }
 0x5bf   :  { %v6696_v27 = vadd.f32 %v13854_v44, %v15243_v2 }
 0x5c0   :  { %v6176_v26 = vpack.c.bf16 %v6144_v63, %v6144_v63  ;;  %v6335_v15 = vpack.c.bf16 %v6303_v6, %v6303_v6  ;;  %v6701_v63 = vadd.f32 %v13854_v44, %v13507_v31  ;;  %v6875_v6 = vadd.f32 %v13863_v19, %v13764_v18  ;;  %v15247_v31 = vld [vmem:[#allocation17_spill] sm:$0xff] }
 0x5c1   :  { %v14146_v55 = vadd.f32 %v15244_v61, %v6696_v27  ;;  %v6925_v27 = vld [vmem:[%s14425_s6] sm:$0xff] }
 0x5c2   :  { %v6243_v24 = vunpack.c.l.bf16 %v6176_v26  ;;  %v6428_v58 = vunpack.c.l.b16 %v6335_v15  ;;  %v6740_v60 = vpop.f32.mrf.mxu1  ;;  %v6888_v26 = vadd.f32 %v14108_v20, %v14102_v32  ;;  %v15246_v15 = vld [vmem:[#allocation39_spill] sm:$0xff]  ;;  %v6876_v53 = vadd.f32 %v6875_v6, %v13890_v28  ;;  %6971 = vmatpush.msra.mxu3 %v6925_v27 }
 0x5c3   :  { %v6741_v17 = vadd.f32 %v13854_v44, %v6740_v60  ;;  %v6706_v4 = vadd.f32 %v13854_v44, %v15246_v15 }
 0x5c4   :  { %v6304_v1 = vadd.f32 %v15218_v25, %v6243_v24  ;;  %v6829_v52 = vpop.f32.mrf.mxu2  ;;  %v6862_v24 = vadd.f32 %v14146_v55, %v15245_v10  ;;  %v6889_v12 = vadd.f32 %v6888_v26, %v14115_v0 }
 0x5c5   :  { %v14118_v14 = vadd.f32 %v6829_v52, %v6741_v17  ;;  %v15248_v52 = vld [vmem:[#allocation37_spill] sm:$0xff]  ;;  %v15249_v17 = vld [vmem:[#allocation71_spill] sm:$0xff] }
 0x5c6   :  { %v6336_v7 = vpack.c.bf16 %v6304_v1, %v6304_v1  ;;  %v14157_v1 = vadd.f32 %v13529_v23, %v6701_v63  ;;  %v14169_v23 = vadd.f32 %v15248_v52, %v6706_v4  ;;  %v15252_v63 = vld [vmem:[#allocation16_spill] sm:$0xff] }
 0x5c8   :  { %v6429_v22 = vunpack.c.l.b16 %v6336_v7  ;;  %v6863_v7 = vadd.f32 %v6862_v24, %v15247_v31 }
 0x5ca   :  { %v6445_v5 = vpack.c.b16 %v6429_v22, %v6428_v58  ;;  %v6743_v35 = vpop.f32.mrf.mxu1  ;;  %v6877_v58 = vadd.f32 %v6876_v53, %v13942_v34  ;;  %v6890_v22 = vadd.f32 %v6889_v12, %v14118_v14  ;;  %v6864_v60 = vadd.f32 %v6863_v7, %v14157_v1  ;;  %v8370_v7 = vld [vmem:[#allocation5 + $0x78] sm:$0xff] }
 0x5cb   :  { %v6744_v9 = vadd.f32 %v13854_v44, %v6743_v35  ;;  %v6711_v35 = vadd.f32 %v13854_v44, %v15249_v17  ;;  %7525 = vmatpush.bf16.msrb.mxu0 %v8370_v7  ;;  %v8369_v17 = vld [vmem:[#allocation5 + $0x70] sm:$0xff] }
 0x5cc   :  { %6767 = vmatmul.bf16.gmra.mxu1 %v6445_v5  ;;  %v6832_v25 = vpop.f32.mrf.mxu2 }
 0x5cd   :  { %v14121_v47 = vadd.f32 %v6832_v25, %v6744_v9  ;;  %v6878_v25 = vadd.f32 %v6877_v58, %v13992_v11  ;;  %v6992_v58 = vld [vmem:[%s14427_s8 + $0x78] sm:$0xff] }
 0x5ce   :  { %6997 = vmatpush.msrb.mxu3 %v6992_v58 }
 0x5cf   :  { %v6891_v9 = vadd.f32 %v6890_v22, %v14121_v47  ;;  %7526 = vmatpush.bf16.msrb.mxu0 %v8369_v17  ;;  %v6984_v17 = vld [vmem:[%s14427_s8 + $0x38] sm:$0xff] }
 0x5d2   :  { %v6745_v21 = vpop.f32.mrf.mxu1 }
 0x5d3   :  { %v6746_v30 = vadd.f32 %v13854_v44, %v6745_v21 }
 0x5d4   :  { %v6834_v40 = vpop.f32.mrf.mxu2 }
 0x5d5   :  { %v14124_v54 = vadd.f32 %v6834_v40, %v6746_v30  ;;  %v15250_v30 = vld [vmem:[#allocation36_spill] sm:$0xff] }
 0x5d6   :  { %v6865_v46 = vadd.f32 %v6864_v60, %v15250_v30 }
 0x5d8   :  { %v6866_v42 = vadd.f32 %v6865_v46, %v14169_v23 }
 0x5da   :  { %v6748_v41 = vpop.f32.mrf.mxu1  ;;  %v6867_v6 = vadd.f32 %v6866_v42, %v15252_v63 }
 0x5db   :  { %v6749_v62 = vadd.f32 %v13854_v44, %v6748_v41  ;;  %v6879_v41 = vadd.f32 %v6878_v25, %v14047_v8 }
 0x5dc   :  { %v6837_v39 = vpop.f32.mrf.mxu2 }
 0x5dd   :  { %v14130_v3 = vadd.f32 %v6837_v39, %v6749_v62  ;;  %v6892_v62 = vadd.f32 %v6891_v9, %v14124_v54  ;;  %v6880_v36 = vadd.f32 %v6879_v41, %v14054_v57  ;;  %v6989_v9 = vld [vmem:[%s14427_s8 + $0x60] sm:$0xff] }
 0x5df   :  { %v6893_v61 = vadd.f32 %v6892_v62, %v14130_v3 }
 0x5e2   :  { %v6750_v38 = vpop.f32.mrf.mxu1 }
 0x5e3   :  { %v6751_v5 = vadd.f32 %v13854_v44, %v6750_v38  ;;  %v14182_v38 = vadd.f32 %v15251_v45, %v6711_v35  ;;  %v6990_v35 = vld [vmem:[%s14427_s8 + $0x68] sm:$0xff] }
 0x5e4   :  { %v6839_v33 = vpop.f32.mrf.mxu2 }
 0x5e5   :  { %v14178_v39 = vadd.f32 %v6839_v33, %v6751_v5  ;;  %v6881_v33 = vadd.f32 %v6880_v36, %v14090_v50  ;;  %v6868_v4 = vadd.f32 %v6867_v6, %v14182_v38 }
 0x5e7   :  { %v6894_v15 = vadd.f32 %v6893_v61, %v14178_v39  ;;  %v6882_v22 = vrot.slane %v6881_v33, 4 }
 0x5e9   :  { %v6895_v60 = vrot.slane %v6894_v15, 4  ;;  %v6883_v41 = vadd.f32 %v6882_v22, %v6881_v33 }
 0x5eb   :  { %v6896_v36 = vadd.f32 %v6895_v60, %v6894_v15  ;;  %v6884_v33 = vrot.slane %v6883_v41, 2 }
 0x5ec   :  { %v6842_v48 = vpop.f32.mrf.mxu2 }
 0x5ed   :  { %v6897_v15 = vrot.slane %v6896_v36, 2 }
 0x5f4   :  { %v6844_v49 = vpop.f32.mrf.mxu2 }
 0x5fc   :  { %v6847_v16 = vpop.f32.mrf.mxu2 }
 0x5ff   :  { %v6753_v56 = vpop.f32.mrf.mxu1 }
 0x600   :  { %v6754_v26 = vadd.f32 %v13854_v44, %v6753_v56 }
 0x602   :  { %v14202_v5 = vadd.f32 %v6842_v48, %v6754_v26  ;;  %v6869_v48 = vrot.slane %v6868_v4, 4 }
 0x604   :  { %v6849_v37 = vpop.f32.mrf.mxu2 }
 0x607   :  { %v6755_v43 = vpop.f32.mrf.mxu1 }
 0x608   :  { %v6756_v2 = vadd.f32 %v13854_v44, %v6755_v43  ;;  %v8737_v43 = vmov 64.0  }
 0x609   :  { %8622 = vrcp.f32 %v8737_v43 }
 0x60a   :  { %v14196_v53 = vadd.f32 %v6844_v49, %v6756_v2  ;;  %v6991_v49 = vld [vmem:[%s14427_s8 + $0x70] sm:$0xff]  ;;  %v6870_v2 = vadd.f32 %v6869_v48, %v6868_v4  ;;  %v6986_v4 = vld [vmem:[%s14427_s8 + $0x48] sm:$0xff] }
 0x60b   :  { %6998 = vmatpush.msrb.mxu3 %v6991_v49  ;;  %v6885_v49 = vadd.f32 %v6884_v33, %v6883_v41 }
 0x60d   :  { %6999 = vmatpush.msrb.mxu3 %v6990_v35 }
 0x60f   :  { %v8623_v46 = vpop.eup %8622  ;;  %7000 = vmatpush.msrb.mxu3 %v6989_v9 }
 0x610   :  { %v6915_v6 = vmul.f32 64.0, %v8623_v46  ;;  %vm6919_vm2 = vweird.f32 %v8623_v46 }
 0x612   :  { %v6916_v58 = vsub.f32 1.0, %v6915_v6 }
 0x613   :  { %v14143_v29 = vpop.f32.mrf.mxu2 }
 0x614   :  { %v6917_v48 = vmul.f32 %v8623_v46, %v6916_v58 }
 0x615   :  { %v6758_v13 = vpop.f32.mrf.mxu1 }
 0x616   :  { %v6759_v24 = vadd.f32 %v13854_v44, %v6758_v13 }
 0x618   :  { %v14204_v56 = vadd.f32 %v6847_v16, %v6759_v24  ;;  %v6901_v16 = vadd.f32 %v14196_v53, %v14202_v5 }
 0x61a   :  { %v6902_v62 = vadd.f32 %v6901_v16, %v14204_v56  ;;  %v6983_v16 = vld [vmem:[%s14427_s8 + $0x30] sm:$0xff] }
 0x61b   :  { %v6854_v40 = vpop.f32.mrf.mxu2 }
 0x61d   :  { %v6760_v59 = vpop.f32.mrf.mxu1 }
 0x61e   :  { %v6761_v12 = vadd.f32 %v13854_v44, %v6760_v59 }
 0x620   :  { %v14215_v25 = vadd.f32 %v6849_v37, %v6761_v12  ;;  %v6988_v37 = vld [vmem:[%s14427_s8 + $0x58] sm:$0xff] }
 0x621   :  { %7001 = vmatpush.msrb.mxu3 %v6988_v37  ;;  %v6918_v37 = vadd.f32 %v8623_v46, %v6917_v48  ;;  %v8364_v48 = vld [vmem:[#allocation5 + $0x48] sm:$0xff] }
 0x622   :  { %v6903_v27 = vadd.f32 %v6902_v62, %v14215_v25  ;;  %v6982_v62 = vld [vmem:[%s14427_s8 + $0x28] sm:$0xff] }
 0x62c   :  { %v6857_v59 = vpop.f32.mrf.mxu2 }
 0x634   :  { %v6763_v51 = vpop.f32.mrf.mxu1  ;;  %v6859_v22 = vpop.f32.mrf.mxu2 }
 0x635   :  { %v6764_v13 = vadd.f32 %v13854_v44, %v6763_v51 }
 0x637   :  { %v14223_v42 = vadd.f32 %v14143_v29, %v6764_v13  ;;  %v6987_v29 = vld [vmem:[%s14427_s8 + $0x50] sm:$0xff]  ;;  %v6985_v13 = vld [vmem:[%s14427_s8 + $0x40] sm:$0xff] }
 0x638   :  { %7002 = vmatpush.msrb.mxu3 %v6987_v29  ;;  %v6980_v29 = vld [vmem:[%s14427_s8 + $0x18] sm:$0xff] }
 0x639   :  { %v6904_v26 = vadd.f32 %v6903_v27, %v14223_v42 }
 0x63a   :  { %7003 = vmatpush.msrb.mxu3 %v6986_v4 }
 0x63c   :  { %v6765_v21 = vpop.f32.mrf.mxu1  ;;  %7004 = vmatpush.msrb.mxu3 %v6985_v13 }
 0x63d   :  { %v6766_v51 = vadd.f32 %v13854_v44, %v6765_v21  ;;  %v8368_v21 = vld [vmem:[#allocation5 + $0x68] sm:$0xff] }
 0x63e   :  { %7527 = vmatpush.bf16.msrb.mxu0 %v8368_v21  ;;  %7005 = vmatpush.msrb.mxu3 %v6984_v17  ;;  %v6981_v21 = vld [vmem:[%s14427_s8 + $0x20] sm:$0xff] }
 0x63f   :  { %v14230_v61 = vadd.f32 %v6854_v40, %v6766_v51  ;;  %v6871_v40 = vrot.slane %v6870_v2, 2  ;;  %v6886_v51 = vrot.slane %v6885_v49, 1  ;;  %v8367_v17 = vld [vmem:[#allocation5 + $0x60] sm:$0xff] }
 0x640   :  { %7006 = vmatpush.msrb.mxu3 %v6983_v16  ;;  %v8491_v16 = vld [vmem:[%s14426_s7] ss:$0 sm:$0xff] }
 0x641   :  { %v6905_v12 = vadd.f32 %v6904_v26, %v14230_v61  ;;  %v6872_v35 = vadd.f32 %v6871_v40, %v6870_v2  ;;  %v6887_v2 = vadd.f32 %v6886_v51, %v6885_v49 }
 0x642   :  { %7007 = vmatpush.msrb.mxu3 %v6982_v62  ;;  %7528 = vmatpush.bf16.msrb.mxu0 %v8367_v17  ;;  %v8492_v62 = vld [vmem:[%s14428_s9] ss:$0 sm:$0xff] }
 0x644   :  { %7008 = vmatpush.msrb.mxu3 %v6981_v21  ;;  %v8361_v21 = vld [vmem:[#allocation5 + $0x30] sm:$0xff] }
 0x646   :  { %7009 = vmatpush.msrb.mxu3 %v6980_v29 }
 0x649   :  { %v6768_v52 = vpop.f32.mrf.mxu1 }
 0x64a   :  { %v6769_v45 = vadd.f32 %v13854_v44, %v6768_v52 }
 0x64c   :  { %v14236_v24 = vadd.f32 %v6857_v59, %v6769_v45  ;;  %v6898_v59 = vadd.f32 %v6897_v15, %v6896_v36  ;;  %v6873_v45 = vrot.slane %v6872_v35, 1  ;;  %v6920_v15 = vsel %vm6919_vm2, %v8623_v46, %v6918_v37  ;;  %v6978_v46 = vld [vmem:[%s14427_s8 + $0x8] sm:$0xff] }
 0x64e   :  { %v6906_v60 = vadd.f32 %v6905_v12, %v14236_v24  ;;  %v6899_v41 = vrot.slane %v6898_v59, 1  ;;  %v6874_v33 = vadd.f32 %v6873_v45, %v6872_v35  ;;  %v8366_v35 = vld [vmem:[#allocation5 + $0x58] sm:$0xff] }
 0x64f   :  { %7529 = vmatpush.bf16.msrb.mxu0 %v8366_v35  ;;  %v8362_v45 = vld [vmem:[#allocation5 + $0x38] sm:$0xff] }
 0x650   :  { %v6900_v6 = vadd.f32 %v6899_v41, %v6898_v59  ;;  %v6921_v12 = vmul.f32 %v6920_v15, %v6874_v33  ;;  %v6977_v59 = vld [vmem:[%s14427_s8] sm:$0xff] }
 0x651   :  { %v6770_v43 = vpop.f32.mrf.mxu1  ;;  %v8359_v33 = vld [vmem:[#allocation5 + $0x20] sm:$0xff] }
 0x652   :  { %v6771_v7 = vadd.f32 %v13854_v44, %v6770_v43  ;;  %v6922_v43 = vmul.f32 %v6920_v15, %v6887_v2  ;;  %v6923_v40 = vmul.f32 %v6920_v15, %v6900_v6  ;;  %v8360_v6 = vld [vmem:[#allocation5 + $0x28] sm:$0xff] }
 0x654   :  { %v14247_v52 = vadd.f32 %v6859_v22, %v6771_v7  ;;  %v6950_v22 = vsel %vm6949_vm5, %v6922_v43, %v6921_v12  ;;  %v8356_v12 = vld [vmem:[#allocation5 + $0x8] sm:$0xff] }
 0x655   :  { %v6952_v13 = vsel %vm6951_vm8, %v6923_v40, %v6950_v22  ;;  %v8357_v40 = vld [vmem:[#allocation5 + $0x10] sm:$0xff]  ;;  %v8355_v22 = vld [vmem:[#allocation5] sm:$0xff] }
 0x656   :  { %v6907_v44 = vadd.f32 %v6906_v60, %v14247_v52  ;;  %v6979_v60 = vld [vmem:[%s14427_s8 + $0x10] sm:$0xff] }
 0x657   :  { %7010 = vmatpush.msrb.mxu3 %v6979_v60 }
 0x658   :  { %v6908_v9 = vrot.slane %v6907_v44, 4 }
 0x659   :  { %7011 = vmatpush.msrb.mxu3 %v6978_v46 }
 0x65a   :  { %v6909_v36 = vadd.f32 %v6908_v9, %v6907_v44  ;;  %v8365_v44 = vld [vmem:[#allocation5 + $0x50] sm:$0xff] }
 0x65b   :  { %7012 = vmatpush.msrb.mxu3 %v6977_v59  ;;  %7530 = vmatpush.bf16.msrb.mxu0 %v8365_v44  ;;  %v8252_v59 = vld [vmem:[%s14420_s1 + $0x8] sm:$0xff] }
 0x65c   :  { %v6910_v27 = vrot.slane %v6909_v36, 2 }
 0x65e   :  { %v6911_v26 = vadd.f32 %v6910_v27, %v6909_v36  ;;  %v8363_v27 = vld [vmem:[#allocation5 + $0x40] sm:$0xff] }
 0x65f   :  { %7531 = vmatpush.bf16.msrb.mxu0 %v8364_v48 }
 0x660   :  { %v6912_v4 = vrot.slane %v6911_v26, 1 }
 0x662   :  { %v6913_v7 = vadd.f32 %v6912_v4, %v6911_v26  ;;  %v8358_v26 = vld [vmem:[#allocation5 + $0x18] sm:$0xff] }
 0x663   :  { %7532 = vmatpush.bf16.msrb.mxu0 %v8363_v27 }
 0x664   :  { %v6924_v58 = vmul.f32 %v6920_v15, %v6913_v7  ;;  %v8251_v15 = vld [vmem:[%s14420_s1] sm:$0xff] }
 0x666   :  { %v6954_v49 = vsel %vm6953_vm3, %v6924_v58, %v6952_v13  ;;  %7533 = vmatmul.bf16.vlgmr.msrb.gmra.mxu0 %v8251_v15 }
 0x667   :  { %6972 = vmatmul.f32.vlgmr.msra.gmra.mxu3 %v6954_v49 }
 0x668   :  { %7436 = vmatpush.bf16.msra.mxu3 %v8362_v45 }
 0x66c   :  { %7437 = vmatpush.bf16.msra.mxu3 %v8361_v21  ;;  %v8253_v21 = vld [vmem:[%s14420_s1 + $0x10] sm:$0xff] }
 0x670   :  { %7438 = vmatpush.bf16.msra.mxu3 %v8360_v6 }
 0x674   :  { %7439 = vmatpush.bf16.msra.mxu3 %v8359_v33 }
 0x676   :  { %7538 = vmatmul.bf16.gmra.mxu0 %v8252_v59 }
 0x678   :  { %7440 = vmatpush.bf16.msra.mxu3 %v8358_v26  ;;  %v8254_v26 = vld [vmem:[%s14420_s1 + $0x18] sm:$0xff] }
 0x67c   :  { %7441 = vmatpush.bf16.msra.mxu3 %v8357_v40 }
 0x680   :  { %7442 = vmatpush.bf16.msra.mxu3 %v8356_v12 }
 0x684   :  { %7443 = vmatpush.bf16.msra.mxu3 %v8355_v22 }
 0x686   :  { %7543 = vmatmul.bf16.gmra.mxu0 %v8253_v21 }
 0x696   :  { %7548 = vmatmul.bf16.gmra.mxu0 %v8254_v26  ;;  %v8259_v26 = vld [vmem:[%s14420_s1 + $0x40] sm:$0xff] }
 0x6ea   :  { %v6973_v51 = vpop.f32.mrf.mxu3 }
 0x6eb   :  { %v6974_v9 = vadd.f32 %v8491_v16, %v6973_v51 }
 0x6ed   :  { %v6976_v41 = vmax.f32 %v6974_v9, 0.0 }
 0x6ef   :  { %7013 = vmatmul.f32.vlgmr.msrb.gmra.mxu3 %v6976_v41 }
 0x772   :  { %v7014_v36 = vpop.f32.mrf.mxu3 }
 0x773   :  { %v7015_v37 = vadd.f32 %v8492_v62, %v7014_v36 }
 0x775   :  { %v7017_v2 = vsub.f32 0.0, %v7015_v37 }
 0x777   :  { %v7018_v29 = vmul.f32 1.442695, %v7017_v2 }
 0x779   :  { %8624 = vpow2.f32 %v7018_v29 }
 0x77f   :  { %v8625_v43 = vpop.eup %8624 }
 0x780   :  { %v7020_v4 = vadd.f32 1.0, %v8625_v43 }
 0x782   :  { %8626 = vrcp.f32 %v7020_v4  ;;  %v7032_v49 = vand.u32 2147483648, %v7020_v4  ;;  %v7030_v46 = vand.u32 2147483647, %v7020_v4  ;;  %vm7026_vm9 = vweird.f32 %v7020_v4 }
 0x784   :  { %v7033_v35 = vor.u32 1.1754944e-38, %v7032_v49  ;;  %vm7031_vm4 = vcmp.eq.f32.partialorder %v7030_v46, 8.507059e+37 }
 0x788   :  { %v8627_v7 = vpop.eup %8626 }
 0x789   :  { %v7022_v58 = vmul.f32 %v8627_v7, %v7020_v4  ;;  %vm7027_vm10 = vweird.f32 %v8627_v7 }
 0x78a   :  { %vm7028_vm6 = vmor %vm7026_vm9, %vm7027_vm10 }
 0x78b   :  { %v7023_v13 = vsub.f32 1.0, %v7022_v58 }
 0x78d   :  { %v7024_v60 = vmul.f32 %v8627_v7, %v7023_v13 }
 0x78f   :  { %v7025_v17 = vadd.f32 %v8627_v7, %v7024_v60 }
 0x791   :  { %v7029_v44 = vsel %vm7028_vm6, %v8627_v7, %v7025_v17  ;;  %v8255_v7 = vld [vmem:[%s14420_s1 + $0x20] sm:$0xff]  ;;  %v8256_v17 = vld [vmem:[%s14420_s1 + $0x28] sm:$0xff] }
 0x792   :  { %v14286_v48 = vsel %vm7031_vm4, %v7033_v35, %v7029_v44  ;;  %7553 = vmatmul.bf16.gmra.mxu0 %v8255_v7 }
 0x793   :  { %v7040_v16 = vperm.slane %v14286_v48, 0 }
 0x795   :  { %v7048_v51 = vmul.f32 %v7040_v16, %v15245_v10  ;;  %v7049_v9 = vmul.f32 %v7040_v16, %v14146_v55  ;;  %v7050_v2 = vmul.f32 %v7040_v16, %v15247_v31  ;;  %v7051_v27 = vmul.f32 %v7040_v16, %v14157_v1 }
 0x796   :  { %v7052_v15 = vmul.f32 %v7040_v16, %v15250_v30  ;;  %v7053_v43 = vmul.f32 %v7040_v16, %v14169_v23  ;;  %v7054_v58 = vmul.f32 %v7040_v16, %v15252_v63  ;;  %v7055_v22 = vmul.f32 %v7040_v16, %v14182_v38 }
 0x797   :  { %v7080_v41 = vpack.c.bf16 %v7048_v51, %v7048_v51  ;;  %v7081_v62 = vpack.c.bf16 %v7049_v9, %v7049_v9  ;;  %v7082_v6 = vpack.c.bf16 %v7050_v2, %v7050_v2  ;;  %v7083_v29 = vpack.c.bf16 %v7051_v27, %v7051_v27  ;;  %v8258_v2 = vld [vmem:[%s14420_s1 + $0x38] sm:$0xff] }
 0x798   :  { %v7084_v4 = vpack.c.bf16 %v7052_v15, %v7052_v15  ;;  %v7085_v31 = vpack.c.bf16 %v7053_v43, %v7053_v43  ;;  %v7086_v13 = vpack.c.bf16 %v7054_v58, %v7054_v58  ;;  %v7087_v30 = vpack.c.bf16 %v7055_v22, %v7055_v22 }
 0x799   :  { %v7144_v45 = vunpack.c.l.b16 %v7080_v41  ;;  %v7145_v36 = vunpack.c.l.b16 %v7081_v62  ;;  %v7146_v10 = vunpack.c.l.b16 %v7082_v6  ;;  %v7147_v33 = vunpack.c.l.b16 %v7083_v29  ;;  %v8257_v41 = vld [vmem:[%s14420_s1 + $0x30] sm:$0xff] }
 0x79a   :  { %v7148_v40 = vunpack.c.l.b16 %v7084_v4  ;;  %v7149_v1 = vunpack.c.l.b16 %v7085_v31  ;;  %v7037_v23 = vrot.slane %v14286_v48, 1  ;;  %v7150_v49 = vunpack.c.l.b16 %v7086_v13 }
 0x79b   :  { %v7176_v37 = vpack.c.b16 %v7145_v36, %v7144_v45  ;;  %v7177_v55 = vpack.c.b16 %v7147_v33, %v7146_v10  ;;  %v7151_v60 = vunpack.c.l.b16 %v7087_v30  ;;  %v7038_v31 = vrot.slane %v14286_v48, 2 }
 0x79c   :  { %v7178_v12 = vpack.c.b16 %v7149_v1, %v7148_v40  ;;  %v7041_v46 = vperm.slane %v7037_v23, 0 }
 0x79d   :  { %7444 = vmatmul.bf16.vlgmr.msra.gmra.mxu3 %v7176_v37  ;;  %v7179_v59 = vpack.c.b16 %v7151_v60, %v7150_v49 }
 0x79e   :  { %v7056_v35 = vmul.f32 %v7041_v46, %v13764_v18  ;;  %v7057_v63 = vmul.f32 %v7041_v46, %v13863_v19  ;;  %v7058_v62 = vmul.f32 %v7041_v46, %v13890_v28  ;;  %v7059_v45 = vmul.f32 %v7041_v46, %v13942_v34 }
 0x79f   :  { %v7060_v27 = vmul.f32 %v7041_v46, %v13992_v11  ;;  %v7061_v6 = vmul.f32 %v7041_v46, %v14047_v8  ;;  %v7062_v15 = vmul.f32 %v7041_v46, %v14054_v57  ;;  %v7063_v43 = vmul.f32 %v7041_v46, %v14090_v50  ;;  %v8260_v57 = vld [vmem:[%s14420_s1 + $0x48] sm:$0xff] }
 0x7a0   :  { %v7088_v38 = vpack.c.bf16 %v7056_v35, %v7056_v35  ;;  %v7089_v44 = vpack.c.bf16 %v7057_v63, %v7057_v63  ;;  %v7090_v36 = vpack.c.bf16 %v7058_v62, %v7058_v62  ;;  %v7091_v18 = vpack.c.bf16 %v7059_v45, %v7059_v45  ;;  %v14341_v63 = vld [vmem:[%s14430_s11] ss:$0 sm:$0xff] }
 0x7a1   :  { %v7092_v29 = vpack.c.bf16 %v7060_v27, %v7060_v27  ;;  %v7093_v28 = vpack.c.bf16 %v7061_v6, %v7061_v6  ;;  %v7094_v11 = vpack.c.bf16 %v7062_v15, %v7062_v15  ;;  %v7095_v4 = vpack.c.bf16 %v7063_v43, %v7063_v43 }
 0x7a2   :  { %7558 = vmatmul.bf16.gmra.mxu0 %v8256_v17  ;;  %v7152_v16 = vunpack.c.l.b16 %v7088_v38  ;;  %v7153_v51 = vunpack.c.l.b16 %v7089_v44  ;;  %v7154_v37 = vunpack.c.l.b16 %v7090_v36  ;;  %v7155_v19 = vunpack.c.l.b16 %v7091_v18 }
 0x7a3   :  { %v7156_v10 = vunpack.c.l.b16 %v7092_v29  ;;  %v7157_v34 = vunpack.c.l.b16 %v7093_v28  ;;  %v7158_v40 = vunpack.c.l.b16 %v7094_v11  ;;  %v7159_v1 = vunpack.c.l.b16 %v7095_v4 }
 0x7a4   :  { %v7180_v9 = vpack.c.b16 %v7153_v51, %v7152_v16  ;;  %v7181_v21 = vpack.c.b16 %v7155_v19, %v7154_v37 }
 0x7a5   :  { %v7182_v33 = vpack.c.b16 %v7157_v34, %v7156_v10  ;;  %v7183_v7 = vpack.c.b16 %v7159_v1, %v7158_v40 }
 0x7ad   :  { %7449 = vmatmul.bf16.gmra.mxu3 %v7177_v55  ;;  %v7534_v55 = vpop.f32.mrf.mxu0 }
 0x7b2   :  { %7563 = vmatmul.bf16.gmra.mxu0 %v8257_v41 }
 0x7b5   :  { %v7536_v8 = vpop.f32.mrf.mxu0 }
 0x7bd   :  { %7454 = vmatmul.bf16.gmra.mxu3 %v7178_v12  ;;  %v7042_v12 = vperm.slane %v7038_v31, 0  ;;  %v7539_v13 = vpop.f32.mrf.mxu0  ;;  %v8263_v31 = vld [vmem:[%s14420_s1 + $0x60] sm:$0xff] }
 0x7bf   :  { %v7064_v58 = vmul.f32 %v7042_v12, %v14102_v32  ;;  %v7065_v22 = vmul.f32 %v7042_v12, %v14108_v20  ;;  %v7067_v17 = vmul.f32 %v7042_v12, %v14118_v14  ;;  %v8261_v20 = vld [vmem:[%s14420_s1 + $0x50] sm:$0xff]  ;;  %v7068_v37 = vmul.f32 %v7042_v12, %v14121_v47 }
 0x7c0   :  { %v7069_v19 = vmul.f32 %v7042_v12, %v14124_v54  ;;  %v7070_v11 = vmul.f32 %v7042_v12, %v14130_v3  ;;  %v7071_v4 = vmul.f32 %v7042_v12, %v14178_v39 }
 0x7c1   :  { %v7096_v50 = vpack.c.bf16 %v7064_v58, %v7064_v58  ;;  %v7097_v30 = vpack.c.bf16 %v7065_v22, %v7065_v22  ;;  %v7099_v44 = vpack.c.bf16 %v7067_v17, %v7067_v17  ;;  %v7100_v6 = vpack.c.bf16 %v7068_v37, %v7068_v37  ;;  %v8264_v17 = vld [vmem:[%s14420_s1 + $0x68] sm:$0xff] }
 0x7c2   :  { %7568 = vmatmul.bf16.gmra.mxu0 %v8258_v2  ;;  %v8262_v2 = vld [vmem:[%s14420_s1 + $0x58] sm:$0xff]  ;;  %v7101_v29 = vpack.c.bf16 %v7069_v19, %v7069_v19  ;;  %v7102_v1 = vpack.c.bf16 %v7070_v11, %v7070_v11  ;;  %v7039_v58 = vrot.slane %v14286_v48, 3 }
 0x7c3   :  { %v7160_v23 = vunpack.c.l.b16 %v7096_v50  ;;  %v7161_v49 = vunpack.c.l.b16 %v7097_v30  ;;  %v7164_v10 = vunpack.c.l.b16 %v7100_v6 }
 0x7c4   :  { %v7165_v34 = vunpack.c.l.b16 %v7101_v29  ;;  %v14360_v39 = vperm.slane %v7039_v58, 0 }
 0x7c5   :  { %v7541_v60 = vpop.f32.mrf.mxu0  ;;  %v7184_v46 = vpack.c.b16 %v7161_v49, %v7160_v23 }
 0x7c6   :  { %v7186_v54 = vpack.c.b16 %v7165_v34, %v7164_v10  ;;  %v7073_v48 = vmul.f32 %v14360_v39, %v14196_v53 }
 0x7cd   :  { %7459 = vmatmul.bf16.gmra.mxu3 %v7179_v59  ;;  %v7066_v59 = vmul.f32 %v7042_v12, %v14115_v0  ;;  %v7544_v32 = vpop.f32.mrf.mxu0  ;;  %v7163_v0 = vunpack.c.l.b16 %v7099_v44 }
 0x7cf   :  { %v7098_v38 = vpack.c.bf16 %v7066_v59, %v7066_v59 }
 0x7d1   :  { %v7162_v51 = vunpack.c.l.b16 %v7098_v38 }
 0x7d2   :  { %7573 = vmatmul.bf16.gmra.mxu0 %v8259_v26 }
 0x7d3   :  { %v7185_v36 = vpack.c.b16 %v7163_v0, %v7162_v51 }
 0x7dd   :  { %7464 = vmatmul.bf16.gmra.mxu3 %v7180_v9  ;;  %v7546_v9 = vpop.f32.mrf.mxu0 }
 0x7e2   :  { %7578 = vmatmul.bf16.gmra.mxu0 %v8260_v57 }
 0x7ed   :  { %7469 = vmatmul.bf16.gmra.mxu3 %v7181_v21  ;;  %v7549_v21 = vpop.f32.mrf.mxu0 }
 0x7f2   :  { %7583 = vmatmul.bf16.gmra.mxu0 %v8261_v20 }
 0x7fd   :  { %7474 = vmatmul.bf16.gmra.mxu3 %v7182_v33  ;;  %v7551_v33 = vpop.f32.mrf.mxu0 }
 0x802   :  { %7588 = vmatmul.bf16.gmra.mxu0 %v8262_v2 }
 0x80d   :  { %7479 = vmatmul.bf16.gmra.mxu3 %v7183_v7  ;;  %v7103_v7 = vpack.c.bf16 %v7071_v4, %v7071_v4 }
 0x80f   :  { %v7167_v57 = vunpack.c.l.b16 %v7103_v7 }
 0x812   :  { %7593 = vmatmul.bf16.gmra.mxu0 %v8263_v31 }
 0x81d   :  { %7484 = vmatmul.bf16.gmra.mxu3 %v7184_v46  ;;  %v7072_v46 = vmul.f32 %v14360_v39, %v14202_v5 }
 0x820   :  { %v7445_v35 = vpop.f32.mrf.mxu3 }
 0x821   :  { %v7446_v16 = vadd.f32 %v14341_v63, %v7445_v35  ;;  %v7104_v35 = vpack.c.bf16 %v7072_v46, %v7072_v46 }
 0x822   :  { %7598 = vmatmul.bf16.gmra.mxu0 %v8264_v17 }
 0x823   :  { %v7535_v62 = vadd.f32 %v7534_v55, %v7446_v16  ;;  %v7168_v44 = vunpack.c.l.b16 %v7104_v35 }
 0x828   :  { %v7447_v14 = vpop.f32.mrf.mxu3 }
 0x829   :  { %v7448_v41 = vadd.f32 %v14341_v63, %v7447_v14 }
 0x82b   :  { %v7537_v45 = vadd.f32 %v7536_v8, %v7448_v41  ;;  %v7554_v8 = vpop.f32.mrf.mxu0 }
 0x82d   :  { %v8374_v18 = vpack.c.bf16 %v7537_v45, %v7535_v62  ;;  %7489 = vmatmul.bf16.gmra.mxu3 %v7185_v36  ;;  %v7074_v62 = vmul.f32 %v14360_v39, %v14204_v56  ;;  %v7075_v45 = vmul.f32 %v14360_v39, %v14215_v25 }
 0x82f   :  { %8375 = vst [vmem:[#allocation7] sm:$0xff] %v8374_v18   ;;  %v8265_v18 = vld [vmem:[%s14420_s1 + $0x70] sm:$0xff]  ;;  %v7106_v19 = vpack.c.bf16 %v7074_v62, %v7074_v62 }
 0x830   :  { %v7450_v27 = vpop.f32.mrf.mxu3 }
 0x831   :  { %v7451_v28 = vadd.f32 %v14341_v63, %v7450_v27  ;;  %v7170_v27 = vunpack.c.l.b16 %v7106_v19 }
 0x832   :  { %7603 = vmatmul.bf16.gmra.mxu0 %v8265_v18 }
 0x833   :  { %v7540_v47 = vadd.f32 %v7539_v13, %v7451_v28  ;;  %v7166_v13 = vunpack.c.l.b16 %v7102_v1  ;;  %v7556_v50 = vpop.f32.mrf.mxu0 }
 0x835   :  { %v7187_v49 = vpack.c.b16 %v7167_v57, %v7166_v13  ;;  %v7078_v13 = vmul.f32 %v14360_v39, %v14236_v24  ;;  %v7079_v57 = vmul.f32 %v14360_v39, %v14247_v52 }
 0x838   :  { %v7452_v55 = vpop.f32.mrf.mxu3 }
 0x839   :  { %v7453_v26 = vadd.f32 %v14341_v63, %v7452_v55  ;;  %v7076_v55 = vmul.f32 %v14360_v39, %v14223_v42 }
 0x83b   :  { %v7542_v15 = vadd.f32 %v7541_v60, %v7453_v26  ;;  %v7559_v59 = vpop.f32.mrf.mxu0  ;;  %v7077_v26 = vmul.f32 %v14360_v39, %v14230_v61 }
 0x83d   :  { %v8379_v43 = vpack.c.bf16 %v7542_v15, %v7540_v47  ;;  %7494 = vmatmul.bf16.gmra.mxu3 %v7186_v54  ;;  %v8266_v47 = vld [vmem:[%s14420_s1 + $0x78] sm:$0xff]  ;;  %v7109_v11 = vpack.c.bf16 %v7077_v26, %v7077_v26  ;;  %s8738_s1 = smov [#allocation7]  }
 0x83e   :  { %s7682_s25 = sshll.u32 %s8738_s1, 4  ;;  %s7683_s25 = int_to_ptr.vmem [resolvable:$true] %s7682_s25 }
 0x83f   :  { %8451 = vst [vmem:[#allocation7 + $0x8] sm:$0xff] %v8379_v43   ;;  %v7108_v43 = vpack.c.bf16 %v7076_v55, %v7076_v55  ;;  %v7173_v31 = vunpack.c.l.b16 %v7109_v11 }
 0x840   :  { %v7455_v40 = vpop.f32.mrf.mxu3 }
 0x841   :  { %v7456_v22 = vadd.f32 %v14341_v63, %v7455_v40 }
 0x842   :  { %7608 = vmatmul.bf16.gmra.mxu0 %v8266_v47 }
 0x843   :  { %v7545_v12 = vadd.f32 %v7544_v32, %v7456_v22  ;;  %v7105_v32 = vpack.c.bf16 %v7073_v48, %v7073_v48  ;;  %v7561_v51 = vpop.f32.mrf.mxu0 }
 0x845   :  { %v7169_v16 = vunpack.c.l.b16 %v7105_v32 }
 0x847   :  { %v7188_v53 = vpack.c.b16 %v7169_v16, %v7168_v44 }
 0x848   :  { %v7457_v30 = vpop.f32.mrf.mxu3 }
 0x849   :  { %v7458_v3 = vadd.f32 %v14341_v63, %v7457_v30  ;;  %v7110_v30 = vpack.c.bf16 %v7078_v13, %v7078_v13 }
 0x84b   :  { %v7547_v23 = vadd.f32 %v7546_v9, %v7458_v3  ;;  %v7564_v36 = vpop.f32.mrf.mxu0  ;;  %v7111_v3 = vpack.c.bf16 %v7079_v57, %v7079_v57 }
 0x84d   :  { %v8384_v60 = vpack.c.bf16 %v7547_v23, %v7545_v12  ;;  %7499 = vmatmul.bf16.gmra.mxu3 %v7187_v49  ;;  %v7174_v49 = vunpack.c.l.b16 %v7110_v30 }
 0x84f   :  { %8452 = vst [vmem:[#allocation7 + $0x10] sm:$0xff] %v8384_v60   ;;  %v7175_v60 = vunpack.c.l.b16 %v7111_v3 }
 0x850   :  { %v7460_v20 = vpop.f32.mrf.mxu3 }
 0x851   :  { %v7461_v38 = vadd.f32 %v14341_v63, %v7460_v20  ;;  %v7191_v20 = vpack.c.b16 %v7175_v60, %v7174_v49 }
 0x853   :  { %v7550_v9 = vadd.f32 %v7549_v21, %v7461_v38  ;;  %v7107_v21 = vpack.c.bf16 %v7075_v45, %v7075_v45  ;;  %v7566_v29 = vpop.f32.mrf.mxu0 }
 0x855   :  { %v7171_v6 = vunpack.c.l.b16 %v7107_v21 }
 0x857   :  { %v7189_v25 = vpack.c.b16 %v7171_v6, %v7170_v27 }
 0x858   :  { %v7462_v0 = vpop.f32.mrf.mxu3 }
 0x859   :  { %v7463_v5 = vadd.f32 %v14341_v63, %v7462_v0 }
 0x85b   :  { %v7552_v14 = vadd.f32 %v7551_v33, %v7463_v5  ;;  %v7569_v54 = vpop.f32.mrf.mxu0 }
 0x85d   :  { %v8389_v41 = vpack.c.bf16 %v7552_v14, %v7550_v9  ;;  %7504 = vmatmul.bf16.gmra.mxu3 %v7188_v53 }
 0x85f   :  { %8453 = vst [vmem:[#allocation7 + $0x18] sm:$0xff] %v8389_v41  }
 0x860   :  { %v7465_v37 = vpop.f32.mrf.mxu3 }
 0x861   :  { %v7466_v2 = vadd.f32 %v14341_v63, %v7465_v37 }
 0x863   :  { %v7555_v10 = vadd.f32 %v7554_v8, %v7466_v2  ;;  %v7172_v8 = vunpack.c.l.b16 %v7108_v43  ;;  %v7571_v42 = vpop.f32.mrf.mxu0 }
 0x865   :  { %v7190_v61 = vpack.c.b16 %v7173_v31, %v7172_v8 }
 0x868   :  { %v7467_v28 = vpop.f32.mrf.mxu3 }
 0x869   :  { %v7468_v56 = vadd.f32 %v14341_v63, %v7467_v28 }
 0x86b   :  { %v7557_v34 = vadd.f32 %v7556_v50, %v7468_v56  ;;  %v7574_v12 = vpop.f32.mrf.mxu0 }
 0x86d   :  { %v8394_v33 = vpack.c.bf16 %v7557_v34, %v7555_v10  ;;  %7509 = vmatmul.bf16.gmra.mxu3 %v7189_v25 }
 0x86f   :  { %8454 = vst [vmem:[#allocation7 + $0x20] sm:$0xff] %v8394_v33  }
 0x870   :  { %v7470_v15 = vpop.f32.mrf.mxu3 }
 0x871   :  { %v7471_v4 = vadd.f32 %v14341_v63, %v7470_v15 }
 0x873   :  { %v7560_v7 = vadd.f32 %v7559_v59, %v7471_v4  ;;  %v7576_v24 = vpop.f32.mrf.mxu0 }
 0x878   :  { %v7472_v40 = vpop.f32.mrf.mxu3 }
 0x879   :  { %v7473_v1 = vadd.f32 %v14341_v63, %v7472_v40 }
 0x87b   :  { %v7562_v58 = vadd.f32 %v7561_v51, %v7473_v1  ;;  %v7579_v38 = vpop.f32.mrf.mxu0 }
 0x87d   :  { %v8399_v22 = vpack.c.bf16 %v7562_v58, %v7560_v7  ;;  %7514 = vmatmul.bf16.gmra.mxu3 %v7190_v61 }
 0x87f   :  { %8455 = vst [vmem:[#allocation7 + $0x28] sm:$0xff] %v8399_v22  }
 0x880   :  { %v7475_v50 = vpop.f32.mrf.mxu3 }
 0x881   :  { %v7476_v23 = vadd.f32 %v14341_v63, %v7475_v50 }
 0x883   :  { %v7565_v59 = vadd.f32 %v7564_v36, %v7476_v23  ;;  %v7581_v9 = vpop.f32.mrf.mxu0 }
 0x888   :  { %v7477_v46 = vpop.f32.mrf.mxu3 }
 0x889   :  { %v7478_v48 = vadd.f32 %v14341_v63, %v7477_v46 }
 0x88b   :  { %v7567_v17 = vadd.f32 %v7566_v29, %v7478_v48  ;;  %v7584_v36 = vpop.f32.mrf.mxu0 }
 0x88d   :  { %v8404_v35 = vpack.c.bf16 %v7567_v17, %v7565_v59  ;;  %7519 = vmatmul.bf16.gmra.mxu3 %v7191_v20 }
 0x88f   :  { %8456 = vst [vmem:[#allocation7 + $0x30] sm:$0xff] %v8404_v35  }
 0x890   :  { %v7480_v32 = vpop.f32.mrf.mxu3 }
 0x891   :  { %v7481_v52 = vadd.f32 %v14341_v63, %v7480_v32 }
 0x893   :  { %v7570_v16 = vadd.f32 %v7569_v54, %v7481_v52  ;;  %v7586_v19 = vpop.f32.mrf.mxu0 }
 0x898   :  { %v7482_v39 = vpop.f32.mrf.mxu3 }
 0x899   :  { %v7483_v44 = vadd.f32 %v14341_v63, %v7482_v39 }
 0x89b   :  { %v7572_v51 = vadd.f32 %v7571_v42, %v7483_v44  ;;  %v7589_v10 = vpop.f32.mrf.mxu0 }
 0x89d   :  { %v8409_v0 = vpack.c.bf16 %v7572_v51, %v7570_v16 }
 0x89f   :  { %8457 = vst [vmem:[#allocation7 + $0x38] sm:$0xff] %v8409_v0  }
 0x8a0   :  { %v7485_v5 = vpop.f32.mrf.mxu3 }
 0x8a1   :  { %v7486_v14 = vadd.f32 %v14341_v63, %v7485_v5 }
 0x8a3   :  { %v7575_v62 = vadd.f32 %v7574_v12, %v7486_v14  ;;  %v7591_v55 = vpop.f32.mrf.mxu0 }
 0x8a8   :  { %v7487_v53 = vpop.f32.mrf.mxu3 }
 0x8a9   :  { %v7488_v41 = vadd.f32 %v14341_v63, %v7487_v53 }
 0x8ab   :  { %v7577_v45 = vadd.f32 %v7576_v24, %v7488_v41  ;;  %v7594_v43 = vpop.f32.mrf.mxu0 }
 0x8ad   :  { %v8414_v18 = vpack.c.bf16 %v7577_v45, %v7575_v62 }
 0x8af   :  { %8458 = vst [vmem:[#allocation7 + $0x40] sm:$0xff] %v8414_v18  }
 0x8b0   :  { %v7490_v37 = vpop.f32.mrf.mxu3 }
 0x8b1   :  { %v7491_v21 = vadd.f32 %v14341_v63, %v7490_v37 }
 0x8b3   :  { %v7580_v6 = vadd.f32 %v7579_v38, %v7491_v21  ;;  %v7596_v42 = vpop.f32.mrf.mxu0 }
 0x8b8   :  { %v7492_v2 = vpop.f32.mrf.mxu3 }
 0x8b9   :  { %v7493_v27 = vadd.f32 %v14341_v63, %v7492_v2 }
 0x8bb   :  { %v7582_v29 = vadd.f32 %v7581_v9, %v7493_v27  ;;  %v7599_v22 = vpop.f32.mrf.mxu0 }
 0x8bd   :  { %v8419_v28 = vpack.c.bf16 %v7582_v29, %v7580_v6 }
 0x8bf   :  { %8459 = vst [vmem:[#allocation7 + $0x48] sm:$0xff] %v8419_v28  }
 0x8c0   :  { %v7495_v56 = vpop.f32.mrf.mxu3 }
 0x8c1   :  { %v7496_v34 = vadd.f32 %v14341_v63, %v7495_v56 }
 0x8c3   :  { %v7585_v26 = vadd.f32 %v7584_v36, %v7496_v34  ;;  %v7601_v12 = vpop.f32.mrf.mxu0 }
 0x8c8   :  { %v7497_v25 = vpop.f32.mrf.mxu3 }
 0x8c9   :  { %v7498_v33 = vadd.f32 %v14341_v63, %v7497_v25 }
 0x8cb   :  { %v7587_v47 = vadd.f32 %v7586_v19, %v7498_v33  ;;  %v7604_v59 = vpop.f32.mrf.mxu0 }
 0x8cd   :  { %v8424_v15 = vpack.c.bf16 %v7587_v47, %v7585_v26 }
 0x8cf   :  { %8460 = vst [vmem:[#allocation7 + $0x50] sm:$0xff] %v8424_v15  }
 0x8d0   :  { %v7500_v54 = vpop.f32.mrf.mxu3 }
 0x8d1   :  { %v7501_v11 = vadd.f32 %v14341_v63, %v7500_v54 }
 0x8d3   :  { %v7590_v31 = vadd.f32 %v7589_v10, %v7501_v11  ;;  %v7606_v35 = vpop.f32.mrf.mxu0 }
 0x8d8   :  { %v7502_v4 = vpop.f32.mrf.mxu3 }
 0x8d9   :  { %v7503_v8 = vadd.f32 %v14341_v63, %v7502_v4 }
 0x8db   :  { %v7592_v40 = vadd.f32 %v7591_v55, %v7503_v8  ;;  %v7609_v16 = vpop.f32.mrf.mxu0 }
 0x8dd   :  { %v8429_v1 = vpack.c.bf16 %v7592_v40, %v7590_v31 }
 0x8df   :  { %8461 = vst [vmem:[#allocation7 + $0x58] sm:$0xff] %v8429_v1  }
 0x8e0   :  { %v7505_v7 = vpop.f32.mrf.mxu3 }
 0x8e1   :  { %v7506_v58 = vadd.f32 %v14341_v63, %v7505_v7 }
 0x8e3   :  { %v7595_v57 = vadd.f32 %v7594_v43, %v7506_v58  ;;  %v7611_v14 = vpop.f32.mrf.mxu0 }
 0x8e8   :  { %v7507_v61 = vpop.f32.mrf.mxu3 }
 0x8e9   :  { %v7508_v13 = vadd.f32 %v14341_v63, %v7507_v61 }
 0x8eb   :  { %v7597_v50 = vadd.f32 %v7596_v42, %v7508_v13 }
 0x8ed   :  { %v8434_v30 = vpack.c.bf16 %v7597_v50, %v7595_v57 }
 0x8ef   :  { %8462 = vst [vmem:[#allocation7 + $0x60] sm:$0xff] %v8434_v30  }
 0x8f0   :  { %v7510_v3 = vpop.f32.mrf.mxu3 }
 0x8f1   :  { %v7511_v23 = vadd.f32 %v14341_v63, %v7510_v3 }
 0x8f3   :  { %v7600_v46 = vadd.f32 %v7599_v22, %v7511_v23 }
 0x8f8   :  { %v7512_v49 = vpop.f32.mrf.mxu3 }
 0x8f9   :  { %v7513_v60 = vadd.f32 %v14341_v63, %v7512_v49 }
 0x8fb   :  { %v7602_v48 = vadd.f32 %v7601_v12, %v7513_v60 }
 0x8fd   :  { %v8439_v17 = vpack.c.bf16 %v7602_v48, %v7600_v46 }
 0x8ff   :  { %8463 = vst [vmem:[#allocation7 + $0x68] sm:$0xff] %v8439_v17  }
 0x900   :  { %v7515_v20 = vpop.f32.mrf.mxu3 }
 0x901   :  { %v7516_v24 = vadd.f32 %v14341_v63, %v7515_v20 }
 0x903   :  { %v7605_v39 = vadd.f32 %v7604_v59, %v7516_v24 }
 0x908   :  { %v7517_v32 = vpop.f32.mrf.mxu3 }
 0x909   :  { %v7518_v52 = vadd.f32 %v14341_v63, %v7517_v32 }
 0x90b   :  { %v7607_v38 = vadd.f32 %v7606_v35, %v7518_v52 }
 0x90d   :  { %v8444_v44 = vpack.c.bf16 %v7607_v38, %v7605_v39 }
 0x90f   :  { %8464 = vst [vmem:[#allocation7 + $0x70] sm:$0xff] %v8444_v44  }
 0x910   :  { %v7520_v51 = vpop.f32.mrf.mxu3 }
 0x911   :  { %v7521_v0 = vadd.f32 %v14341_v63, %v7520_v51 }
 0x913   :  { %v7610_v53 = vadd.f32 %v7609_v16, %v7521_v0 }
 0x918   :  { %v7522_v5 = vpop.f32.mrf.mxu3 }
 0x919   :  { %v7523_v9 = vadd.f32 %v14341_v63, %v7522_v5 }
 0x91b   :  { %v7612_v41 = vadd.f32 %v7611_v14, %v7523_v9 }
 0x91d   :  { %v8449_v62 = vpack.c.bf16 %v7612_v41, %v7610_v53 }
 0x91f   :  { %8465 = vst [vmem:[#allocation7 + $0x78] sm:$0xff] %v8449_v62  }
 0x920   :  { %7690 = dma.vmem_to_hbm [thread:$0]  %s7683_s25, 2048, %s7685_s28, [#allocation4], %s8733_s29, %s8733_s29, %s8734_s30  }
 0x921   :  { %8730 = dma.done.wait [#allocation4], 2048  }
 0x922   :  { %8731 = vsyncadd [#allocation4], 4294965248 }
 0x923   :  { %7695 = vsyncpa [#allocation3], 1 }
 0x924   :  { %7696 = vsyncpa [#allocation6], 1 }
 0x925   :  { %7697 = vsyncpa [#allocation4], 1 }

</bundles_post_ra>
